<compile_context>
chip_gen: v7x
topology: tpu7x:2x2x1
jax: 0.10.0
libtpu: 0.0.40
codegen_flags: <defaults>
</compile_context>

<pallas_src>
import functools

import jax
import jax.numpy as jnp
from jax.experimental import pallas as pl
from jax.experimental.pallas import tpu as pltpu


def _round_up(x, m):
    return ((x + m - 1) // m) * m


def _e3_attn_pool_kernel(f_ref, wbi_ref, batch_ref, num_ref, norm_ref, *,
                         mxu_segsum, red_axis):
    """One (tile_n, d_in) atom tile; accumulates segment sums of w*f and w."""
    # Init the resident accumulators on the first tile of the reduction axis.
    @pl.when(pl.program_id(red_axis) == 0)
    def _init():
        num_ref[...] = jnp.zeros_like(num_ref)
        norm_ref[...] = jnp.zeros_like(norm_ref)

    f = f_ref[...]                                                    # (T, D)

    # Bilinear attention logit: diag(f @ W_bi @ f^T); the 1/sqrt(dim_key) scale
    # is folded into W_bi in the wrapper.  Single MXU matmul per tile.
    t = jnp.dot(f, wbi_ref[...], preferred_element_type=jnp.float32)  # (T, D)
    logits = jnp.sum(t * f.astype(jnp.float32), axis=-1, keepdims=True)
    # TODO(synk): no per-graph running-max subtraction (matches reference but
    #             can overflow for large logits).
    w = jnp.exp(logits)                                               # (T, 1)

    payload = f.astype(jnp.float32) * w                               # (T, D)
    g_pad, d_in = num_ref.shape
    tile_n = f.shape[0]

    if mxu_segsum:
        # Large-G fallback: one-hot segment sum on the MXU.  Pushes tile_n
        # weight rows per tile, so only used when g_pad is too large for the
        # unrolled VPU path below.
        b_row = batch_ref[...]                                        # (1, T)
        iota_g = jax.lax.broadcasted_iota(jnp.int32, (g_pad, tile_n), 0)
        onehot = (iota_g == b_row).astype(jnp.float32)                # (G_pad, T)
        seg = jnp.dot(onehot, jnp.concatenate([payload, w], axis=-1),
                      preferred_element_type=jnp.float32)             # (G_pad, D+1)
        num_ref[...] += seg[:, :d_in]
        norm_ref[...] += seg[:, d_in:]
    else:
        # Small-G path: per-graph masked select + sublane sum.  Runs on the
        # VPU/XLU slots that are idle while the MXU does the logit matmul and
        # avoids pushing a tile_n-row stationary operand through the MXU.
        b_col = batch_ref[...]                                        # (T, 1)
        num_rows, norm_rows = [], []
        for g in range(g_pad):                                        # static unroll
            m = b_col == g                                            # (T, 1)
            num_rows.append(
                jnp.sum(jnp.where(m, payload, 0.0), axis=0, keepdims=True))
            norm_rows.append(
                jnp.sum(jnp.where(m, w, 0.0), axis=0, keepdims=True))
        num_ref[...] += jnp.concatenate(num_rows, axis=0)             # (G_pad, D)
        norm_ref[...] += jnp.concatenate(norm_rows, axis=0)           # (G_pad, 1)


def e3_attention_pooling(f, batch, params, num_graphs, *, tile_n=1024,
                         num_cores=1, compute_dtype=jnp.bfloat16,
                         mxu_segsum=None):
    """JAX wrapper around the Pallas kernel.

    f:      (N, Din) float32 per-atom features
    batch:  (N,)     int graph index per atom (None -> all zeros, G=1).
            Ids must lie in [0, num_graphs); out-of-range atoms are dropped by
            the in-kernel mask (same convention used for row padding).
    params: dict with 'wq' (Din,Dq), 'wk' (Din,Dk), 'wv' (Din,Din), 'wdot' (Dq,Dk)
    tile_n: atoms per grid step (multiple of 128).  VMEM use is tiny:
            2 * tile_n * Din * bytes(compute_dtype) for the double-buffered f
            tile plus Din^2 for W_bi — even tile_n=2048 at Din=512 in bf16 is
            ~4 MiB, far below the 32 MiB scoped default on every generation
            (v7x's 64 MiB VMEM is not a constraint here).
    num_cores: 1 (v5e/v6e) or 2 (v7x megacore: leading 'parallel' grid axis,
            per-core partial accumulators summed in the wrapper).
    compute_dtype: bf16 (default) feeds the MXU at full rate on v6e/v7x and
            halves f's HBM traffic; pass jnp.float32 for tight reference match.
            Logits / exp / accumulators are always f32.
    mxu_segsum: None -> auto (MXU one-hot path only when padded G > 16).
    """
    n, d_in = f.shape
    d_k = params["wk"].shape[1]
    if batch is None:
        batch = jnp.zeros((n,), dtype=jnp.int32)
        num_graphs = 1

    assert tile_n % 128 == 0, "tile_n must be a multiple of 128"
    tile_n = max(128, min(tile_n, _round_up(n, 128)))   # avoid useless row padding
    g_pad = max(_round_up(num_graphs, 8), 8)
    if mxu_segsum is None:
        mxu_segsum = g_pad > 16

    tiles_total = _round_up(max(pl.cdiv(n, tile_n), 1), num_cores)
    tiles_per_core = tiles_total // num_cores
    n_pad = tiles_total * tile_n

    # --- operands: f stays at its true feature width (no 128-col inflation) --
    f_in = f.astype(compute_dtype)
    batch_i32 = batch.astype(jnp.int32)
    if n_pad != n:
        f_in = jnp.zeros((n_pad, d_in), compute_dtype).at[:n, :].set(f_in)
        # Padded atoms get batch = -1 -> never match a graph id -> contribute 0.
        batch_i32 = jnp.full((n_pad,), -1, jnp.int32).at[:n].set(batch_i32)
    batch_arr = (batch_i32.reshape(1, n_pad) if mxu_segsum
                 else batch_i32.reshape(n_pad, 1))

    # Fold Wq @ Wdot @ Wk^T and the 1/sqrt(dim_key) scale into one bilinear
    # weight (exact for scalar-only irreps).
    # TODO(synk): for large d_in (>~256) keep the low-rank factors (Wq@Wdot, Wk)
    #             instead of the dense (d_in, d_in) fold.
    scale = 1.0 / (float(d_k) ** 0.5)
    w_bi = ((params["wq"] @ params["wdot"] @ params["wk"].T) * scale
            ).astype(compute_dtype)                                   # (D, D)

    kernel = functools.partial(_e3_attn_pool_kernel,
                               mxu_segsum=mxu_segsum,
                               red_axis=0 if num_cores == 1 else 1)

    out_shape = (
        jax.ShapeDtypeStruct((num_cores * g_pad, d_in), jnp.float32),  # sum w*f
        jax.ShapeDtypeStruct((num_cores * g_pad, 1), jnp.float32),     # sum w
    )

    if num_cores == 1:
        grid = (tiles_total,)
        f_spec = pl.BlockSpec((tile_n, d_in), lambda i: (i, 0))
        w_spec = pl.BlockSpec((d_in, d_in), lambda i: (0, 0))
        b_spec = (pl.BlockSpec((1, tile_n), lambda i: (0, i)) if mxu_segsum
                  else pl.BlockSpec((tile_n, 1), lambda i: (i, 0)))
        out_specs = (pl.BlockSpec((g_pad, d_in), lambda i: (0, 0)),
                     pl.BlockSpec((g_pad, 1), lambda i: (0, 0)))
        dims = ("arbitrary",)
    else:
        grid = (num_cores, tiles_per_core)
        f_spec = pl.BlockSpec((tile_n, d_in),
                              lambda c, i: (c * tiles_per_core + i, 0))
        w_spec = pl.BlockSpec((d_in, d_in), lambda c, i: (0, 0))
        b_spec = (pl.BlockSpec((1, tile_n),
                               lambda c, i: (0, c * tiles_per_core + i))
                  if mxu_segsum else
                  pl.BlockSpec((tile_n, 1),
                               lambda c, i: (c * tiles_per_core + i, 0)))
        out_specs = (pl.BlockSpec((g_pad, d_in), lambda c, i: (c, 0)),
                     pl.BlockSpec((g_pad, 1), lambda c, i: (c, 0)))
        dims = ("parallel", "arbitrary")

    num_acc, norm_acc = pl.pallas_call(
        kernel,
        out_shape=out_shape,
        grid=grid,
        in_specs=[f_spec, w_spec, b_spec],
        out_specs=out_specs,
        compiler_params=pltpu.CompilerParams(dimension_semantics=dims),
    )(f_in, w_bi, batch_arr)

    # Tiny (G, Din) epilogue in plain JAX: combine per-core partials, apply Wv
    # once (commuted out of the per-tile loop: (sum_n w_n f_n) @ Wv ==
    # sum_n w_n (f_n @ Wv)), clamp the norm and divide.
    if num_cores > 1:
        num_acc = num_acc.reshape(num_cores, g_pad, d_in).sum(axis=0)
        norm_acc = norm_acc.reshape(num_cores, g_pad, 1).sum(axis=0)
    num = num_acc[:num_graphs]
    norm = jnp.maximum(norm_acc[:num_graphs], 1e-8)                    # (G, 1)
    return (num @ params["wv"].astype(jnp.float32)) / norm


def init_params(key, d_in, d_q, d_k):
    """Deterministic synthetic parameters (e3nn-style fan-in normalization)."""
    k1, k2, k3, k4 = jax.random.split(key, 4)
    wq = jax.random.normal(k1, (d_in, d_q), jnp.float32) / jnp.sqrt(d_in)
    wk = jax.random.normal(k2, (d_in, d_k), jnp.float32) / jnp.sqrt(d_in)
    wv = jax.random.normal(k3, (d_in, d_in), jnp.float32) / jnp.sqrt(d_in)
    # FullyConnectedTensorProduct path normalization: 1/sqrt(#paths)
    wdot = jax.random.normal(k4, (d_q, d_k), jnp.float32) / jnp.sqrt(d_q * d_k)
    return {"wq": wq, "wk": wk, "wv": wv, "wdot": wdot}


def reference(f, batch, params, num_graphs, d_k):
    """Pure-JAX reference for a sanity check."""
    q = f @ params["wq"]
    k = f @ params["wk"]
    v = f @ params["wv"]
    logits = jnp.einsum("nq,qk,nk->n", q, params["wdot"], k) / jnp.sqrt(
        jnp.float32(d_k))
    w = jnp.exp(logits)
    norm = jax.ops.segment_sum(w, batch, num_segments=num_graphs)
    norm = jnp.maximum(norm, 1e-8)
    num = jax.ops.segment_sum(v * w[:, None], batch, num_segments=num_graphs)
    return num / norm[:, None]


if __name__ == "__main__":
    key = jax.random.PRNGKey(0)
    kf, kp = jax.random.split(key)

    # Small shapes: 200 atoms ("32x0e" features), 16 query, 16 key, 2 graphs.
    N, D_IN, D_Q, D_K, G = 200, 32, 16, 16, 2

    f = jax.random.normal(kf, (N, D_IN), jnp.float32)
    batch = jnp.concatenate(
        [jnp.zeros((100,), jnp.int32), jnp.ones((100,), jnp.int32)])
    params = init_params(kp, D_IN, D_Q, D_K)
    ref = reference(f, batch, params, G, D_K)

    # f32, single core, VPU segment-sum path (default for small G).
    out = jax.block_until_ready(e3_attention_pooling(
        f, batch, params, num_graphs=G, tile_n=512, num_cores=1,
        compute_dtype=jnp.float32))
    assert out.shape == (G, D_IN)
    assert jnp.allclose(out, ref, atol=1e-4, rtol=1e-4), "mismatch (f32, 1 core)"

    # f32, two-core grid (v7x megacore layout); also exercises multi-tile grid,
    # per-core partial accumulators and padded-atom (batch=-1) masking.
    out2 = jax.block_until_ready(e3_attention_pooling(
        f, batch, params, num_graphs=G, tile_n=128, num_cores=2,
        compute_dtype=jnp.float32))
    assert jnp.allclose(out2, ref, atol=1e-4, rtol=1e-4), "mismatch (2 cores)"

    # f32, forced MXU one-hot segment-sum fallback (used when G is large).
    out3 = jax.block_until_ready(e3_attention_pooling(
        f, batch, params, num_graphs=G, tile_n=512, num_cores=1,
        compute_dtype=jnp.float32, mxu_segsum=True))
    assert jnp.allclose(out3, ref, atol=1e-4, rtol=1e-4), "mismatch (mxu segsum)"

    # Default bf16 compute path (perf config for v6e/v7x): looser tolerance.
    out4 = jax.block_until_ready(e3_attention_pooling(
        f, batch, params, num_graphs=G))
    assert jnp.allclose(out4, ref, atol=5e-2, rtol=5e-2), "mismatch (bf16)"

    # batch=None (single graph) path.
    ref1 = reference(f, jnp.zeros((N,), jnp.int32), params, 1, D_K)
    out5 = jax.block_until_ready(e3_attention_pooling(
        f, None, params, num_graphs=1, compute_dtype=jnp.float32))
    assert jnp.allclose(out5, ref1, atol=1e-4, rtol=1e-4), "mismatch (G=1)"

    print("KERNEL_OK")
</pallas_src>

<mosaic_0001>
module attributes {stable_mosaic.version = 11 : i64} {
  func.func @_e3_attn_pool_kernel(%arg0: i32, %arg1: memref<256x32xf32, #tpu.memory_space<vmem>>, %arg2: memref<32x32xf32, #tpu.memory_space<vmem>>, %arg3: memref<256x1xi32, #tpu.memory_space<vmem>>, %arg4: memref<8x32xf32, #tpu.memory_space<vmem>>, %arg5: memref<8x1xf32, #tpu.memory_space<vmem>>) attributes {dimension_semantics = [#tpu.dimension_semantics<arbitrary>], iteration_bounds = array<i64: 1>, scalar_prefetch = 0 : i64, scratch_operands = 0 : i64, tpu.core_type = #tpu.core_type<tc>, window_params = [{transform_indices = @transform_0, window_bounds = array<i64: 256, 32>}, {pipeline_mode = #tpu.pipeline_mode<synchronous>, transform_indices = @transform_1, window_bounds = array<i64: 32, 32>}, {transform_indices = @transform_2, window_bounds = array<i64: 256, 1>}, {pipeline_mode = #tpu.pipeline_mode<synchronous>, transform_indices = @transform_3, window_bounds = array<i64: 8, 32>}, {pipeline_mode = #tpu.pipeline_mode<synchronous>, transform_indices = @transform_4, window_bounds = array<i64: 8, 1>}]} {
    %c0_i32 = arith.constant 0 : i32
    %0 = arith.cmpi eq, %arg0, %c0_i32 : i32
    %1 = arith.extui %0 : i1 to i32
    %c0_i32_0 = arith.constant 0 : i32
    %2 = arith.cmpi ne, %1, %c0_i32_0 : i32
    scf.if %2 {
      %cst_48 = arith.constant 0.000000e+00 : f32
      %117 = vector.broadcast %cst_48 : f32 to vector<8x32xf32>
      %c0_49 = arith.constant 0 : index
      %c0_50 = arith.constant 0 : index
      %118 = vector.load %arg4[%c0_49, %c0_50] : memref<8x32xf32, #tpu.memory_space<vmem>>, vector<8x32xf32>
      tpu.vector_store %arg4[%c0_49, %c0_50], %117 {strides = array<i32>} : memref<8x32xf32, #tpu.memory_space<vmem>>, vector<8x32xf32>,
      %cst_51 = arith.constant 0.000000e+00 : f32
      %119 = vector.broadcast %cst_51 : f32 to vector<8x1xf32>
      %c0_52 = arith.constant 0 : index
      %c0_53 = arith.constant 0 : index
      %120 = vector.load %arg5[%c0_52, %c0_53] : memref<8x1xf32, #tpu.memory_space<vmem>>, vector<8x1xf32>
      tpu.vector_store %arg5[%c0_52, %c0_53], %119 {strides = array<i32>} : memref<8x1xf32, #tpu.memory_space<vmem>>, vector<8x1xf32>,
    } else {
    }
    %c0 = arith.constant 0 : index
    %c0_1 = arith.constant 0 : index
    %3 = vector.load %arg1[%c0, %c0_1] : memref<256x32xf32, #tpu.memory_space<vmem>>, vector<256x32xf32>
    %c0_2 = arith.constant 0 : index
    %c0_3 = arith.constant 0 : index
    %4 = vector.load %arg2[%c0_2, %c0_3] : memref<32x32xf32, #tpu.memory_space<vmem>>, vector<32x32xf32>
    %cst = arith.constant dense<0.000000e+00> : vector<256x32xf32>
    %5 = tpu.matmul %3, %4, %cst {dimension_numbers = #tpu.dot_dimension_numbers<[1], [0], [0], [1], [0, 0, 1, 1], [], []>} : vector<256x32xf32>, vector<32x32xf32>, vector<256x32xf32> -> vector<256x32xf32>
    %6 = arith.mulf %5, %3 : vector<256x32xf32>
    %cst_4 = arith.constant dense<0.000000e+00> : vector<256xf32>
    %7 = vector.multi_reduction <add>, %6, %cst_4 [1] : vector<256x32xf32> to vector<256xf32>
    %8 = vector.shape_cast %7 : vector<256xf32> to vector<256x1xf32>
    %9 = math.exp %8 : vector<256x1xf32>
    %10 = vector.broadcast %9 : vector<256x1xf32> to vector<256x32xf32>
    %11 = arith.mulf %3, %10 : vector<256x32xf32>
    %c0_5 = arith.constant 0 : index
    %c0_6 = arith.constant 0 : index
    %12 = vector.load %arg3[%c0_5, %c0_6] : memref<256x1xi32, #tpu.memory_space<vmem>>, vector<256x1xi32>
    %c0_i32_7 = arith.constant 0 : i32
    %13 = vector.broadcast %c0_i32_7 : i32 to vector<256x1xi32>
    %14 = arith.cmpi eq, %12, %13 : vector<256x1xi32>
    %cst_8 = arith.constant 0.000000e+00 : f32
    %15 = vector.shape_cast %14 : vector<256x1xi1> to vector<256x1xi1>
    %16 = vector.broadcast %15 : vector<256x1xi1> to vector<256x32xi1>
    %17 = vector.broadcast %cst_8 : f32 to vector<256x32xf32>
    %18 = arith.select %16, %11, %17 : vector<256x32xi1>, vector<256x32xf32>
    %cst_9 = arith.constant dense<0.000000e+00> : vector<32xf32>
    %19 = vector.multi_reduction <add>, %18, %cst_9 [0] : vector<256x32xf32> to vector<32xf32>
    %20 = vector.shape_cast %19 : vector<32xf32> to vector<1x32xf32>
    %cst_10 = arith.constant 0.000000e+00 : f32
    %21 = vector.broadcast %cst_10 : f32 to vector<256x1xf32>
    %22 = arith.select %14, %9, %21 : vector<256x1xi1>, vector<256x1xf32>
    %cst_11 = arith.constant dense<0.000000e+00> : vector<1xf32>
    %23 = vector.multi_reduction <add>, %22, %cst_11 [0] : vector<256x1xf32> to vector<1xf32>
    %24 = vector.shape_cast %23 : vector<1xf32> to vector<1x1xf32>
    %c1_i32 = arith.constant 1 : i32
    %25 = vector.broadcast %c1_i32 : i32 to vector<256x1xi32>
    %26 = arith.cmpi eq, %12, %25 : vector<256x1xi32>
    %cst_12 = arith.constant 0.000000e+00 : f32
    %27 = vector.shape_cast %26 : vector<256x1xi1> to vector<256x1xi1>
    %28 = vector.broadcast %27 : vector<256x1xi1> to vector<256x32xi1>
    %29 = vector.broadcast %cst_12 : f32 to vector<256x32xf32>
    %30 = arith.select %28, %11, %29 : vector<256x32xi1>, vector<256x32xf32>
    %cst_13 = arith.constant dense<0.000000e+00> : vector<32xf32>
    %31 = vector.multi_reduction <add>, %30, %cst_13 [0] : vector<256x32xf32> to vector<32xf32>
    %32 = vector.shape_cast %31 : vector<32xf32> to vector<1x32xf32>
    %cst_14 = arith.constant 0.000000e+00 : f32
    %33 = vector.broadcast %cst_14 : f32 to vector<256x1xf32>
    %34 = arith.select %26, %9, %33 : vector<256x1xi1>, vector<256x1xf32>
    %cst_15 = arith.constant dense<0.000000e+00> : vector<1xf32>
    %35 = vector.multi_reduction <add>, %34, %cst_15 [0] : vector<256x1xf32> to vector<1xf32>
    %36 = vector.shape_cast %35 : vector<1xf32> to vector<1x1xf32>
    %c2_i32 = arith.constant 2 : i32
    %37 = vector.broadcast %c2_i32 : i32 to vector<256x1xi32>
    %38 = arith.cmpi eq, %12, %37 : vector<256x1xi32>
    %cst_16 = arith.constant 0.000000e+00 : f32
    %39 = vector.shape_cast %38 : vector<256x1xi1> to vector<256x1xi1>
    %40 = vector.broadcast %39 : vector<256x1xi1> to vector<256x32xi1>
    %41 = vector.broadcast %cst_16 : f32 to vector<256x32xf32>
    %42 = arith.select %40, %11, %41 : vector<256x32xi1>, vector<256x32xf32>
    %cst_17 = arith.constant dense<0.000000e+00> : vector<32xf32>
    %43 = vector.multi_reduction <add>, %42, %cst_17 [0] : vector<256x32xf32> to vector<32xf32>
    %44 = vector.shape_cast %43 : vector<32xf32> to vector<1x32xf32>
    %cst_18 = arith.constant 0.000000e+00 : f32
    %45 = vector.broadcast %cst_18 : f32 to vector<256x1xf32>
    %46 = arith.select %38, %9, %45 : vector<256x1xi1>, vector<256x1xf32>
    %cst_19 = arith.constant dense<0.000000e+00> : vector<1xf32>
    %47 = vector.multi_reduction <add>, %46, %cst_19 [0] : vector<256x1xf32> to vector<1xf32>
    %48 = vector.shape_cast %47 : vector<1xf32> to vector<1x1xf32>
    %c3_i32 = arith.constant 3 : i32
    %49 = vector.broadcast %c3_i32 : i32 to vector<256x1xi32>
    %50 = arith.cmpi eq, %12, %49 : vector<256x1xi32>
    %cst_20 = arith.constant 0.000000e+00 : f32
    %51 = vector.shape_cast %50 : vector<256x1xi1> to vector<256x1xi1>
    %52 = vector.broadcast %51 : vector<256x1xi1> to vector<256x32xi1>
    %53 = vector.broadcast %cst_20 : f32 to vector<256x32xf32>
    %54 = arith.select %52, %11, %53 : vector<256x32xi1>, vector<256x32xf32>
    %cst_21 = arith.constant dense<0.000000e+00> : vector<32xf32>
    %55 = vector.multi_reduction <add>, %54, %cst_21 [0] : vector<256x32xf32> to vector<32xf32>
    %56 = vector.shape_cast %55 : vector<32xf32> to vector<1x32xf32>
    %cst_22 = arith.constant 0.000000e+00 : f32
    %57 = vector.broadcast %cst_22 : f32 to vector<256x1xf32>
    %58 = arith.select %50, %9, %57 : vector<256x1xi1>, vector<256x1xf32>
    %cst_23 = arith.constant dense<0.000000e+00> : vector<1xf32>
    %59 = vector.multi_reduction <add>, %58, %cst_23 [0] : vector<256x1xf32> to vector<1xf32>
    %60 = vector.shape_cast %59 : vector<1xf32> to vector<1x1xf32>
    %c4_i32 = arith.constant 4 : i32
    %61 = vector.broadcast %c4_i32 : i32 to vector<256x1xi32>
    %62 = arith.cmpi eq, %12, %61 : vector<256x1xi32>
    %cst_24 = arith.constant 0.000000e+00 : f32
    %63 = vector.shape_cast %62 : vector<256x1xi1> to vector<256x1xi1>
    %64 = vector.broadcast %63 : vector<256x1xi1> to vector<256x32xi1>
    %65 = vector.broadcast %cst_24 : f32 to vector<256x32xf32>
    %66 = arith.select %64, %11, %65 : vector<256x32xi1>, vector<256x32xf32>
    %cst_25 = arith.constant dense<0.000000e+00> : vector<32xf32>
    %67 = vector.multi_reduction <add>, %66, %cst_25 [0] : vector<256x32xf32> to vector<32xf32>
    %68 = vector.shape_cast %67 : vector<32xf32> to vector<1x32xf32>
    %cst_26 = arith.constant 0.000000e+00 : f32
    %69 = vector.broadcast %cst_26 : f32 to vector<256x1xf32>
    %70 = arith.select %62, %9, %69 : vector<256x1xi1>, vector<256x1xf32>
    %cst_27 = arith.constant dense<0.000000e+00> : vector<1xf32>
    %71 = vector.multi_reduction <add>, %70, %cst_27 [0] : vector<256x1xf32> to vector<1xf32>
    %72 = vector.shape_cast %71 : vector<1xf32> to vector<1x1xf32>
    %c5_i32 = arith.constant 5 : i32
    %73 = vector.broadcast %c5_i32 : i32 to vector<256x1xi32>
    %74 = arith.cmpi eq, %12, %73 : vector<256x1xi32>
    %cst_28 = arith.constant 0.000000e+00 : f32
    %75 = vector.shape_cast %74 : vector<256x1xi1> to vector<256x1xi1>
    %76 = vector.broadcast %75 : vector<256x1xi1> to vector<256x32xi1>
    %77 = vector.broadcast %cst_28 : f32 to vector<256x32xf32>
    %78 = arith.select %76, %11, %77 : vector<256x32xi1>, vector<256x32xf32>
    %cst_29 = arith.constant dense<0.000000e+00> : vector<32xf32>
    %79 = vector.multi_reduction <add>, %78, %cst_29 [0] : vector<256x32xf32> to vector<32xf32>
    %80 = vector.shape_cast %79 : vector<32xf32> to vector<1x32xf32>
    %cst_30 = arith.constant 0.000000e+00 : f32
    %81 = vector.broadcast %cst_30 : f32 to vector<256x1xf32>
    %82 = arith.select %74, %9, %81 : vector<256x1xi1>, vector<256x1xf32>
    %cst_31 = arith.constant dense<0.000000e+00> : vector<1xf32>
    %83 = vector.multi_reduction <add>, %82, %cst_31 [0] : vector<256x1xf32> to vector<1xf32>
    %84 = vector.shape_cast %83 : vector<1xf32> to vector<1x1xf32>
    %c6_i32 = arith.constant 6 : i32
    %85 = vector.broadcast %c6_i32 : i32 to vector<256x1xi32>
    %86 = arith.cmpi eq, %12, %85 : vector<256x1xi32>
    %cst_32 = arith.constant 0.000000e+00 : f32
    %87 = vector.shape_cast %86 : vector<256x1xi1> to vector<256x1xi1>
    %88 = vector.broadcast %87 : vector<256x1xi1> to vector<256x32xi1>
    %89 = vector.broadcast %cst_32 : f32 to vector<256x32xf32>
    %90 = arith.select %88, %11, %89 : vector<256x32xi1>, vector<256x32xf32>
    %cst_33 = arith.constant dense<0.000000e+00> : vector<32xf32>
    %91 = vector.multi_reduction <add>, %90, %cst_33 [0] : vector<256x32xf32> to vector<32xf32>
    %92 = vector.shape_cast %91 : vector<32xf32> to vector<1x32xf32>
    %cst_34 = arith.constant 0.000000e+00 : f32
    %93 = vector.broadcast %cst_34 : f32 to vector<256x1xf32>
    %94 = arith.select %86, %9, %93 : vector<256x1xi1>, vector<256x1xf32>
    %cst_35 = arith.constant dense<0.000000e+00> : vector<1xf32>
    %95 = vector.multi_reduction <add>, %94, %cst_35 [0] : vector<256x1xf32> to vector<1xf32>
    %96 = vector.shape_cast %95 : vector<1xf32> to vector<1x1xf32>
    %c7_i32 = arith.constant 7 : i32
    %97 = vector.broadcast %c7_i32 : i32 to vector<256x1xi32>
    %98 = arith.cmpi eq, %12, %97 : vector<256x1xi32>
    %cst_36 = arith.constant 0.000000e+00 : f32
    %99 = vector.shape_cast %98 : vector<256x1xi1> to vector<256x1xi1>
    %100 = vector.broadcast %99 : vector<256x1xi1> to vector<256x32xi1>
    %101 = vector.broadcast %cst_36 : f32 to vector<256x32xf32>
    %102 = arith.select %100, %11, %101 : vector<256x32xi1>, vector<256x32xf32>
    %cst_37 = arith.constant dense<0.000000e+00> : vector<32xf32>
    %103 = vector.multi_reduction <add>, %102, %cst_37 [0] : vector<256x32xf32> to vector<32xf32>
    %104 = vector.shape_cast %103 : vector<32xf32> to vector<1x32xf32>
    %cst_38 = arith.constant 0.000000e+00 : f32
    %105 = vector.broadcast %cst_38 : f32 to vector<256x1xf32>
    %106 = arith.select %98, %9, %105 : vector<256x1xi1>, vector<256x1xf32>
    %cst_39 = arith.constant dense<0.000000e+00> : vector<1xf32>
    %107 = vector.multi_reduction <add>, %106, %cst_39 [0] : vector<256x1xf32> to vector<1xf32>
    %108 = vector.shape_cast %107 : vector<1xf32> to vector<1x1xf32>
    %c0_40 = arith.constant 0 : index
    %c0_41 = arith.constant 0 : index
    %109 = vector.load %arg4[%c0_40, %c0_41] : memref<8x32xf32, #tpu.memory_space<vmem>>, vector<8x32xf32>
    %110 = tpu.concatenate %20, %32, %44, %56, %68, %80, %92, %104 in 0 : vector<1x32xf32>, vector<1x32xf32>, vector<1x32xf32>, vector<1x32xf32>, vector<1x32xf32>, vector<1x32xf32>, vector<1x32xf32>, vector<1x32xf32> -> vector<8x32xf32>
    %111 = arith.addf %109, %110 : vector<8x32xf32>
    %c0_42 = arith.constant 0 : index
    %c0_43 = arith.constant 0 : index
    %112 = vector.load %arg4[%c0_42, %c0_43] : memref<8x32xf32, #tpu.memory_space<vmem>>, vector<8x32xf32>
    tpu.vector_store %arg4[%c0_42, %c0_43], %111 {strides = array<i32>} : memref<8x32xf32, #tpu.memory_space<vmem>>, vector<8x32xf32>,
    %c0_44 = arith.constant 0 : index
    %c0_45 = arith.constant 0 : index
    %113 = vector.load %arg5[%c0_44, %c0_45] : memref<8x1xf32, #tpu.memory_space<vmem>>, vector<8x1xf32>
    %114 = tpu.concatenate %24, %36, %48, %60, %72, %84, %96, %108 in 0 : vector<1x1xf32>, vector<1x1xf32>, vector<1x1xf32>, vector<1x1xf32>, vector<1x1xf32>, vector<1x1xf32>, vector<1x1xf32>, vector<1x1xf32> -> vector<8x1xf32>
    %115 = arith.addf %113, %114 : vector<8x1xf32>
    %c0_46 = arith.constant 0 : index
    %c0_47 = arith.constant 0 : index
    %116 = vector.load %arg5[%c0_46, %c0_47] : memref<8x1xf32, #tpu.memory_space<vmem>>, vector<8x1xf32>
    tpu.vector_store %arg5[%c0_46, %c0_47], %115 {strides = array<i32>} : memref<8x1xf32, #tpu.memory_space<vmem>>, vector<8x1xf32>,
    return
  }
  func.func @transform_0(%arg0: i32) -> (i32, i32) {
    %c0_i32 = arith.constant 0 : i32
    %c0_i32_0 = arith.constant 0 : i32
    return %arg0, %c0_i32 : i32, i32
  }
  func.func @transform_1(%arg0: i32) -> (i32, i32) {
    %c0_i32 = arith.constant 0 : i32
    %c0_i32_0 = arith.constant 0 : i32
    %c0_i32_1 = arith.constant 0 : i32
    return %c0_i32, %c0_i32_0 : i32, i32
  }
  func.func @transform_2(%arg0: i32) -> (i32, i32) {
    %c0_i32 = arith.constant 0 : i32
    %c0_i32_0 = arith.constant 0 : i32
    return %arg0, %c0_i32 : i32, i32
  }
  func.func @transform_3(%arg0: i32) -> (i32, i32) {
    %c0_i32 = arith.constant 0 : i32
    %c0_i32_0 = arith.constant 0 : i32
    %c0_i32_1 = arith.constant 0 : i32
    return %c0_i32, %c0_i32_0 : i32, i32
  }
  func.func @transform_4(%arg0: i32) -> (i32, i32) {
    %c0_i32 = arith.constant 0 : i32
    %c0_i32_0 = arith.constant 0 : i32
    %c0_i32_1 = arith.constant 0 : i32
    return %c0_i32, %c0_i32_0 : i32, i32
  }
}

</mosaic_0001>

<bundles_post_ra>
// kernel: tpu_custom_call.1
= control target key start
LH: loop header
LB: loop body
LE: loop exit
PB: predicated region body
PF: predicated region fallthrough
CT: control target
= control target key end

     0   :  { %v9397_v3 = vmov 0   ;;  %vm9561_vm4 = vcmask 261120   ;;  %s9280_s0 = inlined_call_operand.vmem [shape: f32[256,32], index: 0, kind: input, shape index: {}]   ;;  %s9281_s1 = inlined_call_operand.vmem [shape: f32[32,32], index: 1, kind: input, shape index: {}]   ;;  %s9282_s2 = inlined_call_operand.vmem [shape: s32[256,1], index: 2, kind: input, shape index: {}]   ;;  %s9283_s3 = inlined_call_operand.hbm [shape: f32[8,32], index: 3, kind: output, shape index: {0}]   ;;  %s9284_s4 = inlined_call_operand.vmem [shape: f32[8,1], index: 4, kind: output, shape index: {1}]  }
   0x1   :  { %v4223_v0 = vld [vmem:[%s9282_s2 + $0x8] sm:$0xff]  ;;  %v4228_v1 = vld [vmem:[%s9282_s2] sm:$0xff]  ;;  %3977 = vset.pattern.permute.xlu1 %v9397_v3  ;;  %3976 = vset.pattern.permute.xlu0 %v9397_v3  ;;  %v4243_v5 = vld [vmem:[%s9282_s2 + $0x10] sm:$0xff] }
   0x2   :  { %9832 = vst [vmem:[#allocation5_spill] sm:$0xff] %v4223_v0  ;;  %9833 = vst [vmem:[#allocation6_spill] sm:$0xff] %v4228_v1  ;;  %v57_v2 = vld [vmem:[%s9281_s1] sm:$0xff]  ;;  %vm9545_vm0 = vcmp.eq.s32.totalorder %v4223_v0, 0  ;;  %vm9549_vm1 = vcmp.eq.s32.totalorder %v4228_v1, 0  ;;  %v58_v4 = vld [vmem:[%s9281_s1 + $0x8] sm:$0xff] }
   0x3   :  { %9834 = vst [vmem:[#allocation7_spill] sm:$0xff] %v4243_v5  ;;  %v4248_v6 = vld [vmem:[%s9282_s2 + $0x48] sm:$0xff]  ;;  %v672_v7 = vsel %vm9545_vm0, 1, %v9397_v3  ;;  %v671_v8 = vsel %vm9549_vm1, 1, %v9397_v3  ;;  %v3961_v9 = vpack.c.bf16 %v58_v4, %v57_v2  ;;  %vm9544_vm2 = vcmp.eq.s32.totalorder %v4243_v5, 0  ;;  %v59_v10 = vld [vmem:[%s9281_s1 + $0x10] sm:$0xff] }
   0x4   :  { %9835 = vst [vmem:[#allocation8_spill] sm:$0xff] %v4248_v6  ;;  %v60_v11 = vld [vmem:[%s9281_s1 + $0x18] sm:$0xff]  ;;  %707 = vperm.xlu1 %3977, %v672_v7   ;;  %704 = vperm.xlu0 %3976, %v671_v8   ;;  %vm9315_vm3 = vcmp.eq.s32.totalorder %v4248_v6, 0  ;;  %v673_v15 = vsel %vm9544_vm2, 1, %v9397_v3  ;;  %v4283_v17 = vld [vmem:[%s9280_s0] sm:$0xff]  ;;  %v4300_v20 = vld [vmem:[%s9282_s2 + $0x68] sm:$0xff] }
   0x5   :  { %v3965_v12 = vpack.c.bf16 %v60_v11, %v59_v10  ;;  %v4267_v13 = vld [vmem:[%s9282_s2 + $0x18] sm:$0xff]  ;;  %3962 = vmatprep.subr.bf16.mxu0 %v3961_v9  ;;  %3969 = vmatprep.subr.bf16.mxu1 %v3961_v9  ;;  %v680_v16 = vsel %vm9315_vm3, 1, %v9397_v3  ;;  %v4288_v18 = vld [vmem:[%s9280_s0 + $0x80] sm:$0xff]  ;;  %9839 = vst [vmem:[#allocation12_spill] sm:$0xff] %v4300_v20  ;;  %v4315_v23 = vld [vmem:[%s9280_s0 + $0x8] sm:$0xff]  ;;  %vm9287_vm8 = vcmp.eq.s32.totalorder %v4300_v20, 0 }
   0x6   :  { %9836 = vst [vmem:[#allocation9_spill] sm:$0xff] %v4267_v13  ;;  %v4272_v14 = vld [vmem:[%s9282_s2 + $0x58] sm:$0xff]  ;;  %3964 = vmatpush3.bf16.msra.mxu0 %v3961_v9  ;;  %3971 = vmatpush3.bf16.msra.mxu1 %v3961_v9  ;;  %vm9543_vm5 = vcmp.eq.s32.totalorder %v4267_v13, 0  ;;  %v4295_v19 = vld [vmem:[%s9282_s2 + $0x20] sm:$0xff]  ;;  %v4320_v24 = vld [vmem:[%s9280_s0 + $0x88] sm:$0xff]  ;;  %v684_v30 = vsel %vm9287_vm8, 1, %v9397_v3 }
   0x7   :  { %9837 = vst [vmem:[#allocation10_spill] sm:$0xff] %v4272_v14  ;;  %vm9289_vm6 = vcmp.eq.s32.totalorder %v4272_v14, 0  ;;  %3966 = vmatprep.subr.bf16.mxu0 %v3965_v12  ;;  %3970 = vmatprep.subr.bf16.mxu1 %v3965_v12  ;;  %9838 = vst [vmem:[#allocation11_spill] sm:$0xff] %v4295_v19  ;;  %v674_v21 = vsel %vm9543_vm5, 1, %v9397_v3  ;;  %v4325_v25 = vld [vmem:[%s9280_s0 + $0x10] sm:$0xff]  ;;  %vm9538_vm7 = vcmp.eq.s32.totalorder %v4295_v19, 0 }
   0x8   :  { %710 = vperm.xlu1 %3977, %v673_v15   ;;  %731 = vperm.xlu0 %3976, %v680_v16   ;;  %v682_v22 = vsel %vm9289_vm6, 1, %v9397_v3  ;;  %v4332_v26 = vld [vmem:[%s9280_s0 + $0x90] sm:$0xff]  ;;  %v4337_v27 = vld [vmem:[%s9282_s2 + $0x28] sm:$0xff]  ;;  %v4342_v28 = vld [vmem:[%s9282_s2 + $0x78] sm:$0xff]  ;;  %v675_v29 = vsel %vm9538_vm7, 1, %v9397_v3 }
   0x9   :  { %3913 = vmatprep.mubr.msk.f32.mxu0 %vm9561_vm4, %v4283_v17  ;;  %3937 = vmatprep.mubr.msk.f32.mxu1 %vm9561_vm4, %v4288_v18  ;;  %9840 = vst [vmem:[#allocation13_spill] sm:$0xff] %v4337_v27  ;;  %9841 = vst [vmem:[#allocation14_spill] sm:$0xff] %v4342_v28  ;;  %v4359_v31 = vld [vmem:[%s9280_s0 + $0x18] sm:$0xff]  ;;  %vm9489_vm9 = vcmp.eq.s32.totalorder %v4337_v27, 0  ;;  %vm9285_vm10 = vcmp.eq.s32.totalorder %v4342_v28, 0  ;;  %v4373_v33 = vld [vmem:[%s9282_s2 + $0x30] sm:$0xff] }
   0xa   :  { %3968 = vmatpush3.bf16.msra.mxu0 %v3965_v12  ;;  %3972 = vmatpush3.bf16.msra.mxu1 %v3965_v12  ;;  %v4368_v32 = vld [vmem:[%s9280_s0 + $0x98] sm:$0xff]  ;;  %9842 = vst [vmem:[#allocation15_spill] sm:$0xff] %v4373_v33  ;;  %v4378_v34 = vld [vmem:[%s9282_s2 + $0x88] sm:$0xff]  ;;  %v4383_v35 = vld [vmem:[%s9280_s0 + $0x20] sm:$0xff]  ;;  %v676_v37 = vsel %vm9489_vm9, 1, %v9397_v3  ;;  %v686_v38 = vsel %vm9285_vm10, 1, %v9397_v3 }
   0xb   :  { %9843 = vst [vmem:[#allocation16_spill] sm:$0xff] %v4378_v34  ;;  %v4388_v36 = vld [vmem:[%s9280_s0 + $0xa0] sm:$0xff]  ;;  %vm9486_vm11 = vcmp.eq.s32.totalorder %v4373_v33, 0  ;;  %vm9568_vm12 = vcmp.eq.s32.totalorder %v4378_v34, 0  ;;  %v4407_v39 = vld [vmem:[%s9280_s0 + $0x28] sm:$0xff]  ;;  %v4412_v40 = vld [vmem:[%s9282_s2 + $0x38] sm:$0xff] }
   0xc   :  { %713 = vperm.xlu1 %3977, %v674_v21   ;;  %737 = vperm.xlu0 %3976, %v682_v22   ;;  %9844 = vst [vmem:[#allocation17_spill] sm:$0xff] %v4412_v40  ;;  %v4419_v41 = vld [vmem:[%s9280_s0 + $0xa8] sm:$0xff]  ;;  %v4424_v42 = vld [vmem:[%s9282_s2 + $0x98] sm:$0xff]  ;;  %v4429_v43 = vld [vmem:[%s9280_s0 + $0x30] sm:$0xff]  ;;  %v677_v45 = vsel %vm9486_vm11, 1, %v9397_v3  ;;  %v688_v46 = vsel %vm9568_vm12, 1, %v9397_v3 }
   0xd   :  { %3914 = vmatmul.mubr.msk.f32.vlgmr.msra.gmra.mrb[0].mxu0 %vm9561_vm4, %v4315_v23  ;;  %3938 = vmatmul.mubr.msk.f32.vlgmr.msra.gmra.mrb[0].mxu1 %vm9561_vm4, %v4320_v24  ;;  %9845 = vst [vmem:[#allocation18_spill] sm:$0xff] %v4424_v42  ;;  %v4434_v44 = vld [vmem:[%s9280_s0 + $0xb0] sm:$0xff]  ;;  %vm9483_vm13 = vcmp.eq.s32.totalorder %v4412_v40, 0  ;;  %vm9286_vm14 = vcmp.eq.s32.totalorder %v4424_v42, 0  ;;  %v4451_v47 = vld [vmem:[%s9282_s2 + $0x40] sm:$0xff]  ;;  %v4458_v48 = vld [vmem:[%s9280_s0 + $0x38] sm:$0xff] }
   0xe   :  { %3916 = vmatprep.mubr.msk.f32.mxu0 %vm9561_vm4, %v4325_v25  ;;  %3940 = vmatprep.mubr.msk.f32.mxu1 %vm9561_vm4, %v4332_v26  ;;  %9846 = vst [vmem:[#allocation19_spill] sm:$0xff] %v4451_v47  ;;  %v4465_v49 = vld [vmem:[%s9280_s0 + $0xb8] sm:$0xff]  ;;  %v4470_v50 = vld [vmem:[%s9282_s2 + $0xa8] sm:$0xff]  ;;  %v4475_v51 = vld [vmem:[%s9280_s0 + $0x40] sm:$0xff]  ;;  %v678_v53 = vsel %vm9483_vm13, 1, %v9397_v3  ;;  %v690_v54 = vsel %vm9286_vm14, 1, %v9397_v3 }
   0xf   :  { %9847 = vst [vmem:[#allocation20_spill] sm:$0xff] %v4470_v50  ;;  %v4480_v52 = vld [vmem:[%s9280_s0 + $0xc0] sm:$0xff] }
  0x10   :  { %716 = vperm.xlu1 %3977, %v675_v29   ;;  %743 = vperm.xlu0 %3976, %v684_v30  }
  0x11   :  { %3917 = vmatmul.mubr.msk.f32.gmra.mrb[2].mxu0 %vm9561_vm4, %v4359_v31  ;;  %3941 = vmatmul.mubr.msk.f32.gmra.mrb[2].mxu1 %vm9561_vm4, %v4368_v32 }
  0x12   :  { %3919 = vmatprep.mubr.msk.f32.mxu0 %vm9561_vm4, %v4383_v35  ;;  %3943 = vmatprep.mubr.msk.f32.mxu1 %vm9561_vm4, %v4388_v36 }
  0x14   :  { %719 = vperm.xlu1 %3977, %v676_v37   ;;  %749 = vperm.xlu0 %3976, %v686_v38  }
  0x15   :  { %3920 = vmatmul.mubr.msk.f32.gmra.mrb[4].mxu0 %vm9561_vm4, %v4407_v39  ;;  %3944 = vmatmul.mubr.msk.f32.gmra.mrb[4].mxu1 %vm9561_vm4, %v4419_v41 }
  0x16   :  { %3922 = vmatprep.mubr.msk.f32.mxu0 %vm9561_vm4, %v4429_v43  ;;  %3946 = vmatprep.mubr.msk.f32.mxu1 %vm9561_vm4, %v4434_v44 }
  0x18   :  { %722 = vperm.xlu1 %3977, %v677_v45   ;;  %755 = vperm.xlu0 %3976, %v688_v46  }
  0x19   :  { %3923 = vmatmul.mubr.msk.f32.gmra.mrb[6].mxu0 %vm9561_vm4, %v4458_v48  ;;  %3947 = vmatmul.mubr.msk.f32.gmra.mrb[6].mxu1 %vm9561_vm4, %v4465_v49 }
  0x1a   :  { %10 = vsyncpa [#allocation3], 0  ;;  %vm9482_vm15 = vcmp.eq.s32.totalorder %v4451_v47, 0  ;;  %vm9288_vm10 = vcmp.eq.s32.totalorder %v4470_v50, 0  ;;  %v4497_v55 = vld [vmem:[%s9282_s2 + $0x50] sm:$0xff]  ;;  %3925 = vmatprep.mubr.msk.f32.mxu0 %vm9561_vm4, %v4475_v51  ;;  %v4504_v56 = vld [vmem:[%s9280_s0 + $0x48] sm:$0xff]  ;;  %3949 = vmatprep.mubr.msk.f32.mxu1 %vm9561_vm4, %v4480_v52 }
  0x1b   :  { %9848 = vst [vmem:[#allocation21_spill] sm:$0xff] %v4497_v55  ;;  %v4511_v57 = vld [vmem:[%s9280_s0 + $0xc8] sm:$0xff]  ;;  %v4516_v58 = vld [vmem:[%s9282_s2 + $0xb8] sm:$0xff]  ;;  %v4521_v59 = vld [vmem:[%s9280_s0 + $0x50] sm:$0xff]  ;;  %v679_v61 = vsel %vm9482_vm15, 1, %v9397_v3  ;;  %v692_v62 = vsel %vm9288_vm10, 1, %v9397_v3 }
  0x1c   :  { %9849 = vst [vmem:[#allocation22_spill] sm:$0xff] %v4516_v58  ;;  %v4526_v60 = vld [vmem:[%s9280_s0 + $0xd0] sm:$0xff]  ;;  %725 = vperm.xlu1 %3977, %v678_v53   ;;  %761 = vperm.xlu0 %3976, %v690_v54   ;;  %vm9291_vm14 = vcmp.eq.s32.totalorder %v4497_v55, 0  ;;  %vm9290_vm8 = vcmp.eq.s32.totalorder %v4516_v58, 0  ;;  %v4543_v63 = vld [vmem:[%s9282_s2 + $0x60] sm:$0xff]  ;;  %v4550_v2 = vld [vmem:[%s9280_s0 + $0x58] sm:$0xff] }
  0x1d   :  { %3926 = vmatmul.mubr.msk.f32.gmra.mrb[8].mxu0 %vm9561_vm4, %v4504_v56  ;;  %3950 = vmatmul.mubr.msk.f32.gmra.mrb[8].mxu1 %vm9561_vm4, %v4511_v57  ;;  %9850 = vst [vmem:[#allocation23_spill] sm:$0xff] %v4543_v63  ;;  %v4557_v4 = vld [vmem:[%s9280_s0 + $0xd8] sm:$0xff]  ;;  %v4562_v7 = vld [vmem:[%s9282_s2 + $0xc8] sm:$0xff]  ;;  %v4567_v8 = vld [vmem:[%s9280_s0 + $0x60] sm:$0xff]  ;;  %v681_v10 = vsel %vm9291_vm14, 1, %v9397_v3  ;;  %v694_v11 = vsel %vm9290_vm8, 1, %v9397_v3 }
  0x1e   :  { %3928 = vmatprep.mubr.msk.f32.mxu0 %vm9561_vm4, %v4521_v59  ;;  %3952 = vmatprep.mubr.msk.f32.mxu1 %vm9561_vm4, %v4526_v60  ;;  %9851 = vst [vmem:[#allocation24_spill] sm:$0xff] %v4562_v7  ;;  %v4572_v9 = vld [vmem:[%s9280_s0 + $0xe0] sm:$0xff]  ;;  %vm9293_vm10 = vcmp.eq.s32.totalorder %v4543_v63, 0  ;;  %vm9292_vm6 = vcmp.eq.s32.totalorder %v4562_v7, 0  ;;  %v4589_v12 = vld [vmem:[%s9282_s2 + $0x70] sm:$0xff]  ;;  %v4596_v15 = vld [vmem:[%s9280_s0 + $0x68] sm:$0xff] }
  0x1f   :  { %9852 = vst [vmem:[#allocation25_spill] sm:$0xff] %v4572_v9  ;;  %9853 = vst [vmem:[#allocation26_spill] sm:$0xff] %v4589_v12  ;;  %v4603_v16 = vld [vmem:[%s9280_s0 + $0xe8] sm:$0xff]  ;;  %v4608_v21 = vld [vmem:[%s9282_s2 + $0xd8] sm:$0xff]  ;;  %v683_v30 = vsel %vm9293_vm10, 1, %v9397_v3  ;;  %v696_v37 = vsel %vm9292_vm6, 1, %v9397_v3 }
  0x20   :  { %728 = vperm.xlu1 %3977, %v679_v61   ;;  %767 = vperm.xlu0 %3976, %v692_v62   ;;  %9854 = vst [vmem:[#allocation27_spill] sm:$0xff] %v4603_v16  ;;  %9855 = vst [vmem:[#allocation28_spill] sm:$0xff] %v4608_v21  ;;  %v4613_v22 = vld [vmem:[%s9280_s0 + $0x70] sm:$0xff]  ;;  %vm9295_vm8 = vcmp.eq.s32.totalorder %v4589_v12, 0  ;;  %vm9294_vm14 = vcmp.eq.s32.totalorder %v4608_v21, 0  ;;  %v4637_v38 = vld [vmem:[%s9280_s0 + $0x78] sm:$0xff] }
  0x21   :  { %3929 = vmatmul.mubr.msk.f32.gmra.mrb[10].mxu0 %vm9561_vm4, %v4550_v2  ;;  %3953 = vmatmul.mubr.msk.f32.gmra.mrb[10].mxu1 %vm9561_vm4, %v4557_v4  ;;  %9856 = vst [vmem:[#allocation29_spill] sm:$0xff] %v4613_v22  ;;  %v4618_v29 = vld [vmem:[%s9280_s0 + $0xf0] sm:$0xff]  ;;  %9858 = vst [vmem:[#allocation31_spill] sm:$0xff] %v4637_v38  ;;  %v4644_v45 = vld [vmem:[%s9280_s0 + $0xf8] sm:$0xff]  ;;  %v685_v54 = vsel %vm9295_vm8, 1, %v9397_v3  ;;  %v698_v61 = vsel %vm9294_vm14, 1, %v9397_v3 }
  0x22   :  { %3931 = vmatprep.mubr.msk.f32.mxu0 %vm9561_vm4, %v4567_v8  ;;  %3955 = vmatprep.mubr.msk.f32.mxu1 %vm9561_vm4, %v4572_v9  ;;  %9857 = vst [vmem:[#allocation30_spill] sm:$0xff] %v4618_v29  ;;  %9859 = vst [vmem:[#allocation32_spill] sm:$0xff] %v4644_v45  ;;  %v4649_v46 = vld [vmem:[%s9282_s2 + $0x80] sm:$0xff]  ;;  %v4654_v53 = vld [vmem:[%s9282_s2 + $0xe8] sm:$0xff]  ;;  %vm9320_vm3 = vcmp.eq.s32.totalorder %v4300_v20, 1 }
  0x23   :  { %9860 = vst [vmem:[#allocation33_spill] sm:$0xff] %v4649_v46  ;;  %9861 = vst [vmem:[#allocation34_spill] sm:$0xff] %v4654_v53  ;;  %vm9297_vm6 = vcmp.eq.s32.totalorder %v4649_v46, 0  ;;  %vm9296_vm10 = vcmp.eq.s32.totalorder %v4654_v53, 0  ;;  %v4671_v62 = vld [vmem:[%s9282_s2 + $0x90] sm:$0xff] }
  0x24   :  { %734 = vperm.xlu1 %3977, %v681_v10   ;;  %773 = vperm.xlu0 %3976, %v694_v11   ;;  %9862 = vst [vmem:[#allocation35_spill] sm:$0xff] %v4671_v62  ;;  %v4676_v10 = vld [vmem:[%s9282_s2 + $0xf8] sm:$0xff]  ;;  %v687_v11 = vsel %vm9297_vm6, 1, %v9397_v3  ;;  %vm9300_vm14 = vcmp.eq.s32.totalorder %v4671_v62, 0  ;;  %vm9302_vm6 = vcmp.eq.s32.totalorder %v4223_v0, 1  ;;  %v4754_v9 = vld [vmem:[%s9282_s2 + $0xf0] sm:$0xff] }
  0x25   :  { %3932 = vmatmul.mubr.msk.f32.gmra.mrb[12].mxu0 %vm9561_vm4, %v4596_v15  ;;  %3956 = vmatmul.mubr.msk.f32.gmra.mrb[12].mxu1 %vm9561_vm4, %v4603_v16  ;;  %9863 = vst [vmem:[#allocation36_spill] sm:$0xff] %v4676_v10  ;;  %vm9299_vm8 = vcmp.eq.s32.totalorder %v4676_v10, 0  ;;  %9869 = vst [vmem:[#allocation42_spill] sm:$0xff] %v4754_v9 }
  0x26   :  { %3934 = vmatprep.mubr.msk.f32.mxu0 %vm9561_vm4, %v4613_v22  ;;  %3958 = vmatprep.mubr.msk.f32.mxu1 %vm9561_vm4, %v4618_v29  ;;  %v4702_v29 = vld [vmem:[%s9282_s2 + $0xb0] sm:$0xff] }
  0x27   :  { %9865 = vst [vmem:[#allocation38_spill] sm:$0xff] %v4702_v29  ;;  %v4728_v22 = vld [vmem:[%s9282_s2 + $0xd0] sm:$0xff] }
  0x28   :  { %740 = vperm.xlu1 %3977, %v683_v30   ;;  %779 = vperm.xlu0 %3976, %v696_v37   ;;  %v700_v30 = vsel %vm9296_vm10, 1, %v9397_v3  ;;  %v4689_v37 = vld [vmem:[%s9282_s2 + $0xa0] sm:$0xff]  ;;  %9867 = vst [vmem:[#allocation40_spill] sm:$0xff] %v4728_v22  ;;  %vm9515_vm13 = vcmp.eq.s32.totalorder %v4728_v22, 3 }
  0x29   :  { %3935 = vmatmul.mubr.msk.f32.gmra.mrb[14].mxu0 %vm9561_vm4, %v4637_v38  ;;  %3959 = vmatmul.mubr.msk.f32.gmra.mrb[14].mxu1 %vm9561_vm4, %v4644_v45  ;;  %9864 = vst [vmem:[#allocation37_spill] sm:$0xff] %v4689_v37  ;;  %vm9303_vm10 = vcmp.eq.s32.totalorder %v4689_v37, 0  ;;  %v4715_v45 = vld [vmem:[%s9282_s2 + $0xc0] sm:$0xff] }
  0x2a   :  { %9866 = vst [vmem:[#allocation39_spill] sm:$0xff] %v4715_v45  ;;  %v4741_v38 = vld [vmem:[%s9282_s2 + $0xe0] sm:$0xff] }
  0x2b   :  { %9868 = vst [vmem:[#allocation41_spill] sm:$0xff] %v4741_v38  ;;  %vm9518_vm9 = vcmp.eq.s32.totalorder %v4741_v38, 3 }
  0x2c   :  { %746 = vperm.xlu1 %3977, %v685_v54   ;;  %785 = vperm.xlu0 %3976, %v698_v61   ;;  %v689_v54 = vsel %vm9300_vm14, 1, %v9397_v3  ;;  %v702_v61 = vsel %vm9299_vm8, 1, %v9397_v3  ;;  %vm9306_vm8 = vcmp.eq.s32.totalorder %v4702_v29, 0  ;;  %vm9305_vm14 = vcmp.eq.s32.totalorder %v4267_v13, 1 }
  0x30   :  { %752 = vperm.xlu1 %3977, %v687_v11   ;;  %791 = vperm.xlu0 %3976, %v700_v30   ;;  %v691_v11 = vsel %vm9303_vm10, 1, %v9397_v3  ;;  %v1067_v30 = vsel %vm9302_vm6, 1, %v9397_v3  ;;  %vm9309_vm6 = vcmp.eq.s32.totalorder %v4715_v45, 0  ;;  %vm9308_vm10 = vcmp.eq.s32.totalorder %v4337_v27, 1 }
  0x34   :  { %758 = vperm.xlu1 %3977, %v689_v54   ;;  %797 = vperm.xlu0 %3976, %v702_v61   ;;  %v693_v54 = vsel %vm9306_vm8, 1, %v9397_v3  ;;  %v1069_v61 = vsel %vm9305_vm14, 1, %v9397_v3  ;;  %vm9312_vm14 = vcmp.eq.s32.totalorder %v4728_v22, 0  ;;  %vm9311_vm8 = vcmp.eq.s32.totalorder %v4412_v40, 1 }
  0x38   :  { %764 = vperm.xlu1 %3977, %v691_v11   ;;  %1102 = vperm.xlu0 %3976, %v1067_v30   ;;  %v695_v11 = vsel %vm9309_vm6, 1, %v9397_v3  ;;  %v1071_v30 = vsel %vm9308_vm10, 1, %v9397_v3  ;;  %vm9314_vm10 = vcmp.eq.s32.totalorder %v4741_v38, 0  ;;  %vm9316_vm6 = vcmp.eq.s32.totalorder %v4248_v6, 1 }
  0x3c   :  { %770 = vperm.xlu1 %3977, %v693_v54   ;;  %1108 = vperm.xlu0 %3976, %v1069_v61   ;;  %v697_v54 = vsel %vm9312_vm14, 1, %v9397_v3  ;;  %v1073_v61 = vsel %vm9311_vm8, 1, %v9397_v3  ;;  %vm9317_vm8 = vcmp.eq.s32.totalorder %v4754_v9, 0  ;;  %vm9318_vm14 = vcmp.eq.s32.totalorder %v4272_v14, 1 }
  0x3d   :  { %v701_v16 = vsel %vm9317_vm8, 1, %v9397_v3  ;;  %vm9322_vm8 = vcmp.eq.s32.totalorder %v4342_v28, 1 }
  0x40   :  { %776 = vperm.xlu1 %3977, %v695_v11   ;;  %1114 = vperm.xlu0 %3976, %v1071_v30   ;;  %v699_v11 = vsel %vm9314_vm10, 1, %v9397_v3  ;;  %v1075_v30 = vsel %vm9316_vm6, 1, %v9397_v3  ;;  %vm9319_vm10 = vcmp.eq.s32.totalorder %v4228_v1, 1  ;;  %vm9321_vm6 = vcmp.eq.s32.totalorder %v4243_v5, 1 }
  0x44   :  { %782 = vperm.xlu1 %3977, %v697_v54   ;;  %1120 = vperm.xlu0 %3976, %v1073_v61   ;;  %v1077_v54 = vsel %vm9318_vm14, 1, %v9397_v3  ;;  %v1066_v61 = vsel %vm9319_vm10, 1, %v9397_v3  ;;  %vm9323_vm14 = vcmp.eq.s32.totalorder %v4295_v19, 1  ;;  %vm9324_vm10 = vcmp.eq.s32.totalorder %v4378_v34, 1 }
  0x48   :  { %788 = vperm.xlu1 %3977, %v699_v11   ;;  %1126 = vperm.xlu0 %3976, %v1075_v30   ;;  %v1079_v11 = vsel %vm9320_vm3, 1, %v9397_v3  ;;  %v1068_v30 = vsel %vm9321_vm6, 1, %v9397_v3  ;;  %vm9325_vm3 = vcmp.eq.s32.totalorder %v4373_v33, 1  ;;  %vm9326_vm6 = vcmp.eq.s32.totalorder %v4424_v42, 1 }
  0x4c   :  { %794 = vperm.xlu1 %3977, %v701_v16   ;;  %1132 = vperm.xlu0 %3976, %v1077_v54   ;;  %v1081_v16 = vsel %vm9322_vm8, 1, %v9397_v3  ;;  %v1070_v54 = vsel %vm9323_vm14, 1, %v9397_v3  ;;  %vm9327_vm8 = vcmp.eq.s32.totalorder %v4451_v47, 1  ;;  %vm9328_vm14 = vcmp.eq.s32.totalorder %v4470_v50, 1 }
  0x50   :  { %1099 = vperm.xlu1 %3977, %v1066_v61   ;;  %1138 = vperm.xlu0 %3976, %v1079_v11   ;;  %v1083_v61 = vsel %vm9324_vm10, 1, %v9397_v3  ;;  %v1072_v11 = vsel %vm9325_vm3, 1, %v9397_v3  ;;  %vm9329_vm10 = vcmp.eq.s32.totalorder %v4497_v55, 1  ;;  %vm9330_vm3 = vcmp.eq.s32.totalorder %v4516_v58, 1 }
  0x54   :  { %1105 = vperm.xlu1 %3977, %v1068_v30   ;;  %1144 = vperm.xlu0 %3976, %v1081_v16   ;;  %v1085_v30 = vsel %vm9326_vm6, 1, %v9397_v3  ;;  %v1074_v16 = vsel %vm9327_vm8, 1, %v9397_v3  ;;  %vm9331_vm6 = vcmp.eq.s32.totalorder %v4543_v63, 1  ;;  %vm9332_vm8 = vcmp.eq.s32.totalorder %v4562_v7, 1 }
  0x58   :  { %1111 = vperm.xlu1 %3977, %v1070_v54   ;;  %1150 = vperm.xlu0 %3976, %v1083_v61   ;;  %v1087_v54 = vsel %vm9328_vm14, 1, %v9397_v3  ;;  %v1076_v61 = vsel %vm9329_vm10, 1, %v9397_v3  ;;  %vm9333_vm14 = vcmp.eq.s32.totalorder %v4589_v12, 1  ;;  %vm9334_vm10 = vcmp.eq.s32.totalorder %v4608_v21, 1 }
  0x5c   :  { %1117 = vperm.xlu1 %3977, %v1072_v11   ;;  %1156 = vperm.xlu0 %3976, %v1085_v30   ;;  %v1089_v11 = vsel %vm9330_vm3, 1, %v9397_v3  ;;  %v1078_v30 = vsel %vm9331_vm6, 1, %v9397_v3  ;;  %vm9335_vm3 = vcmp.eq.s32.totalorder %v4649_v46, 1  ;;  %vm9336_vm6 = vcmp.eq.s32.totalorder %v4654_v53, 1 }
  0x60   :  { %1123 = vperm.xlu1 %3977, %v1074_v16   ;;  %1162 = vperm.xlu0 %3976, %v1087_v54   ;;  %v1091_v16 = vsel %vm9332_vm8, 1, %v9397_v3  ;;  %v1080_v54 = vsel %vm9333_vm14, 1, %v9397_v3  ;;  %vm9337_vm8 = vcmp.eq.s32.totalorder %v4671_v62, 1  ;;  %vm9338_vm14 = vcmp.eq.s32.totalorder %v4676_v10, 1 }
  0x64   :  { %1129 = vperm.xlu1 %3977, %v1076_v61   ;;  %1168 = vperm.xlu0 %3976, %v1089_v11   ;;  %v1093_v61 = vsel %vm9334_vm10, 1, %v9397_v3  ;;  %v1082_v11 = vsel %vm9335_vm3, 1, %v9397_v3  ;;  %vm9339_vm10 = vcmp.eq.s32.totalorder %v4689_v37, 1  ;;  %vm9340_vm3 = vcmp.eq.s32.totalorder %v4223_v0, 2 }
  0x68   :  { %1135 = vperm.xlu1 %3977, %v1078_v30   ;;  %1174 = vperm.xlu0 %3976, %v1091_v16   ;;  %v1095_v30 = vsel %vm9336_vm6, 1, %v9397_v3  ;;  %v1084_v16 = vsel %vm9337_vm8, 1, %v9397_v3  ;;  %vm9341_vm6 = vcmp.eq.s32.totalorder %v4702_v29, 1  ;;  %vm9342_vm8 = vcmp.eq.s32.totalorder %v4267_v13, 2 }
  0x6c   :  { %1141 = vperm.xlu1 %3977, %v1080_v54   ;;  %1180 = vperm.xlu0 %3976, %v1093_v61   ;;  %v1097_v54 = vsel %vm9338_vm14, 1, %v9397_v3  ;;  %v1086_v61 = vsel %vm9339_vm10, 1, %v9397_v3  ;;  %vm9343_vm14 = vcmp.eq.s32.totalorder %v4715_v45, 1  ;;  %vm9344_vm10 = vcmp.eq.s32.totalorder %v4337_v27, 2 }
  0x70   :  { %1147 = vperm.xlu1 %3977, %v1082_v11   ;;  %1186 = vperm.xlu0 %3976, %v1095_v30   ;;  %v1461_v11 = vsel %vm9340_vm3, 1, %v9397_v3  ;;  %v1088_v30 = vsel %vm9341_vm6, 1, %v9397_v3  ;;  %vm9432_vm3 = vcmp.eq.s32.totalorder %v4728_v22, 1  ;;  %vm9345_vm6 = vcmp.eq.s32.totalorder %v4412_v40, 2 }
  0x74   :  { %1153 = vperm.xlu1 %3977, %v1084_v16   ;;  %1192 = vperm.xlu0 %3976, %v1097_v54   ;;  %v1463_v16 = vsel %vm9342_vm8, 1, %v9397_v3  ;;  %v1090_v54 = vsel %vm9343_vm14, 1, %v9397_v3  ;;  %vm9351_vm8 = vcmp.eq.s32.totalorder %v4741_v38, 1  ;;  %vm9350_vm14 = vcmp.eq.s32.totalorder %v4248_v6, 2 }
  0x78   :  { %1159 = vperm.xlu1 %3977, %v1086_v61   ;;  %1496 = vperm.xlu0 %3976, %v1461_v11   ;;  %v1465_v61 = vsel %vm9344_vm10, 1, %v9397_v3  ;;  %v1092_v11 = vsel %vm9432_vm3, 1, %v9397_v3  ;;  %vm9354_vm10 = vcmp.eq.s32.totalorder %v4754_v9, 1  ;;  %vm9436_vm3 = vcmp.eq.s32.totalorder %v4562_v7, 2 }
  0x7c   :  { %1165 = vperm.xlu1 %3977, %v1088_v30   ;;  %1502 = vperm.xlu0 %3976, %v1463_v16   ;;  %v1467_v30 = vsel %vm9345_vm6, 1, %v9397_v3  ;;  %vm9355_vm6 = vcmp.eq.s32.totalorder %v4272_v14, 2 }
  0x80   :  { %1171 = vperm.xlu1 %3977, %v1090_v54   ;;  %1508 = vperm.xlu0 %3976, %v1465_v61   ;;  %v1094_v54 = vsel %vm9351_vm8, 1, %v9397_v3  ;;  %v1469_v61 = vsel %vm9350_vm14, 1, %v9397_v3  ;;  %vm9361_vm14 = vcmp.eq.s32.totalorder %v4228_v1, 2  ;;  %vm9360_vm8 = vcmp.eq.s32.totalorder %v4300_v20, 2 }
  0x83   :  { %v4884_v16 = vpop.permute.xlu1 %707  ;;  %v4896_v27 = vpop.permute.xlu0 %704 }
  0x84   :  { %1177 = vperm.xlu1 %3977, %v1092_v11   ;;  %1514 = vperm.xlu0 %3976, %v1467_v30   ;;  %v1096_v11 = vsel %vm9354_vm10, 1, %v9397_v3  ;;  %v1471_v30 = vsel %vm9355_vm6, 1, %v9397_v3  ;;  %vm9369_vm10 = vcmp.eq.s32.totalorder %v4243_v5, 2  ;;  %vm9366_vm6 = vcmp.eq.s32.totalorder %v4342_v28, 2 }
  0x87   :  { %v4894_v40 = vpop.permute.xlu1 %710  ;;  %v4916_v14 = vpop.permute.xlu0 %731 }
  0x88   :  { %1183 = vperm.xlu1 %3977, %v1094_v54   ;;  %1520 = vperm.xlu0 %3976, %v1469_v61   ;;  %v1460_v54 = vsel %vm9361_vm14, 1, %v9397_v3  ;;  %v1473_v61 = vsel %vm9360_vm8, 1, %v9397_v3  ;;  %9871 = vst [vmem:[#allocation44_spill] sm:$0xff] %v4916_v14  ;;  %vm9427_vm8 = vcmp.eq.s32.totalorder %v4295_v19, 2  ;;  %vm9374_vm14 = vcmp.eq.s32.totalorder %v4378_v34, 2 }
  0x8b   :  { %v4906_v6 = vpop.permute.xlu1 %713  ;;  %v4930_v0 = vpop.permute.xlu0 %737 }
  0x8c   :  { %9870 = vst [vmem:[#allocation43_spill] sm:$0xff] %v4906_v6  ;;  %1189 = vperm.xlu1 %3977, %v1096_v11   ;;  %1526 = vperm.xlu0 %3976, %v1471_v30   ;;  %v1462_v11 = vsel %vm9369_vm10, 1, %v9397_v3  ;;  %v1475_v30 = vsel %vm9366_vm6, 1, %v9397_v3  ;;  %9874 = vst [vmem:[#allocation47_spill] sm:$0xff] %v4930_v0  ;;  %vm9377_vm6 = vcmp.eq.s32.totalorder %v4373_v33, 2  ;;  %vm9380_vm10 = vcmp.eq.s32.totalorder %v4451_v47, 2 }
  0x8d   :  { %v1468_v5 = vsel %vm9380_vm10, 1, %v9397_v3  ;;  %vm9426_vm10 = vcmp.eq.s32.totalorder %v4589_v12, 2 }
  0x8f   :  { %v4918_v13 = vpop.permute.xlu1 %716 }
  0x90   :  { %9872 = vst [vmem:[#allocation45_spill] sm:$0xff] %v4918_v13  ;;  %1493 = vperm.xlu1 %3977, %v1460_v54   ;;  %1532 = vperm.xlu0 %3976, %v1473_v61   ;;  %v1464_v54 = vsel %vm9427_vm8, 1, %v9397_v3  ;;  %v1477_v61 = vsel %vm9374_vm14, 1, %v9397_v3  ;;  %vm9385_vm14 = vcmp.eq.s32.totalorder %v4497_v55, 2  ;;  %v1474_v55 = vsel %vm9426_vm10, 1, %v9397_v3 }
  0x91   :  { %vm9430_vm10 = vcmp.eq.s32.totalorder %v4424_v42, 2  ;;  %vm9431_vm8 = vcmp.eq.s32.totalorder %v4715_v45, 2 }
  0x93   :  { %v4928_v20 = vpop.permute.xlu1 %719 }
  0x94   :  { %9873 = vst [vmem:[#allocation46_spill] sm:$0xff] %v4928_v20  ;;  %1499 = vperm.xlu1 %3977, %v1462_v11   ;;  %1538 = vperm.xlu0 %3976, %v1475_v30   ;;  %v1466_v11 = vsel %vm9377_vm6, 1, %v9397_v3  ;;  %v4945_v30 = vpop.permute.xlu0 %743  ;;  %vm9388_vm6 = vcmp.eq.s32.totalorder %v4543_v63, 2 }
  0x95   :  { %9876 = vst [vmem:[#allocation49_spill] sm:$0xff] %v4945_v30 }
  0x97   :  { %v4939_v28 = vpop.permute.xlu1 %722 }
  0x98   :  { %9875 = vst [vmem:[#allocation48_spill] sm:$0xff] %v4939_v28  ;;  %1505 = vperm.xlu1 %3977, %v1464_v54   ;;  %1544 = vperm.xlu0 %3976, %v1477_v61   ;;  %v4955_v54 = vpop.permute.xlu0 %749  ;;  %v1470_v61 = vsel %vm9385_vm14, 1, %v9397_v3  ;;  %vm9425_vm14 = vcmp.eq.s32.totalorder %v4649_v46, 2 }
  0x99   :  { %9879 = vst [vmem:[#allocation52_spill] sm:$0xff] %v4955_v54  ;;  %v1476_v30 = vsel %vm9425_vm14, 1, %v9397_v3  ;;  %vm9429_vm14 = vcmp.eq.s32.totalorder %v4702_v29, 2 }
  0x9b   :  { %v4947_v19 = vpop.permute.xlu1 %725 }
  0x9c   :  { %9877 = vst [vmem:[#allocation50_spill] sm:$0xff] %v4947_v19  ;;  %1511 = vperm.xlu1 %3977, %v1466_v11   ;;  %v1472_v11 = vsel %vm9388_vm6, 1, %v9397_v3  ;;  %v4967_v47 = vpop.permute.xlu0 %755  ;;  %vm9424_vm6 = vcmp.eq.s32.totalorder %v4671_v62, 2 }
  0x9f   :  { %v4953_v1 = vpop.permute.xlu1 %728 }
  0xa0   :  { %9878 = vst [vmem:[#allocation51_spill] sm:$0xff] %v4953_v1  ;;  %1517 = vperm.xlu1 %3977, %v1468_v5  }
  0xa3   :  { %v4961_v33 = vpop.permute.xlu1 %734 }
  0xa4   :  { %9880 = vst [vmem:[#allocation53_spill] sm:$0xff] %v4961_v33  ;;  %1523 = vperm.xlu1 %3977, %v1470_v61   ;;  %v4977_v61 = vpop.permute.xlu0 %761 }
  0xa5   :  { %9883 = vst [vmem:[#allocation56_spill] sm:$0xff] %v4977_v61 }
  0xa7   :  { %v4969_v5 = vpop.permute.xlu1 %740 }
  0xa8   :  { %9881 = vst [vmem:[#allocation54_spill] sm:$0xff] %v4969_v5  ;;  %1529 = vperm.xlu1 %3977, %v1472_v11   ;;  %v1478_v11 = vsel %vm9424_vm6, 1, %v9397_v3  ;;  %v4988_v5 = vpop.permute.xlu0 %767  ;;  %vm9428_vm6 = vcmp.eq.s32.totalorder %v4689_v37, 2 }
  0xa9   :  { %9885 = vst [vmem:[#allocation58_spill] sm:$0xff] %v4988_v5 }
  0xab   :  { %v4975_v54 = vpop.permute.xlu1 %746 }
  0xac   :  { %9882 = vst [vmem:[#allocation55_spill] sm:$0xff] %v4975_v54  ;;  %1535 = vperm.xlu1 %3977, %v1474_v55   ;;  %v4994_v54 = vpop.permute.xlu0 %773 }
  0xad   :  { %9888 = vst [vmem:[#allocation61_spill] sm:$0xff] %v4994_v54 }
  0xaf   :  { %v4983_v33 = vpop.permute.xlu1 %752 }
  0xb0   :  { %9884 = vst [vmem:[#allocation57_spill] sm:$0xff] %v4983_v33  ;;  %1541 = vperm.xlu1 %3977, %v1476_v30   ;;  %v4998_v0 = vpop.permute.xlu0 %779 }
  0xb1   :  { %9890 = vst [vmem:[#allocation63_spill] sm:$0xff] %v4998_v0 }
  0xb3   :  { %v4990_v1 = vpop.permute.xlu1 %758 }
  0xb4   :  { %9886 = vst [vmem:[#allocation59_spill] sm:$0xff] %v4990_v1  ;;  %1547 = vperm.xlu1 %3977, %v1478_v11   ;;  %v5004_v33 = vpop.permute.xlu0 %785 }
  0xb5   :  { %9893 = vst [vmem:[#allocation66_spill] sm:$0xff] %v5004_v33 }
  0xb7   :  { %v4992_v55 = vpop.permute.xlu1 %764 }
  0xb8   :  { %9887 = vst [vmem:[#allocation60_spill] sm:$0xff] %v4992_v55  ;;  %v5008_v5 = vpop.permute.xlu0 %791 }
  0xb9   :  { %9895 = vst [vmem:[#allocation68_spill] sm:$0xff] %v5008_v5 }
  0xbb   :  { %v4996_v61 = vpop.permute.xlu1 %770 }
  0xbc   :  { %9889 = vst [vmem:[#allocation62_spill] sm:$0xff] %v4996_v61  ;;  %v5012_v11 = vpop.permute.xlu0 %797 }
  0xbd   :  { %9897 = vst [vmem:[#allocation70_spill] sm:$0xff] %v5012_v11 }
  0xbf   :  { %v5000_v14 = vpop.permute.xlu1 %776 }
  0xc0   :  { %9891 = vst [vmem:[#allocation64_spill] sm:$0xff] %v5000_v14  ;;  %v5016_v54 = vpop.permute.xlu0 %1102 }
  0xc1   :  { %9899 = vst [vmem:[#allocation72_spill] sm:$0xff] %v5016_v54 }
  0xc3   :  { %v5002_v30 = vpop.permute.xlu1 %782 }
  0xc4   :  { %9892 = vst [vmem:[#allocation65_spill] sm:$0xff] %v5002_v30  ;;  %v5020_v0 = vpop.permute.xlu0 %1108 }
  0xc5   :  { %9901 = vst [vmem:[#allocation74_spill] sm:$0xff] %v5020_v0 }
  0xc7   :  { %v5006_v3 = vpop.permute.xlu1 %788 }
  0xc8   :  { %9894 = vst [vmem:[#allocation67_spill] sm:$0xff] %v5006_v3  ;;  %v5026_v28 = vpop.permute.xlu0 %1114 }
  0xc9   :  { %9903 = vst [vmem:[#allocation76_spill] sm:$0xff] %v5026_v28 }
  0xcb   :  { %v5010_v1 = vpop.permute.xlu1 %794 }
  0xcc   :  { %9896 = vst [vmem:[#allocation69_spill] sm:$0xff] %v5010_v1 }
  0xcf   :  { %v5014_v55 = vpop.permute.xlu1 %1099 }
  0xd0   :  { %9898 = vst [vmem:[#allocation71_spill] sm:$0xff] %v5014_v55 }
  0xd3   :  { %v5018_v61 = vpop.permute.xlu1 %1105 }
  0xd4   :  { %9900 = vst [vmem:[#allocation73_spill] sm:$0xff] %v5018_v61 }
  0xd7   :  { %v5022_v14 = vpop.permute.xlu1 %1111 }
  0xd8   :  { %9902 = vst [vmem:[#allocation75_spill] sm:$0xff] %v5022_v14 }
  0xdb   :  { %v5028_v11 = vpop.permute.xlu1 %1117 }
  0xdc   :  { %9904 = vst [vmem:[#allocation77_spill] sm:$0xff] %v5028_v11 }
  0xe0   :  { %v3915_v30 = vpop.f32.mrb[0].mxu0  ;;  %v3939_v33 = vpop.f32.mrb[0].mxu1 }
  0xe1   :  { %v384_v3 = vmul.f32 %v3915_v30, %v4315_v23  ;;  %v400_v5 = vmul.f32 %v3939_v33, %v4320_v24  ;;  %v224_v19 = vpop.f32.mrb[1].mxu0  ;;  %v304_v1 = vpop.f32.mrb[1].mxu1 }
  0xe2   :  { %v383_v55 = vmul.f32 %v224_v19, %v4283_v17  ;;  %v399_v24 = vmul.f32 %v304_v1, %v4288_v18 }
  0xe3   :  { %v466_v61 = vsel %vm9561_vm4, %v400_v5, 0.0  ;;  %v418_v0 = vsel %vm9561_vm4, %v384_v3, 0.0 }
  0xe4   :  { %467 = vadd.xlane.f32.xlu1 %v466_v61  ;;  %419 = vadd.xlane.f32.xlu0 %v418_v0  ;;  %v3918_v14 = vpop.f32.mrb[2].mxu0  ;;  %v3942_v54 = vpop.f32.mrb[2].mxu1  ;;  %v415_v11 = vsel %vm9561_vm4, %v383_v55, 0.0 }
  0xe5   :  { %v386_v23 = vmul.f32 %v3918_v14, %v4359_v31  ;;  %v402_v33 = vmul.f32 %v3942_v54, %v4368_v32  ;;  %v234_v30 = vpop.f32.mrb[3].mxu0  ;;  %v314_v28 = vpop.f32.mrb[3].mxu1  ;;  %v463_v14 = vsel %vm9561_vm4, %v399_v24, 0.0 }
  0xe6   :  { %v385_v0 = vmul.f32 %v234_v30, %v4325_v25  ;;  %v401_v5 = vmul.f32 %v314_v28, %v4332_v26  ;;  %v5042_v32 = vpop.permute.xlu0 %1120  ;;  %v5044_v54 = vpop.permute.xlu1 %1123 }
  0xe7   :  { %v424_v17 = vsel %vm9561_vm4, %v386_v23, 0.0  ;;  %v472_v1 = vsel %vm9561_vm4, %v402_v33, 0.0  ;;  %9905 = vst [vmem:[#allocation78_spill] sm:$0xff] %v5042_v32  ;;  %9906 = vst [vmem:[#allocation79_spill] sm:$0xff] %v5044_v54  ;;  %v5392_v32 = vld [vmem:[%s9282_s2 + $0xa8] sm:$0xff] }
  0xe8   :  { %416 = vadd.xlane.f32.xlu0 %v415_v11  ;;  %425 = vadd.xlane.f32.xlu1 %v424_v17  ;;  %v3921_v19 = vpop.f32.mrb[4].mxu0  ;;  %v3945_v3 = vpop.f32.mrb[4].mxu1  ;;  %v469_v26 = vsel %vm9561_vm4, %v401_v5, 0.0  ;;  %v421_v28 = vsel %vm9561_vm4, %v385_v0, 0.0  ;;  %9961 = vst [vmem:[#allocation121_spill] sm:$0xff] %v5392_v32  ;;  %vm9517_vm15 = vcmp.eq.s32.totalorder %v5392_v32, 3 }
  0xe9   :  { %v244_v18 = vpop.f32.mrb[5].mxu0  ;;  %v324_v31 = vpop.f32.mrb[5].mxu1  ;;  %v388_v11 = vmul.f32 %v3921_v19, %v4407_v39  ;;  %v404_v17 = vmul.f32 %v3945_v3, %v4419_v41 }
  0xea   :  { %v387_v25 = vmul.f32 %v244_v18, %v4383_v35  ;;  %v5054_v18 = vpop.permute.xlu0 %1126  ;;  %v5056_v5 = vpop.permute.xlu1 %1129 }
  0xeb   :  { %9907 = vst [vmem:[#allocation80_spill] sm:$0xff] %v5054_v18  ;;  %9908 = vst [vmem:[#allocation81_spill] sm:$0xff] %v5056_v5 }
  0xec   :  { %464 = vadd.xlane.f32.xlu0 %v463_v14  ;;  %473 = vadd.xlane.f32.xlu1 %v472_v1  ;;  %v3924_v61 = vpop.f32.mrb[6].mxu0  ;;  %v3948_v55 = vpop.f32.mrb[6].mxu1  ;;  %v403_v14 = vmul.f32 %v324_v31, %v4388_v36  ;;  %v430_v1 = vsel %vm9561_vm4, %v388_v11, 0.0  ;;  %v427_v39 = vsel %vm9561_vm4, %v387_v25, 0.0  ;;  %v478_v36 = vsel %vm9561_vm4, %v404_v17, 0.0 }
  0xed   :  { %v254_v23 = vpop.f32.mrb[7].mxu0  ;;  %v334_v24 = vpop.f32.mrb[7].mxu1  ;;  %v406_v5 = vmul.f32 %v3948_v55, %v4465_v49 }
  0xee   :  { %v389_v41 = vmul.f32 %v254_v23, %v4429_v43  ;;  %v475_v3 = vsel %vm9561_vm4, %v403_v14, 0.0  ;;  %v5066_v23 = vpop.permute.xlu0 %1132  ;;  %v5068_v17 = vpop.permute.xlu1 %1135 }
  0xef   :  { %9909 = vst [vmem:[#allocation82_spill] sm:$0xff] %v5066_v23  ;;  %9910 = vst [vmem:[#allocation83_spill] sm:$0xff] %v5068_v17  ;;  %v5361_v17 = vld [vmem:[%s9282_s2 + $0x78] sm:$0xff] }
  0xf0   :  { %470 = vadd.xlane.f32.xlu0 %v469_v26  ;;  %422 = vadd.xlane.f32.xlu1 %v421_v28  ;;  %v3927_v33 = vpop.f32.mrb[8].mxu0  ;;  %v3951_v30 = vpop.f32.mrb[8].mxu1  ;;  %v390_v28 = vmul.f32 %v3924_v61, %v4458_v48  ;;  %v433_v48 = vsel %vm9561_vm4, %v389_v41, 0.0  ;;  %9958 = vst [vmem:[#allocation118_spill] sm:$0xff] %v5361_v17 }
  0xf1   :  { %v264_v19 = vpop.f32.mrb[9].mxu0  ;;  %v344_v35 = vpop.f32.mrb[9].mxu1 }
  0xf2   :  { %v391_v49 = vmul.f32 %v264_v19, %v4475_v51  ;;  %v5074_v41 = vpop.permute.xlu0 %1138  ;;  %v5076_v23 = vpop.permute.xlu1 %1141 }
  0xf3   :  { %9911 = vst [vmem:[#allocation84_spill] sm:$0xff] %v5074_v41  ;;  %9912 = vst [vmem:[#allocation85_spill] sm:$0xff] %v5076_v23  ;;  %v5374_v41 = vld [vmem:[%s9282_s2 + $0x88] sm:$0xff] }
  0xf4   :  { %431 = vadd.xlane.f32.xlu1 %v430_v1  ;;  %428 = vadd.xlane.f32.xlu0 %v427_v39  ;;  %v3930_v0 = vpop.f32.mrb[10].mxu0  ;;  %v3954_v26 = vpop.f32.mrb[10].mxu1  ;;  %v405_v1 = vmul.f32 %v334_v24, %v4434_v44  ;;  %v436_v39 = vsel %vm9561_vm4, %v390_v28, 0.0  ;;  %v484_v44 = vsel %vm9561_vm4, %v406_v5, 0.0  ;;  %v439_v51 = vsel %vm9561_vm4, %v391_v49, 0.0  ;;  %9959 = vst [vmem:[#allocation119_spill] sm:$0xff] %v5374_v41 }
  0xf5   :  { %v274_v31 = vpop.f32.mrb[11].mxu0  ;;  %v354_v11 = vpop.f32.mrb[11].mxu1  ;;  %vm2233_vm0 = vcmp.eq.s32.totalorder %v5374_v41, 4 }
  0xf6   :  { %v481_v55 = vsel %vm9561_vm4, %v405_v1, 0.0  ;;  %v393_v19 = vmul.f32 %v274_v31, %v4521_v59 }
  0xf8   :  { %479 = vadd.xlane.f32.xlu1 %v478_v36  ;;  %476 = vadd.xlane.f32.xlu0 %v475_v3  ;;  %v3933_v25 = vpop.f32.mrb[12].mxu0  ;;  %v3957_v18 = vpop.f32.mrb[12].mxu1  ;;  %v392_v3 = vmul.f32 %v3927_v33, %v4504_v56  ;;  %v394_v33 = vmul.f32 %v3930_v0, %v4550_v2  ;;  %v445_v2 = vsel %vm9561_vm4, %v393_v19, 0.0 }
  0xf9   :  { %v284_v61 = vpop.f32.mrb[13].mxu0  ;;  %v364_v43 = vpop.f32.mrb[13].mxu1  ;;  %v396_v0 = vmul.f32 %v3933_v25, %v4596_v15  ;;  %v9922_v25 = vld [vmem:[#allocation29_spill] sm:$0xff] }
  0xfa   :  { %v442_v56 = vsel %vm9561_vm4, %v392_v3, 0.0  ;;  %v395_v31 = vmul.f32 %v284_v61, %v4567_v8  ;;  %v9921_v8 = vld [vmem:[#allocation31_spill] sm:$0xff] }
  0xfc   :  { %437 = vadd.xlane.f32.xlu1 %v436_v39  ;;  %434 = vadd.xlane.f32.xlu0 %v433_v48  ;;  %v3936_v14 = vpop.f32.mrb[14].mxu0  ;;  %v3960_v36 = vpop.f32.mrb[14].mxu1  ;;  %v408_v39 = vmul.f32 %v3951_v30, %v4511_v57  ;;  %v407_v48 = vmul.f32 %v344_v35, %v4480_v52  ;;  %v410_v52 = vmul.f32 %v3954_v26, %v4557_v4  ;;  %v448_v30 = vsel %vm9561_vm4, %v394_v33, 0.0 }
  0xfd   :  { %v294_v24 = vpop.f32.mrb[15].mxu0  ;;  %v374_v28 = vpop.f32.mrb[15].mxu1  ;;  %v409_v57 = vmul.f32 %v354_v11, %v4526_v60  ;;  %v9917_v60 = vld [vmem:[#allocation27_spill] sm:$0xff]  ;;  %v9918_v11 = vld [vmem:[#allocation25_spill] sm:$0xff]  ;;  %v398_v15 = vmul.f32 %v3936_v14, %v9921_v8 }
  0xfe   :  { %v490_v5 = vsel %vm9561_vm4, %v408_v39, 0.0  ;;  %v487_v1 = vsel %vm9561_vm4, %v407_v48, 0.0  ;;  %v496_v3 = vsel %vm9561_vm4, %v410_v52, 0.0  ;;  %v412_v26 = vmul.f32 %v3957_v18, %v9917_v60  ;;  %v9926_v52 = vld [vmem:[#allocation30_spill] sm:$0xff] }
  0xff   :  { %v493_v4 = vsel %vm9561_vm4, %v409_v57, 0.0  ;;  %v411_v49 = vmul.f32 %v364_v43, %v9918_v11  ;;  %v454_v39 = vsel %vm9561_vm4, %v396_v0, 0.0  ;;  %v451_v48 = vsel %vm9561_vm4, %v395_v31, 0.0 }
 0x100   :  { %485 = vadd.xlane.f32.xlu1 %v484_v44  ;;  %482 = vadd.xlane.f32.xlu0 %v481_v55  ;;  %v5086_v44 = vpop.permute.xlu0 %1144  ;;  %v5088_v55 = vpop.permute.xlu1 %1147  ;;  %v397_v61 = vmul.f32 %v294_v24, %v9922_v25  ;;  %v502_v33 = vsel %vm9561_vm4, %v412_v26, 0.0  ;;  %v413_v57 = vmul.f32 %v374_v28, %v9926_v52  ;;  %v9933_v60 = vmov 0  }
 0x101   :  { %9913 = vst [vmem:[#allocation86_spill] sm:$0xff] %v5086_v44  ;;  %9914 = vst [vmem:[#allocation87_spill] sm:$0xff] %v5088_v55  ;;  %v499_v18 = vsel %vm9561_vm4, %v411_v49, 0.0  ;;  %v1480_v26 = vsel %vm9428_vm6, 1, %v9933_v60  ;;  %vm9480_vm6 = vcmp.eq.s32.totalorder %v4470_v50, 2  ;;  %v1484_v8 = vsel %vm9431_vm8, 1, %v9933_v60 }
 0x102   :  { %v457_v14 = vsel %vm9561_vm4, %v397_v61, 0.0  ;;  %v1481_v61 = vsel %vm9480_vm6, 1, %v9933_v60  ;;  %vm9435_vm8 = vcmp.eq.s32.totalorder %v4741_v38, 2  ;;  %v5344_v55 = vld [vmem:[%s9282_s2 + $0x68] sm:$0xff]  ;;  %vm9510_vm6 = vcmp.eq.s32.totalorder %v4715_v45, 3  ;;  %v5441_v45 = vld [vmem:[%s9282_s2 + $0xd8] sm:$0xff] }
 0x103   :  { %v1488_v52 = vsel %vm9435_vm8, 1, %v9933_v60  ;;  %9956 = vst [vmem:[#allocation116_spill] sm:$0xff] %v5344_v55  ;;  %v1875_v50 = vsel %vm9517_vm15, 1, %v9933_v60  ;;  %9964 = vst [vmem:[#allocation124_spill] sm:$0xff] %v5441_v45  ;;  %v5466_v38 = vld [vmem:[%s9282_s2 + $0xf8] sm:$0xff] }
 0x104   :  { %443 = vadd.xlane.f32.xlu1 %v442_v56  ;;  %440 = vadd.xlane.f32.xlu0 %v439_v51  ;;  %v5094_v59 = vpop.permute.xlu0 %1150  ;;  %v5096_v35 = vpop.permute.xlu1 %1153  ;;  %9966 = vst [vmem:[#allocation126_spill] sm:$0xff] %v5466_v38 }
 0x105   :  { %9915 = vst [vmem:[#allocation88_spill] sm:$0xff] %v5094_v59  ;;  %9916 = vst [vmem:[#allocation89_spill] sm:$0xff] %v5096_v35  ;;  %v5327_v35 = vld [vmem:[%s9282_s2 + $0x58] sm:$0xff] }
 0x106   :  { %9953 = vst [vmem:[#allocation113_spill] sm:$0xff] %v5327_v35 }
 0x108   :  { %491 = vadd.xlane.f32.xlu1 %v490_v5  ;;  %488 = vadd.xlane.f32.xlu0 %v487_v1  ;;  %v5106_v56 = vpop.permute.xlu0 %1156  ;;  %v5108_v51 = vpop.permute.xlu1 %1159  ;;  %v9925_v5 = vld [vmem:[#allocation32_spill] sm:$0xff] }
 0x109   :  { %9919 = vst [vmem:[#allocation27_spill] sm:$0xff] %v5106_v56  ;;  %9920 = vst [vmem:[#allocation25_spill] sm:$0xff] %v5108_v51  ;;  %v414_v1 = vmul.f32 %v3960_v36, %v9925_v5 }
 0x10b   :  { %v508_v24 = vsel %vm9561_vm4, %v414_v1, 0.0 }
 0x10c   :  { %449 = vadd.xlane.f32.xlu1 %v448_v30  ;;  %446 = vadd.xlane.f32.xlu0 %v445_v2  ;;  %v5114_v43 = vpop.permute.xlu0 %1162  ;;  %v5116_v19 = vpop.permute.xlu1 %1165  ;;  %v460_v30 = vsel %vm9561_vm4, %v398_v15, 0.0  ;;  %v505_v2 = vsel %vm9561_vm4, %v413_v57, 0.0  ;;  %v1485_v57 = vsel %vm9436_vm3, 1, %v9933_v60  ;;  %vm9440_vm3 = vcmp.eq.s32.totalorder %v4654_v53, 2 }
 0x10d   :  { %9923 = vst [vmem:[#allocation31_spill] sm:$0xff] %v5114_v43  ;;  %9924 = vst [vmem:[#allocation29_spill] sm:$0xff] %v5116_v19  ;;  %v5314_v43 = vld [vmem:[%s9282_s2 + $0x48] sm:$0xff] }
 0x10e   :  { %9952 = vst [vmem:[#allocation112_spill] sm:$0xff] %v5314_v43  ;;  %vm9572_vm4 = vcmp.eq.s32.totalorder %v5314_v43, 4 }
 0x110   :  { %497 = vadd.xlane.f32.xlu1 %v496_v3  ;;  %494 = vadd.xlane.f32.xlu0 %v493_v4  ;;  %v5124_v0 = vpop.permute.xlu0 %1168  ;;  %v5126_v31 = vpop.permute.xlu1 %1171 }
 0x111   :  { %9927 = vst [vmem:[#allocation32_spill] sm:$0xff] %v5124_v0  ;;  %9928 = vst [vmem:[#allocation30_spill] sm:$0xff] %v5126_v31  ;;  %v5291_v31 = vld [vmem:[%s9282_s2 + $0x50] sm:$0xff] }
 0x112   :  { %9948 = vst [vmem:[#allocation108_spill] sm:$0xff] %v5291_v31  ;;  %vm9562_vm5 = vcmp.eq.s32.totalorder %v5291_v31, 4 }
 0x114   :  { %455 = vadd.xlane.f32.xlu1 %v454_v39  ;;  %452 = vadd.xlane.f32.xlu0 %v451_v48  ;;  %v5128_v3 = vpop.permute.xlu0 %1174  ;;  %v5130_v36 = vpop.permute.xlu1 %1177  ;;  %v1482_v39 = vsel %vm9429_vm14, 1, %v9933_v60  ;;  %v1479_v48 = vsel %vm9430_vm10, 1, %v9933_v60  ;;  %vm9433_vm14 = vcmp.eq.s32.totalorder %v4728_v22, 2  ;;  %vm9434_vm10 = vcmp.eq.s32.totalorder %v4516_v58, 2 }
 0x115   :  { %9929 = vst [vmem:[#allocation90_spill] sm:$0xff] %v5128_v3  ;;  %9930 = vst [vmem:[#allocation91_spill] sm:$0xff] %v5130_v36  ;;  %v1878_v58 = vsel %vm9510_vm6, 1, %v9933_v60  ;;  %vm9533_vm6 = vcmp.eq.s32.totalorder %v5441_v45, 3 }
 0x118   :  { %503 = vadd.xlane.f32.xlu1 %v502_v33  ;;  %500 = vadd.xlane.f32.xlu0 %v499_v18  ;;  %v5132_v28 = vpop.permute.xlu0 %1180  ;;  %v5134_v4 = vpop.permute.xlu1 %1183  ;;  %v1486_v33 = vsel %vm9433_vm14, 1, %v9933_v60  ;;  %v1483_v18 = vsel %vm9434_vm10, 1, %v9933_v60  ;;  %vm9437_vm14 = vcmp.eq.s32.totalorder %v4754_v9, 2  ;;  %vm9438_vm10 = vcmp.eq.s32.totalorder %v4608_v21, 2 }
 0x119   :  { %9931 = vst [vmem:[#allocation92_spill] sm:$0xff] %v5132_v28  ;;  %9932 = vst [vmem:[#allocation93_spill] sm:$0xff] %v5134_v4 }
 0x11c   :  { %461 = vadd.xlane.f32.xlu1 %v460_v30  ;;  %458 = vadd.xlane.f32.xlu0 %v457_v14  ;;  %v5142_v11 = vpop.permute.xlu0 %1186  ;;  %v5144_v49 = vpop.permute.xlu1 %1189  ;;  %v1490_v30 = vsel %vm9437_vm14, 1, %v9933_v60 }
 0x11d   :  { %9934 = vst [vmem:[#allocation94_spill] sm:$0xff] %v5142_v11  ;;  %9935 = vst [vmem:[#allocation95_spill] sm:$0xff] %v5144_v49  ;;  %v5251_v49 = vld [vmem:[%s9282_s2 + $0x30] sm:$0xff]  ;;  %v5269_v11 = vld [vmem:[%s9282_s2 + $0x40] sm:$0xff] }
 0x11e   :  { %9942 = vst [vmem:[#allocation102_spill] sm:$0xff] %v5251_v49  ;;  %9944 = vst [vmem:[#allocation104_spill] sm:$0xff] %v5269_v11 }
 0x120   :  { %509 = vadd.xlane.f32.xlu1 %v508_v24  ;;  %506 = vadd.xlane.f32.xlu0 %v505_v2  ;;  %v5157_v15 = vpop.permute.xlu0 %1192  ;;  %v5159_v25 = vpop.permute.xlu1 %1493  ;;  %v1487_v2 = vsel %vm9438_vm10, 1, %v9933_v60  ;;  %vm9448_vm10 = vcmp.eq.s32.totalorder %v4676_v10, 2  ;;  %v5402_v10 = vld [vmem:[%s9282_s2 + $0xb8] sm:$0xff] }
 0x121   :  { %9936 = vst [vmem:[#allocation96_spill] sm:$0xff] %v5157_v15  ;;  %9962 = vst [vmem:[#allocation122_spill] sm:$0xff] %v5402_v10  ;;  %vm9516_vm11 = vcmp.eq.s32.totalorder %v5402_v10, 3  ;;  %vm2239_vm12 = vcmp.eq.s32.totalorder %v5402_v10, 4  ;;  %v10094_v10 = vld [vmem:[#allocation108_spill] sm:$0xff] }
 0x124   :  { %v5174_v5 = vpop.permute.xlu0 %1496  ;;  %v5176_v1 = vpop.permute.xlu1 %1499 }
 0x128   :  { %v5189_v14 = vpop.permute.xlu0 %1502  ;;  %v5191_v24 = vpop.permute.xlu1 %1505 }
 0x131   :  { %1553 = vperm.xlu1 %3977, %v1480_v26   ;;  %v5199_v26 = vld [vmem:[%s9282_s2] sm:$0xff] }
 0x132   :  { %9937 = vst [vmem:[#allocation97_spill] sm:$0xff] %v5199_v26  ;;  %vm9439_vm8 = vcmp.eq.s32.totalorder %v5199_v26, 3  ;;  %vm9569_vm15 = vcmp.eq.s32.totalorder %v5199_v26, 4 }
 0x135   :  { %1559 = vperm.xlu1 %3977, %v1482_v39   ;;  %v1854_v39 = vsel %vm9439_vm8, 1, %v9933_v60 }
 0x136   :  { %1550 = vperm.xlu0 %3976, %v1479_v48   ;;  %v1489_v48 = vsel %vm9440_vm3, 1, %v9933_v60 }
 0x139   :  { %1565 = vperm.xlu1 %3977, %v1484_v8   ;;  %v5212_v8 = vld [vmem:[%s9282_s2 + $0x10] sm:$0xff] }
 0x13a   :  { %1556 = vperm.xlu0 %3976, %v1481_v61   ;;  %9938 = vst [vmem:[#allocation98_spill] sm:$0xff] %v5212_v8  ;;  %vm9443_vm14 = vcmp.eq.s32.totalorder %v5212_v8, 3  ;;  %v5216_v61 = vpop.permute.xlu0 %1508 }
 0x13d   :  { %1571 = vperm.xlu1 %3977, %v1486_v33   ;;  %v5218_v33 = vpop.permute.xlu1 %1511 }
 0x13e   :  { %1562 = vperm.xlu0 %3976, %v1483_v18   ;;  %v1856_v18 = vsel %vm9443_vm14, 1, %v9933_v60  ;;  %vm9453_vm14 = vcmp.eq.s32.totalorder %v5251_v49, 3 }
 0x141   :  { %1577 = vperm.xlu1 %3977, %v1488_v52   ;;  %v1491_v52 = vsel %vm9448_vm10, 1, %v9933_v60 }
 0x142   :  { %1568 = vperm.xlu0 %3976, %v1485_v57   ;;  %v5229_v57 = vld [vmem:[%s9282_s2 + $0x20] sm:$0xff] }
 0x143   :  { %9939 = vst [vmem:[#allocation99_spill] sm:$0xff] %v5229_v57  ;;  %vm9444_vm8 = vcmp.eq.s32.totalorder %v5229_v57, 3 }
 0x145   :  { %1583 = vperm.xlu1 %3977, %v1490_v30   ;;  %v5235_v30 = vld [vmem:[%s9282_s2 + $0x8] sm:$0xff] }
 0x146   :  { %1574 = vperm.xlu0 %3976, %v1487_v2   ;;  %9940 = vst [vmem:[#allocation100_spill] sm:$0xff] %v5235_v30  ;;  %vm9447_vm3 = vcmp.eq.s32.totalorder %v5235_v30, 3  ;;  %v1858_v2 = vsel %vm9444_vm8, 1, %v9933_v60 }
 0x147   :  { %v1855_v15 = vsel %vm9447_vm3, 1, %v9933_v60  ;;  %vm9458_vm3 = vcmp.eq.s32.totalorder %v5269_v11, 3 }
 0x148   :  { %v1862_v28 = vsel %vm9458_vm3, 1, %v9933_v60  ;;  %vm9466_vm3 = vcmp.eq.s32.totalorder %v4543_v63, 3  ;;  %v5482_v63 = vsel %vm9569_vm15, 1, %v9933_v60  ;;  %vm2610_vm15 = vcmp.eq.s32.totalorder %v5199_v26, 5 }
 0x149   :  { %1887 = vperm.xlu1 %3977, %v1854_v39   ;;  %v5241_v39 = vpop.permute.xlu0 %1514 }
 0x14a   :  { %1580 = vperm.xlu0 %3976, %v1489_v48   ;;  %v5243_v48 = vpop.permute.xlu1 %1517 }
 0x14b   :  { %9941 = vst [vmem:[#allocation101_spill] sm:$0xff] %v5243_v48 }
 0x14d   :  { %1893 = vperm.xlu1 %3977, %v1856_v18   ;;  %v5257_v18 = vld [vmem:[%s9282_s2 + $0x18] sm:$0xff] }
 0x14e   :  { %1586 = vperm.xlu0 %3976, %v1491_v52   ;;  %9943 = vst [vmem:[#allocation103_spill] sm:$0xff] %v5257_v18  ;;  %vm9454_vm8 = vcmp.eq.s32.totalorder %v5257_v18, 3  ;;  %v1860_v52 = vsel %vm9453_vm14, 1, %v9933_v60  ;;  %v5280_v36 = vpop.permute.xlu1 %1523  ;;  %vm9461_vm14 = vcmp.eq.s32.totalorder %v5291_v31, 3 }
 0x14f   :  { %v1857_v4 = vsel %vm9454_vm8, 1, %v9933_v60  ;;  %9947 = vst [vmem:[#allocation107_spill] sm:$0xff] %v5280_v36 }
 0x151   :  { %1899 = vperm.xlu1 %3977, %v1858_v2   ;;  %v5275_v2 = vld [vmem:[%s9282_s2 + $0x28] sm:$0xff] }
 0x152   :  { %1890 = vperm.xlu0 %3976, %v1855_v15   ;;  %9945 = vst [vmem:[#allocation105_spill] sm:$0xff] %v5275_v2  ;;  %vm9460_vm10 = vcmp.eq.s32.totalorder %v5275_v2, 3  ;;  %v5278_v15 = vpop.permute.xlu0 %1520  ;;  %v5305_v19 = vpop.permute.xlu1 %1529 }
 0x153   :  { %9946 = vst [vmem:[#allocation106_spill] sm:$0xff] %v5278_v15  ;;  %v1859_v3 = vsel %vm9460_vm10, 1, %v9933_v60  ;;  %9951 = vst [vmem:[#allocation111_spill] sm:$0xff] %v5305_v19  ;;  %vm9468_vm10 = vcmp.eq.s32.totalorder %v5314_v43, 3 }
 0x155   :  { %1905 = vperm.xlu1 %3977, %v1860_v52   ;;  %v5297_v52 = vld [vmem:[%s9282_s2 + $0x38] sm:$0xff] }
 0x156   :  { %1896 = vperm.xlu0 %3976, %v1857_v4   ;;  %9949 = vst [vmem:[#allocation109_spill] sm:$0xff] %v5297_v52  ;;  %vm9463_vm8 = vcmp.eq.s32.totalorder %v5297_v52, 3  ;;  %v1864_v4 = vsel %vm9461_vm14, 1, %v9933_v60  ;;  %v5303_v0 = vpop.permute.xlu0 %1526  ;;  %vm9471_vm14 = vcmp.eq.s32.totalorder %v4589_v12, 3  ;;  %vm9567_vm1 = vcmp.eq.s32.totalorder %v5297_v52, 4 }
 0x157   :  { %9950 = vst [vmem:[#allocation110_spill] sm:$0xff] %v5303_v0  ;;  %v1861_v51 = vsel %vm9463_vm8, 1, %v9933_v60  ;;  %vm9473_vm8 = vcmp.eq.s32.totalorder %v5327_v35, 3 }
 0x158   :  { %v1865_v59 = vsel %vm9473_vm8, 1, %v9933_v60  ;;  %vm9479_vm8 = vcmp.eq.s32.totalorder %v5361_v17, 3 }
 0x159   :  { %1911 = vperm.xlu1 %3977, %v1862_v28   ;;  %v1863_v28 = vsel %vm9468_vm10, 1, %v9933_v60  ;;  %vm9476_vm10 = vcmp.eq.s32.totalorder %v5344_v55, 3 }
 0x15a   :  { %1902 = vperm.xlu0 %3976, %v1859_v3   ;;  %v1866_v3 = vsel %vm9466_vm3, 1, %v9933_v60  ;;  %v5330_v56 = vpop.permute.xlu0 %1532  ;;  %vm9474_vm3 = vcmp.eq.s32.totalorder %v4649_v46, 3  ;;  %v1867_v23 = vsel %vm9476_vm10, 1, %v9933_v60  ;;  %vm9536_vm10 = vcmp.eq.s32.totalorder %v5374_v41, 3  ;;  %v5457_v46 = vld [vmem:[%s9282_s2 + $0xe8] sm:$0xff] }
 0x15b   :  { %9954 = vst [vmem:[#allocation114_spill] sm:$0xff] %v5330_v56  ;;  %v1871_v53 = vsel %vm9536_vm10, 1, %v9933_v60  ;;  %9965 = vst [vmem:[#allocation125_spill] sm:$0xff] %v5457_v46  ;;  %vm9553_vm10 = vcmp.eq.s32.totalorder %v5269_v11, 4  ;;  %v5564_v11 = vld [vmem:[%s9282_s2 + $0xb0] sm:$0xff] }
 0x15c   :  { %v5547_v6 = vsel %vm9553_vm10, 1, %v9933_v60  ;;  %vm9590_vm10 = vcmp.eq.s32.totalorder %v5564_v11, 4 }
 0x15d   :  { %1917 = vperm.xlu1 %3977, %v1864_v4   ;;  %v1868_v4 = vsel %vm9471_vm14, 1, %v9933_v60  ;;  %vm9478_vm14 = vcmp.eq.s32.totalorder %v4671_v62, 3  ;;  %v5435_v62 = vsel %vm9516_vm11, 1, %v9933_v60  ;;  %vm9573_vm11 = vcmp.eq.s32.totalorder %v5235_v30, 4 }
 0x15e   :  { %1908 = vperm.xlu0 %3976, %v1861_v51   ;;  %v5332_v51 = vpop.permute.xlu1 %1535 }
 0x15f   :  { %9955 = vst [vmem:[#allocation115_spill] sm:$0xff] %v5332_v51 }
 0x161   :  { %1923 = vperm.xlu1 %3977, %v1866_v3   ;;  %v1870_v3 = vsel %vm9474_vm3, 1, %v9933_v60  ;;  %vm9490_vm3 = vcmp.eq.s32.totalorder %v4689_v37, 3 }
 0x162   :  { %1914 = vperm.xlu0 %3976, %v1863_v28   ;;  %v5350_v28 = vpop.permute.xlu0 %1538  ;;  %v5352_v44 = vpop.permute.xlu1 %1541 }
 0x163   :  { %9957 = vst [vmem:[#allocation117_spill] sm:$0xff] %v5350_v28 }
 0x165   :  { %1929 = vperm.xlu1 %3977, %v1868_v4   ;;  %v1869_v4 = vsel %vm9479_vm8, 1, %v9933_v60 }
 0x166   :  { %1920 = vperm.xlu0 %3976, %v1865_v59   ;;  %v1872_v59 = vsel %vm9478_vm14, 1, %v9933_v60  ;;  %v5377_v54 = vpop.permute.xlu0 %1544  ;;  %vm9507_vm14 = vcmp.eq.s32.totalorder %v4702_v29, 3  ;;  %v5430_v29 = vsel %vm9515_vm13, 1, %v9933_v60  ;;  %vm9537_vm13 = vcmp.eq.s32.totalorder %v5457_v46, 3 }
 0x167   :  { %v1876_v21 = vsel %vm9507_vm14, 1, %v9933_v60  ;;  %vm9532_vm14 = vcmp.eq.s32.totalorder %v4754_v9, 3  ;;  %v5488_v9 = vsel %vm9537_vm13, 1, %v9933_v60 }
 0x168   :  { %v5472_v12 = vsel %vm9532_vm14, 1, %v9933_v60  ;;  %vm9550_vm14 = vcmp.eq.s32.totalorder %v5251_v49, 4  ;;  %v5582_v49 = vld [vmem:[%s9282_s2 + $0x70] sm:$0xff] }
 0x169   :  { %1935 = vperm.xlu1 %3977, %v1870_v3   ;;  %v5385_v3 = vld [vmem:[%s9282_s2 + $0x98] sm:$0xff]  ;;  %v5529_v13 = vsel %vm9550_vm14, 1, %v9933_v60  ;;  %9970 = vst [vmem:[#allocation130_spill] sm:$0xff] %v5582_v49 }
 0x16a   :  { %1926 = vperm.xlu0 %3976, %v1867_v23   ;;  %v5379_v23 = vpop.permute.xlu1 %1547  ;;  %9960 = vst [vmem:[#allocation120_spill] sm:$0xff] %v5385_v3  ;;  %vm9526_vm8 = vcmp.eq.s32.totalorder %v5385_v3, 3 }
 0x16b   :  { %v1873_v7 = vsel %vm9526_vm8, 1, %v9933_v60  ;;  %vm9554_vm8 = vcmp.eq.s32.totalorder %v5229_v57, 4 }
 0x16d   :  { %1941 = vperm.xlu1 %3977, %v1872_v59   ;;  %v1874_v59 = vsel %vm9490_vm3, 1, %v9933_v60 }
 0x16e   :  { %1932 = vperm.xlu0 %3976, %v1869_v4   ;;  %v5412_v4 = vld [vmem:[%s9282_s2 + $0xc8] sm:$0xff] }
 0x16f   :  { %9963 = vst [vmem:[#allocation123_spill] sm:$0xff] %v5412_v4  ;;  %vm9521_vm3 = vcmp.eq.s32.totalorder %v5412_v4, 3 }
 0x170   :  { %v5452_v22 = vsel %vm9521_vm3, 1, %v9933_v60  ;;  %vm9540_vm3 = vcmp.eq.s32.totalorder %v5466_v38, 3  ;;  %v5523_v38 = vsel %vm9573_vm11, 1, %v9933_v60  ;;  %vm9611_vm11 = vcmp.eq.s32.totalorder %v5457_v46, 4 }
 0x171   :  { %v468_v37 = vpop.xlane.xlu1 %467  ;;  %v420_v42 = vpop.xlane.xlu0 %419  ;;  %1947 = vperm.xlu1 %3977, %v1874_v59   ;;  %v5447_v59 = vsel %vm9518_vm9, 1, %v9933_v60  ;;  %vm9559_vm9 = vcmp.eq.s32.totalorder %v5212_v8, 4  ;;  %v5774_v41 = vsel %vm9611_vm11, 1, %v9933_v60  ;;  %vm10011_vm11 = vcmp.eq.s32.totalorder %v4967_v47, 1 }
 0x172   :  { %1938 = vperm.xlu0 %3976, %v1871_v53   ;;  %v545_v53 = vmul.f32 1.442695, %v468_v37  ;;  %v5477_v37 = vsel %vm9533_vm6, 1, %v9933_v60  ;;  %v513_v51 = vmul.f32 1.442695, %v420_v42  ;;  %vm9555_vm6 = vcmp.eq.s32.totalorder %v5257_v18, 4 }
 0x173   :  { %v5495_v0 = vsel %vm9559_vm9, 1, %v9933_v60  ;;  %v5500_v42 = vsel %vm9540_vm3, 1, %v9933_v60  ;;  %vm9558_vm3 = vcmp.eq.s32.totalorder %v5275_v2, 4  ;;  %vm9583_vm9 = vcmp.eq.s32.totalorder %v5327_v35, 4  ;;  %10001 = vst [vmem:[#allocation160_spill] sm:$0xff] %v5774_v41 }
 0x174   :  { %3978 = vpow2.f32 %v545_v53  ;;  %v5535_v53 = vld [vmem:[%s9282_s2 + $0xa0] sm:$0xff] }
 0x175   :  { %v417_v28 = vpop.xlane.xlu0 %416  ;;  %v426_v56 = vpop.xlane.xlu1 %425  ;;  %1953 = vperm.xlu1 %3977, %v1876_v21   ;;  %v5506_v21 = vld [vmem:[%s9282_s2 + $0x80] sm:$0xff]  ;;  %vm9589_vm2 = vcmp.eq.s32.totalorder %v5535_v53, 4  ;;  %3980 = vpow2.f32 %v513_v51  ;;  %v5553_v51 = vsel %vm9558_vm3, 1, %v9933_v60  ;;  %vm9575_vm3 = vcmp.eq.s32.totalorder %v5582_v49, 4 }
 0x176   :  { %v511_v19 = vmul.f32 1.442695, %v417_v28  ;;  %1944 = vperm.xlu0 %3976, %v1873_v7   ;;  %vm9588_vm13 = vcmp.eq.s32.totalorder %v5506_v21, 4  ;;  %v5512_v7 = vld [vmem:[%s9282_s2 + $0x90] sm:$0xff]  ;;  %v5518_v28 = vsel %vm9554_vm8, 1, %v9933_v60  ;;  %vm2235_vm8 = vcmp.eq.s32.totalorder %v5385_v3, 4 }
 0x177   :  { %vm9587_vm7 = vcmp.eq.s32.totalorder %v5512_v7, 4  ;;  %v517_v20 = vmul.f32 1.442695, %v426_v56  ;;  %v5542_v56 = vsel %vm9555_vm6, 1, %v9933_v60  ;;  %vm2237_vm6 = vcmp.eq.s32.totalorder %v5392_v32, 4  ;;  %v10069_v32 = vld [vmem:[#allocation107_spill] sm:$0xff] }
 0x178   :  { %3982 = vpow2.f32 %v511_v19  ;;  %v5577_v19 = vsel %vm9567_vm1, 1, %v9933_v60  ;;  %vm9586_vm1 = vcmp.eq.s32.totalorder %v5361_v17, 4  ;;  %v5633_v49 = vsel %vm9587_vm7, 1, %v9933_v60 }
 0x179   :  { %v465_v36 = vpop.xlane.xlu0 %464  ;;  %v474_v15 = vpop.xlane.xlu1 %473  ;;  %1959 = vperm.xlu1 %3977, %v1878_v58   ;;  %v5558_v58 = vld [vmem:[%s9282_s2 + $0x60] sm:$0xff]  ;;  %9969 = vst [vmem:[#allocation129_spill] sm:$0xff] %v5577_v19  ;;  %3984 = vpow2.f32 %v517_v20  ;;  %v5597_v19 = vsel %vm9572_vm4, 1, %v9933_v60  ;;  %vm1605_vm4 = vcmp.eq.s32.totalorder %v5377_v54, 1  ;;  %9976 = vst [vmem:[#allocation136_spill] sm:$0xff] %v5633_v49  ;;  %v5639_v43 = vsel %vm9586_vm1, 1, %v9933_v60 }
 0x17a   :  { %1950 = vperm.xlu0 %3976, %v1875_v50   ;;  %9967 = vst [vmem:[#allocation127_spill] sm:$0xff] %v5558_v58  ;;  %vm9571_vm14 = vcmp.eq.s32.totalorder %v5558_v58, 4  ;;  %v5572_v50 = vsel %vm9562_vm5, 1, %v9933_v60  ;;  %v543_v48 = vmul.f32 1.442695, %v465_v36  ;;  %vm9582_vm5 = vcmp.eq.s32.totalorder %v5344_v55, 4 }
 0x17b   :  { %9968 = vst [vmem:[#allocation128_spill] sm:$0xff] %v5572_v50  ;;  %v5592_v52 = vsel %vm9571_vm14, 1, %v9933_v60  ;;  %v5611_v36 = vsel %vm9583_vm9, 1, %v9933_v60  ;;  %v5616_v58 = vld [vmem:[%s9282_s2 + $0xc0] sm:$0xff]  ;;  %v549_v35 = vmul.f32 1.442695, %v474_v15 }
 0x17c   :  { %9972 = vst [vmem:[#allocation132_spill] sm:$0xff] %v5611_v36  ;;  %9973 = vst [vmem:[#allocation133_spill] sm:$0xff] %v5616_v58  ;;  %vm9591_vm14 = vcmp.eq.s32.totalorder %v5616_v58, 4  ;;  %3986 = vpow2.f32 %v543_v48  ;;  %v5644_v55 = vld [vmem:[%s9282_s2 + $0xd0] sm:$0xff]  ;;  %vm2612_vm9 = vcmp.eq.s32.totalorder %v5212_v8, 5  ;;  %v5654_v15 = vsel %vm9589_vm2, 1, %v9933_v60 }
 0x17d   :  { %v471_v31 = vpop.xlane.xlu0 %470  ;;  %v423_v50 = vpop.xlane.xlu1 %422  ;;  %1965 = vperm.xlu1 %3977, %v5430_v29   ;;  %v5606_v29 = vsel %vm9575_vm3, 1, %v9933_v60  ;;  %vm9616_vm3 = vcmp.eq.s32.totalorder %v5412_v4, 4  ;;  %9977 = vst [vmem:[#allocation137_spill] sm:$0xff] %v5639_v43  ;;  %9979 = vst [vmem:[#allocation139_spill] sm:$0xff] %v5654_v15  ;;  %v5659_v17 = vsel %vm2233_vm0, 1, %v9933_v60  ;;  %vm9612_vm1 = vcmp.eq.s32.totalorder %v5441_v45, 4 }
 0x17e   :  { %v515_v20 = vmul.f32 1.442695, %v423_v50  ;;  %1956 = vperm.xlu0 %3976, %v5435_v62   ;;  %9971 = vst [vmem:[#allocation131_spill] sm:$0xff] %v5606_v29  ;;  %v5623_v62 = vsel %vm9588_vm13, 1, %v9933_v60  ;;  %v5628_v50 = vsel %vm9582_vm5, 1, %v9933_v60  ;;  %vm9593_vm5 = vcmp.eq.s32.totalorder %v5644_v55, 4 }
 0x17f   :  { %9974 = vst [vmem:[#allocation134_spill] sm:$0xff] %v5623_v62  ;;  %9975 = vst [vmem:[#allocation135_spill] sm:$0xff] %v5628_v50  ;;  %v5648_v50 = vpop.eup %3978  ;;  %vm1588_vm13 = vcmp.eq.s32.totalorder %v5159_v25, 1  ;;  %v5673_v15 = vld [vmem:[%s9282_s2 + $0xe0] sm:$0xff]  ;;  %vm1589_vm7 = vcmp.eq.s32.totalorder %v5174_v5, 1  ;;  %v5693_v43 = vsel %vm2237_vm6, 1, %v9933_v60 }
 0x180   :  { %9978 = vst [vmem:[#allocation138_spill] sm:$0xff] %v5648_v50  ;;  %3988 = vpow2.f32 %v515_v20  ;;  %9980 = vst [vmem:[#allocation140_spill] sm:$0xff] %v5659_v17  ;;  %vm9594_vm2 = vcmp.eq.s32.totalorder %v5673_v15, 4  ;;  %v5677_v17 = vpop.eup %3980  ;;  %v5729_v29 = vsel %vm9616_vm3, 1, %v9933_v60  ;;  %v4077_v54 = vld [vmem:[%s9280_s0 + $0x18] sm:$0xff] }
 0x181   :  { %v432_v49 = vpop.xlane.xlu1 %431  ;;  %v429_v48 = vpop.xlane.xlu0 %428  ;;  %1971 = vperm.xlu1 %3977, %v5447_v59   ;;  %v5668_v59 = vsel %vm9590_vm10, 1, %v9933_v60  ;;  %9982 = vst [vmem:[#allocation142_spill] sm:$0xff] %v5673_v15  ;;  %9983 = vst [vmem:[#allocation143_spill] sm:$0xff] %v5677_v17  ;;  %vm1591_vm10 = vcmp.eq.s32.totalorder %v5189_v14, 1  ;;  %3990 = vpow2.f32 %v549_v35  ;;  %v5714_v35 = vsel %vm9593_vm5, 1, %v9933_v60 }
 0x182   :  { %v519_v20 = vmul.f32 1.442695, %v429_v48  ;;  %1962 = vperm.xlu0 %3976, %v5452_v22   ;;  %9981 = vst [vmem:[#allocation141_spill] sm:$0xff] %v5668_v59  ;;  %v547_v48 = vmul.f32 1.442695, %v471_v31  ;;  %v5683_v22 = vsel %vm2235_vm8, 1, %v9933_v60  ;;  %v5695_v62 = vpop.eup %3982 }
 0x183   :  { %9984 = vst [vmem:[#allocation144_spill] sm:$0xff] %v5683_v22  ;;  %v5688_v59 = vsel %vm9591_vm14, 1, %v9933_v60  ;;  %9986 = vst [vmem:[#allocation146_spill] sm:$0xff] %v5693_v43  ;;  %v521_v31 = vmul.f32 1.442695, %v432_v49  ;;  %v4073_v22 = vld [vmem:[%s9280_s0 + $0x88] sm:$0xff] }
 0x184   :  { %9985 = vst [vmem:[#allocation145_spill] sm:$0xff] %v5688_v59  ;;  %9987 = vst [vmem:[#allocation147_spill] sm:$0xff] %v5695_v62  ;;  %v5702_v36 = vmul.f32 %v4073_v22, %v5648_v50  ;;  %v5707_v59 = vld [vmem:[%s9282_s2 + $0xf0] sm:$0xff]  ;;  %v5719_v49 = vsel %vm2239_vm12, 1, %v9933_v60  ;;  %v5724_v22 = vsel %vm9594_vm2, 1, %v9933_v60  ;;  %vm1590_vm5 = vcmp.eq.s32.totalorder %v5176_v1, 1 }
 0x185   :  { %9989 = vst [vmem:[#allocation149_spill] sm:$0xff] %v5707_v59  ;;  %vm9603_vm14 = vcmp.eq.s32.totalorder %v5707_v59, 4  ;;  %v480_v43 = vpop.xlane.xlu1 %479  ;;  %v477_v58 = vpop.xlane.xlu0 %476  ;;  %1977 = vperm.xlu1 %3977, %v5472_v12   ;;  %9990 = vst [vmem:[#allocation150_spill] sm:$0xff] %v5714_v35  ;;  %3992 = vpow2.f32 %v519_v20  ;;  %vm9998_vm2 = vcmp.eq.s32.totalorder %v5235_v30, 4  ;;  %v2526_v20 = vsel %vm2233_vm0, %v5648_v50, 0.0  ;;  %v4075_v59 = vld [vmem:[%s9280_s0] sm:$0xff] }
 0x186   :  { %9988 = vst [vmem:[#allocation148_spill] sm:$0xff] %v5702_v36  ;;  %9991 = vst [vmem:[#allocation151_spill] sm:$0xff] %v5719_v49  ;;  %v5731_v12 = vpop.eup %3984  ;;  %1968 = vperm.xlu0 %3976, %v5477_v37   ;;  %v5738_v49 = vsel %vm9603_vm14, 1, %v9933_v60  ;;  %3994 = vpow2.f32 %v547_v48  ;;  %v2510_v37 = vsel %vm9998_vm2, %v5677_v17, 0.0  ;;  %v4076_v48 = vld [vmem:[%s9280_s0 + $0x8] sm:$0xff]  ;;  %v1637_v30 = vsel %vm1605_vm4, %v5702_v36, 0.0 }
 0x187   :  { %9992 = vst [vmem:[#allocation152_spill] sm:$0xff] %v5724_v22  ;;  %9993 = vst [vmem:[#allocation153_spill] sm:$0xff] %v5729_v29  ;;  %v5743_v22 = vsel %vm9612_vm1, 1, %v9933_v60  ;;  %v5748_v29 = vsel %vm2610_vm15, 1, %v9933_v60  ;;  %3996 = vpow2.f32 %v521_v31  ;;  %vm1604_vm0 = vcmp.eq.s32.totalorder %v5352_v44, 1  ;;  %v5797_v46 = vpop.eup %3986 }
 0x188   :  { %9994 = vst [vmem:[#allocation154_spill] sm:$0xff] %v5731_v12  ;;  %9995 = vst [vmem:[#allocation155_spill] sm:$0xff] %v5738_v49  ;;  %vm10002_vm2 = vcmp.eq.s32.totalorder %v5199_v26, 4  ;;  %vm10004_vm4 = vcmp.eq.s32.totalorder %v4378_v34, 0  ;;  %v553_v47 = vmul.f32 1.442695, %v480_v43 }
 0x189   :  { %9996 = vst [vmem:[#allocation156_spill] sm:$0xff] %v5743_v22  ;;  %9997 = vst [vmem:[#allocation157_spill] sm:$0xff] %v5748_v29  ;;  %v5760_v22 = vmul.f32 %v4075_v59, %v5695_v62  ;;  %v5766_v29 = vmul.f32 %v4076_v48, %v5677_v17  ;;  %v438_v59 = vpop.xlane.xlu1 %437  ;;  %v435_v31 = vpop.xlane.xlu0 %434  ;;  %v2509_v49 = vsel %vm10002_vm2, %v5695_v62, 0.0  ;;  %2281 = vperm.xlu1 %3977, %v5482_v63   ;;  %v5790_v17 = vsel %vm2612_vm9, 1, %v9933_v60 }
 0x18a   :  { %v5785_v48 = vmul.f32 %v4077_v54, %v5731_v12  ;;  %v5795_v41 = vsel %vm10004_vm4, %v5648_v50, 0.0  ;;  %10006 = vst [vmem:[#allocation163_spill] sm:$0xff] %v5797_v46  ;;  %v551_v63 = vmul.f32 1.442695, %v477_v58  ;;  %v523_v15 = vmul.f32 1.442695, %v435_v31  ;;  %1974 = vperm.xlu0 %3976, %v5488_v9   ;;  %v5804_v45 = vpop.eup %3988 }
 0x18b   :  { %9999 = vst [vmem:[#allocation158_spill] sm:$0xff] %v5760_v22  ;;  %10000 = vst [vmem:[#allocation159_spill] sm:$0xff] %v5766_v29  ;;  %vm10007_vm2 = vcmask 7168   ;;  %v525_v60 = vmul.f32 1.442695, %v438_v59  ;;  %v1620_v34 = vsel %vm1588_vm13, %v5760_v22, 0.0 }
 0x18c   :  { %10003 = vst [vmem:[#allocation161_spill] sm:$0xff] %v5785_v48  ;;  %10005 = vst [vmem:[#allocation162_spill] sm:$0xff] %v5795_v41  ;;  %v2542_v35 = vsel %vm10007_vm2, %v2510_v37, 0.0  ;;  %vm10010_vm4 = vcmask 261120   ;;  %v5815_v58 = vsel %vm10011_vm11, %v5702_v36, 0.0  ;;  %vm799_vm11 = vcmp.eq.s32.totalorder %v4896_v27, 1  ;;  %v5838_v36 = vpop.eup %3990 }
 0x18d   :  { %vm10008_vm14 = vmmov %vm10007_vm2  ;;  %10009 = vst [vmem:[#allocation164_spill] sm:$0xff] %v5804_v45  ;;  %v5810_v50 = vsel %vm10010_vm4, %v1637_v30, 0.0  ;;  %v1621_v30 = vsel %vm1589_vm7, %v5766_v29, 0.0  ;;  %3998 = vpow2.f32 %v523_v15  ;;  %v483_v59 = vpop.xlane.xlu0 %482  ;;  %2287 = vperm.xlu1 %3977, %v5495_v0   ;;  %vm800_vm7 = vcmp.eq.s32.totalorder %v4884_v16, 1  ;;  %v4079_v0 = vld [vmem:[%s9280_s0 + $0x80] sm:$0xff] }
 0x18e   :  { %v5802_v54 = vsel %vm10008_vm14, %v2526_v20, 0.0  ;;  %10012 = vst [vmem:[#allocation165_spill] sm:$0xff] %v5815_v58  ;;  %vm10013_vm1 = vmmov %vm10007_vm2  ;;  %vm10014_vm14 = vcmp.eq.s32.totalorder %v5212_v8, 4  ;;  %v4078_v20 = vld [vmem:[%s9280_s0 + $0x10] sm:$0xff]  ;;  %vm1592_vm13 = vcmp.eq.s32.totalorder %v5191_v24, 1  ;;  %4000 = vpow2.f32 %v551_v63  ;;  %1980 = vperm.xlu0 %3976, %v5500_v42  }
 0x18f   :  { %v2541_v9 = vsel %vm10013_vm1, %v2509_v49, 0.0  ;;  %v2511_v37 = vsel %vm10014_vm14, %v5804_v45, 0.0  ;;  %v5825_v25 = vmul.f32 %v4078_v20, %v5804_v45  ;;  %v486_v49 = vpop.xlane.xlu1 %485  ;;  %vm10016_vm1 = vcmp.eq.s32.totalorder %v5257_v18, 4  ;;  %10017 = vst [vmem:[#allocation167_spill] sm:$0xff] %v5838_v36  ;;  %v5861_v63 = vpop.eup %3992 }
 0x190   :  { %v2512_v31 = vsel %vm10016_vm1, %v5731_v12, 0.0  ;;  %v1623_v20 = vsel %vm1591_vm10, %v5785_v48, 0.0  ;;  %vm10018_vm2 = vcmp.eq.s32.totalorder %v5506_v21, 4  ;;  %v5850_v5 = vmul.f32 %v4079_v0, %v5797_v46  ;;  %vm10020_vm10 = vmmov %vm10010_vm4  ;;  %10022 = vst [vmem:[#allocation169_spill] sm:$0xff] %v5861_v63  ;;  %v4081_v12 = vld [vmem:[%s9280_s0 + $0x20] sm:$0xff] }
 0x191   :  { %10015 = vst [vmem:[#allocation166_spill] sm:$0xff] %v5825_v25  ;;  %v2525_v43 = vsel %vm10018_vm2, %v5797_v46, 0.0  ;;  %v1652_v14 = vsel %vm10020_vm10, %v1620_v34, 0.0  ;;  %vm1606_vm4 = vcmp.eq.s32.totalorder %v5379_v23, 1  ;;  %4002 = vpow2.f32 %v525_v60  ;;  %vm10024_vm3 = vmmov %vm10020_vm10  ;;  %v441_v41 = vpop.xlane.xlu0 %440  ;;  %2293 = vperm.xlu1 %3977, %v5518_v28  }
 0x192   :  { %10019 = vst [vmem:[#allocation168_spill] sm:$0xff] %v5850_v5  ;;  %vm10021_vm14 = vcmask 7168   ;;  %v1622_v42 = vsel %vm1590_vm5, %v5825_v25, 0.0  ;;  %v2903_v21 = vsel %vm2610_vm15, %v5695_v62, 0.0  ;;  %vm1593_vm1 = vcmp.eq.s32.totalorder %v5216_v61, 1  ;;  %2284 = vperm.xlu0 %3976, %v5523_v38  }
 0x193   :  { %v2544_v15 = vsel %vm10021_vm14, %v2511_v37, 0.0  ;;  %v2543_v0 = vadd.f32 %v2542_v35, %v2541_v9  ;;  %vm10023_vm2 = vmmov %vm10021_vm14  ;;  %v1653_v18 = vsel %vm10020_vm10, %v1621_v30, 0.0  ;;  %v1657_v60 = vsel %vm10024_vm3, %v1623_v20, 0.0  ;;  %v5867_v37 = vpop.eup %3994  ;;  %v444_v1 = vpop.xlane.xlu1 %443  ;;  %v4080_v35 = vld [vmem:[%s9280_s0 + $0x98] sm:$0xff] }
 0x194   :  { %v2546_v34 = vsel %vm10023_vm2, %v2512_v31, 0.0  ;;  %10025 = vst [vmem:[#allocation170_spill] sm:$0xff] %v5867_v37  ;;  %4004 = vpow2.f32 %v553_v47  ;;  %vm10026_vm5 = vmmov %vm10023_vm2  ;;  %v5877_v9 = vmul.f32 %v4080_v35, %v5838_v36  ;;  %v1654_v30 = vadd.f32 %v1653_v18, %v1652_v14  ;;  %v5879_v31 = vpop.eup %3996 }
 0x195   :  { %v5871_v26 = vsel %vm10026_vm5, %v2525_v43, 0.0  ;;  %10028 = vst [vmem:[#allocation172_spill] sm:$0xff] %v5879_v31  ;;  %v527_v20 = vmul.f32 1.442695, %v441_v41  ;;  %v2545_v47 = vadd.f32 %v2544_v15, %v2543_v0  ;;  %v1636_v28 = vsel %vm1604_vm0, %v5850_v5, 0.0  ;;  %vm10030_vm15 = vmmov %vm10023_vm2  ;;  %2299 = vperm.xlu1 %3977, %v5529_v13   ;;  %v4083_v0 = vld [vmem:[%s9280_s0 + $0x28] sm:$0xff] }
 0x196   :  { %10027 = vst [vmem:[#allocation171_spill] sm:$0xff] %v5877_v9  ;;  %v1655_v43 = vsel %vm10024_vm3, %v1622_v42, 0.0  ;;  %v555_v46 = vmul.f32 1.442695, %v483_v59  ;;  %v5890_v35 = vmul.f32 %v4081_v12, %v5861_v63  ;;  %v2528_v41 = vsel %vm2235_vm8, %v5838_v36, 0.0  ;;  %v4082_v12 = vld [vmem:[%s9280_s0 + $0x90] sm:$0xff]  ;;  %2290 = vperm.xlu0 %3976, %v5542_v56   ;;  %vm10036_vm8 = vmmov %vm10024_vm3 }
 0x197   :  { %v5896_v38 = vsel %vm10030_vm15, %v2903_v21, 0.0  ;;  %vm1594_vm14 = vcmp.eq.s32.totalorder %v5218_v33, 1  ;;  %v529_v44 = vmul.f32 1.442695, %v444_v1  ;;  %vm10032_vm0 = vcmp.eq.s32.totalorder %v5229_v57, 4  ;;  %v492_v42 = vpop.xlane.xlu1 %491  ;;  %v489_v21 = vpop.xlane.xlu0 %488  ;;  %vm10037_vm10 = vmmov %vm10026_vm5  ;;  %v10047_v57 = vld [vmem:[#allocation101_spill] sm:$0xff] }
 0x198   :  { %10029 = vst [vmem:[#allocation173_spill] sm:$0xff] %v5890_v35  ;;  %10031 = vst [vmem:[#allocation174_spill] sm:$0xff] %v5896_v38  ;;  %v2513_v18 = vsel %vm10032_vm0, %v5861_v63, 0.0  ;;  %vm10033_vm2 = vcmp.eq.s32.totalorder %v5512_v7, 4  ;;  %v5909_v14 = vmul.f32 %v4082_v12, %v5867_v37  ;;  %v557_v15 = vmul.f32 1.442695, %v486_v49 }
 0x199   :  { %v2527_v59 = vsel %vm10033_vm2, %v5867_v37, 0.0  ;;  %4006 = vpow2.f32 %v527_v20  ;;  %v5916_v7 = vmul.f32 %v4083_v0, %v5879_v31  ;;  %v1656_v1 = vadd.f32 %v1655_v43, %v1654_v30  ;;  %v5930_v20 = vpop.eup %3998  ;;  %vm10039_vm3 = vmmov %vm10037_vm10  ;;  %2305 = vperm.xlu1 %3977, %v5547_v6   ;;  %v10073_v37 = vld [vmem:[#allocation45_spill] sm:$0xff] }
 0x19a   :  { %10034 = vst [vmem:[#allocation175_spill] sm:$0xff] %v5909_v14  ;;  %v2547_v3 = vadd.f32 %v2546_v34, %v2545_v47  ;;  %v5920_v12 = vsel %vm10036_vm8, %v1636_v28, 0.0  ;;  %v5923_v49 = vsel %vm10037_vm10, %v2528_v41, 0.0  ;;  %v5928_v13 = vsel %vm799_vm11, %v5760_v22, 0.0  ;;  %10038 = vst [vmem:[#allocation177_spill] sm:$0xff] %v5930_v20  ;;  %v5942_v47 = vpop.eup %4000  ;;  %v4084_v41 = vld [vmem:[%s9280_s0 + $0x30] sm:$0xff]  ;;  %2296 = vperm.xlu0 %3976, %v5553_v51  }
 0x19b   :  { %10035 = vst [vmem:[#allocation176_spill] sm:$0xff] %v5916_v7  ;;  %vm1595_vm5 = vcmp.eq.s32.totalorder %v5241_v39, 1  ;;  %4008 = vpow2.f32 %v555_v46  ;;  %v2548_v34 = vsel %vm10039_vm3, %v2513_v18, 0.0  ;;  %v1624_v56 = vsel %vm1592_vm13, %v5890_v35, 0.0  ;;  %10040 = vst [vmem:[#allocation178_spill] sm:$0xff] %v5942_v47  ;;  %v5953_v28 = vpop.eup %4002  ;;  %v450_v16 = vpop.xlane.xlu1 %449  ;;  %v10122_v22 = vld [vmem:[#allocation137_spill] sm:$0xff] }
 0x19c   :  { %v5940_v30 = vsel %vm800_vm7, %v5766_v29, 0.0  ;;  %4010 = vpow2.f32 %v529_v44  ;;  %vm10041_vm11 = vcmp.eq.s32.totalorder %v5275_v2, 4  ;;  %vm10042_vm15 = vmmov %vm10039_vm3  ;;  %v1638_v24 = vsel %vm1606_vm4, %v5909_v14, 0.0  ;;  %10043 = vst [vmem:[#allocation179_spill] sm:$0xff] %v5953_v28  ;;  %v447_v43 = vpop.xlane.xlu0 %446  ;;  %v10056_v29 = vld [vmem:[#allocation129_spill] sm:$0xff] }
 0x19d   :  { %v2514_v27 = vsel %vm10041_vm11, %v5879_v31, 0.0  ;;  %v5948_v46 = vsel %vm10042_vm15, %v2527_v59, 0.0  ;;  %4012 = vpow2.f32 %v557_v15  ;;  %v5960_v44 = vmul.f32 %v4084_v41, %v5930_v20  ;;  %vm10045_vm13 = vmmov %vm10036_vm8 }
 0x19e   :  { %v1625_v18 = vsel %vm1593_vm1, %v5916_v7, 0.0  ;;  %v1658_v23 = vadd.f32 %v1657_v60, %v1656_v1  ;;  %vm801_vm7 = vcmp.eq.s32.totalorder %v4894_v40, 1  ;;  %v559_v59 = vmul.f32 1.442695, %v489_v21  ;;  %v5968_v2 = vpop.eup %4004  ;;  %vm10048_vm0 = vmmov %vm10039_vm3  ;;  %v4085_v1 = vld [vmem:[%s9280_s0 + $0x38] sm:$0xff]  ;;  %2302 = vperm.xlu0 %3976, %v10056_v29   ;;  %v4087_v29 = vld [vmem:[%s9280_s0 + $0xa0] sm:$0xff] }
 0x19f   :  { %10044 = vst [vmem:[#allocation180_spill] sm:$0xff] %v5960_v44  ;;  %v531_v15 = vmul.f32 1.442695, %v447_v43  ;;  %v2549_v0 = vadd.f32 %v2548_v34, %v2547_v3  ;;  %v1659_v6 = vsel %vm10045_vm13, %v1624_v56, 0.0  ;;  %10046 = vst [vmem:[#allocation181_spill] sm:$0xff] %v5968_v2  ;;  %vm1596_vm4 = vcmp.eq.s32.totalorder %v10047_v57, 1 }
 0x1a0   :  { %v533_v41 = vmul.f32 1.442695, %v450_v16  ;;  %v2550_v38 = vsel %vm10048_vm0, %v2514_v27, 0.0  ;;  %vm10049_vm2 = vmmov %vm10036_vm8  ;;  %v2905_v60 = vsel %vm2612_vm9, %v5804_v45, 0.0  ;;  %v10050_v3 = vld [vmem:[#allocation102_spill] sm:$0xff]  ;;  %vm10052_vm8 = vcmp.eq.s32.totalorder %v5535_v53, 4  ;;  %v495_v16 = vpop.xlane.xlu0 %494 }
 0x1a1   :  { %v5973_v61 = vsel %vm10049_vm2, %v1638_v24, 0.0  ;;  %vm10051_vm1 = vcmp.eq.s32.totalorder %v10050_v3, 4  ;;  %v2529_v21 = vsel %vm10052_vm8, %v5942_v47, 0.0  ;;  %v5988_v34 = vmul.f32 %v4085_v1, %v5953_v28  ;;  %vm10054_vm10 = vmmov %vm10049_vm2  ;;  %v498_v24 = vpop.xlane.xlu1 %497  ;;  %v10055_v43 = vld [vmem:[#allocation128_spill] sm:$0xff]  ;;  %v4086_v1 = vld [vmem:[%s9280_s0 + $0xa8] sm:$0xff] }
 0x1a2   :  { %v2515_v51 = vsel %vm10051_vm1, %v5930_v20, 0.0  ;;  %v1661_v56 = vsel %vm10054_vm10, %v1625_v18, 0.0  ;;  %v561_v27 = vmul.f32 1.442695, %v492_v42  ;;  %4014 = vpow2.f32 %v531_v15  ;;  %2311 = vperm.xlu1 %3977, %v10055_v43   ;;  %vm10059_vm9 = vmmov %vm10048_vm0  ;;  %2308 = vperm.xlu0 %3976, %v5597_v19   ;;  %v4089_v40 = vld [vmem:[%s9280_s0 + $0x48] sm:$0xff]  ;;  %v10085_v57 = vld [vmem:[#allocation132_spill] sm:$0xff] }
 0x1a3   :  { %10053 = vst [vmem:[#allocation101_spill] sm:$0xff] %v5988_v34  ;;  %v1626_v53 = vsel %vm1594_vm14, %v5960_v44, 0.0  ;;  %v1660_v3 = vadd.f32 %v1659_v6, %v1658_v23  ;;  %4016 = vpow2.f32 %v559_v59  ;;  %v2551_v8 = vadd.f32 %v2550_v38, %v2549_v0  ;;  %v6005_v15 = vpop.eup %4006  ;;  %vm10060_vm14 = vmmov %vm10048_vm0  ;;  %v10062_v59 = vld [vmem:[#allocation43_spill] sm:$0xff]  ;;  %v10063_v0 = vld [vmem:[#allocation106_spill] sm:$0xff] }
 0x1a4   :  { %v6000_v42 = vmul.f32 %v4086_v1, %v5968_v2  ;;  %v2530_v18 = vsel %vm2237_vm6, %v5968_v2, 0.0  ;;  %10058 = vst [vmem:[#allocation129_spill] sm:$0xff] %v6005_v15  ;;  %v2552_v33 = vsel %vm10059_vm9, %v2515_v51, 0.0  ;;  %4018 = vpow2.f32 %v533_v41  ;;  %v10064_v6 = vld [vmem:[#allocation109_spill] sm:$0xff]  ;;  %v4088_v41 = vld [vmem:[%s9280_s0 + $0x40] sm:$0xff]  ;;  %vm10067_vm15 = vmmov %vm10049_vm2  ;;  %v453_v2 = vpop.xlane.xlu0 %452 }
 0x1a5   :  { %v6009_v38 = vsel %vm10060_vm14, %v2529_v21, 0.0  ;;  %v6015_v23 = vmul.f32 %v4087_v29, %v5942_v47  ;;  %vm802_vm3 = vcmp.eq.s32.totalorder %v10062_v59, 1  ;;  %vm1597_vm11 = vcmp.eq.s32.totalorder %v10063_v0, 1  ;;  %v6032_v29 = vpop.eup %4008  ;;  %vm10070_vm2 = vmmov %vm10048_vm0  ;;  %v10104_v0 = vld [vmem:[#allocation50_spill] sm:$0xff] }
 0x1a6   :  { %10057 = vst [vmem:[#allocation128_spill] sm:$0xff] %v6000_v42  ;;  %vm10065_vm6 = vcmp.eq.s32.totalorder %v10064_v6, 4  ;;  %v6026_v51 = vmul.f32 %v4088_v41, %v6005_v15  ;;  %v1627_v21 = vsel %vm1595_vm5, %v5988_v34, 0.0  ;;  %v1663_v1 = vsel %vm10067_vm15, %v1626_v53, 0.0  ;;  %10068 = vst [vmem:[#allocation106_spill] sm:$0xff] %v6032_v29  ;;  %v456_v6 = vpop.xlane.xlu1 %455  ;;  %2317 = vperm.xlu1 %3977, %v5592_v52   ;;  %v6042_v39 = vpop.eup %4010  ;;  %v10074_v53 = vld [vmem:[#allocation46_spill] sm:$0xff]  ;;  %2314 = vperm.xlu0 %3976, %v10085_v57  }
 0x1a7   :  { %10061 = vst [vmem:[#allocation182_spill] sm:$0xff] %v6015_v23  ;;  %v2516_v43 = vsel %vm10065_vm6, %v5953_v28, 0.0  ;;  %vm1598_vm13 = vcmp.eq.s32.totalorder %v10069_v32, 1  ;;  %4020 = vpow2.f32 %v561_v27  ;;  %v1662_v47 = vadd.f32 %v1661_v56, %v1660_v3  ;;  %10072 = vst [vmem:[#allocation183_spill] sm:$0xff] %v6042_v39  ;;  %v10075_v28 = vld [vmem:[#allocation104_spill] sm:$0xff]  ;;  %v6050_v3 = vpop.eup %4012 }
 0x1a8   :  { %10066 = vst [vmem:[#allocation43_spill] sm:$0xff] %v6026_v51  ;;  %v6037_v36 = vsel %vm10048_vm0, %v2530_v18, 0.0  ;;  %v6040_v41 = vsel %vm10070_vm2, %v2905_v60, 0.0  ;;  %vm803_vm5 = vcmp.eq.s32.totalorder %v10073_v37, 1  ;;  %vm804_vm1 = vcmp.eq.s32.totalorder %v10074_v53, 1  ;;  %10077 = vst [vmem:[#allocation45_spill] sm:$0xff] %v6050_v3 }
 0x1a9   :  { %10071 = vst [vmem:[#allocation107_spill] sm:$0xff] %v6040_v41  ;;  %vm10076_vm8 = vcmp.eq.s32.totalorder %v10075_v28, 4  ;;  %v2553_v20 = vadd.f32 %v2552_v33, %v2551_v8  ;;  %v537_v31 = vmul.f32 1.442695, %v456_v6  ;;  %v535_v52 = vmul.f32 1.442695, %v453_v2  ;;  %vm10078_vm10 = vmmov %vm10048_vm0  ;;  %v501_v6 = vpop.xlane.xlu0 %500 }
 0x1aa   :  { %v2517_v27 = vsel %vm10076_vm8, %v6005_v15, 0.0  ;;  %v2554_v60 = vsel %vm10078_vm10, %v2516_v43, 0.0  ;;  %v1664_v56 = vadd.f32 %v1663_v1, %v1662_v47  ;;  %vm10079_vm9 = vmmov %vm10067_vm15  ;;  %v6057_v41 = vsel %vm801_vm7, %v5825_v25, 0.0  ;;  %v504_v33 = vpop.xlane.xlu1 %503  ;;  %v10082_v43 = vld [vmem:[#allocation131_spill] sm:$0xff]  ;;  %v4092_v15 = vld [vmem:[%s9280_s0 + $0x50] sm:$0xff] }
 0x1ab   :  { %v1665_v18 = vsel %vm10079_vm9, %v1627_v21, 0.0  ;;  %v565_v63 = vmul.f32 1.442695, %v498_v24  ;;  %4022 = vpow2.f32 %v537_v31  ;;  %vm10080_vm14 = vcmp.eq.s32.totalorder %v5564_v11, 4  ;;  %vm10081_vm6 = vmmov %vm10048_vm0  ;;  %2323 = vperm.xlu1 %3977, %v10082_v43   ;;  %v10084_v11 = vld [vmem:[#allocation48_spill] sm:$0xff]  ;;  %v4091_v1 = vld [vmem:[%s9280_s0 + $0xb8] sm:$0xff] }
 0x1ac   :  { %v2531_v8 = vsel %vm10080_vm14, %v6032_v29, 0.0  ;;  %v1628_v2 = vsel %vm1596_vm4, %v6026_v51, 0.0  ;;  %v2556_v19 = vsel %vm10081_vm6, %v2517_v27, 0.0  ;;  %v563_v47 = vmul.f32 1.442695, %v495_v16  ;;  %v4090_v16 = vld [vmem:[%s9280_s0 + $0xb0] sm:$0xff]  ;;  %vm10092_vm2 = vmmov %vm10079_vm9 }
 0x1ad   :  { %4024 = vpow2.f32 %v535_v52  ;;  %v6071_v31 = vmul.f32 %v4089_v40, %v6042_v39  ;;  %vm805_vm7 = vcmp.eq.s32.totalorder %v10084_v11, 1  ;;  %v2555_v24 = vadd.f32 %v2554_v60, %v2553_v20  ;;  %v6090_v52 = vpop.eup %4014  ;;  %v10089_v60 = vld [vmem:[#allocation110_spill] sm:$0xff]  ;;  %v10090_v43 = vld [vmem:[#allocation112_spill] sm:$0xff]  ;;  %vm10100_vm10 = vmmov %vm10048_vm0 }
 0x1ae   :  { %v6079_v21 = vmul.f32 %v4090_v16, %v6032_v29  ;;  %v6085_v27 = vmul.f32 %v4091_v1, %v6050_v3  ;;  %v2532_v20 = vsel %vm2239_vm12, %v6050_v3, 0.0  ;;  %10088 = vst [vmem:[#allocation132_spill] sm:$0xff] %v6090_v52  ;;  %vm1599_vm4 = vcmp.eq.s32.totalorder %v10089_v60, 1  ;;  %v6100_v1 = vpop.eup %4016  ;;  %vm10105_vm9 = vmmov %vm10048_vm0  ;;  %v10109_v32 = vld [vmem:[#allocation44_spill] sm:$0xff]  ;;  %v10132_v11 = vld [vmem:[#allocation115_spill] sm:$0xff] }
 0x1af   :  { %10083 = vst [vmem:[#allocation46_spill] sm:$0xff] %v6071_v31  ;;  %vm10091_vm15 = vcmp.eq.s32.totalorder %v10090_v43, 4  ;;  %v6097_v57 = vsel %vm10048_vm0, %v2531_v8, 0.0  ;;  %v1666_v16 = vadd.f32 %v1665_v18, %v1664_v56  ;;  %v1667_v28 = vsel %vm10092_vm2, %v1628_v2, 0.0  ;;  %10093 = vst [vmem:[#allocation110_spill] sm:$0xff] %v6100_v1  ;;  %v6111_v8 = vpop.eup %4018  ;;  %v10098_v56 = vld [vmem:[#allocation111_spill] sm:$0xff]  ;;  %v459_v2 = vpop.xlane.xlu0 %458 }
 0x1b0   :  { %10086 = vst [vmem:[#allocation131_spill] sm:$0xff] %v6079_v21  ;;  %10087 = vst [vmem:[#allocation48_spill] sm:$0xff] %v6085_v27  ;;  %v2518_v40 = vsel %vm10091_vm15, %v6042_v39, 0.0  ;;  %4026 = vpow2.f32 %v565_v63  ;;  %vm10095_vm12 = vcmp.eq.s32.totalorder %v10094_v10, 4  ;;  %v2557_v29 = vadd.f32 %v2556_v19, %v2555_v24  ;;  %v10099_v18 = vld [vmem:[#allocation134_spill] sm:$0xff]  ;;  %v462_v63 = vpop.xlane.xlu1 %461  ;;  %v10102_v39 = vld [vmem:[#allocation135_spill] sm:$0xff] }
 0x1b1   :  { %v2519_v3 = vsel %vm10095_vm12, %v6090_v52, 0.0  ;;  %v6109_v43 = vmul.f32 %v4092_v15, %v6090_v52  ;;  %10097 = vst [vmem:[#allocation185_spill] sm:$0xff] %v6111_v8  ;;  %vm1600_vm8 = vcmp.eq.s32.totalorder %v10098_v56, 1  ;;  %4028 = vpow2.f32 %v563_v47  ;;  %2329 = vperm.xlu1 %3977, %v10099_v18   ;;  %2320 = vperm.xlu0 %3976, %v10102_v39   ;;  %v6130_v45 = vpop.eup %4020  ;;  %vm10106_vm14 = vmmov %vm10048_vm0  ;;  %v4096_v60 = vld [vmem:[%s9280_s0 + $0xc0] sm:$0xff] }
 0x1b2   :  { %v1629_v19 = vsel %vm1597_vm11, %v6071_v31, 0.0  ;;  %v6119_v24 = vsel %vm10100_vm10, %v2532_v20, 0.0  ;;  %v6124_v15 = vsel %vm802_vm3, %v5785_v48, 0.0  ;;  %v541_v10 = vmul.f32 1.442695, %v462_v63  ;;  %10103 = vst [vmem:[#allocation134_spill] sm:$0xff] %v6130_v45  ;;  %vm10117_vm15 = vmmov %vm10092_vm2 }
 0x1b3   :  { %10096 = vst [vmem:[#allocation184_spill] sm:$0xff] %v6109_v43  ;;  %10101 = vst [vmem:[#allocation111_spill] sm:$0xff] %v6124_v15  ;;  %v539_v52 = vmul.f32 1.442695, %v459_v2  ;;  %v1630_v47 = vsel %vm1598_vm13, %v6109_v43, 0.0  ;;  %v1668_v18 = vadd.f32 %v1667_v28, %v1666_v16  ;;  %vm806_vm11 = vcmp.eq.s32.totalorder %v10104_v0, 1 }
 0x1b4   :  { %v2560_v20 = vsel %vm10105_vm9, %v2519_v3, 0.0  ;;  %v2558_v62 = vsel %vm10106_vm14, %v2518_v40, 0.0  ;;  %v6138_v59 = vsel %vm803_vm5, %v5890_v35, 0.0  ;;  %v6143_v39 = vsel %vm804_vm1, %v5916_v7, 0.0  ;;  %v10110_v28 = vld [vmem:[#allocation47_spill] sm:$0xff]  ;;  %v10113_v40 = vld [vmem:[#allocation133_spill] sm:$0xff]  ;;  %v510_v48 = vpop.xlane.xlu1 %509  ;;  %vm10118_vm0 = vmmov %vm10092_vm2 }
 0x1b5   :  { %10107 = vst [vmem:[#allocation135_spill] sm:$0xff] %v6138_v59  ;;  %10108 = vst [vmem:[#allocation50_spill] sm:$0xff] %v6143_v39  ;;  %vm808_vm3 = vcmp.eq.s32.totalorder %v10109_v32, 1  ;;  %vm810_vm13 = vcmp.eq.s32.totalorder %v10110_v28, 1  ;;  %v10111_v16 = vld [vmem:[#allocation51_spill] sm:$0xff]  ;;  %v2559_v63 = vadd.f32 %v2558_v62, %v2557_v29  ;;  %4030 = vpow2.f32 %v541_v10  ;;  %v10115_v2 = vld [vmem:[#allocation114_spill] sm:$0xff]  ;;  %v6161_v29 = vpop.eup %4022  ;;  %2326 = vperm.xlu0 %3976, %v10122_v22  }
 0x1b6   :  { %vm807_vm6 = vcmp.eq.s32.totalorder %v10111_v16, 1  ;;  %v4093_v3 = vld [vmem:[%s9280_s0 + $0x58] sm:$0xff]  ;;  %vm10114_vm5 = vcmp.eq.s32.totalorder %v10113_v40, 4  ;;  %vm1601_vm1 = vcmp.eq.s32.totalorder %v10115_v2, 1  ;;  %v567_v7 = vmul.f32 1.442695, %v501_v6  ;;  %vm10124_vm12 = vmmov %vm10105_vm9 }
 0x1b7   :  { %v6152_v37 = vmul.f32 %v4093_v3, %v6111_v8  ;;  %v2533_v53 = vsel %vm10114_vm5, %v6100_v1, 0.0  ;;  %4032 = vpow2.f32 %v539_v52  ;;  %v10116_v35 = vld [vmem:[#allocation136_spill] sm:$0xff]  ;;  %v1669_v10 = vsel %vm10117_vm15, %v1629_v19, 0.0  ;;  %10119 = vst [vmem:[#allocation47_spill] sm:$0xff] %v6161_v29  ;;  %v10120_v3 = vld [vmem:[#allocation113_spill] sm:$0xff]  ;;  %v6167_v6 = vpop.eup %4024  ;;  %vm10133_vm5 = vmmov %vm10124_vm12 }
 0x1b8   :  { %2335 = vperm.xlu1 %3977, %v10116_v35   ;;  %v1671_v62 = vsel %vm10118_vm0, %v1630_v47, 0.0  ;;  %v569_v58 = vmul.f32 1.442695, %v504_v33  ;;  %vm10121_vm2 = vcmp.eq.s32.totalorder %v10120_v3, 4  ;;  %v2561_v40 = vadd.f32 %v2560_v20, %v2559_v63  ;;  %10123 = vst [vmem:[#allocation51_spill] sm:$0xff] %v6167_v6  ;;  %v4094_v52 = vld [vmem:[%s9280_s0 + $0xc8] sm:$0xff]  ;;  %vm10134_vm15 = vmmov %vm10133_vm5  ;;  %v507_v3 = vpop.xlane.xlu0 %506 }
 0x1b9   :  { %10112 = vst [vmem:[#allocation44_spill] sm:$0xff] %v6152_v37  ;;  %v2520_v25 = vsel %vm10121_vm2, %v6111_v8, 0.0  ;;  %v1670_v39 = vadd.f32 %v1669_v10, %v1668_v18  ;;  %v6170_v35 = vsel %vm10124_vm12, %v2533_v53, 0.0  ;;  %v6176_v19 = vmul.f32 %v4094_v52, %v6130_v45  ;;  %v10128_v47 = vld [vmem:[#allocation127_spill] sm:$0xff]  ;;  %v4095_v20 = vld [vmem:[%s9280_s0 + $0x60] sm:$0xff]  ;;  %v10131_v52 = vld [vmem:[#allocation117_spill] sm:$0xff] }
 0x1ba   :  { %vm10126_vm10 = vcmp.eq.s32.totalorder %v5412_v4, 4  ;;  %v6184_v22 = vsel %vm805_vm7, %v5960_v44, 0.0  ;;  %vm10129_vm9 = vcmp.eq.s32.totalorder %v10128_v47, 4  ;;  %v6193_v63 = vmul.f32 %v4095_v20, %v6167_v6  ;;  %v10135_v44 = vld [vmem:[#allocation139_spill] sm:$0xff]  ;;  %vm10142_vm2 = vmmov %vm10118_vm0  ;;  %v10147_v8 = vld [vmem:[#allocation116_spill] sm:$0xff] }
 0x1bb   :  { %10125 = vst [vmem:[#allocation133_spill] sm:$0xff] %v6176_v19  ;;  %v2534_v33 = vsel %vm10126_vm10, %v6130_v45, 0.0  ;;  %10127 = vst [vmem:[#allocation114_spill] sm:$0xff] %v6184_v22  ;;  %v2521_v18 = vsel %vm10129_vm9, %v6167_v6, 0.0  ;;  %v1631_v53 = vsel %vm1599_vm4, %v6152_v37, 0.0  ;;  %v1672_v10 = vadd.f32 %v1671_v62, %v1670_v39  ;;  %v6203_v45 = vpop.permute.xlu1 %1553  ;;  %v6211_v62 = vpop.eup %4026  ;;  %v4098_v28 = vld [vmem:[%s9280_s0 + $0xd8] sm:$0xff] }
 0x1bc   :  { %10130 = vst [vmem:[#allocation136_spill] sm:$0xff] %v6193_v63  ;;  %vm1603_vm14 = vcmp.eq.s32.totalorder %v10131_v52, 1  ;;  %vm1602_vm7 = vcmp.eq.s32.totalorder %v10132_v11, 1  ;;  %v2564_v4 = vsel %vm10133_vm5, %v2521_v18, 0.0  ;;  %4034 = vpow2.f32 %v567_v7  ;;  %2341 = vperm.xlu1 %3977, %v10135_v44   ;;  %10137 = vst [vmem:[#allocation127_spill] sm:$0xff] %v6211_v62  ;;  %v10138_v18 = vld [vmem:[#allocation140_spill] sm:$0xff]  ;;  %v6223_v6 = vpop.eup %4028 }
 0x1bd   :  { %v2562_v47 = vsel %vm10134_vm15, %v2520_v25, 0.0  ;;  %v6209_v39 = vmul.f32 %v4096_v60, %v6100_v1  ;;  %4036 = vpow2.f32 %v569_v58  ;;  %2332 = vperm.xlu0 %3976, %v10138_v18   ;;  %v4097_v25 = vld [vmem:[%s9280_s0 + $0x68] sm:$0xff]  ;;  %v1632_v44 = vsel %vm1600_vm8, %v6193_v63, 0.0  ;;  %10140 = vst [vmem:[#allocation115_spill] sm:$0xff] %v6223_v6  ;;  %vm10143_vm12 = vmmov %vm10133_vm5  ;;  %v4101_v11 = vld [vmem:[%s9280_s0 + $0xd0] sm:$0xff] }
 0x1be   :  { %v2563_v20 = vadd.f32 %v2562_v47, %v2561_v40  ;;  %v6218_v7 = vmul.f32 %v4097_v25, %v6161_v29  ;;  %v10141_v60 = vld [vmem:[#allocation53_spill] sm:$0xff]  ;;  %v573_v1 = vmul.f32 1.442695, %v510_v48  ;;  %v1673_v58 = vsel %vm10118_vm0, %v1631_v53, 0.0  ;;  %v10146_v25 = vld [vmem:[#allocation59_spill] sm:$0xff] }
 0x1bf   :  { %10136 = vst [vmem:[#allocation137_spill] sm:$0xff] %v6209_v39  ;;  %vm809_vm4 = vcmp.eq.s32.totalorder %v10141_v60, 1  ;;  %v1675_v40 = vsel %vm10142_vm2, %v1632_v44, 0.0  ;;  %v6229_v47 = vsel %vm10143_vm12, %v2534_v33, 0.0  ;;  %v10145_v18 = vld [vmem:[#allocation57_spill] sm:$0xff]  ;;  %vm817_vm9 = vcmp.eq.s32.totalorder %v10146_v25, 1  ;;  %v6242_v33 = vpop.permute.xlu1 %1559 }
 0x1c0   :  { %10139 = vst [vmem:[#allocation117_spill] sm:$0xff] %v6218_v7  ;;  %10144 = vst [vmem:[#allocation139_spill] sm:$0xff] %v6229_v47  ;;  %vm815_vm10 = vcmp.eq.s32.totalorder %v10145_v18, 1  ;;  %vm10148_vm5 = vcmp.eq.s32.totalorder %v10147_v8, 4  ;;  %v2565_v22 = vadd.f32 %v2564_v4, %v2563_v20  ;;  %v1674_v59 = vadd.f32 %v1673_v58, %v1672_v10  ;;  %v10149_v44 = vld [vmem:[#allocation141_spill] sm:$0xff]  ;;  %v6244_v47 = vpop.permute.xlu0 %1550  ;;  %v10153_v58 = vld [vmem:[#allocation144_spill] sm:$0xff] }
 0x1c1   :  { %v2522_v56 = vsel %vm10148_vm5, %v6161_v29, 0.0  ;;  %v6239_v48 = vsel %vm806_vm11, %v5988_v34, 0.0  ;;  %v571_v53 = vmul.f32 1.442695, %v507_v3  ;;  %2347 = vperm.xlu1 %3977, %v10149_v44   ;;  %v6249_v15 = vsel %vm807_vm6, %v6026_v51, 0.0  ;;  %v6261_v3 = vpop.eup %4030  ;;  %v10152_v10 = vld [vmem:[#allocation49_spill] sm:$0xff]  ;;  %2338 = vperm.xlu0 %3976, %v10153_v58  }
 0x1c2   :  { %v6254_v4 = vsel %vm808_vm3, %v6071_v31, 0.0  ;;  %v6259_v0 = vsel %vm810_vm13, %v6152_v37, 0.0  ;;  %10151 = vst [vmem:[#allocation53_spill] sm:$0xff] %v6261_v3  ;;  %vm812_vm8 = vcmp.eq.s32.totalorder %v10152_v10, 1  ;;  %v1633_v16 = vsel %vm1601_vm1, %v6218_v7, 0.0  ;;  %v6277_v8 = vpop.eup %4032  ;;  %vm10157_vm3 = vmmov %vm10143_vm12  ;;  %v10163_v51 = vld [vmem:[#allocation130_spill] sm:$0xff] }
 0x1c3   :  { %10150 = vst [vmem:[#allocation140_spill] sm:$0xff] %v6259_v0  ;;  %v1676_v20 = vadd.f32 %v1675_v40, %v1674_v59  ;;  %vm10154_vm11 = vcmp.eq.s32.totalorder %v5644_v55, 4  ;;  %v6275_v44 = vmul.f32 %v4098_v28, %v6211_v62  ;;  %10156 = vst [vmem:[#allocation59_spill] sm:$0xff] %v6277_v8  ;;  %v2566_v37 = vsel %vm10157_vm3, %v2522_v56, 0.0  ;;  %v4099_v59 = vld [vmem:[%s9280_s0 + $0x78] sm:$0xff]  ;;  %v10159_v55 = vld [vmem:[#allocation124_spill] sm:$0xff] }
 0x1c4   :  { %v2535_v32 = vsel %vm10154_vm11, %v6223_v6, 0.0  ;;  %4038 = vpow2.f32 %v573_v1  ;;  %v6284_v2 = vmul.f32 %v4099_v59, %v6261_v3  ;;  %vm10160_vm13 = vcmp.eq.s32.totalorder %v10159_v55, 4  ;;  %v10161_v28 = vld [vmem:[#allocation118_spill] sm:$0xff]  ;;  %vm10166_vm15 = vmmov %vm10157_vm3  ;;  %v6306_v34 = vpop.permute.xlu0 %1556  ;;  %v4102_v25 = vld [vmem:[%s9280_s0 + $0xe8] sm:$0xff] }
 0x1c5   :  { %10155 = vst [vmem:[#allocation57_spill] sm:$0xff] %v6275_v44  ;;  %v2536_v40 = vsel %vm10160_vm13, %v6211_v62, 0.0  ;;  %v2567_v58 = vadd.f32 %v2566_v37, %v2565_v22  ;;  %vm10162_vm6 = vcmp.eq.s32.totalorder %v10161_v28, 4  ;;  %vm10164_vm1 = vcmp.eq.s32.totalorder %v10163_v51, 4  ;;  %v4100_v56 = vld [vmem:[%s9280_s0 + $0x70] sm:$0xff]  ;;  %v10167_v22 = vld [vmem:[#allocation145_spill] sm:$0xff]  ;;  %v6304_v28 = vpop.permute.xlu1 %1565  ;;  %vm10168_vm2 = vmmov %vm10157_vm3 }
 0x1c6   :  { %10158 = vst [vmem:[#allocation141_spill] sm:$0xff] %v6284_v2  ;;  %v2524_v31 = vsel %vm10162_vm6, %v6261_v3, 0.0  ;;  %v2523_v1 = vsel %vm10164_vm1, %v6277_v8, 0.0  ;;  %v6299_v59 = vmul.f32 %v4100_v56, %v6277_v8  ;;  %4040 = vpow2.f32 %v571_v53  ;;  %2353 = vperm.xlu1 %3977, %v10167_v22   ;;  %v10169_v62 = vld [vmem:[#allocation56_spill] sm:$0xff]  ;;  %v10170_v3 = vld [vmem:[#allocation54_spill] sm:$0xff]  ;;  %v6320_v8 = vpop.eup %4034  ;;  %vm10173_vm11 = vmmov %vm10168_vm2 }
 0x1c7   :  { %v2568_v55 = vsel %vm10166_vm15, %v2523_v1, 0.0  ;;  %v1677_v37 = vsel %vm10118_vm0, %v1633_v16, 0.0  ;;  %v6309_v51 = vsel %vm10168_vm2, %v2535_v32, 0.0  ;;  %vm818_vm12 = vcmp.eq.s32.totalorder %v10169_v62, 1  ;;  %v10171_v22 = vld [vmem:[#allocation146_spill] sm:$0xff]  ;;  %10172 = vst [vmem:[#allocation144_spill] sm:$0xff] %v6320_v8  ;;  %vm10174_vm13 = vmmov %vm10118_vm0  ;;  %v6331_v52 = vpop.eup %4036 }
 0x1c8   :  { %10165 = vst [vmem:[#allocation49_spill] sm:$0xff] %v6299_v59  ;;  %vm811_vm5 = vcmp.eq.s32.totalorder %v10170_v3, 1  ;;  %v2569_v56 = vadd.f32 %v2568_v55, %v2567_v58  ;;  %v1634_v53 = vsel %vm1602_vm7, %v6299_v59, 0.0  ;;  %v1635_v16 = vsel %vm1603_vm14, %v6284_v2, 0.0  ;;  %2344 = vperm.xlu0 %3976, %v10171_v22   ;;  %10176 = vst [vmem:[#allocation145_spill] sm:$0xff] %v6331_v52  ;;  %v6347_v0 = vpop.permute.xlu0 %1562  ;;  %v10183_v18 = vld [vmem:[#allocation142_spill] sm:$0xff] }
 0x1c9   :  { %v1678_v1 = vadd.f32 %v1677_v37, %v1676_v20  ;;  %v2570_v32 = vsel %vm10173_vm11, %v2524_v31, 0.0  ;;  %vm1608_vm3 = vcmp.eq.s32.totalorder %v6203_v45, 1  ;;  %v1679_v29 = vsel %vm10174_vm13, %v1634_v53, 0.0  ;;  %v10177_v20 = vld [vmem:[#allocation52_spill] sm:$0xff]  ;;  %vm10178_vm7 = vmmov %vm10168_vm2  ;;  %v10186_v45 = vld [vmem:[#allocation125_spill] sm:$0xff] }
 0x1ca   :  { %v6329_v55 = vmul.f32 %v4101_v11, %v6223_v6  ;;  %vm814_vm14 = vcmp.eq.s32.totalorder %v10177_v20, 1  ;;  %v2571_v58 = vadd.f32 %v2570_v32, %v2569_v56  ;;  %v6335_v22 = vsel %vm10178_vm7, %v2536_v40, 0.0  ;;  %vm10179_vm1 = vmmov %vm10118_vm0  ;;  %v10180_v11 = vld [vmem:[#allocation150_spill] sm:$0xff]  ;;  %v6345_v6 = vpop.permute.xlu1 %1571  ;;  %v10181_v40 = vld [vmem:[#allocation55_spill] sm:$0xff] }
 0x1cb   :  { %v1680_v37 = vadd.f32 %v1679_v29, %v1678_v1  ;;  %v6340_v31 = vsel %vm809_vm4, %v6109_v43, 0.0  ;;  %vm1610_vm6 = vcmp.eq.s32.totalorder %v6242_v33, 1  ;;  %v1681_v53 = vsel %vm10179_vm1, %v1635_v16, 0.0  ;;  %2359 = vperm.xlu1 %3977, %v10180_v11   ;;  %v10182_v32 = vld [vmem:[#allocation151_spill] sm:$0xff]  ;;  %vm10190_vm11 = vmmov %vm10179_vm1 }
 0x1cc   :  { %10175 = vst [vmem:[#allocation130_spill] sm:$0xff] %v6329_v55  ;;  %v6352_v29 = vsel %vm815_vm10, %v5850_v5, 0.0  ;;  %v6357_v60 = vsel %vm817_vm9, %v5909_v14, 0.0  ;;  %vm813_vm4 = vcmp.eq.s32.totalorder %v10181_v40, 1  ;;  %v1640_v56 = vsel %vm1608_vm3, %v6015_v23, 0.0  ;;  %2350 = vperm.xlu0 %3976, %v10182_v32   ;;  %v10192_v5 = vld [vmem:[#allocation152_spill] sm:$0xff] }
 0x1cd   :  { %v2573_v16 = vadd.f32 %v5871_v26, %v2571_v58  ;;  %v1682_v1 = vadd.f32 %v1681_v53, %v1680_v37  ;;  %vm10184_vm10 = vcmp.eq.s32.totalorder %v10183_v18, 4  ;;  %vm1607_vm15 = vcmp.eq.s32.totalorder %v6244_v47, 1  ;;  %v10188_v37 = vld [vmem:[#allocation60_spill] sm:$0xff]  ;;  %v10202_v62 = vld [vmem:[#allocation155_spill] sm:$0xff]  ;;  %v10215_v40 = vld [vmem:[#allocation157_spill] sm:$0xff] }
 0x1ce   :  { %v2537_v11 = vsel %vm10184_vm10, %v6320_v8, 0.0  ;;  %v6373_v14 = vmul.f32 %v4102_v25, %v6331_v52  ;;  %vm10187_vm9 = vcmp.eq.s32.totalorder %v10186_v45, 4  ;;  %v6381_v58 = vsel %vm812_vm8, %v6218_v7, 0.0  ;;  %v6390_v25 = vpop.eup %4038  ;;  %vm10191_vm8 = vmmov %vm10178_vm7 }
 0x1cf   :  { %v2538_v26 = vsel %vm10187_vm9, %v6331_v52, 0.0  ;;  %vm819_vm0 = vcmp.eq.s32.totalorder %v10188_v37, 1  ;;  %v2575_v53 = vadd.f32 %v5802_v54, %v2573_v16  ;;  %v1642_v32 = vsel %vm1610_vm6, %v6079_v21, 0.0  ;;  %10189 = vst [vmem:[#allocation54_spill] sm:$0xff] %v6390_v25  ;;  %2365 = vperm.xlu1 %3977, %v10192_v5   ;;  %v4103_v54 = vld [vmem:[%s9280_s0 + $0xe0] sm:$0xff]  ;;  %v10194_v16 = vld [vmem:[#allocation58_spill] sm:$0xff]  ;;  %vm10201_vm9 = vmmov %vm10179_vm1 }
 0x1d0   :  { %10185 = vst [vmem:[#allocation56_spill] sm:$0xff] %v6373_v14  ;;  %v1684_v18 = vadd.f32 %v5920_v12, %v1682_v1  ;;  %vm1612_vm2 = vcmp.eq.s32.totalorder %v6304_v28, 1  ;;  %v1691_v45 = vsel %vm10190_vm11, %v1640_v56, 0.0  ;;  %vm1609_vm3 = vcmp.eq.s32.totalorder %v6306_v34, 1  ;;  %v6404_v12 = vpop.permute.xlu1 %1577  ;;  %v10195_v5 = vld [vmem:[#allocation153_spill] sm:$0xff]  ;;  %v6416_v43 = vpop.eup %4040 }
 0x1d1   :  { %v6395_v10 = vsel %vm10191_vm8, %v2537_v11, 0.0  ;;  %v6402_v33 = vmul.f32 %v4103_v54, %v6320_v8  ;;  %vm820_vm13 = vcmp.eq.s32.totalorder %v10194_v16, 1  ;;  %v1639_v1 = vsel %vm1607_vm15, %v5877_v9, 0.0  ;;  %2356 = vperm.xlu0 %3976, %v10195_v5   ;;  %10197 = vst [vmem:[#allocation150_spill] sm:$0xff] %v6416_v43  ;;  %v10198_v54 = vld [vmem:[#allocation62_spill] sm:$0xff]  ;;  %v10207_v8 = vld [vmem:[#allocation149_spill] sm:$0xff] }
 0x1d2   :  { %v1686_v56 = vadd.f32 %v5810_v50, %v1684_v18  ;;  %v2577_v11 = vadd.f32 %v5948_v46, %v2575_v53  ;;  %v6414_v7 = vsel %vm10178_vm7, %v2538_v26, 0.0  ;;  %vm821_vm6 = vcmp.eq.s32.totalorder %v10198_v54, 1  ;;  %v1569_v18 = vpop.permute.xlu0 %1568  ;;  %v10199_v26 = vld [vmem:[#allocation61_spill] sm:$0xff]  ;;  %v10200_v53 = vld [vmem:[#allocation64_spill] sm:$0xff] }
 0x1d3   :  { %10193 = vst [vmem:[#allocation146_spill] sm:$0xff] %v6402_v33  ;;  %10196 = vst [vmem:[#allocation52_spill] sm:$0xff] %v6414_v7  ;;  %v1695_v52 = vsel %vm10179_vm1, %v1642_v32, 0.0  ;;  %v1644_v50 = vsel %vm1612_vm2, %v6209_v39, 0.0  ;;  %v6426_v46 = vsel %vm811_vm5, %v6193_v63, 0.0  ;;  %v6431_v47 = vsel %vm818_vm12, %v5877_v9, 0.0  ;;  %2371 = vperm.xlu1 %3977, %v10202_v62  }
 0x1d4   :  { %vm822_vm10 = vcmp.eq.s32.totalorder %v10199_v26, 1  ;;  %vm823_vm15 = vcmp.eq.s32.totalorder %v10200_v53, 1  ;;  %v1688_v32 = vadd.f32 %v5973_v61, %v1686_v56  ;;  %v2579_v28 = vadd.f32 %v5923_v49, %v2577_v11  ;;  %v6444_v9 = vpop.permute.xlu1 %1583  ;;  %v4104_v61 = vld [vmem:[%s9280_s0 + $0xf8] sm:$0xff] }
 0x1d5   :  { %v1641_v5 = vsel %vm1609_vm3, %v6000_v42, 0.0  ;;  %vm1614_vm5 = vcmp.eq.s32.totalorder %v6345_v6, 1  ;;  %v1689_v3 = vsel %vm10201_vm9, %v1639_v1, 0.0  ;;  %vm1611_vm2 = vcmp.eq.s32.totalorder %v6347_v0, 1  ;;  %v10204_v56 = vld [vmem:[#allocation63_spill] sm:$0xff]  ;;  %v10205_v1 = vld [vmem:[#allocation65_spill] sm:$0xff]  ;;  %vm10206_vm3 = vmmov %vm10179_vm1 }
 0x1d6   :  { %v6450_v49 = vmul.f32 %v4104_v61, %v6390_v25  ;;  %v6455_v34 = vsel %vm814_vm14, %v6284_v2, 0.0  ;;  %vm824_vm12 = vcmp.eq.s32.totalorder %v10204_v56, 1  ;;  %vm825_vm11 = vcmp.eq.s32.totalorder %v10205_v1, 1  ;;  %v10209_v61 = vld [vmem:[#allocation156_spill] sm:$0xff]  ;;  %v10210_v25 = vld [vmem:[#allocation66_spill] sm:$0xff]  ;;  %vm10212_vm14 = vmmov %vm10179_vm1 }
 0x1d7   :  { %v1690_v11 = vadd.f32 %v1689_v3, %v1688_v32  ;;  %v1699_v62 = vsel %vm10206_vm3, %v1644_v50, 0.0  ;;  %v2581_v63 = vadd.f32 %v6009_v38, %v2579_v28  ;;  %vm10208_vm8 = vcmp.eq.s32.totalorder %v10207_v8, 4  ;;  %2362 = vperm.xlu0 %3976, %v10209_v61   ;;  %v4105_v50 = vld [vmem:[%s9280_s0 + $0xf0] sm:$0xff]  ;;  %v1575_v61 = vpop.permute.xlu0 %1574  ;;  %2675 = vperm.xlu1 %3977, %v10215_v40   ;;  %v10217_v0 = vld [vmem:[#allocation67_spill] sm:$0xff] }
 0x1d8   :  { %10203 = vst [vmem:[#allocation55_spill] sm:$0xff] %v6450_v49  ;;  %v2539_v7 = vsel %vm10208_vm8, %v6416_v43, 0.0  ;;  %vm826_vm7 = vcmp.eq.s32.totalorder %v10210_v25, 1  ;;  %v1693_v20 = vsel %vm10179_vm1, %v1641_v5, 0.0  ;;  %v1646_v2 = vsel %vm1614_vm5, %v6329_v55, 0.0  ;;  %vm10219_vm8 = vmmov %vm10179_vm1  ;;  %v10231_v1 = vld [vmem:[#allocation50_spill] sm:$0xff] }
 0x1d9   :  { %v6474_v38 = vmul.f32 %v4105_v50, %v6416_v43  ;;  %v6479_v8 = vsel %vm813_vm4, %v6299_v59, 0.0  ;;  %v1692_v32 = vadd.f32 %v1691_v45, %v1690_v11  ;;  %v2583_v28 = vadd.f32 %v6037_v36, %v2581_v63  ;;  %v10216_v63 = vld [vmem:[#allocation68_spill] sm:$0xff]  ;;  %v1888_v11 = vpop.permute.xlu1 %1887 }
 0x1da   :  { %v1643_v6 = vsel %vm1611_vm2, %v6085_v27, 0.0  ;;  %v863_v5 = vsel %vm10212_vm14, %v5928_v13, 0.0  ;;  %vm1616_vm5 = vcmp.eq.s32.totalorder %v6404_v12, 1  ;;  %vm1613_vm9 = vcmp.eq.s32.totalorder %v1569_v18, 1  ;;  %v10218_v50 = vld [vmem:[#allocation160_spill] sm:$0xff]  ;;  %vm10220_vm14 = vmmov %vm10179_vm1 }
 0x1db   :  { %10211 = vst [vmem:[#allocation151_spill] sm:$0xff] %v6474_v38  ;;  %vm10213_vm3 = vcmask 7168   ;;  %v6495_v36 = vsel %vm819_vm0, %v6015_v23, 0.0  ;;  %vm828_vm4 = vcmp.eq.s32.totalorder %v10216_v63, 1  ;;  %vm827_vm2 = vcmp.eq.s32.totalorder %v10217_v0, 1  ;;  %2368 = vperm.xlu0 %3976, %v10218_v50   ;;  %vm10221_vm0 = vmmov %vm10179_vm1  ;;  %2681 = vperm.xlu1 %3977, %v5790_v17   ;;  %v1581_v26 = vpop.permute.xlu0 %1580 }
 0x1dc   :  { %v6489_v3 = vsel %vm10213_vm3, %v2539_v7, 0.0  ;;  %v1694_v45 = vadd.f32 %v1693_v20, %v1692_v32  ;;  %v2585_v13 = vadd.f32 %v6097_v57, %v2583_v28  ;;  %v864_v7 = vsel %vm10219_vm8, %v5940_v30, 0.0  ;;  %v10222_v57 = vld [vmem:[#allocation69_spill] sm:$0xff] }
 0x1dd   :  { %10214 = vst [vmem:[#allocation142_spill] sm:$0xff] %v6489_v3  ;;  %v866_v40 = vsel %vm10179_vm1, %v6057_v41, 0.0  ;;  %v1703_v37 = vsel %vm10220_vm14, %v1646_v2, 0.0  ;;  %v1697_v3 = vsel %vm10221_vm0, %v1643_v6, 0.0  ;;  %v6510_v23 = vsel %vm820_vm13, %v6000_v42, 0.0  ;;  %v10223_v2 = vld [vmem:[#allocation70_spill] sm:$0xff]  ;;  %vm10225_vm13 = vmmov %vm10221_vm0 }
 0x1de   :  { %v865_v20 = vadd.f32 %v864_v7, %v863_v5  ;;  %vm829_vm3 = vcmp.eq.s32.totalorder %v10222_v57, 1  ;;  %v1696_v32 = vadd.f32 %v1695_v52, %v1694_v45  ;;  %v2587_v28 = vadd.f32 %v6119_v24, %v2585_v13  ;;  %v10224_v5 = vld [vmem:[#allocation111_spill] sm:$0xff]  ;;  %vm10234_vm14 = vmmov %vm10221_vm0 }
 0x1df   :  { %v1648_v30 = vsel %vm1616_vm5, %v6402_v33, 0.0  ;;  %v6520_v41 = vsel %vm821_vm6, %v6079_v21, 0.0  ;;  %vm830_vm8 = vcmp.eq.s32.totalorder %v10223_v2, 1  ;;  %v1645_v16 = vsel %vm1613_vm9, %v6176_v19, 0.0  ;;  %v10226_v45 = vld [vmem:[#allocation135_spill] sm:$0xff]  ;;  %vm10227_vm6 = vmmov %vm10221_vm0 }
 0x1e0   :  { %v6529_v24 = vsel %vm822_vm10, %v6085_v27, 0.0  ;;  %v6534_v52 = vsel %vm823_vm15, %v6209_v39, 0.0  ;;  %v867_v12 = vadd.f32 %v866_v40, %v865_v20  ;;  %v1698_v54 = vadd.f32 %v1697_v3, %v1696_v32  ;;  %vm10228_vm5 = vmmov %vm10221_vm0  ;;  %v10230_v40 = vld [vmem:[#allocation139_spill] sm:$0xff]  ;;  %v1894_v32 = vpop.permute.xlu1 %1893 }
 0x1e1   :  { %v2589_v6 = vadd.f32 %v6170_v35, %v2587_v28  ;;  %v868_v18 = vsel %vm10225_vm13, %v10224_v5, 0.0  ;;  %v870_v17 = vsel %vm10227_vm6, %v10226_v45, 0.0  ;;  %v1707_v13 = vsel %vm10228_vm5, %v1648_v30, 0.0  ;;  %vm10229_vm10 = vmmov %vm10221_vm0  ;;  %v10235_v5 = vld [vmem:[#allocation158_spill] sm:$0xff] }
 0x1e2   :  { %v856_v50 = vsel %vm824_vm12, %v6176_v19, 0.0  ;;  %v857_v53 = vsel %vm825_vm11, %v6329_v55, 0.0  ;;  %v869_v3 = vadd.f32 %v868_v18, %v867_v12  ;;  %v1700_v7 = vadd.f32 %v1699_v62, %v1698_v54  ;;  %vm10232_vm11 = vmmov %vm10221_vm0  ;;  %v10233_v62 = vld [vmem:[#allocation114_spill] sm:$0xff] }
 0x1e3   :  { %v1701_v35 = vsel %vm10229_vm10, %v1645_v16, 0.0  ;;  %v2591_v20 = vadd.f32 %v10230_v40, %v2589_v6  ;;  %v858_v28 = vsel %vm826_vm7, %v6275_v44, 0.0  ;;  %vm1618_vm15 = vcmp.eq.s32.totalorder %v6444_v9, 1  ;;  %vm10237_vm7 = vmmov %vm10228_vm5 }
 0x1e4   :  { %vm1615_vm9 = vcmp.eq.s32.totalorder %v1575_v61, 1  ;;  %vm1982_vm1 = vcmp.eq.s32.totalorder %v1888_v11, 1  ;;  %v871_v56 = vadd.f32 %v870_v17, %v869_v3  ;;  %v1702_v30 = vadd.f32 %v1701_v35, %v1700_v7  ;;  %v10236_v3 = vld [vmem:[#allocation166_spill] sm:$0xff] }
 0x1e5   :  { %vm1617_vm12 = vcmp.eq.s32.totalorder %v1581_v26, 1  ;;  %v872_v12 = vsel %vm10232_vm11, %v10231_v1, 0.0  ;;  %v874_v16 = vsel %vm10234_vm14, %v10233_v62, 0.0  ;;  %vm1984_vm0 = vcmp.eq.s32.totalorder %v1894_v32, 1 }
 0x1e6   :  { %v859_v54 = vsel %vm827_vm2, %v6402_v33, 0.0  ;;  %v860_v9 = vsel %vm828_vm4, %v6373_v14, 0.0  ;;  %v873_v25 = vadd.f32 %v872_v12, %v871_v56  ;;  %v1650_v61 = vsel %vm1618_vm15, %v6474_v38, 0.0  ;;  %vm10238_vm4 = vmmov %vm10228_vm5  ;;  %v10249_v12 = vld [vmem:[#allocation140_spill] sm:$0xff]  ;;  %v10387_v33 = vld [vmem:[#allocation77_spill] sm:$0xff] }
 0x1e7   :  { %v1647_v11 = vsel %vm1615_vm9, %v6275_v44, 0.0  ;;  %v2593_v6 = vadd.f32 %v6309_v51, %v2591_v20  ;;  %v2014_v18 = vsel %vm1982_vm1, %v10235_v5, 0.0  ;;  %v1704_v45 = vadd.f32 %v1703_v37, %v1702_v30  ;;  %vm10239_vm2 = vmmov %vm10238_vm4 }
 0x1e8   :  { %v1649_v17 = vsel %vm1617_vm12, %v6373_v14, 0.0  ;;  %v861_v0 = vsel %vm829_vm3, %v6474_v38, 0.0  ;;  %v875_v26 = vadd.f32 %v874_v16, %v873_v25  ;;  %v2016_v63 = vsel %vm1984_vm0, %v10236_v3, 0.0  ;;  %vm10241_vm13 = vmmov %vm10239_vm2  ;;  %v10371_v38 = vld [vmem:[#allocation34_spill] sm:$0xff] }
 0x1e9   :  { %v862_v7 = vsel %vm830_vm8, %v6450_v49, 0.0  ;;  %v876_v35 = vsel %vm10237_vm7, %v6239_v48, 0.0  ;;  %v878_v51 = vsel %vm10238_vm4, %v6249_v15, 0.0  ;;  %v6581_v37 = vsel %vm10239_vm2, %v1650_v61, 0.0  ;;  %vm10242_vm6 = vmmov %vm10239_vm2 }
 0x1ea   :  { %10240 = vst [vmem:[#allocation60_spill] sm:$0xff] %v6581_v37  ;;  %v1705_v40 = vsel %vm10241_vm13, %v1647_v11, 0.0  ;;  %v6585_v57 = vsel %vm10242_vm6, %v2014_v18, 0.0  ;;  %v877_v20 = vadd.f32 %v876_v35, %v875_v26  ;;  %v2595_v32 = vadd.f32 %v6335_v22, %v2593_v6  ;;  %vm10244_vm3 = vmmov %vm10239_vm2  ;;  %v10256_v11 = vld [vmem:[#allocation165_spill] sm:$0xff]  ;;  %v10269_v26 = vld [vmem:[#allocation6_spill] sm:$0xff] }
 0x1eb   :  { %10243 = vst [vmem:[#allocation152_spill] sm:$0xff] %v6585_v57  ;;  %v1709_v2 = vsel %vm10244_vm3, %v1649_v17, 0.0  ;;  %vm10245_vm8 = vmmov %vm10239_vm2  ;;  %v1706_v15 = vadd.f32 %v1705_v40, %v1704_v45  ;;  %v10272_v35 = vld [vmem:[#allocation5_spill] sm:$0xff]  ;;  %v10275_v40 = vld [vmem:[#allocation7_spill] sm:$0xff] }
 0x1ec   :  { %v880_v56 = vsel %vm10245_vm8, %v6254_v4, 0.0  ;;  %vm10246_vm5 = vmmov %vm10239_vm2  ;;  %v879_v1 = vadd.f32 %v878_v51, %v877_v20  ;;  %v10277_v20 = vld [vmem:[#allocation52_spill] sm:$0xff]  ;;  %v10300_v57 = vld [vmem:[#allocation179_spill] sm:$0xff] }
 0x1ed   :  { %v882_v48 = vsel %vm10246_vm5, %v6340_v31, 0.0  ;;  %vm10247_vm10 = vmmov %vm10239_vm2  ;;  %v1708_v18 = vadd.f32 %v1707_v13, %v1706_v15  ;;  %v10301_v37 = vld [vmem:[#allocation17_spill] sm:$0xff] }
 0x1ee   :  { %v6594_v30 = vsel %vm10247_vm10, %v2016_v63, 0.0  ;;  %vm10250_vm15 = vmmov %vm10239_vm2  ;;  %v881_v25 = vadd.f32 %v880_v56, %v879_v1 }
 0x1ef   :  { %10248 = vst [vmem:[#allocation58_spill] sm:$0xff] %v6594_v30  ;;  %v884_v62 = vsel %vm10250_vm15, %v10249_v12, 0.0  ;;  %vm10251_vm9 = vmmov %vm10239_vm2  ;;  %v10285_v12 = vld [vmem:[#allocation154_spill] sm:$0xff] }
 0x1f0   :  { %v886_v16 = vsel %vm10251_vm9, %v6426_v46, 0.0  ;;  %vm10252_vm1 = vmmov %vm10239_vm2  ;;  %v883_v45 = vadd.f32 %v882_v48, %v881_v25  ;;  %vm10270_vm9 = vcmp.eq.s32.totalorder %v10269_v26, 0  ;;  %v6671_v48 = vadd.f32 %v1709_v2, %v1708_v18  ;;  %v10294_v18 = vld [vmem:[#allocation172_spill] sm:$0xff] }
 0x1f1   :  { %v888_v22 = vsel %vm10252_vm1, %v6381_v58, 0.0  ;;  %vm10253_vm12 = vmmov %vm10252_vm1  ;;  %v2597_v58 = vadd.f32 %v6395_v10, %v2595_v32 }
 0x1f2   :  { %v890_v4 = vsel %vm10253_vm12, %v6479_v8, 0.0  ;;  %vm10254_vm11 = vmmov %vm10252_vm1  ;;  %v885_v17 = vadd.f32 %v884_v62, %v883_v45  ;;  %vm10276_vm12 = vcmp.eq.s32.totalorder %v10275_v40, 0  ;;  %10282 = vst [vmem:[#allocation61_spill] sm:$0xff] %v6671_v48  ;;  %v10286_v62 = vld [vmem:[#allocation9_spill] sm:$0xff] }
 0x1f3   :  { %v892_v31 = vsel %vm10254_vm11, %v6455_v34, 0.0  ;;  %vm10255_vm14 = vmmov %vm10252_vm1  ;;  %v6660_v32 = vadd.f32 %v10277_v20, %v2597_v58  ;;  %v10289_v58 = vld [vmem:[#allocation11_spill] sm:$0xff] }
 0x1f4   :  { %v894_v61 = vsel %vm10255_vm14, %v6352_v29, 0.0  ;;  %vm10257_vm0 = vmmov %vm10252_vm1  ;;  %vm10273_vm1 = vcmp.eq.s32.totalorder %v10272_v35, 0  ;;  %v887_v15 = vadd.f32 %v886_v16, %v885_v17  ;;  %v10295_v16 = vld [vmem:[#allocation13_spill] sm:$0xff]  ;;  %v10298_v20 = vld [vmem:[#allocation15_spill] sm:$0xff] }
 0x1f5   :  { %v6610_v6 = vsel %vm10257_vm0, %v10256_v11, 0.0  ;;  %vm10258_vm7 = vmmov %vm10257_vm0  ;;  %10278 = vst [vmem:[#allocation153_spill] sm:$0xff] %v6660_v32  ;;  %v6669_v56 = vsel %vm10257_vm0, %v861_v0, 0.0  ;;  %v10288_v11 = vld [vmem:[#allocation169_spill] sm:$0xff] }
 0x1f6   :  { %v6614_v46 = vsel %vm10258_vm7, %v6357_v60, 0.0  ;;  %vm10259_vm4 = vmmov %vm10257_vm0  ;;  %10281 = vst [vmem:[#allocation62_spill] sm:$0xff] %v6669_v56  ;;  %v889_v2 = vadd.f32 %v888_v22, %v887_v15  ;;  %v10297_v17 = vld [vmem:[#allocation177_spill] sm:$0xff]  ;;  %v10309_v15 = vld [vmem:[#allocation132_spill] sm:$0xff] }
 0x1f7   :  { %v6619_v8 = vsel %vm10259_vm4, %v6431_v47, 0.0  ;;  %vm10260_vm2 = vmmov %vm10257_vm0  ;;  %vm10287_vm4 = vcmp.eq.s32.totalorder %v10286_v62, 0  ;;  %v10370_v56 = vld [vmem:[#allocation145_spill] sm:$0xff] }
 0x1f8   :  { %v6623_v34 = vsel %vm10260_vm2, %v6495_v36, 0.0  ;;  %vm10261_vm13 = vmmov %vm10257_vm0  ;;  %v935_v25 = vsel %vm10287_vm4, %v10285_v12, 0.0  ;;  %vm10290_vm2 = vcmp.eq.s32.totalorder %v10289_v58, 0  ;;  %v10303_v58 = vld [vmem:[#allocation129_spill] sm:$0xff]  ;;  %v891_v62 = vadd.f32 %v890_v4, %v889_v2 }
 0x1f9   :  { %v6627_v29 = vsel %vm10261_vm13, %v6510_v23, 0.0  ;;  %vm10262_vm6 = vmmov %vm10257_vm0  ;;  %vm10291_vm13 = vcmask 7168  }
 0x1fa   :  { %v6631_v60 = vsel %vm10262_vm6, %v6520_v41, 0.0  ;;  %vm10263_vm3 = vmmov %vm10257_vm0  ;;  %v10268_v41 = vld [vmem:[#allocation147_spill] sm:$0xff]  ;;  %v893_v2 = vadd.f32 %v892_v31, %v891_v62  ;;  %v10341_v62 = vld [vmem:[#allocation181_spill] sm:$0xff] }
 0x1fb   :  { %v6635_v10 = vsel %vm10263_vm3, %v6529_v24, 0.0  ;;  %vm10264_vm8 = vmmov %vm10257_vm0  ;;  %v932_v63 = vsel %vm10270_vm9, %v10268_v41, 0.0  ;;  %v10271_v24 = vld [vmem:[#allocation143_spill] sm:$0xff] }
 0x1fc   :  { %v6639_v47 = vsel %vm10264_vm8, %v6534_v52, 0.0  ;;  %vm10265_vm5 = vmmov %vm10257_vm0  ;;  %v933_v51 = vsel %vm10273_vm1, %v10271_v24, 0.0  ;;  %v10274_v52 = vld [vmem:[#allocation164_spill] sm:$0xff]  ;;  %vm10296_vm8 = vcmp.eq.s32.totalorder %v10295_v16, 0  ;;  %v10310_v16 = vld [vmem:[#allocation21_spill] sm:$0xff]  ;;  %v895_v26 = vadd.f32 %v894_v61, %v893_v2 }
 0x1fd   :  { %v6642_v36 = vsel %vm10265_vm5, %v856_v50, 0.0  ;;  %vm10266_vm10 = vmmov %vm10257_vm0  ;;  %v934_v50 = vsel %vm10276_vm12, %v10274_v52, 0.0  ;;  %vm10299_vm5 = vcmp.eq.s32.totalorder %v10298_v20, 0  ;;  %vm10311_vm1 = vcmp.eq.s32.totalorder %v10310_v16, 0  ;;  %v10312_v20 = vld [vmem:[#allocation185_spill] sm:$0xff]  ;;  %v10338_v24 = vld [vmem:[#allocation178_spill] sm:$0xff] }
 0x1fe   :  { %v6645_v23 = vsel %vm10266_vm10, %v857_v53, 0.0  ;;  %vm10267_vm15 = vmmov %vm10257_vm0  ;;  %v938_v32 = vsel %vm10299_vm5, %v10297_v17, 0.0  ;;  %vm10302_vm10 = vcmp.eq.s32.totalorder %v10301_v37, 0  ;;  %v10313_v17 = vld [vmem:[#allocation10_spill] sm:$0xff]  ;;  %v10316_v37 = vld [vmem:[#allocation23_spill] sm:$0xff] }
 0x1ff   :  { %v6648_v13 = vsel %vm10267_vm15, %v858_v28, 0.0  ;;  %vm10279_vm11 = vmmov %vm10257_vm0  ;;  %v939_v48 = vsel %vm10302_vm10, %v10300_v57, 0.0  ;;  %vm10314_vm12 = vcmp.eq.s32.totalorder %v10313_v17, 0  ;;  %v10326_v17 = vld [vmem:[#allocation53_spill] sm:$0xff]  ;;  %v10358_v2 = vld [vmem:[#allocation72_spill] sm:$0xff] }
 0x200   :  { %v6663_v53 = vsel %vm10279_vm11, %v859_v54, 0.0  ;;  %vm10280_vm14 = vmmov %vm10257_vm0  ;;  %v936_v54 = vsel %vm10290_vm2, %v10288_v11, 0.0  ;;  %v10306_v11 = vld [vmem:[#allocation183_spill] sm:$0xff]  ;;  %vm10317_vm11 = vcmp.eq.s32.totalorder %v10316_v37, 0 }
 0x201   :  { %v6666_v28 = vsel %vm10280_vm14, %v860_v9, 0.0  ;;  %vm10283_vm7 = vmmov %vm10257_vm0  ;;  %v965_v9 = vsel %vm10291_vm13, %v932_v63, 0.0  ;;  %v10304_v63 = vld [vmem:[#allocation19_spill] sm:$0xff] }
 0x202   :  { %v6674_v1 = vsel %vm10283_vm7, %v862_v7, 0.0  ;;  %vm10292_vm6 = vmmov %vm10291_vm13  ;;  %v937_v7 = vsel %vm10296_vm8, %v10294_v18, 0.0  ;;  %vm10305_vm15 = vcmp.eq.s32.totalorder %v10304_v63, 0  ;;  %v942_v18 = vsel %vm10311_vm1, %v10309_v15, 0.0  ;;  %v10318_v63 = vld [vmem:[#allocation47_spill] sm:$0xff] }
 0x203   :  { %10284 = vst [vmem:[#allocation64_spill] sm:$0xff] %v6674_v1  ;;  %v966_v45 = vsel %vm10292_vm6, %v933_v51, 0.0  ;;  %vm10293_vm3 = vmmov %vm10292_vm6  ;;  %v940_v51 = vsel %vm10305_vm15, %v10303_v58, 0.0  ;;  %v10319_v58 = vld [vmem:[#allocation12_spill] sm:$0xff]  ;;  %v10329_v37 = vld [vmem:[#allocation163_spill] sm:$0xff] }
 0x204   :  { %v968_v0 = vsel %vm10293_vm3, %v934_v50, 0.0  ;;  %v967_v30 = vadd.f32 %v966_v45, %v965_v9  ;;  %v10307_v50 = vld [vmem:[#allocation8_spill] sm:$0xff]  ;;  %v943_v9 = vsel %vm10314_vm12, %v10312_v20, 0.0  ;;  %v10315_v45 = vld [vmem:[#allocation51_spill] sm:$0xff]  ;;  %vm10320_vm14 = vcmp.eq.s32.totalorder %v10319_v58, 0  ;;  %vm10324_vm7 = vmmov %vm10293_vm3 }
 0x205   :  { %vm10308_vm9 = vcmp.eq.s32.totalorder %v10307_v50, 0  ;;  %v944_v57 = vsel %vm10317_vm11, %v10315_v45, 0.0  ;;  %v945_v40 = vsel %vm10320_vm14, %v10318_v63, 0.0  ;;  %v10321_v50 = vld [vmem:[#allocation59_spill] sm:$0xff]  ;;  %v970_v16 = vsel %vm10324_vm7, %v935_v25, 0.0  ;;  %vm10325_vm4 = vmmov %vm10293_vm3  ;;  %v10327_v20 = vld [vmem:[#allocation14_spill] sm:$0xff] }
 0x206   :  { %v941_v22 = vsel %vm10308_vm9, %v10306_v11, 0.0  ;;  %v969_v12 = vadd.f32 %v968_v0, %v967_v30  ;;  %v10322_v11 = vld [vmem:[#allocation26_spill] sm:$0xff]  ;;  %v972_v4 = vsel %vm10325_vm4, %v936_v54, 0.0  ;;  %vm10328_vm2 = vcmp.eq.s32.totalorder %v10327_v20, 0  ;;  %v10330_v45 = vld [vmem:[#allocation33_spill] sm:$0xff]  ;;  %v10333_v63 = vld [vmem:[#allocation35_spill] sm:$0xff] }
 0x207   :  { %vm10323_vm0 = vcmp.eq.s32.totalorder %v10322_v11, 0  ;;  %v947_v15 = vsel %vm10328_vm2, %v10326_v17, 0.0  ;;  %vm10331_vm13 = vcmp.eq.s32.totalorder %v10330_v45, 0  ;;  %v10332_v58 = vld [vmem:[#allocation170_spill] sm:$0xff]  ;;  %vm10334_vm6 = vcmp.eq.s32.totalorder %v10333_v63, 0  ;;  %v10335_v11 = vld [vmem:[#allocation167_spill] sm:$0xff]  ;;  %vm10356_vm12 = vmmov %vm10325_vm4 }
 0x208   :  { %v946_v52 = vsel %vm10323_vm0, %v10321_v50, 0.0  ;;  %v948_v30 = vsel %vm10331_vm13, %v10329_v37, 0.0  ;;  %v971_v0 = vadd.f32 %v970_v16, %v969_v12  ;;  %v950_v35 = vsel %vm10334_vm6, %v10332_v58, 0.0  ;;  %v10336_v50 = vld [vmem:[#allocation18_spill] sm:$0xff]  ;;  %v10339_v54 = vld [vmem:[#allocation37_spill] sm:$0xff]  ;;  %v10342_v20 = vld [vmem:[#allocation20_spill] sm:$0xff] }
 0x209   :  { %vm10337_vm3 = vcmp.eq.s32.totalorder %v10336_v50, 0  ;;  %vm10340_vm8 = vcmp.eq.s32.totalorder %v10339_v54, 0  ;;  %vm10343_vm5 = vcmp.eq.s32.totalorder %v10342_v20, 0  ;;  %v10344_v45 = vld [vmem:[#allocation106_spill] sm:$0xff]  ;;  %v10347_v16 = vld [vmem:[#allocation45_spill] sm:$0xff]  ;;  %v974_v20 = vsel %vm10356_vm12, %v937_v7, 0.0  ;;  %vm10357_vm11 = vmmov %vm10325_vm4 }
 0x20a   :  { %v951_v25 = vsel %vm10337_vm3, %v10335_v11, 0.0  ;;  %v952_v31 = vsel %vm10340_vm8, %v10338_v24, 0.0  ;;  %v953_v17 = vsel %vm10343_vm5, %v10341_v62, 0.0  ;;  %v10345_v37 = vld [vmem:[#allocation38_spill] sm:$0xff]  ;;  %v973_v41 = vadd.f32 %v972_v4, %v971_v0  ;;  %v10351_v11 = vld [vmem:[#allocation39_spill] sm:$0xff]  ;;  %v10354_v24 = vld [vmem:[#allocation24_spill] sm:$0xff] }
 0x20b   :  { %vm10346_vm10 = vcmp.eq.s32.totalorder %v10345_v37, 0  ;;  %v10348_v63 = vld [vmem:[#allocation22_spill] sm:$0xff]  ;;  %vm10352_vm9 = vcmp.eq.s32.totalorder %v10351_v11, 0  ;;  %vm10355_vm1 = vcmp.eq.s32.totalorder %v10354_v24, 0  ;;  %v976_v61 = vsel %vm10357_vm11, %v938_v32, 0.0  ;;  %v10359_v37 = vld [vmem:[#allocation71_spill] sm:$0xff] }
 0x20c   :  { %v954_v12 = vsel %vm10346_vm10, %v10344_v45, 0.0  ;;  %vm10349_vm15 = vcmp.eq.s32.totalorder %v10348_v63, 0  ;;  %v10350_v50 = vld [vmem:[#allocation110_spill] sm:$0xff]  ;;  %vm1195_vm14 = vcmp.eq.s32.totalorder %v10358_v2, 1  ;;  %vm1194_vm0 = vcmp.eq.s32.totalorder %v10359_v37, 1  ;;  %v10361_v4 = vld [vmem:[#allocation40_spill] sm:$0xff] }
 0x20d   :  { %v955_v58 = vsel %vm10349_vm15, %v10347_v16, 0.0  ;;  %v956_v1 = vsel %vm10352_vm9, %v10350_v50, 0.0  ;;  %v10353_v54 = vld [vmem:[#allocation134_spill] sm:$0xff]  ;;  %v897_v63 = vadd.f32 %v6610_v6, %v895_v26  ;;  %v10360_v16 = vld [vmem:[#allocation115_spill] sm:$0xff]  ;;  %vm10362_vm7 = vcmp.eq.s32.totalorder %v10361_v4, 0  ;;  %v10364_v50 = vld [vmem:[#allocation28_spill] sm:$0xff] }
 0x20e   :  { %v957_v49 = vsel %vm10355_vm1, %v10353_v54, 0.0  ;;  %v958_v0 = vsel %vm10362_vm7, %v10360_v16, 0.0  ;;  %v10363_v11 = vld [vmem:[#allocation127_spill] sm:$0xff]  ;;  %vm10365_vm4 = vcmp.eq.s32.totalorder %v10364_v50, 0  ;;  %v975_v24 = vadd.f32 %v974_v20, %v973_v41  ;;  %v10366_v54 = vld [vmem:[#allocation73_spill] sm:$0xff]  ;;  %v10367_v7 = vld [vmem:[#allocation144_spill] sm:$0xff] }
 0x20f   :  { %v959_v45 = vsel %vm10365_vm4, %v10363_v11, 0.0  ;;  %vm1196_vm2 = vcmp.eq.s32.totalorder %v10366_v54, 1  ;;  %v10368_v62 = vld [vmem:[#allocation41_spill] sm:$0xff]  ;;  %vm10372_vm6 = vcmp.eq.s32.totalorder %v10371_v38, 0  ;;  %v10373_v6 = vld [vmem:[#allocation42_spill] sm:$0xff]  ;;  %v10376_v16 = vld [vmem:[#allocation36_spill] sm:$0xff]  ;;  %v899_v20 = vadd.f32 %v6614_v46, %v897_v63 }
 0x210   :  { %vm10369_vm13 = vcmp.eq.s32.totalorder %v10368_v62, 0  ;;  %v961_v14 = vsel %vm10372_vm6, %v10370_v56, 0.0  ;;  %vm10374_vm3 = vcmp.eq.s32.totalorder %v10373_v6, 0  ;;  %v10375_v4 = vld [vmem:[#allocation54_spill] sm:$0xff]  ;;  %vm10377_vm8 = vcmp.eq.s32.totalorder %v10376_v16, 0  ;;  %v10379_v41 = vld [vmem:[#allocation75_spill] sm:$0xff]  ;;  %vm10380_vm15 = vmmov %vm10357_vm11 }
 0x211   :  { %v960_v32 = vsel %vm10369_vm13, %v10367_v7, 0.0  ;;  %v962_v26 = vsel %vm10374_vm3, %v6416_v43, 0.0  ;;  %v963_v50 = vsel %vm10377_vm8, %v10375_v4, 0.0  ;;  %v10378_v11 = vld [vmem:[#allocation74_spill] sm:$0xff]  ;;  %vm1198_vm10 = vcmp.eq.s32.totalorder %v10379_v41, 1  ;;  %vm10381_vm9 = vmmov %vm10357_vm11  ;;  %v10386_v4 = vld [vmem:[#allocation76_spill] sm:$0xff] }
 0x212   :  { %vm1197_vm5 = vcmp.eq.s32.totalorder %v10378_v11, 1  ;;  %v977_v62 = vadd.f32 %v976_v61, %v975_v24  ;;  %v978_v7 = vsel %vm10380_vm15, %v939_v48, 0.0  ;;  %v980_v38 = vsel %vm10381_vm9, %v940_v51, 0.0  ;;  %vm10382_vm1 = vmmov %vm10381_vm9  ;;  %v10390_v51 = vld [vmem:[#allocation78_spill] sm:$0xff]  ;;  %v10400_v61 = vld [vmem:[#allocation81_spill] sm:$0xff] }
 0x213   :  { %v982_v56 = vsel %vm10382_vm1, %v941_v22, 0.0  ;;  %vm10383_vm12 = vmmov %vm10382_vm1  ;;  %vm1199_vm4 = vcmp.eq.s32.totalorder %v10386_v4, 1  ;;  %vm1200_vm13 = vcmp.eq.s32.totalorder %v10387_v33, 1  ;;  %v901_v46 = vadd.f32 %v6619_v8, %v899_v20  ;;  %v10433_v54 = vld [vmem:[#allocation29_spill] sm:$0xff]  ;;  %v10437_v11 = vld [vmem:[#allocation30_spill] sm:$0xff] }
 0x214   :  { %v984_v6 = vsel %vm10383_vm12, %v942_v18, 0.0  ;;  %vm10384_vm11 = vmmov %vm10382_vm1  ;;  %v979_v24 = vadd.f32 %v978_v7, %v977_v62  ;;  %vm1201_vm8 = vcmp.eq.s32.totalorder %v10390_v51, 1  ;;  %v10391_v18 = vld [vmem:[#allocation79_spill] sm:$0xff]  ;;  %v6797_v22 = vsel %vm10382_vm1, %v948_v30, 0.0  ;;  %v10398_v62 = vld [vmem:[#allocation80_spill] sm:$0xff] }
 0x215   :  { %v986_v43 = vsel %vm10384_vm11, %v943_v9, 0.0  ;;  %vm10385_vm7 = vmmov %vm10382_vm1  ;;  %v10393_v9 = vld [vmem:[#allocation162_spill] sm:$0xff]  ;;  %v903_v7 = vadd.f32 %v6623_v34, %v901_v46  ;;  %v6814_v30 = vsel %vm10382_vm1, %v952_v31, 0.0  ;;  %v10407_v34 = vld [vmem:[#allocation84_spill] sm:$0xff]  ;;  %v1228_v37 = vsel %vm1196_vm2, %v10236_v3, 0.0 }
 0x216   :  { %v6780_v16 = vsel %vm10385_vm7, %v944_v57, 0.0  ;;  %vm10388_vm6 = vmmov %vm10382_vm1  ;;  %v10436_v3 = vld [vmem:[#allocation32_spill] sm:$0xff]  ;;  %v10454_v51 = vld [vmem:[#allocation93_spill] sm:$0xff] }
 0x217   :  { %v6786_v48 = vsel %vm10388_vm6, %v945_v40, 0.0  ;;  %vm10389_vm3 = vmmov %vm10382_vm1  ;;  %v905_v31 = vadd.f32 %v6627_v29, %v903_v7  ;;  %v1226_v29 = vsel %vm1194_vm0, %v10235_v5, 0.0  ;;  %v10421_v7 = vld [vmem:[#allocation27_spill] sm:$0xff] }
 0x218   :  { %v6789_v63 = vsel %vm10389_vm3, %v946_v52, 0.0  ;;  %vm10392_vm9 = vmmov %vm10382_vm1  ;;  %v10399_v52 = vld [vmem:[#allocation82_spill] sm:$0xff] }
 0x219   :  { %v6794_v57 = vsel %vm10392_vm9, %v947_v15, 0.0  ;;  %vm10394_vm12 = vmmov %vm10382_vm1  ;;  %v981_v15 = vadd.f32 %v980_v38, %v979_v24  ;;  %v10408_v38 = vld [vmem:[#allocation83_spill] sm:$0xff] }
 0x21a   :  { %v6801_v8 = vsel %vm10394_vm12, %v10393_v9, 0.0  ;;  %vm10396_vm11 = vmmov %vm10382_vm1  ;;  %v10414_v24 = vld [vmem:[#allocation87_spill] sm:$0xff] }
 0x21b   :  { %10395 = vst [vmem:[#allocation155_spill] sm:$0xff] %v6801_v8  ;;  %v6804_v40 = vsel %vm10396_vm11, %v950_v35, 0.0  ;;  %vm10401_vm9 = vmmov %vm10382_vm1  ;;  %v983_v46 = vadd.f32 %v982_v56, %v981_v15  ;;  %v10419_v56 = vld [vmem:[#allocation159_spill] sm:$0xff]  ;;  %v10422_v15 = vld [vmem:[#allocation89_spill] sm:$0xff] }
 0x21c   :  { %10397 = vst [vmem:[#allocation63_spill] sm:$0xff] %v6804_v40  ;;  %v6811_v20 = vsel %vm10401_vm9, %v951_v25, 0.0  ;;  %vm10402_vm12 = vmmov %vm10382_vm1  ;;  %vm1206_vm9 = vcmp.eq.s32.totalorder %v10408_v38, 1  ;;  %v10409_v25 = vld [vmem:[#allocation85_spill] sm:$0xff] }
 0x21d   :  { %v6817_v9 = vsel %vm10402_vm12, %v953_v17, 0.0  ;;  %vm10403_vm11 = vmmov %vm10382_vm1  ;;  %vm1208_vm15 = vcmp.eq.s32.totalorder %v10409_v25, 1  ;;  %v6833_v17 = vsel %vm10382_vm1, %v957_v49, 0.0  ;;  %v1227_v49 = vsel %vm1195_vm14, %v10419_v56, 0.0  ;;  %v10429_v56 = vld [vmem:[#allocation161_spill] sm:$0xff] }
 0x21e   :  { %v6820_v35 = vsel %vm10403_vm11, %v954_v12, 0.0  ;;  %vm10404_vm7 = vmmov %vm10382_vm1  ;;  %10410 = vst [vmem:[#allocation149_spill] sm:$0xff] %v6833_v17  ;;  %v10451_v17 = vld [vmem:[#allocation44_spill] sm:$0xff] }
 0x21f   :  { %v6823_v40 = vsel %vm10404_vm7, %v955_v58, 0.0  ;;  %vm10405_vm6 = vmmov %vm10382_vm1  ;;  %v10413_v58 = vld [vmem:[#allocation86_spill] sm:$0xff] }
 0x220   :  { %v6826_v8 = vsel %vm10405_vm6, %v956_v1, 0.0  ;;  %vm10411_vm12 = vmmov %vm10382_vm1  ;;  %vm1209_vm7 = vcmp.eq.s32.totalorder %v10413_v58, 1  ;;  %vm1212_vm6 = vcmp.eq.s32.totalorder %v10422_v15, 1 }
 0x221   :  { %10406 = vst [vmem:[#allocation65_spill] sm:$0xff] %v6826_v8  ;;  %v6836_v12 = vsel %vm10411_vm12, %v958_v0, 0.0  ;;  %vm10415_vm11 = vmmov %vm10382_vm1  ;;  %v10420_v0 = vld [vmem:[#allocation88_spill] sm:$0xff]  ;;  %vm1217_vm12 = vcmp.eq.s32.totalorder %v10436_v3, 1 }
 0x222   :  { %10412 = vst [vmem:[#allocation156_spill] sm:$0xff] %v6836_v12  ;;  %v6841_v1 = vsel %vm10415_vm11, %v959_v45, 0.0  ;;  %vm10417_vm3 = vmmov %vm10382_vm1  ;;  %vm1211_vm1 = vcmp.eq.s32.totalorder %v10420_v0, 1  ;;  %v907_v45 = vadd.f32 %v6631_v60, %v905_v31  ;;  %v10430_v12 = vld [vmem:[#allocation173_spill] sm:$0xff] }
 0x223   :  { %10416 = vst [vmem:[#allocation66_spill] sm:$0xff] %v6841_v1  ;;  %v6844_v8 = vsel %vm10417_vm3, %v960_v32, 0.0  ;;  %v985_v1 = vadd.f32 %v984_v6, %v983_v46  ;;  %vm10423_vm11 = vmmov %vm10417_vm3  ;;  %v1230_v60 = vsel %vm1198_vm10, %v10430_v12, 0.0  ;;  %v10432_v6 = vld [vmem:[#allocation25_spill] sm:$0xff]  ;;  %v10439_v12 = vld [vmem:[#allocation180_spill] sm:$0xff] }
 0x224   :  { %10418 = vst [vmem:[#allocation157_spill] sm:$0xff] %v6844_v8  ;;  %v6857_v32 = vsel %vm10423_vm11, %v961_v14, 0.0  ;;  %vm10425_vm0 = vmmov %vm10417_vm3  ;;  %v1229_v8 = vsel %vm1197_vm5, %v10429_v56, 0.0  ;;  %v10431_v14 = vld [vmem:[#allocation31_spill] sm:$0xff]  ;;  %vm1214_vm11 = vcmp.eq.s32.totalorder %v10432_v6, 1  ;;  %vm1218_vm5 = vcmp.eq.s32.totalorder %v10437_v11, 1 }
 0x225   :  { %10424 = vst [vmem:[#allocation68_spill] sm:$0xff] %v6857_v32  ;;  %v6863_v5 = vsel %vm10425_vm0, %v962_v26, 0.0  ;;  %vm10427_vm14 = vmmov %vm10425_vm0  ;;  %vm1215_vm3 = vcmp.eq.s32.totalorder %v10431_v14, 1  ;;  %v909_v26 = vadd.f32 %v6635_v10, %v907_v45  ;;  %v987_v31 = vadd.f32 %v986_v43, %v985_v1  ;;  %v10438_v56 = vld [vmem:[#allocation176_spill] sm:$0xff]  ;;  %v10441_v43 = vld [vmem:[#allocation90_spill] sm:$0xff] }
 0x226   :  { %10426 = vst [vmem:[#allocation67_spill] sm:$0xff] %v6863_v5  ;;  %v6866_v2 = vsel %vm10427_vm14, %v963_v50, 0.0  ;;  %vm10434_vm0 = vcmask 261120   ;;  %v1231_v41 = vsel %vm1199_vm4, %v10438_v56, 0.0  ;;  %v10442_v1 = vld [vmem:[#allocation92_spill] sm:$0xff]  ;;  %v10444_v32 = vld [vmem:[#allocation101_spill] sm:$0xff] }
 0x227   :  { %10428 = vst [vmem:[#allocation160_spill] sm:$0xff] %v6866_v2  ;;  %v1258_v50 = vsel %vm10434_vm0, %v1226_v29, 0.0  ;;  %vm10435_vm14 = vmmov %vm10434_vm0  ;;  %v1232_v2 = vsel %vm1200_vm13, %v10439_v12, 0.0  ;;  %v10443_v29 = vld [vmem:[#allocation91_spill] sm:$0xff]  ;;  %v989_v45 = vadd.f32 %v6780_v16, %v987_v31  ;;  %v1233_v4 = vsel %vm1201_vm8, %v10444_v32, 0.0  ;;  %v10459_v32 = vld [vmem:[#allocation136_spill] sm:$0xff] }
 0x228   :  { %v1259_v46 = vsel %vm10435_vm14, %v1227_v49, 0.0  ;;  %vm10440_vm10 = vmmov %vm10434_vm0  ;;  %v911_v49 = vadd.f32 %v6639_v47, %v909_v26  ;;  %v10445_v56 = vld [vmem:[#allocation43_spill] sm:$0xff]  ;;  %vm10446_vm4 = vcmp.eq.s32.totalorder %v10391_v18, 1  ;;  %vm10448_vm13 = vcmp.eq.s32.totalorder %v10398_v62, 1  ;;  %v10453_v26 = vld [vmem:[#allocation94_spill] sm:$0xff] }
 0x229   :  { %v1260_v5 = vadd.f32 %v1259_v46, %v1258_v50  ;;  %v1261_v10 = vsel %vm10440_vm10, %v1228_v37, 0.0  ;;  %v1234_v33 = vsel %vm10446_vm4, %v10445_v56, 0.0  ;;  %v10447_v50 = vld [vmem:[#allocation46_spill] sm:$0xff]  ;;  %v10449_v46 = vld [vmem:[#allocation184_spill] sm:$0xff]  ;;  %vm10450_vm10 = vcmp.eq.s32.totalorder %v10400_v61, 1  ;;  %v10455_v31 = vld [vmem:[#allocation95_spill] sm:$0xff] }
 0x22a   :  { %v1235_v37 = vsel %vm10448_vm13, %v10447_v50, 0.0  ;;  %v1236_v12 = vsel %vm10450_vm10, %v10449_v46, 0.0  ;;  %vm10452_vm0 = vcmp.eq.s32.totalorder %v10399_v52, 1  ;;  %vm1223_vm14 = vcmp.eq.s32.totalorder %v10453_v26, 1  ;;  %v10458_v46 = vld [vmem:[#allocation96_spill] sm:$0xff]  ;;  %v10460_v52 = vld [vmem:[#allocation117_spill] sm:$0xff] }
 0x22b   :  { %v1237_v47 = vsel %vm10452_vm0, %v10451_v17, 0.0  ;;  %v1262_v16 = vadd.f32 %v1261_v10, %v1260_v5  ;;  %vm1222_vm8 = vcmp.eq.s32.totalorder %v10454_v51, 1  ;;  %vm1224_vm2 = vcmp.eq.s32.totalorder %v10455_v31, 1  ;;  %v10463_v17 = vld [vmem:[#allocation168_spill] sm:$0xff] }
 0x22c   :  { %v913_v18 = vadd.f32 %v6642_v36, %v911_v49  ;;  %v991_v62 = vadd.f32 %v6786_v48, %v989_v45  ;;  %vm10456_vm4 = vcmask 261120   ;;  %vm1225_vm10 = vcmp.eq.s32.totalorder %v10458_v46, 1 }
 0x22d   :  { %v1263_v50 = vsel %vm10456_vm4, %v1229_v8, 0.0  ;;  %vm10457_vm13 = vmmov %vm10456_vm4  ;;  %v1238_v5 = vsel %vm1206_vm9, %v10459_v32, 0.0  ;;  %vm10461_vm0 = vcmp.eq.s32.totalorder %v10407_v34, 1  ;;  %v1240_v36 = vsel %vm1208_vm15, %v6299_v59, 0.0  ;;  %v10465_v32 = vld [vmem:[#allocation148_spill] sm:$0xff] }
 0x22e   :  { %v1265_v61 = vsel %vm10457_vm13, %v1230_v60, 0.0  ;;  %v1239_v10 = vsel %vm10461_vm0, %v10460_v52, 0.0  ;;  %v1264_v49 = vadd.f32 %v1263_v50, %v1262_v16  ;;  %v915_v48 = vadd.f32 %v6645_v23, %v913_v18  ;;  %v10462_v60 = vld [vmem:[#allocation141_spill] sm:$0xff]  ;;  %v10466_v52 = vld [vmem:[#allocation175_spill] sm:$0xff]  ;;  %vm10486_vm13 = vmmov %vm10456_vm4 }
 0x22f   :  { %v993_v8 = vadd.f32 %v6789_v63, %v991_v62  ;;  %v1241_v45 = vsel %vm1209_vm7, %v10462_v60, 0.0  ;;  %vm10464_vm9 = vcmp.eq.s32.totalorder %v10414_v24, 1  ;;  %v1243_v34 = vsel %vm1211_vm1, %v10465_v32, 0.0  ;;  %v10467_v50 = vld [vmem:[#allocation171_spill] sm:$0xff]  ;;  %vm10469_vm7 = vmmov %vm10456_vm4  ;;  %v10470_v62 = vld [vmem:[#allocation182_spill] sm:$0xff] }
 0x230   :  { %v1242_v38 = vsel %vm10464_vm9, %v10463_v17, 0.0  ;;  %v1244_v25 = vsel %vm1212_vm6, %v10466_v52, 0.0  ;;  %vm10468_vm15 = vcmp.eq.s32.totalorder %v10421_v7, 1  ;;  %v1266_v63 = vadd.f32 %v1265_v61, %v1264_v49  ;;  %vm10488_vm0 = vmmov %vm10456_vm4  ;;  %v10546_v32 = vld [vmem:[#allocation19_spill] sm:$0xff]  ;;  %v10549_v17 = vld [vmem:[#allocation8_spill] sm:$0xff] }
 0x231   :  { %v1245_v23 = vsel %vm10468_vm15, %v10467_v50, 0.0  ;;  %v917_v58 = vadd.f32 %v6648_v13, %v915_v48  ;;  %v995_v16 = vadd.f32 %v6794_v57, %v993_v8  ;;  %v1267_v24 = vsel %vm10469_vm7, %v1231_v41, 0.0  ;;  %v10475_v41 = vld [vmem:[#allocation155_spill] sm:$0xff]  ;;  %v10478_v8 = vld [vmem:[#allocation146_spill] sm:$0xff]  ;;  %vm10491_vm9 = vmmov %vm10488_vm0 }
 0x232   :  { %v1269_v18 = vsel %vm10456_vm4, %v1232_v2, 0.0  ;;  %v1246_v0 = vsel %vm1214_vm11, %v10470_v62, 0.0  ;;  %v1247_v15 = vsel %vm1215_vm3, %v6000_v42, 0.0  ;;  %vm10471_vm6 = vcmp.eq.s32.totalorder %v10433_v54, 1  ;;  %vm10494_vm15 = vmmov %vm10488_vm0  ;;  %v10541_v42 = vld [vmem:[#allocation17_spill] sm:$0xff]  ;;  %v10548_v60 = vld [vmem:[#allocation183_spill] sm:$0xff] }
 0x233   :  { %v1248_v7 = vsel %vm10471_vm6, %v6079_v21, 0.0  ;;  %v1268_v61 = vadd.f32 %v1267_v24, %v1266_v63  ;;  %v919_v13 = vadd.f32 %v6663_v53, %v917_v58  ;;  %v997_v57 = vadd.f32 %v6797_v22, %v995_v16  ;;  %v10479_v63 = vld [vmem:[#allocation56_spill] sm:$0xff]  ;;  %v10480_v58 = vld [vmem:[#allocation151_spill] sm:$0xff]  ;;  %v10482_v24 = vld [vmem:[#allocation62_spill] sm:$0xff] }
 0x234   :  { %v1249_v2 = vsel %vm1217_vm12, %v6085_v27, 0.0  ;;  %v1250_v6 = vsel %vm1218_vm5, %v6209_v39, 0.0  ;;  %vm10472_vm1 = vcmp.eq.s32.totalorder %v10441_v43, 1  ;;  %vm10473_vm3 = vcmp.eq.s32.totalorder %v10443_v29, 1  ;;  %vm10476_vm12 = vmmov %vm10456_vm4  ;;  %v10540_v39 = vld [vmem:[#allocation179_spill] sm:$0xff]  ;;  %v10545_v62 = vld [vmem:[#allocation129_spill] sm:$0xff] }
 0x235   :  { %v1251_v14 = vsel %vm10472_vm1, %v6176_v19, 0.0  ;;  %v1252_v54 = vsel %vm10473_vm3, %v6329_v55, 0.0  ;;  %vm10474_vm11 = vcmp.eq.s32.totalorder %v10442_v1, 1  ;;  %v1270_v22 = vadd.f32 %v1269_v18, %v1268_v61  ;;  %vm10477_vm5 = vmmov %vm10456_vm4  ;;  %v10534_v19 = vld [vmem:[#allocation177_spill] sm:$0xff]  ;;  %v10535_v55 = vld [vmem:[#allocation15_spill] sm:$0xff] }
 0x236   :  { %v1253_v53 = vsel %vm10474_vm11, %v6275_v44, 0.0  ;;  %v921_v3 = vadd.f32 %v6666_v28, %v919_v13  ;;  %v999_v49 = vadd.f32 %v10475_v41, %v997_v57  ;;  %v1271_v11 = vsel %vm10476_vm12, %v1233_v4, 0.0  ;;  %v6986_v28 = vpop.permute.xlu0 %1586  ;;  %v10483_v4 = vld [vmem:[#allocation63_spill] sm:$0xff]  ;;  %vm10495_vm7 = vmmov %vm10488_vm0 }
 0x237   :  { %v1273_v48 = vsel %vm10477_vm5, %v1234_v33, 0.0  ;;  %v1254_v43 = vsel %vm1222_vm8, %v10478_v8, 0.0  ;;  %v1255_v29 = vsel %vm1223_vm14, %v10479_v63, 0.0  ;;  %v1256_v1 = vsel %vm1224_vm2, %v10480_v58, 0.0  ;;  %10481 = vst [vmem:[#allocation69_spill] sm:$0xff] %v6986_v28  ;;  %v10484_v33 = vld [vmem:[#allocation55_spill] sm:$0xff]  ;;  %vm10485_vm8 = vmmov %vm10456_vm4 }
 0x238   :  { %v1272_v16 = vadd.f32 %v1271_v11, %v1270_v22  ;;  %v923_v18 = vadd.f32 %v10482_v24, %v921_v3  ;;  %v1001_v61 = vadd.f32 %v10483_v4, %v999_v49  ;;  %v1257_v51 = vsel %vm1225_vm10, %v10484_v33, 0.0  ;;  %vm10487_vm14 = vmmov %vm10456_vm4  ;;  %v10489_v22 = vld [vmem:[#allocation64_spill] sm:$0xff]  ;;  %v7001_v24 = vpop.permute.xlu1 %1899  ;;  %v10514_v4 = vld [vmem:[#allocation6_spill] sm:$0xff] }
 0x239   :  { %v1275_v13 = vsel %vm10485_vm8, %v1235_v37, 0.0  ;;  %v1277_v26 = vsel %vm10486_vm13, %v1236_v12, 0.0  ;;  %v1279_v41 = vsel %vm10487_vm14, %v1237_v47, 0.0  ;;  %v1281_v31 = vsel %vm10488_vm0, %v1238_v5, 0.0  ;;  %vm10490_vm2 = vmmov %vm10488_vm0  ;;  %10492 = vst [vmem:[#allocation70_spill] sm:$0xff] %v7001_v24  ;;  %v10531_v63 = vld [vmem:[#allocation172_spill] sm:$0xff] }
 0x23a   :  { %v1274_v57 = vadd.f32 %v1273_v48, %v1272_v16  ;;  %v925_v11 = vadd.f32 %v10489_v22, %v923_v18  ;;  %v1003_v58 = vadd.f32 %v6811_v20, %v1001_v61  ;;  %v1283_v3 = vsel %vm10490_vm2, %v1239_v10, 0.0  ;;  %vm10493_vm10 = vmmov %vm10488_vm0  ;;  %v10532_v8 = vld [vmem:[#allocation13_spill] sm:$0xff]  ;;  %v10559_v33 = vld [vmem:[#allocation51_spill] sm:$0xff] }
 0x23b   :  { %v1285_v49 = vsel %vm10491_vm9, %v1240_v36, 0.0  ;;  %v1287_v37 = vsel %vm10493_vm10, %v1241_v45, 0.0  ;;  %v1289_v48 = vsel %vm10494_vm15, %v1242_v38, 0.0  ;;  %v7006_v12 = vsel %vm10495_vm7, %v1243_v34, 0.0  ;;  %vm10496_vm4 = vmmov %vm10488_vm0  ;;  %v10560_v28 = vld [vmem:[#allocation23_spill] sm:$0xff] }
 0x23c   :  { %v1276_v46 = vadd.f32 %v1275_v13, %v1274_v57  ;;  %v1005_v47 = vadd.f32 %v6814_v30, %v1003_v58  ;;  %v7010_v5 = vsel %vm10496_vm4, %v1244_v25, 0.0  ;;  %vm10497_vm6 = vmmov %vm10488_vm0  ;;  %v7027_v30 = vpop.permute.xlu0 %1890  ;;  %v926_v34 = vrot.slane %v925_v11, 4  ;;  %v10520_v57 = vld [vmem:[#allocation5_spill] sm:$0xff] }
 0x23d   :  { %v7013_v20 = vsel %vm10497_vm6, %v1245_v23, 0.0  ;;  %vm10498_vm1 = vmmov %vm10488_vm0  ;;  %10502 = vst [vmem:[#allocation111_spill] sm:$0xff] %v7027_v30  ;;  %vm10515_vm10 = vcmp.eq.s32.totalorder %v10514_v4, 1  ;;  %vm10521_vm7 = vcmp.eq.s32.totalorder %v10520_v57, 1  ;;  %v10556_v30 = vld [vmem:[#allocation10_spill] sm:$0xff] }
 0x23e   :  { %v7016_v10 = vsel %vm10498_vm1, %v1246_v0, 0.0  ;;  %v1278_v36 = vadd.f32 %v1277_v26, %v1276_v46  ;;  %vm10499_vm3 = vmmov %vm10488_vm0  ;;  %v1007_v25 = vadd.f32 %v6817_v9, %v1005_v47  ;;  %v10522_v26 = vld [vmem:[#allocation164_spill] sm:$0xff]  ;;  %v10525_v46 = vld [vmem:[#allocation154_spill] sm:$0xff] }
 0x23f   :  { %v7019_v16 = vsel %vm10499_vm3, %v1247_v15, 0.0  ;;  %vm10500_vm11 = vmmov %vm10488_vm0  ;;  %v10526_v47 = vld [vmem:[#allocation9_spill] sm:$0xff]  ;;  %vm10533_vm3 = vcmp.eq.s32.totalorder %v10532_v8, 1 }
 0x240   :  { %v7022_v45 = vsel %vm10500_vm11, %v1248_v7, 0.0  ;;  %vm10501_vm12 = vmmov %vm10488_vm0  ;;  %v1280_v58 = vadd.f32 %v1279_v41, %v1278_v36  ;;  %v1009_v18 = vadd.f32 %v6820_v35, %v1007_v25  ;;  %vm10527_vm6 = vcmp.eq.s32.totalorder %v10526_v47, 1  ;;  %v10528_v25 = vld [vmem:[#allocation169_spill] sm:$0xff] }
 0x241   :  { %v7025_v38 = vsel %vm10501_vm12, %v1249_v2, 0.0  ;;  %vm10503_vm5 = vmmov %vm10488_vm0  ;;  %v7043_v2 = vsel %vm10488_vm0, %v1254_v43, 0.0  ;;  %v10519_v43 = vld [vmem:[#allocation143_spill] sm:$0xff]  ;;  %v1330_v36 = vsel %vm10527_vm6, %v10525_v46, 0.0  ;;  %v1332_v44 = vsel %vm10533_vm3, %v10531_v63, 0.0 }
 0x242   :  { %v7031_v23 = vsel %vm10503_vm5, %v1250_v6, 0.0  ;;  %vm10504_vm8 = vmmov %vm10488_vm0  ;;  %10508 = vst [vmem:[#allocation139_spill] sm:$0xff] %v7043_v2  ;;  %v1282_v13 = vadd.f32 %v1281_v31, %v1280_v58  ;;  %v1328_v35 = vsel %vm10521_vm7, %v10519_v43, 0.0  ;;  %v1011_v22 = vadd.f32 %v6823_v40, %v1009_v18  ;;  %v10529_v31 = vld [vmem:[#allocation11_spill] sm:$0xff]  ;;  %v7080_v40 = vpop.permute.xlu0 %1896 }
 0x243   :  { %v7034_v0 = vsel %vm10504_vm8, %v1251_v14, 0.0  ;;  %vm10505_vm13 = vmmov %vm10488_vm0  ;;  %v10513_v14 = vld [vmem:[#allocation147_spill] sm:$0xff]  ;;  %vm10530_vm1 = vcmp.eq.s32.totalorder %v10529_v31, 1  ;;  %vm10536_vm11 = vcmp.eq.s32.totalorder %v10535_v55, 1  ;;  %vm10537_vm12 = vcmask 7168   ;;  %10538 = vst [vmem:[#allocation52_spill] sm:$0xff] %v7080_v40 }
 0x244   :  { %v7037_v15 = vsel %vm10505_vm13, %v1252_v54, 0.0  ;;  %vm10506_vm14 = vmmov %vm10488_vm0  ;;  %v1327_v61 = vsel %vm10515_vm10, %v10513_v14, 0.0  ;;  %v7055_v54 = vpop.permute.xlu1 %1905  ;;  %v1284_v58 = vadd.f32 %v1283_v3, %v1282_v13  ;;  %v1333_v27 = vsel %vm10536_vm11, %v10534_v19, 0.0  ;;  %v10553_v40 = vld [vmem:[#allocation21_spill] sm:$0xff]  ;;  %v10566_v2 = vld [vmem:[#allocation59_spill] sm:$0xff] }
 0x245   :  { %v7040_v7 = vsel %vm10506_vm14, %v1253_v53, 0.0  ;;  %vm10509_vm2 = vmmov %vm10488_vm0  ;;  %10516 = vst [vmem:[#allocation140_spill] sm:$0xff] %v7055_v54  ;;  %vm10542_vm5 = vcmp.eq.s32.totalorder %v10541_v42, 1  ;;  %vm10547_vm14 = vcmp.eq.s32.totalorder %v10546_v32, 1  ;;  %v10552_v54 = vld [vmem:[#allocation132_spill] sm:$0xff]  ;;  %vm10561_vm10 = vcmp.eq.s32.totalorder %v10560_v28, 1 }
 0x246   :  { %10507 = vst [vmem:[#allocation135_spill] sm:$0xff] %v7040_v7  ;;  %v7047_v9 = vsel %vm10509_vm2, %v1255_v29, 0.0  ;;  %vm10511_vm9 = vmmov %vm10488_vm0  ;;  %v10523_v29 = vld [vmem:[#allocation7_spill] sm:$0xff]  ;;  %v1334_v21 = vsel %vm10542_vm5, %v10540_v39, 0.0  ;;  %v1286_v50 = vadd.f32 %v1285_v49, %v1284_v58  ;;  %v1335_v52 = vsel %vm10547_vm14, %v10545_v62, 0.0  ;;  %v10608_v7 = vld [vmem:[#allocation134_spill] sm:$0xff] }
 0x247   :  { %10510 = vst [vmem:[#allocation50_spill] sm:$0xff] %v7047_v9  ;;  %v7050_v6 = vsel %vm10511_vm9, %v1256_v1, 0.0  ;;  %vm10517_vm15 = vmmov %vm10488_vm0  ;;  %vm10524_vm4 = vcmp.eq.s32.totalorder %v10523_v29, 1  ;;  %v927_v1 = vadd.f32 %v926_v34, %v925_v11  ;;  %v1359_v11 = vsel %vm10537_vm12, %v1327_v61, 0.0  ;;  %v10539_v34 = vld [vmem:[#allocation65_spill] sm:$0xff]  ;;  %v10632_v42 = vld [vmem:[#allocation67_spill] sm:$0xff] }
 0x248   :  { %10512 = vst [vmem:[#allocation114_spill] sm:$0xff] %v7050_v6  ;;  %v7058_v53 = vsel %vm10517_vm15, %v1257_v51, 0.0  ;;  %v1329_v41 = vsel %vm10524_vm4, %v10522_v26, 0.0  ;;  %v1331_v51 = vsel %vm10530_vm1, %v10528_v25, 0.0  ;;  %v1013_v18 = vadd.f32 %v10539_v34, %v1011_v22  ;;  %vm10543_vm8 = vmmov %vm10537_vm12  ;;  %v10551_v22 = vld [vmem:[#allocation149_spill] sm:$0xff]  ;;  %v10562_v6 = vld [vmem:[#allocation47_spill] sm:$0xff] }
 0x249   :  { %10518 = vst [vmem:[#allocation165_spill] sm:$0xff] %v7058_v53  ;;  %v1360_v3 = vsel %vm10543_vm8, %v1328_v35, 0.0  ;;  %vm10544_vm13 = vmmov %vm10543_vm8  ;;  %vm10550_vm0 = vcmp.eq.s32.totalorder %v10549_v17, 1  ;;  %v928_v56 = vrot.slane %v927_v1, 2  ;;  %vm10554_vm2 = vcmp.eq.s32.totalorder %v10553_v40, 1  ;;  %v10555_v35 = vld [vmem:[#allocation185_spill] sm:$0xff] }
 0x24a   :  { %v1362_v13 = vsel %vm10544_vm13, %v1329_v41, 0.0  ;;  %v1336_v61 = vsel %vm10550_vm0, %v10548_v60, 0.0  ;;  %v1361_v59 = vadd.f32 %v1360_v3, %v1359_v11  ;;  %v1015_v34 = vadd.f32 %v10551_v22, %v1013_v18  ;;  %v7101_v41 = vpop.permute.xlu1 %1911  ;;  %v10563_v11 = vld [vmem:[#allocation12_spill] sm:$0xff]  ;;  %v10567_v40 = vld [vmem:[#allocation26_spill] sm:$0xff]  ;;  %vm10569_vm4 = vmmov %vm10543_vm8 }
 0x24b   :  { %v1337_v24 = vsel %vm10554_vm2, %v10552_v54, 0.0  ;;  %vm10557_vm9 = vcmp.eq.s32.totalorder %v10556_v30, 1  ;;  %10558 = vst [vmem:[#allocation72_spill] sm:$0xff] %v7101_v41  ;;  %v1288_v58 = vadd.f32 %v1287_v37, %v1286_v50  ;;  %v1339_v53 = vsel %vm10561_vm10, %v10559_v33, 0.0  ;;  %v10565_v22 = vld [vmem:[#allocation156_spill] sm:$0xff]  ;;  %vm10570_vm6 = vmmov %vm10569_vm4  ;;  %v10571_v37 = vld [vmem:[#allocation53_spill] sm:$0xff] }
 0x24c   :  { %v1338_v49 = vsel %vm10557_vm9, %v10555_v35, 0.0  ;;  %vm10564_vm15 = vcmp.eq.s32.totalorder %v10563_v11, 1  ;;  %v1363_v18 = vadd.f32 %v1362_v13, %v1361_v59  ;;  %v1017_v9 = vadd.f32 %v10565_v22, %v1015_v34  ;;  %v10572_v35 = vld [vmem:[#allocation14_spill] sm:$0xff]  ;;  %v10574_v33 = vld [vmem:[#allocation163_spill] sm:$0xff]  ;;  %v10575_v17 = vld [vmem:[#allocation33_spill] sm:$0xff]  ;;  %v7121_v13 = vpop.permute.xlu0 %1902 }
 0x24d   :  { %v1340_v3 = vsel %vm10564_vm15, %v10562_v6, 0.0  ;;  %vm10568_vm7 = vcmp.eq.s32.totalorder %v10567_v40, 1  ;;  %v1364_v30 = vsel %vm10569_vm4, %v1330_v36, 0.0  ;;  %v1366_v41 = vsel %vm10570_vm6, %v1331_v51, 0.0  ;;  %10577 = vst [vmem:[#allocation71_spill] sm:$0xff] %v7121_v13  ;;  %v10578_v22 = vld [vmem:[#allocation66_spill] sm:$0xff]  ;;  %vm10595_vm14 = vmmov %vm10569_vm4 }
 0x24e   :  { %v1341_v54 = vsel %vm10568_vm7, %v10566_v2, 0.0  ;;  %v1290_v50 = vadd.f32 %v1289_v48, %v1288_v58  ;;  %vm10573_vm1 = vcmp.eq.s32.totalorder %v10572_v35, 1  ;;  %vm10576_vm3 = vcmp.eq.s32.totalorder %v10575_v17, 1  ;;  %v10579_v2 = vld [vmem:[#allocation138_spill] sm:$0xff]  ;;  %v10580_v6 = vld [vmem:[#allocation16_spill] sm:$0xff]  ;;  %v10583_v48 = vld [vmem:[#allocation35_spill] sm:$0xff] }
 0x24f   :  { %v1342_v28 = vsel %vm10573_vm1, %v10571_v37, 0.0  ;;  %v1343_v11 = vsel %vm10576_vm3, %v10574_v33, 0.0  ;;  %v1365_v59 = vadd.f32 %v1364_v30, %v1363_v18  ;;  %v929_v34 = vadd.f32 %v928_v56, %v927_v1  ;;  %v10582_v51 = vld [vmem:[#allocation170_spill] sm:$0xff]  ;;  %v10585_v37 = vld [vmem:[#allocation167_spill] sm:$0xff]  ;;  %v10589_v18 = vld [vmem:[#allocation37_spill] sm:$0xff] }
 0x250   :  { %v1019_v40 = vadd.f32 %v10578_v22, %v1017_v9  ;;  %vm10581_vm11 = vcmp.eq.s32.totalorder %v10580_v6, 1  ;;  %vm10584_vm12 = vcmp.eq.s32.totalorder %v10583_v48, 1  ;;  %v1292_v35 = vadd.f32 %v7006_v12, %v1290_v50  ;;  %v10586_v60 = vld [vmem:[#allocation18_spill] sm:$0xff]  ;;  %v10591_v9 = vld [vmem:[#allocation157_spill] sm:$0xff]  ;;  %v10593_v6 = vld [vmem:[#allocation20_spill] sm:$0xff]  ;;  %v7143_v12 = vpop.permute.xlu1 %1917 }
 0x251   :  { %v1344_v36 = vsel %vm10581_vm11, %v10579_v2, 0.0  ;;  %v1345_v58 = vsel %vm10584_vm12, %v10582_v51, 0.0  ;;  %vm10587_vm5 = vcmp.eq.s32.totalorder %v10586_v60, 1  ;;  %v10588_v30 = vld [vmem:[#allocation178_spill] sm:$0xff]  ;;  %vm10590_vm8 = vcmp.eq.s32.totalorder %v10589_v18, 1  ;;  %v10592_v13 = vld [vmem:[#allocation181_spill] sm:$0xff]  ;;  %vm10596_vm0 = vmmov %vm10569_vm4 }
 0x252   :  { %v1346_v17 = vsel %vm10587_vm5, %v10585_v37, 0.0  ;;  %v1347_v56 = vsel %vm10590_vm8, %v10588_v30, 0.0  ;;  %v1367_v1 = vadd.f32 %v1366_v41, %v1365_v59  ;;  %v1021_v22 = vadd.f32 %v10591_v9, %v1019_v40  ;;  %10597 = vst [vmem:[#allocation73_spill] sm:$0xff] %v7143_v12  ;;  %v10598_v60 = vld [vmem:[#allocation106_spill] sm:$0xff]  ;;  %v10601_v30 = vld [vmem:[#allocation45_spill] sm:$0xff]  ;;  %v10609_v12 = vld [vmem:[#allocation24_spill] sm:$0xff] }
 0x253   :  { %vm10594_vm13 = vcmp.eq.s32.totalorder %v10593_v6, 1  ;;  %v1368_v48 = vsel %vm10595_vm14, %v1332_v44, 0.0  ;;  %v1370_v51 = vsel %vm10596_vm0, %v1333_v27, 0.0  ;;  %v1294_v50 = vadd.f32 %v7010_v5, %v1292_v35  ;;  %v10599_v37 = vld [vmem:[#allocation38_spill] sm:$0xff]  ;;  %v10604_v6 = vld [vmem:[#allocation68_spill] sm:$0xff]  ;;  %v10606_v44 = vld [vmem:[#allocation39_spill] sm:$0xff] }
 0x254   :  { %v1348_v2 = vsel %vm10594_vm13, %v10592_v13, 0.0  ;;  %vm10600_vm2 = vcmp.eq.s32.totalorder %v10599_v37, 1  ;;  %v10602_v41 = vld [vmem:[#allocation22_spill] sm:$0xff]  ;;  %v1369_v59 = vadd.f32 %v1368_v48, %v1367_v1  ;;  %v930_v9 = vrot.slane %v929_v34, 1  ;;  %v10611_v37 = vld [vmem:[#allocation115_spill] sm:$0xff]  ;;  %v10621_v62 = vld [vmem:[#allocation145_spill] sm:$0xff] }
 0x255   :  { %v1349_v18 = vsel %vm10600_vm2, %v10598_v60, 0.0  ;;  %vm10603_vm9 = vcmp.eq.s32.totalorder %v10602_v41, 1  ;;  %v1023_v13 = vadd.f32 %v10604_v6, %v1021_v22  ;;  %v10605_v33 = vld [vmem:[#allocation110_spill] sm:$0xff]  ;;  %vm10607_vm10 = vcmp.eq.s32.totalorder %v10606_v44, 1  ;;  %v10612_v60 = vld [vmem:[#allocation40_spill] sm:$0xff]  ;;  %v10614_v41 = vld [vmem:[#allocation127_spill] sm:$0xff]  ;;  %v7166_v6 = vpop.permute.xlu0 %1908 }
 0x256   :  { %v1350_v40 = vsel %vm10603_vm9, %v10601_v30, 0.0  ;;  %v1351_v27 = vsel %vm10607_vm10, %v10605_v33, 0.0  ;;  %vm10610_vm15 = vcmp.eq.s32.totalorder %v10609_v12, 1  ;;  %v1296_v35 = vadd.f32 %v7013_v20, %v1294_v50  ;;  %v10615_v30 = vld [vmem:[#allocation28_spill] sm:$0xff]  ;;  %10617 = vst [vmem:[#allocation74_spill] sm:$0xff] %v7166_v6  ;;  %v10619_v44 = vld [vmem:[#allocation41_spill] sm:$0xff]  ;;  %vm10624_vm3 = vmmov %vm10596_vm0 }
 0x257   :  { %v1352_v5 = vsel %vm10610_vm15, %v10608_v7, 0.0  ;;  %vm10613_vm7 = vcmp.eq.s32.totalorder %v10612_v60, 1  ;;  %vm10616_vm4 = vcmp.eq.s32.totalorder %v10615_v30, 1  ;;  %v1371_v1 = vadd.f32 %v1370_v51, %v1369_v59  ;;  %v10618_v22 = vld [vmem:[#allocation144_spill] sm:$0xff]  ;;  %v10622_v12 = vld [vmem:[#allocation34_spill] sm:$0xff]  ;;  %vm10625_vm11 = vmmov %vm10596_vm0 }
 0x258   :  { %v1353_v32 = vsel %vm10613_vm7, %v10611_v37, 0.0  ;;  %v1354_v48 = vsel %vm10616_vm4, %v10614_v41, 0.0  ;;  %vm10620_vm6 = vcmp.eq.s32.totalorder %v10619_v44, 1  ;;  %vm10623_vm1 = vcmp.eq.s32.totalorder %v10622_v12, 1  ;;  %v10626_v37 = vld [vmem:[#allocation150_spill] sm:$0xff]  ;;  %v10630_v6 = vld [vmem:[#allocation36_spill] sm:$0xff]  ;;  %vm10633_vm8 = vmmov %vm10596_vm0 }
 0x259   :  { %v1355_v33 = vsel %vm10620_vm6, %v10618_v22, 0.0  ;;  %v1356_v7 = vsel %vm10623_vm1, %v10621_v62, 0.0  ;;  %v1372_v20 = vsel %vm10624_vm3, %v1334_v21, 0.0  ;;  %v1374_v50 = vsel %vm10625_vm11, %v1335_v52, 0.0  ;;  %v10627_v30 = vld [vmem:[#allocation42_spill] sm:$0xff]  ;;  %vm10634_vm13 = vmmov %vm10596_vm0  ;;  %v7188_v52 = vpop.permute.xlu1 %1923 }
 0x25a   :  { %v1298_v60 = vadd.f32 %v7016_v10, %v1296_v35  ;;  %vm10628_vm12 = vcmp.eq.s32.totalorder %v10627_v30, 1  ;;  %v10629_v59 = vld [vmem:[#allocation54_spill] sm:$0xff]  ;;  %vm10631_vm5 = vcmp.eq.s32.totalorder %v10630_v6, 1  ;;  %v1373_v44 = vadd.f32 %v1372_v20, %v1371_v1  ;;  %vm10635_vm14 = vmmov %vm10596_vm0  ;;  %v10659_v1 = vld [vmem:[#allocation60_spill] sm:$0xff] }
 0x25b   :  { %v1357_v51 = vsel %vm10628_vm12, %v10626_v37, 0.0  ;;  %v1358_v41 = vsel %vm10631_vm5, %v10629_v59, 0.0  ;;  %v7183_v22 = vadd.f32 %v930_v9, %v929_v34  ;;  %v1025_v12 = vadd.f32 %v10632_v42, %v1023_v13  ;;  %vm10636_vm2 = vmmov %vm10596_vm0 }
 0x25c   :  { %v1376_v62 = vsel %vm10633_vm8, %v1336_v61, 0.0  ;;  %v1378_v21 = vsel %vm10634_vm13, %v1337_v24, 0.0  ;;  %v1300_v10 = vadd.f32 %v7019_v16, %v1298_v60  ;;  %v1375_v35 = vadd.f32 %v1374_v50, %v1373_v44  ;;  %vm10637_vm9 = vmmov %vm10596_vm0  ;;  %v7206_v16 = vpop.permute.xlu0 %1914 }
 0x25d   :  { %v1380_v30 = vsel %vm10635_vm14, %v1338_v49, 0.0  ;;  %v1382_v37 = vsel %vm10596_vm0, %v1339_v53, 0.0  ;;  %v1384_v6 = vsel %vm10636_vm2, %v1340_v3, 0.0  ;;  %v1386_v34 = vsel %vm10637_vm9, %v1341_v54, 0.0  ;;  %vm10638_vm10 = vmmov %vm10596_vm0  ;;  %v10642_v53 = vld [vmem:[#allocation160_spill] sm:$0xff] }
 0x25e   :  { %v1388_v9 = vsel %vm10638_vm10, %v1342_v28, 0.0  ;;  %vm10639_vm15 = vmmov %vm10596_vm0  ;;  %v1302_v24 = vadd.f32 %v7022_v45, %v1300_v10  ;;  %v1377_v61 = vadd.f32 %v1376_v62, %v1375_v35  ;;  %v1027_v49 = vadd.f32 %v10642_v53, %v1025_v12  ;;  %v10670_v35 = vld [vmem:[#allocation129_spill] sm:$0xff] }
 0x25f   :  { %v7197_v42 = vsel %vm10639_vm15, %v1343_v11, 0.0  ;;  %vm10640_vm7 = vmmov %vm10596_vm0  ;;  %vm10660_vm15 = vcmp.eq.s32.totalorder %v10514_v4, 2 }
 0x260   :  { %v7201_v13 = vsel %vm10640_vm7, %v1344_v36, 0.0  ;;  %vm10641_vm4 = vmmov %vm10596_vm0  ;;  %v1304_v62 = vadd.f32 %v7025_v38, %v1302_v24  ;;  %v1379_v45 = vadd.f32 %v1378_v21, %v1377_v61  ;;  %v7237_v38 = vpop.permute.xlu1 %1929  ;;  %vm10661_vm7 = vcmp.eq.s32.totalorder %v10520_v57, 2  ;;  %v7263_v50 = vpop.permute.xlu0 %1920  ;;  %v10668_v21 = vld [vmem:[#allocation17_spill] sm:$0xff]  ;;  %v10671_v24 = vld [vmem:[#allocation19_spill] sm:$0xff] }
 0x261   :  { %v7204_v60 = vsel %vm10641_vm4, %v1345_v58, 0.0  ;;  %vm10643_vm6 = vmmov %vm10596_vm0  ;;  %10652 = vst [vmem:[#allocation75_spill] sm:$0xff] %v7237_v38  ;;  %vm10663_vm4 = vcmp.eq.s32.totalorder %v10523_v29, 2 }
 0x262   :  { %v7210_v54 = vsel %vm10643_vm6, %v1346_v17, 0.0  ;;  %vm10644_vm1 = vmmov %vm10596_vm0  ;;  %v1381_v12 = vadd.f32 %v1380_v30, %v1379_v45  ;;  %10662 = vst [vmem:[#allocation78_spill] sm:$0xff] %v7263_v50  ;;  %vm10664_vm6 = vcmp.eq.s32.totalorder %v10526_v47, 2  ;;  %v10751_v50 = vld [vmem:[#allocation34_spill] sm:$0xff] }
 0x263   :  { %v7213_v28 = vsel %vm10644_vm1, %v1347_v56, 0.0  ;;  %vm10645_vm3 = vmmov %vm10596_vm0  ;;  %vm10665_vm1 = vcmp.eq.s32.totalorder %v10529_v31, 2 }
 0x264   :  { %v7216_v11 = vsel %vm10645_vm3, %v1348_v2, 0.0  ;;  %vm10646_vm11 = vmmov %vm10596_vm0  ;;  %v1383_v30 = vadd.f32 %v1382_v37, %v1381_v12  ;;  %vm10666_vm3 = vcmp.eq.s32.totalorder %v10532_v8, 2  ;;  %v7289_v53 = vpop.permute.xlu1 %1935  ;;  %v10679_v12 = vld [vmem:[#allocation8_spill] sm:$0xff] }
 0x265   :  { %v7220_v3 = vsel %vm10646_vm11, %v1349_v18, 0.0  ;;  %vm10647_vm12 = vmmov %vm10596_vm0  ;;  %v1306_v18 = vadd.f32 %v7031_v23, %v1304_v62  ;;  %v1726_v4 = vsel %vm10666_vm3, %v10531_v63, 0.0  ;;  %vm10667_vm11 = vcmp.eq.s32.totalorder %v10535_v55, 2  ;;  %10675 = vst [vmem:[#allocation79_spill] sm:$0xff] %v7289_v53 }
 0x266   :  { %v7223_v36 = vsel %vm10647_vm12, %v1350_v40, 0.0  ;;  %vm10648_vm5 = vmmov %vm10596_vm0  ;;  %v7241_v40 = vsel %vm10596_vm0, %v1355_v33, 0.0  ;;  %v1721_v33 = vsel %vm10660_vm15, %v10513_v14, 0.0  ;;  %v1385_v37 = vadd.f32 %v1384_v6, %v1383_v30  ;;  %v10685_v30 = vld [vmem:[#allocation10_spill] sm:$0xff] }
 0x267   :  { %v7226_v58 = vsel %vm10648_vm5, %v1351_v27, 0.0  ;;  %vm10649_vm8 = vmmov %vm10596_vm0  ;;  %v1028_v27 = vrot.slane %v1027_v49, 4  ;;  %v1308_v23 = vadd.f32 %v7034_v0, %v1306_v18  ;;  %v1725_v0 = vsel %vm10665_vm1, %v10528_v25, 0.0  ;;  %v10678_v18 = vld [vmem:[#allocation183_spill] sm:$0xff] }
 0x268   :  { %v7229_v17 = vsel %vm10649_vm8, %v1352_v5, 0.0  ;;  %vm10650_vm13 = vmmov %vm10596_vm0  ;;  %v1727_v29 = vsel %vm10667_vm11, %v10534_v19, 0.0  ;;  %vm10669_vm12 = vcmp.eq.s32.totalorder %v10668_v21, 2  ;;  %vm10672_vm5 = vcmp.eq.s32.totalorder %v10671_v24, 2  ;;  %v10688_v21 = vld [vmem:[#allocation23_spill] sm:$0xff] }
 0x269   :  { %v7232_v56 = vsel %vm10650_vm13, %v1353_v32, 0.0  ;;  %vm10651_vm14 = vmmov %vm10596_vm0  ;;  %v1310_v57 = vadd.f32 %v7037_v15, %v1308_v23  ;;  %v1728_v47 = vsel %vm10669_vm12, %v10540_v39, 0.0  ;;  %v1029_v10 = vadd.f32 %v1028_v27, %v1027_v49  ;;  %v10676_v15 = vld [vmem:[#allocation135_spill] sm:$0xff]  ;;  %v10681_v27 = vld [vmem:[#allocation132_spill] sm:$0xff] }
 0x26a   :  { %v7235_v2 = vsel %vm10651_vm14, %v1354_v48, 0.0  ;;  %vm10653_vm2 = vmmov %vm10596_vm0  ;;  %v10658_v48 = vld [vmem:[#allocation61_spill] sm:$0xff]  ;;  %v1729_v31 = vsel %vm10672_vm5, %v10670_v35, 0.0  ;;  %v1387_v62 = vadd.f32 %v1386_v34, %v1385_v37  ;;  %v10691_v24 = vld [vmem:[#allocation47_spill] sm:$0xff] }
 0x26b   :  { %v7244_v44 = vsel %vm10653_vm2, %v1356_v7, 0.0  ;;  %vm10654_vm9 = vmmov %vm10596_vm0  ;;  %v7254_v20 = vadd.f32 %v10659_v1, %v10658_v48  ;;  %v1722_v7 = vsel %vm10661_vm7, %v10519_v43, 0.0  ;;  %v1312_v6 = vadd.f32 %v10676_v15, %v1310_v57  ;;  %v10682_v48 = vld [vmem:[#allocation21_spill] sm:$0xff]  ;;  %v10690_v57 = vld [vmem:[#allocation139_spill] sm:$0xff] }
 0x26c   :  { %v7247_v5 = vsel %vm10654_vm9, %v1357_v51, 0.0  ;;  %vm10656_vm10 = vmmov %vm10596_vm0  ;;  %v1724_v51 = vsel %vm10664_vm6, %v10525_v46, 0.0  ;;  %vm10683_vm2 = vcmp.eq.s32.totalorder %v10682_v48, 2  ;;  %v10684_v23 = vld [vmem:[#allocation185_spill] sm:$0xff]  ;;  %vm10686_vm9 = vcmp.eq.s32.totalorder %v10685_v30, 2  ;;  %v10695_v30 = vld [vmem:[#allocation59_spill] sm:$0xff] }
 0x26d   :  { %10655 = vst [vmem:[#allocation76_spill] sm:$0xff] %v7247_v5  ;;  %v7250_v32 = vsel %vm10656_vm10, %v1358_v41, 0.0  ;;  %v1723_v41 = vsel %vm10663_vm4, %v10522_v26, 0.0  ;;  %vm10673_vm8 = vmmov %vm10596_vm0  ;;  %v1731_v1 = vsel %vm10683_vm2, %v10681_v27, 0.0  ;;  %vm10689_vm10 = vcmp.eq.s32.totalorder %v10688_v21, 2  ;;  %v10696_v26 = vld [vmem:[#allocation26_spill] sm:$0xff] }
 0x26e   :  { %10657 = vst [vmem:[#allocation77_spill] sm:$0xff] %v7250_v32  ;;  %v1753_v61 = vsel %vm10673_vm8, %v1721_v33, 0.0  ;;  %vm10674_vm13 = vmmov %vm10596_vm0  ;;  %v7302_v33 = vsel %vm10686_vm9, %v10684_v23, 0.0  ;;  %v1389_v37 = vadd.f32 %v1388_v9, %v1387_v62  ;;  %v1030_v48 = vrot.slane %v1029_v10, 2  ;;  %v10705_v32 = vld [vmem:[#allocation33_spill] sm:$0xff]  ;;  %v10723_v23 = vld [vmem:[#allocation20_spill] sm:$0xff] }
 0x26f   :  { %v1754_v8 = vsel %vm10674_vm13, %v1722_v7, 0.0  ;;  %vm10677_vm14 = vmmov %vm10596_vm0  ;;  %vm10680_vm0 = vcmp.eq.s32.totalorder %v10679_v12, 2  ;;  %v10687_v7 = vld [vmem:[#allocation51_spill] sm:$0xff]  ;;  %v7315_v12 = vpop.permute.xlu0 %1926  ;;  %vm10697_vm7 = vcmp.eq.s32.totalorder %v10696_v26, 2  ;;  %vm10706_vm3 = vcmp.eq.s32.totalorder %v10705_v32, 2  ;;  %v10759_v5 = vld [vmem:[#allocation36_spill] sm:$0xff] }
 0x270   :  { %v1755_v55 = vadd.f32 %v1754_v8, %v1753_v61  ;;  %v1756_v45 = vsel %vm10677_vm14, %v1723_v41, 0.0  ;;  %v1730_v49 = vsel %vm10680_vm0, %v10678_v18, 0.0  ;;  %v7307_v34 = vsel %vm10689_vm10, %v10687_v7, 0.0  ;;  %v10692_v61 = vld [vmem:[#allocation12_spill] sm:$0xff]  ;;  %10694 = vst [vmem:[#allocation162_spill] sm:$0xff] %v7315_v12  ;;  %vm10698_vm4 = vmmov %vm10673_vm8 }
 0x271   :  { %v1314_v41 = vadd.f32 %v10690_v57, %v1312_v6  ;;  %vm10693_vm15 = vcmp.eq.s32.totalorder %v10692_v61, 2  ;;  %v7320_v14 = vsel %vm10697_vm7, %v10695_v30, 0.0  ;;  %v1758_v21 = vsel %vm10698_vm4, %v1724_v51, 0.0  ;;  %vm10699_vm6 = vmmov %vm10698_vm4  ;;  %v10700_v6 = vld [vmem:[#allocation50_spill] sm:$0xff]  ;;  %v10701_v57 = vld [vmem:[#allocation53_spill] sm:$0xff] }
 0x272   :  { %v7313_v8 = vsel %vm10693_vm15, %v10691_v24, 0.0  ;;  %v1757_v15 = vadd.f32 %v1756_v45, %v1755_v55  ;;  %v1760_v53 = vsel %vm10699_vm6, %v1725_v0, 0.0  ;;  %v1391_v62 = vadd.f32 %v7197_v42, %v1389_v37  ;;  %v10702_v61 = vld [vmem:[#allocation14_spill] sm:$0xff]  ;;  %v10704_v24 = vld [vmem:[#allocation163_spill] sm:$0xff]  ;;  %v10708_v12 = vld [vmem:[#allocation16_spill] sm:$0xff] }
 0x273   :  { %v1316_v9 = vadd.f32 %v10700_v6, %v1314_v41  ;;  %vm10703_vm1 = vcmp.eq.s32.totalorder %v10702_v61, 2  ;;  %v7334_v26 = vsel %vm10706_vm3, %v10704_v24, 0.0  ;;  %v10707_v30 = vld [vmem:[#allocation138_spill] sm:$0xff]  ;;  %vm10709_vm11 = vcmp.eq.s32.totalorder %v10708_v12, 2  ;;  %v10711_v41 = vld [vmem:[#allocation35_spill] sm:$0xff]  ;;  %v10719_v12 = vld [vmem:[#allocation37_spill] sm:$0xff] }
 0x274   :  { %v7329_v55 = vsel %vm10703_vm1, %v10701_v57, 0.0  ;;  %v1759_v45 = vadd.f32 %v1758_v21, %v1757_v15  ;;  %v7339_v51 = vsel %vm10709_vm11, %v10707_v30, 0.0  ;;  %v10710_v0 = vld [vmem:[#allocation170_spill] sm:$0xff]  ;;  %vm10712_vm12 = vcmp.eq.s32.totalorder %v10711_v41, 2  ;;  %v10713_v37 = vld [vmem:[#allocation167_spill] sm:$0xff]  ;;  %v7351_v21 = vpop.permute.xlu1 %1941  ;;  %vm10725_vm14 = vmmov %vm10698_vm4 }
 0x275   :  { %v7344_v42 = vsel %vm10712_vm12, %v10710_v0, 0.0  ;;  %v10714_v6 = vld [vmem:[#allocation18_spill] sm:$0xff]  ;;  %10716 = vst [vmem:[#allocation80_spill] sm:$0xff] %v7351_v21  ;;  %v1393_v57 = vadd.f32 %v7201_v13, %v1391_v62  ;;  %vm10720_vm8 = vcmp.eq.s32.totalorder %v10719_v12, 2  ;;  %v7360_v41 = vadd.f32 %v1030_v48, %v1029_v10  ;;  %v10722_v0 = vld [vmem:[#allocation181_spill] sm:$0xff]  ;;  %vm10726_vm0 = vmmov %vm10698_vm4 }
 0x276   :  { %vm10715_vm5 = vcmp.eq.s32.totalorder %v10714_v6, 2  ;;  %v10717_v15 = vld [vmem:[#allocation114_spill] sm:$0xff]  ;;  %v1761_v38 = vadd.f32 %v1760_v53, %v1759_v45  ;;  %vm10724_vm13 = vcmp.eq.s32.totalorder %v10723_v23, 2  ;;  %v1764_v21 = vsel %vm10726_vm0, %v1727_v29, 0.0  ;;  %v7376_v53 = vpop.permute.xlu0 %1932  ;;  %v10732_v48 = vld [vmem:[#allocation45_spill] sm:$0xff]  ;;  %vm10753_vm3 = vmmov %vm10726_vm0 }
 0x277   :  { %v7349_v61 = vsel %vm10715_vm5, %v10713_v37, 0.0  ;;  %v1318_v32 = vadd.f32 %v10717_v15, %v1316_v9  ;;  %v10718_v24 = vld [vmem:[#allocation178_spill] sm:$0xff]  ;;  %10721 = vst [vmem:[#allocation82_spill] sm:$0xff] %v7360_v41  ;;  %v7365_v6 = vsel %vm10724_vm13, %v10722_v0, 0.0  ;;  %v1762_v37 = vsel %vm10725_vm14, %v1726_v4, 0.0  ;;  %v10727_v9 = vld [vmem:[#allocation165_spill] sm:$0xff]  ;;  %vm10754_vm11 = vmmov %vm10726_vm0 }
 0x278   :  { %v7358_v30 = vsel %vm10720_vm8, %v10718_v24, 0.0  ;;  %v1395_v13 = vadd.f32 %v7204_v60, %v1393_v57  ;;  %v10728_v62 = vld [vmem:[#allocation106_spill] sm:$0xff]  ;;  %v1763_v10 = vadd.f32 %v1762_v37, %v1761_v38  ;;  %10731 = vst [vmem:[#allocation81_spill] sm:$0xff] %v7376_v53  ;;  %v10736_v41 = vld [vmem:[#allocation39_spill] sm:$0xff]  ;;  %v10739_v60 = vld [vmem:[#allocation24_spill] sm:$0xff]  ;;  %vm10752_vm1 = vcmp.eq.s32.totalorder %v10751_v50, 2 }
 0x279   :  { %v1320_v15 = vadd.f32 %v10727_v9, %v1318_v32  ;;  %v10729_v12 = vld [vmem:[#allocation38_spill] sm:$0xff]  ;;  %vm10737_vm10 = vcmp.eq.s32.totalorder %v10736_v41, 2  ;;  %vm10740_vm15 = vcmp.eq.s32.totalorder %v10739_v60, 2  ;;  %v10741_v9 = vld [vmem:[#allocation115_spill] sm:$0xff]  ;;  %v10745_v0 = vld [vmem:[#allocation28_spill] sm:$0xff]  ;;  %vm10760_vm5 = vcmp.eq.s32.totalorder %v10759_v5, 2 }
 0x27a   :  { %vm10730_vm2 = vcmp.eq.s32.totalorder %v10729_v12, 2  ;;  %v10733_v23 = vld [vmem:[#allocation22_spill] sm:$0xff]  ;;  %v10742_v12 = vld [vmem:[#allocation40_spill] sm:$0xff]  ;;  %vm10746_vm4 = vcmp.eq.s32.totalorder %v10745_v0, 2  ;;  %v1765_v41 = vadd.f32 %v1764_v21, %v1763_v10  ;;  %v10748_v53 = vld [vmem:[#allocation41_spill] sm:$0xff]  ;;  %v7427_v50 = vsel %vm10760_vm5, %v10629_v59, 0.0  ;;  %v7439_v5 = vpop.permute.xlu0 %1938 }
 0x27b   :  { %v7374_v24 = vsel %vm10730_vm2, %v10728_v62, 0.0  ;;  %vm10734_vm9 = vcmp.eq.s32.totalorder %v10733_v23, 2  ;;  %v10735_v4 = vld [vmem:[#allocation110_spill] sm:$0xff]  ;;  %vm10743_vm7 = vcmp.eq.s32.totalorder %v10742_v12, 2  ;;  %v1321_v37 = vrot.slane %v1320_v15, 4  ;;  %vm10761_vm8 = vmmov %vm10726_vm0 }
 0x27c   :  { %v7381_v45 = vsel %vm10734_vm9, %v10732_v48, 0.0  ;;  %v7386_v29 = vsel %vm10737_vm10, %v10735_v4, 0.0  ;;  %v10738_v32 = vld [vmem:[#allocation134_spill] sm:$0xff]  ;;  %v7396_v38 = vsel %vm10743_vm7, %v10741_v9, 0.0  ;;  %v1397_v23 = vadd.f32 %v7210_v54, %v1395_v13  ;;  %v10744_v48 = vld [vmem:[#allocation127_spill] sm:$0xff]  ;;  %v10747_v4 = vld [vmem:[#allocation144_spill] sm:$0xff]  ;;  %v7416_v13 = vpop.permute.xlu1 %1947 }
 0x27d   :  { %v7391_v57 = vsel %vm10740_vm15, %v10738_v32, 0.0  ;;  %v7402_v62 = vsel %vm10746_vm4, %v10744_v48, 0.0  ;;  %vm10749_vm6 = vcmp.eq.s32.totalorder %v10748_v53, 2  ;;  %v10750_v32 = vld [vmem:[#allocation145_spill] sm:$0xff]  ;;  %v1766_v9 = vsel %vm10753_vm3, %v1728_v47, 0.0  ;;  %10755 = vst [vmem:[#allocation84_spill] sm:$0xff] %v7416_v13  ;;  %vm10766_vm10 = vmmov %vm10726_vm0 }
 0x27e   :  { %v7407_v60 = vsel %vm10749_vm6, %v10747_v4, 0.0  ;;  %v7412_v12 = vsel %vm10752_vm1, %v10750_v32, 0.0  ;;  %v1768_v54 = vsel %vm10754_vm11, %v1729_v31, 0.0  ;;  %v1322_v0 = vadd.f32 %v1321_v37, %v1320_v15  ;;  %v10756_v21 = vld [vmem:[#allocation150_spill] sm:$0xff]  ;;  %v10762_v32 = vld [vmem:[#allocation69_spill] sm:$0xff]  ;;  %v7434_v31 = vld [vmem:[%s9282_s2 + $0xf8] sm:$0xff] }
 0x27f   :  { %v1399_v48 = vadd.f32 %v7213_v28, %v1397_v23  ;;  %v10757_v10 = vld [vmem:[#allocation42_spill] sm:$0xff]  ;;  %v1767_v4 = vadd.f32 %v1766_v9, %v1765_v41  ;;  %v1770_v47 = vsel %vm10761_vm8, %v1730_v49, 0.0  ;;  %vm1619_vm13 = vcmp.eq.s32.totalorder %v10762_v32, 1  ;;  %v10763_v9 = vld [vmem:[#allocation55_spill] sm:$0xff]  ;;  %vm10767_vm15 = vmmov %vm10726_vm0 }
 0x280   :  { %vm10758_vm12 = vcmp.eq.s32.totalorder %v10757_v10, 2  ;;  %vm2247_vm14 = vcmp.eq.s32.totalorder %v7434_v31, 4  ;;  %v1323_v28 = vrot.slane %v1322_v0, 2  ;;  %v1651_v37 = vsel %vm1619_vm13, %v10763_v9, 0.0  ;;  %vm10768_vm7 = vmmov %vm10726_vm0 }
 0x281   :  { %v7422_v53 = vsel %vm10758_vm12, %v10756_v21, 0.0  ;;  %v1401_v15 = vadd.f32 %v7216_v11, %v1399_v48  ;;  %v1769_v41 = vadd.f32 %v1768_v54, %v1767_v4  ;;  %v1772_v23 = vsel %vm10726_vm0, %v1731_v1, 0.0  ;;  %v7449_v21 = vld [vmem:[%s9282_s2 + $0x20] sm:$0xff]  ;;  %vm10769_vm4 = vmmov %vm10726_vm0 }
 0x282   :  { %vm10764_vm2 = vcmask 261120   ;;  %v10765_v32 = vmov 0   ;;  %vm2614_vm9 = vcmp.eq.s32.totalorder %v7449_v21, 5  ;;  %v1324_v11 = vadd.f32 %v1323_v28, %v1322_v0  ;;  %v7463_v0 = vpop.permute.xlu1 %1953  ;;  %vm10770_vm6 = vmmov %vm10726_vm0  ;;  %v10773_v28 = vld [vmem:[#allocation111_spill] sm:$0xff] }
 0x283   :  { %v1713_v49 = vsel %vm10764_vm2, %v1651_v37, 0.0  ;;  %v2279_v10 = vsel %vm2247_vm14, 1, %v10765_v32  ;;  %v1403_v48 = vadd.f32 %v7220_v3, %v1401_v15  ;;  %v1771_v4 = vadd.f32 %v1770_v47, %v1769_v41  ;;  %vm10771_vm1 = vmmov %vm10726_vm0 }
 0x284   :  { %v1714_v54 = vadd.f32 %v1713_v49, %v7254_v20  ;;  %2374 = vperm.xlu0 %3976, %v2279_v10   ;;  %v1774_v1 = vsel %vm10766_vm10, %v7302_v33, 0.0  ;;  %v1776_v37 = vsel %vm10767_vm15, %v7307_v34, 0.0  ;;  %v1778_v9 = vsel %vm10768_vm7, %v7313_v8, 0.0  ;;  %vm10772_vm3 = vmmov %vm10726_vm0 }
 0x285   :  { %v2646_v13 = vsel %vm2614_vm9, 1, %v10765_v32  ;;  %v1773_v3 = vadd.f32 %v1772_v23, %v1771_v4  ;;  %v1780_v20 = vsel %vm10769_vm4, %v7320_v14, 0.0  ;;  %v1782_v10 = vsel %vm10770_vm6, %v7329_v55, 0.0  ;;  %vm10774_vm12 = vmmov %vm10726_vm0  ;;  %v7479_v55 = vpop.permute.xlu0 %1944 }
 0x286   :  { %v1715_v33 = vrot.slane %v1714_v54, 4  ;;  %2687 = vperm.xlu1 %3977, %v2646_v13   ;;  %v1325_v47 = vrot.slane %v1324_v11, 1  ;;  %v1784_v34 = vsel %vm10771_vm1, %v7334_v26, 0.0  ;;  %v1786_v8 = vsel %vm10772_vm3, %v7339_v51, 0.0  ;;  %vm10775_vm5 = vmmov %vm10726_vm0  ;;  %v10777_v51 = vld [vmem:[#allocation159_spill] sm:$0xff] }
 0x287   :  { %vm1983_vm11 = vcmp.eq.s32.totalorder %v10773_v28, 1  ;;  %v1405_v15 = vadd.f32 %v7223_v36, %v1403_v48  ;;  %v1775_v41 = vadd.f32 %v1774_v1, %v1773_v3  ;;  %v7477_v14 = vsel %vm10774_vm12, %v7344_v42, 0.0  ;;  %vm10776_vm8 = vmmov %vm10726_vm0  ;;  %v7493_v36 = vld [vmem:[%s9282_s2 + $0x8] sm:$0xff] }
 0x288   :  { %v1716_v23 = vadd.f32 %v1715_v33, %v1714_v54  ;;  %v7483_v13 = vsel %vm10775_vm5, %v7349_v61, 0.0  ;;  %v7487_v26 = vsel %vm10776_vm8, %v7358_v30, 0.0  ;;  %v2015_v49 = vsel %vm1983_vm11, %v10777_v51, 0.0  ;;  %10778 = vst [vmem:[#allocation83_spill] sm:$0xff] %v7493_v36  ;;  %vm10779_vm2 = vmmov %vm10726_vm0  ;;  %v7507_v33 = vpop.permute.xlu1 %1959 }
 0x289   :  { %vm2611_vm13 = vcmp.eq.s32.totalorder %v7493_v36, 5  ;;  %v1777_v42 = vadd.f32 %v1776_v37, %v1775_v41  ;;  %v7498_v48 = vsel %vm10726_vm0, %v7365_v6, 0.0  ;;  %v7502_v61 = vsel %vm10779_vm2, %v7374_v24, 0.0  ;;  %vm10781_vm15 = vmmov %vm10726_vm0 }
 0x28a   :  { %v1717_v30 = vrot.slane %v1716_v23, 2  ;;  %v1326_v4 = vadd.f32 %v1325_v47, %v1324_v11  ;;  %vm10780_vm10 = vcmask 261120   ;;  %v2643_v1 = vsel %vm2611_vm13, 1, %v10765_v32  ;;  %vm10782_vm7 = vmmov %vm10726_vm0  ;;  %v10783_v11 = vld [vmem:[#allocation152_spill] sm:$0xff] }
 0x28b   :  { %v2047_v54 = vsel %vm10780_vm10, %v2015_v49, 0.0  ;;  %v2904_v3 = vsel %vm2611_vm13, %v10519_v43, 0.0  ;;  %v1407_v37 = vadd.f32 %v7226_v58, %v1405_v15  ;;  %v1779_v28 = vadd.f32 %v1778_v9, %v1777_v42  ;;  %2678 = vperm.xlu0 %3976, %v2643_v1   ;;  %vm10784_vm6 = vmmov %vm10726_vm0  ;;  %v10785_v43 = vld [vmem:[#allocation174_spill] sm:$0xff]  ;;  %v7527_v9 = vpop.permute.xlu0 %1950  ;;  %v10790_v1 = vld [vmem:[#allocation52_spill] sm:$0xff] }
 0x28c   :  { %v7512_v6 = vsel %vm10781_vm15, %v7381_v45, 0.0  ;;  %v1718_v41 = vadd.f32 %v1717_v30, %v1716_v23  ;;  %v7516_v24 = vsel %vm10782_vm7, %v7386_v29, 0.0  ;;  %vm3793_vm4 = vcmask 1040384   ;;  %v7524_v45 = vld [vmem:[%s9282_s2 + $0x30] sm:$0xff]  ;;  %vm10786_vm3 = vmmov %vm10726_vm0 }
 0x28d   :  { %v2048_v47 = vadd.f32 %v2047_v54, %v10783_v11  ;;  %v2936_v49 = vsel %vm10784_vm6, %v2904_v3, 0.0  ;;  %v1781_v36 = vadd.f32 %v1780_v20, %v1779_v28  ;;  %vm2616_vm1 = vcmp.eq.s32.totalorder %v7524_v45, 5  ;;  %v10787_v20 = vld [vmem:[#allocation70_spill] sm:$0xff]  ;;  %vm10788_vm12 = vmmov %vm10726_vm0  ;;  %v7549_v3 = vpop.permute.xlu1 %1965  ;;  %v7561_v11 = vld [vmem:[%s9282_s2 + $0x18] sm:$0xff] }
 0x28e   :  { %v1719_v51 = vrot.slane %v1718_v41, 1  ;;  %v2937_v58 = vadd.f32 %v2936_v49, %v10785_v43  ;;  %v7531_v29 = vsel %vm10786_vm3, %v7391_v57, 0.0  ;;  %v3794_v15 = vsel %vm3793_vm4, %v7183_v22, %v1326_v4  ;;  %v10789_v22 = vld [vmem:[#allocation58_spill] sm:$0xff]  ;;  %vm10795_vm13 = vmmov %vm10780_vm10 }
 0x28f   :  { %vm1986_vm11 = vcmp.eq.s32.totalorder %v10787_v20, 1  ;;  %v2648_v43 = vsel %vm2616_vm1, 1, %v10765_v32  ;;  %v1409_v23 = vadd.f32 %v7229_v17, %v1407_v37  ;;  %v1783_v42 = vadd.f32 %v1782_v10, %v1781_v36  ;;  %v10792_v10 = vld [vmem:[#allocation173_spill] sm:$0xff]  ;;  %vm10797_vm2 = vmmov %vm10780_vm10 }
 0x290   :  { %v1720_v30 = vadd.f32 %v1719_v51, %v1718_v41  ;;  %v2907_v54 = vsel %vm2614_vm9, %v10528_v25, 0.0  ;;  %2693 = vperm.xlu1 %3977, %v2648_v43   ;;  %v7545_v57 = vsel %vm10788_vm12, %v7396_v38, 0.0  ;;  %vm3795_vm5 = vcmask 1041408   ;;  %v10793_v36 = vld [vmem:[#allocation161_spill] sm:$0xff]  ;;  %vm10794_vm9 = vmmov %vm10726_vm0 }
 0x291   :  { %v2050_v4 = vadd.f32 %v10789_v22, %v2048_v47  ;;  %vm1985_vm8 = vcmp.eq.s32.totalorder %v10790_v1, 1  ;;  %v1785_v28 = vadd.f32 %v1784_v34, %v1783_v42  ;;  %v2018_v51 = vsel %vm1986_vm11, %v10792_v10, 0.0  ;;  %v10796_v47 = vld [vmem:[#allocation107_spill] sm:$0xff]  ;;  %v7567_v42 = vpop.permute.xlu0 %1956  ;;  %v7575_v1 = vld [vmem:[%s9282_s2 + $0x40] sm:$0xff]  ;;  %vm10800_vm7 = vmmov %vm10786_vm3 }
 0x292   :  { %v7552_v17 = vsel %vm3795_vm5, %v3794_v15, %v1720_v30  ;;  %v2017_v37 = vsel %vm1985_vm8, %v10793_v36, 0.0  ;;  %v2942_v41 = vsel %vm10794_vm9, %v2907_v54, 0.0  ;;  %vm2613_vm0 = vcmp.eq.s32.totalorder %v7561_v11, 5  ;;  %v10798_v54 = vld [vmem:[#allocation140_spill] sm:$0xff]  ;;  %10799 = vst [vmem:[#allocation86_spill] sm:$0xff] %v7575_v1  ;;  %vm10802_vm11 = vmmov %vm10786_vm3 }
 0x293   :  { %10791 = vst [vmem:[#allocation85_spill] sm:$0xff] %v7552_v17  ;;  %v2051_v38 = vsel %vm10795_vm13, %v2017_v37, 0.0  ;;  %v2939_v34 = vadd.f32 %v10796_v47, %v2937_v58  ;;  %v1411_v49 = vadd.f32 %v7232_v56, %v1409_v23  ;;  %v1787_v15 = vadd.f32 %v1786_v8, %v1785_v28  ;;  %v10801_v23 = vld [vmem:[#allocation71_spill] sm:$0xff]  ;;  %vm10803_vm12 = vmmov %vm10786_vm3 }
 0x294   :  { %v2052_v20 = vadd.f32 %v2051_v38, %v2050_v4  ;;  %v2645_v43 = vsel %vm2613_vm0, 1, %v10765_v32  ;;  %v2053_v30 = vsel %vm10797_vm2, %v2018_v51, 0.0  ;;  %vm1988_vm10 = vcmp.eq.s32.totalorder %v10798_v54, 1  ;;  %vm10807_vm9 = vmmov %vm10797_vm2  ;;  %v7619_v54 = vld [vmem:[%s9282_s2 + $0x50] sm:$0xff] }
 0x295   :  { %v2906_v22 = vsel %vm2613_vm0, %v10525_v46, 0.0  ;;  %2684 = vperm.xlu0 %3976, %v2645_v43   ;;  %vm2618_vm15 = vcmp.eq.s32.totalorder %v7575_v1, 5  ;;  %v1789_v56 = vadd.f32 %v7477_v14, %v1787_v15  ;;  %vm1987_vm6 = vcmp.eq.s32.totalorder %v10801_v23, 1  ;;  %v7592_v14 = vpop.permute.xlu1 %1971  ;;  %v10804_v43 = vld [vmem:[#allocation180_spill] sm:$0xff]  ;;  %10808 = vst [vmem:[#allocation88_spill] sm:$0xff] %v7619_v54  ;;  %vm10810_vm0 = vmmov %vm10786_vm3  ;;  %v7805_v1 = vld [vmem:[%s9282_s2 + $0x78] sm:$0xff] }
 0x296   :  { %v2940_v8 = vsel %vm10800_vm7, %v2906_v22, 0.0  ;;  %v2650_v58 = vsel %vm2618_vm15, 1, %v10765_v32  ;;  %v7586_v4 = vsel %vm10786_vm3, %v7402_v62, 0.0  ;;  %v7590_v28 = vsel %vm10802_vm11, %v7407_v60, 0.0  ;;  %v7622_v22 = vpop.permute.xlu0 %1962  ;;  %vm10818_vm11 = vmmov %vm10810_vm0  ;;  %10864 = vst [vmem:[#allocation92_spill] sm:$0xff] %v7805_v1 }
 0x297   :  { %v2941_v51 = vadd.f32 %v2940_v8, %v2939_v34  ;;  %2699 = vperm.xlu1 %3977, %v2650_v58   ;;  %v2054_v37 = vadd.f32 %v2053_v30, %v2052_v20  ;;  %v1413_v38 = vadd.f32 %v7235_v2, %v1411_v49  ;;  %v1791_v47 = vadd.f32 %v7483_v13, %v1789_v56  ;;  %v10805_v34 = vld [vmem:[#allocation176_spill] sm:$0xff]  ;;  %v7610_v2 = vld [vmem:[%s9282_s2 + $0x28] sm:$0xff] }
 0x298   :  { %v7598_v15 = vsel %vm10803_vm12, %v7412_v12, 0.0  ;;  %v2909_v62 = vsel %vm2616_vm1, %v10534_v19, 0.0  ;;  %v2020_v60 = vsel %vm1988_vm10, %v10804_v43, 0.0  ;;  %v2019_v20 = vsel %vm1987_vm6, %v10805_v34, 0.0  ;;  %10806 = vst [vmem:[#allocation87_spill] sm:$0xff] %v7610_v2  ;;  %v10809_v56 = vld [vmem:[#allocation72_spill] sm:$0xff]  ;;  %vm10811_vm10 = vmmov %vm10810_vm0 }
 0x299   :  { %vm2615_vm8 = vcmp.eq.s32.totalorder %v7610_v2, 5  ;;  %v2943_v13 = vadd.f32 %v2942_v41, %v2941_v51  ;;  %v1793_v12 = vadd.f32 %v7487_v26, %v1791_v47  ;;  %v2055_v49 = vsel %vm10807_vm9, %v2019_v20, 0.0  ;;  %v7637_v34 = vpop.permute.xlu1 %1977  ;;  %vm10813_vm6 = vmmov %vm10810_vm0  ;;  %v10850_v43 = vld [vmem:[#allocation117_spill] sm:$0xff] }
 0x29a   :  { %v2647_v30 = vsel %vm2615_vm8, 1, %v10765_v32  ;;  %vm2620_vm1 = vcmp.eq.s32.totalorder %v7619_v54, 5  ;;  %vm1990_vm13 = vcmp.eq.s32.totalorder %v10809_v56, 1  ;;  %v2056_v8 = vadd.f32 %v2055_v49, %v2054_v37  ;;  %vm10819_vm12 = vmmov %vm10797_vm2 }
 0x29b   :  { %v2908_v41 = vsel %vm2615_vm8, %v10531_v63, 0.0  ;;  %2690 = vperm.xlu0 %3976, %v2647_v30   ;;  %v2652_v26 = vsel %vm2620_vm1, 1, %v10765_v32  ;;  %v1795_v58 = vadd.f32 %v7498_v48, %v1793_v12  ;;  %v2946_v23 = vsel %vm10810_vm0, %v2909_v62, 0.0  ;;  %v10812_v30 = vld [vmem:[#allocation74_spill] sm:$0xff]  ;;  %v10814_v62 = vld [vmem:[#allocation43_spill] sm:$0xff]  ;;  %v10815_v12 = vld [vmem:[#allocation101_spill] sm:$0xff] }
 0x29c   :  { %v2057_v51 = vsel %vm10797_vm2, %v2020_v60, 0.0  ;;  %v2944_v47 = vsel %vm10811_vm10, %v2908_v41, 0.0  ;;  %2705 = vperm.xlu1 %3977, %v2652_v26   ;;  %v2911_v37 = vsel %vm2618_vm15, %v10670_v35, 0.0  ;;  %vm1989_vm7 = vcmp.eq.s32.totalorder %v10812_v30, 1  ;;  %vm10816_vm15 = vmmov %vm10797_vm2 }
 0x29d   :  { %v2945_v20 = vadd.f32 %v2944_v47, %v2943_v13  ;;  %v2058_v49 = vadd.f32 %v2057_v51, %v2056_v8  ;;  %v1797_v2 = vadd.f32 %v7502_v61, %v1795_v58  ;;  %v7642_v48 = vsel %vm10813_vm6, %v7422_v53, 0.0  ;;  %v7653_v8 = vld [vmem:[%s9282_s2 + $0x38] sm:$0xff]  ;;  %v7659_v47 = vpop.permute.xlu0 %1968  ;;  %vm10823_vm2 = vmmov %vm10813_vm6 }
 0x29e   :  { %v2022_v60 = vsel %vm1990_vm13, %v10814_v62, 0.0  ;;  %v2021_v41 = vsel %vm1989_vm7, %v10815_v12, 0.0  ;;  %v1415_v26 = vadd.f32 %v7241_v40, %v1413_v38  ;;  %10817 = vst [vmem:[#allocation27_spill] sm:$0xff] %v7653_v8  ;;  %vm2617_vm3 = vcmp.eq.s32.totalorder %v7653_v8, 5  ;;  %v10820_v38 = vld [vmem:[#allocation73_spill] sm:$0xff]  ;;  %vm10822_vm13 = vmmov %vm10810_vm0  ;;  %v10835_v8 = vld [vmem:[#allocation136_spill] sm:$0xff] }
 0x29f   :  { %v2059_v13 = vsel %vm10816_vm15, %v2021_v41, 0.0  ;;  %v2947_v61 = vadd.f32 %v2946_v23, %v2945_v20  ;;  %v1799_v53 = vadd.f32 %v7512_v6, %v1797_v2  ;;  %v2950_v58 = vsel %vm10818_vm11, %v2911_v37, 0.0  ;;  %v7667_v23 = vld [vmem:[%s9282_s2 + $0x60] sm:$0xff]  ;;  %vm10829_vm6 = vmmov %vm10819_vm12  ;;  %v10849_v62 = vld [vmem:[#allocation49_spill] sm:$0xff] }
 0x2a0   :  { %v2060_v56 = vadd.f32 %v2059_v13, %v2058_v49  ;;  %v2649_v51 = vsel %vm2617_vm3, 1, %v10765_v32  ;;  %v2061_v40 = vsel %vm10819_vm12, %v2022_v60, 0.0  ;;  %vm1992_vm8 = vcmp.eq.s32.totalorder %v10820_v38, 1  ;;  %10821 = vst [vmem:[#allocation89_spill] sm:$0xff] %v7667_v23  ;;  %v10824_v49 = vld [vmem:[#allocation153_spill] sm:$0xff]  ;;  %v10825_v60 = vld [vmem:[#allocation142_spill] sm:$0xff]  ;;  %vm10831_vm15 = vmmov %vm10823_vm2 }
 0x2a1   :  { %v2910_v30 = vsel %vm2617_vm3, %v10540_v39, 0.0  ;;  %2696 = vperm.xlu0 %3976, %v2649_v51   ;;  %vm2622_vm9 = vcmp.eq.s32.totalorder %v7667_v23, 5  ;;  %v1801_v6 = vadd.f32 %v7516_v24, %v1799_v53  ;;  %vm1991_vm0 = vcmp.eq.s32.totalorder %v7206_v16, 1  ;;  %v7684_v24 = vpop.permute.xlu1 %2281  ;;  %v10826_v16 = vld [vmem:[#allocation184_spill] sm:$0xff]  ;;  %vm10833_vm3 = vmmov %vm10823_vm2 }
 0x2a2   :  { %v2948_v2 = vsel %vm10822_vm13, %v2910_v30, 0.0  ;;  %v2654_v37 = vsel %vm2622_vm9, 1, %v10765_v32  ;;  %v7678_v20 = vsel %vm10823_vm2, %v7427_v50, 0.0  ;;  %v7682_v41 = vadd.f32 %v10825_v60, %v10824_v49  ;;  %v10827_v60 = vld [vmem:[#allocation46_spill] sm:$0xff]  ;;  %vm10834_vm11 = vmmov %vm10829_vm6 }
 0x2a3   :  { %v2949_v13 = vadd.f32 %v2948_v2, %v2947_v61  ;;  %2711 = vperm.xlu1 %3977, %v2654_v37   ;;  %v2062_v51 = vadd.f32 %v2061_v40, %v2060_v56  ;;  %v1417_v53 = vadd.f32 %v7244_v44, %v1415_v26  ;;  %v2913_v30 = vsel %vm2620_vm1, %v10681_v27, 0.0  ;;  %v7699_v56 = vld [vmem:[%s9282_s2 + $0x48] sm:$0xff]  ;;  %vm10840_vm13 = vmmov %vm10829_vm6 }
 0x2a4   :  { %v2024_v50 = vsel %vm1992_vm8, %v10826_v16, 0.0  ;;  %vm1994_vm10 = vcmp.eq.s32.totalorder %v7188_v52, 1  ;;  %v1803_v49 = vadd.f32 %v7531_v29, %v1801_v6  ;;  %v2023_v61 = vsel %vm1991_vm0, %v10827_v60, 0.0  ;;  %10828 = vst [vmem:[#allocation31_spill] sm:$0xff] %v7699_v56  ;;  %v7708_v29 = vld [vmem:[%s9282_s2 + $0x70] sm:$0xff]  ;;  %v7711_v6 = vpop.permute.xlu0 %1974 }
 0x2a5   :  { %vm2619_vm7 = vcmp.eq.s32.totalorder %v7699_v56, 5  ;;  %v2951_v44 = vadd.f32 %v2950_v58, %v2949_v13  ;;  %v2063_v26 = vsel %vm10829_vm6, %v2023_v61, 0.0  ;;  %10830 = vst [vmem:[#allocation25_spill] sm:$0xff] %v7708_v29  ;;  %vm2624_vm1 = vcmp.eq.s32.totalorder %v7708_v29, 5  ;;  %v10832_v61 = vld [vmem:[#allocation76_spill] sm:$0xff] }
 0x2a6   :  { %v2651_v40 = vsel %vm2619_vm7, 1, %v10765_v32  ;;  %v2912_v38 = vsel %vm2619_vm7, %v10678_v18, 0.0  ;;  %v2915_v2 = vsel %vm2622_vm9, %v10687_v7, 0.0  ;;  %v2064_v58 = vadd.f32 %v2063_v26, %v2062_v51  ;;  %v10836_v26 = vld [vmem:[#allocation78_spill] sm:$0xff]  ;;  %vm10838_vm9 = vmmov %vm10823_vm2  ;;  %v10862_v29 = vld [vmem:[#allocation168_spill] sm:$0xff] }
 0x2a7   :  { %v2952_v37 = vsel %vm10831_vm15, %v2912_v38, 0.0  ;;  %2702 = vperm.xlu0 %3976, %v2651_v40   ;;  %v2656_v13 = vsel %vm2624_vm1, 1, %v10765_v32  ;;  %v1419_v56 = vadd.f32 %v10832_v61, %v1417_v53  ;;  %v2954_v60 = vsel %vm10833_vm3, %v2913_v30, 0.0  ;;  %v7730_v40 = vld [vmem:[%s9282_s2 + $0x58] sm:$0xff]  ;;  %v7733_v53 = vpop.permute.xlu1 %2287  ;;  %v7744_v61 = vld [vmem:[%s9282_s2 + $0x80] sm:$0xff]  ;;  %vm10845_vm7 = vmmov %vm10829_vm6 }
 0x2a8   :  { %v2065_v16 = vsel %vm10834_vm11, %v2024_v50, 0.0  ;;  %v2953_v12 = vadd.f32 %v2952_v37, %v2951_v44  ;;  %2717 = vperm.xlu1 %3977, %v2656_v13   ;;  %v2026_v23 = vsel %vm1994_vm10, %v10835_v8, 0.0  ;;  %vm1993_vm12 = vcmp.eq.s32.totalorder %v10836_v26, 1  ;;  %10837 = vst [vmem:[#allocation29_spill] sm:$0xff] %v7730_v40  ;;  %v10839_v44 = vld [vmem:[#allocation44_spill] sm:$0xff]  ;;  %10842 = vst [vmem:[#allocation32_spill] sm:$0xff] %v7744_v61 }
 0x2a9   :  { %v2066_v51 = vadd.f32 %v2065_v16, %v2064_v58  ;;  %vm2621_vm8 = vcmp.eq.s32.totalorder %v7730_v40, 5  ;;  %v1805_v30 = vadd.f32 %v7545_v57, %v1803_v49  ;;  %v2958_v50 = vsel %vm10838_vm9, %v2915_v2, 0.0  ;;  %v10841_v58 = vld [vmem:[#allocation185_spill] sm:$0xff]  ;;  %v10843_v57 = vld [vmem:[#allocation75_spill] sm:$0xff]  ;;  %vm10844_vm10 = vmmov %vm10833_vm3 }
 0x2aa   :  { %v2025_v38 = vsel %vm1993_vm12, %v10839_v44, 0.0  ;;  %v2653_v52 = vsel %vm2621_vm8, 1, %v10765_v32  ;;  %v2914_v37 = vsel %vm2621_vm8, %v10841_v58, 0.0  ;;  %v2955_v13 = vadd.f32 %v2954_v60, %v2953_v12  ;;  %v10846_v44 = vld [vmem:[#allocation162_spill] sm:$0xff]  ;;  %vm10852_vm15 = vmmov %vm10833_vm3 }
 0x2ab   :  { %v2067_v16 = vsel %vm10840_vm13, %v2025_v38, 0.0  ;;  %2708 = vperm.xlu0 %3976, %v2653_v52   ;;  %vm2626_vm0 = vcmp.eq.s32.totalorder %v7744_v61, 5  ;;  %vm1996_vm2 = vcmp.eq.s32.totalorder %v10843_v57, 1  ;;  %v2956_v2 = vsel %vm10844_vm10, %v2914_v37, 0.0  ;;  %v7752_v38 = vpop.permute.xlu0 %1980  ;;  %v10847_v57 = vld [vmem:[#allocation77_spill] sm:$0xff]  ;;  %v10848_v37 = vld [vmem:[#allocation59_spill] sm:$0xff]  ;;  %vm10853_vm3 = vmmov %vm10845_vm7 }
 0x2ac   :  { %v2068_v49 = vadd.f32 %v2067_v16, %v2066_v51  ;;  %v2658_v26 = vsel %vm2626_vm0, 1, %v10765_v32  ;;  %v2540_v12 = vsel %vm2247_vm14, %v10629_v59, 0.0  ;;  %v2069_v60 = vsel %vm10845_vm7, %v2026_v23, 0.0  ;;  %v7769_v23 = vld [vmem:[%s9282_s2 + $0x68] sm:$0xff]  ;;  %vm10856_vm11 = vmmov %vm10838_vm9  ;;  %v10871_v61 = vld [vmem:[#allocation80_spill] sm:$0xff] }
 0x2ad   :  { %v2957_v52 = vadd.f32 %v2956_v2, %v2955_v13  ;;  %2723 = vperm.xlu1 %3977, %v2658_v26   ;;  %vm1995_vm6 = vcmp.eq.s32.totalorder %v10846_v44, 1  ;;  %v1421_v51 = vadd.f32 %v10847_v57, %v1419_v56  ;;  %v1807_v16 = vadd.f32 %v7586_v4, %v1805_v30  ;;  %10851 = vst [vmem:[#allocation30_spill] sm:$0xff] %v7769_v23  ;;  %v7772_v56 = vpop.permute.xlu1 %2293  ;;  %v10855_v26 = vld [vmem:[#allocation79_spill] sm:$0xff]  ;;  %vm10858_vm8 = vmmov %vm10838_vm9 }
 0x2ae   :  { %v2917_v40 = vsel %vm2624_vm1, %v10848_v37, 0.0  ;;  %v2070_v8 = vadd.f32 %v2069_v60, %v2068_v49  ;;  %v2028_v54 = vsel %vm1996_vm2, %v10849_v62, 0.0  ;;  %v2027_v17 = vsel %vm1995_vm6, %v10850_v43, 0.0  ;;  %v10854_v49 = vld [vmem:[#allocation47_spill] sm:$0xff]  ;;  %vm10859_vm9 = vmmov %vm10853_vm3  ;;  %v10860_v43 = vld [vmem:[#allocation81_spill] sm:$0xff] }
 0x2af   :  { %vm2623_vm14 = vcmp.eq.s32.totalorder %v7769_v23, 5  ;;  %v2959_v44 = vadd.f32 %v2958_v50, %v2957_v52  ;;  %v2602_v4 = vsel %vm10852_vm15, %v2540_v12, 0.0  ;;  %v2071_v30 = vsel %vm10853_vm3, %v2027_v17, 0.0  ;;  %v7783_v50 = vld [vmem:[%s9282_s2 + $0x90] sm:$0xff]  ;;  %v10861_v62 = vld [vmem:[#allocation163_spill] sm:$0xff]  ;;  %vm10865_vm10 = vmmov %vm10853_vm3 }
 0x2b0   :  { %v2655_v13 = vsel %vm2623_vm14, 1, %v10765_v32  ;;  %v2916_v2 = vsel %vm2623_vm14, %v10854_v49, 0.0  ;;  %vm1998_vm1 = vcmp.eq.s32.totalorder %v10855_v26, 1  ;;  %v2072_v60 = vadd.f32 %v2071_v30, %v2070_v8  ;;  %10857 = vst [vmem:[#allocation90_spill] sm:$0xff] %v7783_v50  ;;  %v7791_v8 = vpop.permute.xlu0 %2284  ;;  %vm10870_vm6 = vmmov %vm10853_vm3 }
 0x2b1   :  { %v2960_v57 = vsel %vm10856_vm11, %v2916_v2, 0.0  ;;  %2714 = vperm.xlu0 %3976, %v2655_v13   ;;  %vm2628_vm12 = vcmp.eq.s32.totalorder %v7783_v50, 5  ;;  %v2962_v12 = vsel %vm10858_vm8, %v2917_v40, 0.0  ;;  %v2073_v17 = vsel %vm10859_vm9, %v2028_v54, 0.0 }
 0x2b2   :  { %v2961_v52 = vadd.f32 %v2960_v57, %v2959_v44  ;;  %v2660_v23 = vsel %vm2628_vm12, 1, %v10765_v32  ;;  %v1422_v30 = vrot.slane %v1421_v51, 4  ;;  %v1809_v13 = vadd.f32 %v7590_v28, %v1807_v16  ;;  %v10863_v44 = vld [vmem:[#allocation141_spill] sm:$0xff] }
 0x2b3   :  { %2729 = vperm.xlu1 %3977, %v2660_v23   ;;  %v2074_v2 = vadd.f32 %v2073_v17, %v2072_v60  ;;  %vm1997_vm13 = vcmp.eq.s32.totalorder %v10860_v43, 1  ;;  %v2919_v40 = vsel %vm2626_vm0, %v10861_v62, 0.0  ;;  %v2030_v54 = vsel %vm1998_vm1, %v10862_v29, 0.0  ;;  %v10866_v16 = vld [vmem:[#allocation53_spill] sm:$0xff]  ;;  %v7811_v17 = vpop.permute.xlu1 %2299  ;;  %vm10868_vm0 = vmmov %vm10858_vm8 }
 0x2b4   :  { %v2029_v57 = vsel %vm1997_vm13, %v10863_v44, 0.0  ;;  %vm2625_vm2 = vcmp.eq.s32.totalorder %v7805_v1, 5  ;;  %v2963_v60 = vadd.f32 %v2962_v12, %v2961_v52  ;;  %10867 = vst [vmem:[#allocation91_spill] sm:$0xff] %v7811_v17  ;;  %v7814_v26 = vadd.f32 %v2602_v4, %v7682_v41  ;;  %v7820_v1 = vld [vmem:[%s9282_s2 + $0xa0] sm:$0xff]  ;;  %vm10872_vm15 = vmmov %vm10868_vm0 }
 0x2b5   :  { %v2075_v28 = vsel %vm10865_vm10, %v2029_v57, 0.0  ;;  %v2657_v43 = vsel %vm2625_vm2, 1, %v10765_v32  ;;  %v2918_v23 = vsel %vm2625_vm2, %v10866_v16, 0.0  ;;  %10869 = vst [vmem:[#allocation94_spill] sm:$0xff] %v7820_v1  ;;  %vm2630_vm7 = vcmp.eq.s32.totalorder %v7820_v1, 5  ;;  %vm10880_vm8 = vmmov %vm10868_vm0 }
 0x2b6   :  { %v2076_v44 = vadd.f32 %v2075_v28, %v2074_v2  ;;  %v2964_v29 = vsel %vm10868_vm0, %v2918_v23, 0.0  ;;  %2720 = vperm.xlu0 %3976, %v2657_v43   ;;  %v2077_v57 = vsel %vm10870_vm6, %v2030_v54, 0.0  ;;  %vm2000_vm14 = vcmp.eq.s32.totalorder %v10871_v61, 1  ;;  %v7832_v43 = vpop.permute.xlu0 %2290  ;;  %v10873_v23 = vld [vmem:[#allocation170_spill] sm:$0xff]  ;;  %v10875_v61 = vld [vmem:[#allocation175_spill] sm:$0xff]  ;;  %vm10883_vm13 = vmmov %vm10870_vm6 }
 0x2b7   :  { %v2965_v12 = vadd.f32 %v2964_v29, %v2963_v60  ;;  %v2662_v41 = vsel %vm2630_vm7, 1, %v10765_v32  ;;  %v7828_v4 = vadd.f32 %v1422_v30, %v1421_v51  ;;  %v1811_v52 = vadd.f32 %v7598_v15, %v1809_v13  ;;  %v7841_v29 = vld [vmem:[%s9282_s2 + $0x88] sm:$0xff]  ;;  %v10876_v30 = vld [vmem:[#allocation148_spill] sm:$0xff] }
 0x2b8   :  { %v2966_v2 = vsel %vm10872_vm15, %v2919_v40, 0.0  ;;  %2735 = vperm.xlu1 %3977, %v2662_v41   ;;  %v2078_v28 = vadd.f32 %v2077_v57, %v2076_v44  ;;  %v2921_v54 = vsel %vm2628_vm12, %v10873_v23, 0.0  ;;  %vm1999_vm3 = vcmp.eq.s32.totalorder %v7439_v5, 1  ;;  %10874 = vst [vmem:[#allocation93_spill] sm:$0xff] %v7841_v29  ;;  %v10877_v44 = vld [vmem:[#allocation138_spill] sm:$0xff]  ;;  %v10878_v57 = vld [vmem:[#allocation84_spill] sm:$0xff]  ;;  %vm10879_vm12 = vmmov %vm10870_vm6 }
 0x2b9   :  { %vm2627_vm1 = vcmp.eq.s32.totalorder %v7841_v29, 5  ;;  %v2967_v15 = vadd.f32 %v2966_v2, %v2965_v12  ;;  %v2032_v51 = vsel %vm2000_vm14, %v10875_v61, 0.0  ;;  %v2031_v13 = vsel %vm1999_vm3, %v10876_v30, 0.0  ;;  %v7854_v29 = vld [vmem:[%s9282_s2 + $0xb0] sm:$0xff]  ;;  %v7857_v12 = vpop.permute.xlu1 %2305  ;;  %vm10891_vm14 = vmmov %vm10879_vm12 }
 0x2ba   :  { %v2659_v40 = vsel %vm2627_vm1, 1, %v10765_v32  ;;  %v2920_v60 = vsel %vm2627_vm1, %v10877_v44, 0.0  ;;  %vm2002_vm11 = vcmp.eq.s32.totalorder %v10878_v57, 1  ;;  %v2079_v5 = vsel %vm10879_vm12, %v2031_v13, 0.0  ;;  %10881 = vst [vmem:[#allocation95_spill] sm:$0xff] %v7854_v29  ;;  %10882 = vst [vmem:[#allocation96_spill] sm:$0xff] %v7857_v12 }
 0x2bb   :  { %v2968_v41 = vsel %vm10880_vm8, %v2920_v60, 0.0  ;;  %2726 = vperm.xlu0 %3976, %v2659_v40   ;;  %vm2632_vm9 = vcmp.eq.s32.totalorder %v7854_v29, 5  ;;  %v1813_v2 = vadd.f32 %v7642_v48, %v1811_v52  ;;  %v2080_v61 = vadd.f32 %v2079_v5, %v2078_v28  ;;  %v10884_v40 = vld [vmem:[#allocation178_spill] sm:$0xff]  ;;  %v7871_v12 = vld [vmem:[%s9282_s2 + $0x98] sm:$0xff]  ;;  %vm10892_vm15 = vmmov %vm10868_vm0 }
 0x2bc   :  { %v2969_v30 = vadd.f32 %v2968_v41, %v2967_v15  ;;  %v2664_v13 = vsel %vm2632_vm9, 1, %v10765_v32  ;;  %v2081_v60 = vsel %vm10883_vm13, %v2032_v51, 0.0  ;;  %v2923_v50 = vsel %vm2630_vm7, %v10884_v40, 0.0  ;;  %10885 = vst [vmem:[#allocation155_spill] sm:$0xff] %v7871_v12  ;;  %v10886_v52 = vld [vmem:[#allocation182_spill] sm:$0xff]  ;;  %v7879_v51 = vpop.permute.xlu0 %2296  ;;  %v10888_v5 = vld [vmem:[#allocation171_spill] sm:$0xff]  ;;  %vm10890_vm7 = vmmov %vm10868_vm0 }
 0x2bd   :  { %2741 = vperm.xlu1 %3977, %v2664_v13   ;;  %vm2001_vm2 = vcmp.eq.s32.totalorder %v7479_v55, 1  ;;  %vm2629_vm10 = vcmp.eq.s32.totalorder %v7871_v12, 5  ;;  %v2970_v48 = vsel %vm10868_vm0, %v2921_v54, 0.0  ;;  %v2034_v28 = vsel %vm2002_vm11, %v10886_v52, 0.0  ;;  %10887 = vst [vmem:[#allocation62_spill] sm:$0xff] %v7879_v51  ;;  %v10889_v13 = vld [vmem:[#allocation167_spill] sm:$0xff]  ;;  %vm10894_vm1 = vmmov %vm10879_vm12 }
 0x2be   :  { %vm2004_vm6 = vcmp.eq.s32.totalorder %v7463_v0, 1  ;;  %v2082_v15 = vadd.f32 %v2081_v60, %v2080_v61  ;;  %v2033_v55 = vsel %vm2001_vm2, %v10888_v5, 0.0  ;;  %v2661_v41 = vsel %vm2629_vm10, 1, %v10765_v32  ;;  %v7890_v61 = vld [vmem:[%s9282_s2 + $0xc0] sm:$0xff]  ;;  %vm10904_vm2 = vmmov %vm10868_vm0  ;;  %v10907_v29 = vld [vmem:[#allocation137_spill] sm:$0xff] }
 0x2bf   :  { %v2922_v1 = vsel %vm2629_vm10, %v10889_v13, 0.0  ;;  %v2971_v17 = vadd.f32 %v2970_v48, %v2969_v30  ;;  %v2974_v12 = vsel %vm10890_vm7, %v2923_v50, 0.0  ;;  %v2083_v54 = vsel %vm10891_vm14, %v2033_v55, 0.0  ;;  %2732 = vperm.xlu0 %3976, %v2661_v41   ;;  %10893 = vst [vmem:[#allocation63_spill] sm:$0xff] %v7890_v61  ;;  %v7897_v30 = vpop.permute.xlu1 %2311  ;;  %v10896_v48 = vld [vmem:[#allocation106_spill] sm:$0xff]  ;;  %v10897_v55 = vld [vmem:[#allocation131_spill] sm:$0xff]  ;;  %vm10905_vm10 = vmmov %vm10868_vm0 }
 0x2c0   :  { %v2972_v36 = vsel %vm10892_vm15, %v2922_v1, 0.0  ;;  %vm2634_vm3 = vcmp.eq.s32.totalorder %v7890_v61, 5  ;;  %v2085_v57 = vsel %vm10894_vm1, %v2034_v28, 0.0  ;;  %v2084_v60 = vadd.f32 %v2083_v54, %v2082_v15  ;;  %10895 = vst [vmem:[#allocation64_spill] sm:$0xff] %v7897_v30  ;;  %v10899_v28 = vld [vmem:[#allocation128_spill] sm:$0xff]  ;;  %vm10906_vm0 = vmmov %vm10894_vm1 }
 0x2c1   :  { %v2973_v5 = vadd.f32 %v2972_v36, %v2971_v17  ;;  %v2666_v50 = vsel %vm2634_vm3, 1, %v10765_v32  ;;  %v2925_v1 = vsel %vm2632_vm9, %v10896_v48, 0.0  ;;  %v2036_v41 = vsel %vm2004_vm6, %v10897_v55, 0.0  ;;  %v7909_v36 = vld [vmem:[%s9282_s2 + $0xa8] sm:$0xff]  ;;  %vm10900_vm9 = vmmov %vm10894_vm1 }
 0x2c2   :  { %2747 = vperm.xlu1 %3977, %v2666_v50   ;;  %vm2003_vm11 = vcmp.eq.s32.totalorder %v7527_v9, 1  ;;  %10898 = vst [vmem:[#allocation6_spill] sm:$0xff] %v7909_v36  ;;  %vm2631_vm12 = vcmp.eq.s32.totalorder %v7909_v36, 5  ;;  %vm2006_vm8 = vcmp.eq.s32.totalorder %v7507_v33, 1  ;;  %v2086_v17 = vadd.f32 %v2085_v57, %v2084_v60  ;;  %v10901_v55 = vld [vmem:[#allocation181_spill] sm:$0xff]  ;;  %v7920_v9 = vld [vmem:[%s9282_s2 + $0xd0] sm:$0xff]  ;;  %v7923_v36 = vpop.permute.xlu0 %2302  ;;  %vm10912_vm14 = vmmov %vm10906_vm0 }
 0x2c3   :  { %v2035_v15 = vsel %vm2003_vm11, %v10899_v28, 0.0  ;;  %v2663_v54 = vsel %vm2631_vm12, 1, %v10765_v32  ;;  %v2924_v50 = vsel %vm2631_vm12, %v10901_v55, 0.0  ;;  %v2975_v52 = vadd.f32 %v2974_v12, %v2973_v5  ;;  %10902 = vst [vmem:[#allocation5_spill] sm:$0xff] %v7920_v9  ;;  %10903 = vst [vmem:[#allocation7_spill] sm:$0xff] %v7923_v36  ;;  %v4136_v36 = vld [vmem:[%s9282_s2 + $0xe8] sm:$0xff] }
 0x2c4   :  { %v2087_v0 = vsel %vm10900_vm9, %v2035_v15, 0.0  ;;  %2738 = vperm.xlu0 %3976, %v2663_v54   ;;  %vm2636_vm13 = vcmp.eq.s32.totalorder %v7920_v9, 5  ;;  %v7926_v57 = vadd.f32 %v7678_v20, %v1813_v2  ;;  %v2976_v28 = vsel %vm10904_vm2, %v2924_v50, 0.0  ;;  %v7942_v50 = vld [vmem:[%s9282_s2 + $0xb8] sm:$0xff]  ;;  %vm10914_vm11 = vmmov %vm10906_vm0 }
 0x2c5   :  { %v2088_v60 = vadd.f32 %v2087_v0, %v2086_v17  ;;  %v2668_v12 = vsel %vm2636_vm13, 1, %v10765_v32  ;;  %v2978_v5 = vsel %vm10905_vm10, %v2925_v1, 0.0  ;;  %v2089_v15 = vsel %vm10906_vm0, %v2036_v41, 0.0  ;;  %v10908_v17 = vld [vmem:[#allocation48_spill] sm:$0xff]  ;;  %10909 = vst [vmem:[#allocation154_spill] sm:$0xff] %v7942_v50  ;;  %v7945_v1 = vpop.permute.xlu1 %2317  ;;  %vm10915_vm12 = vmmov %vm10904_vm2 }
 0x2c6   :  { %v2977_v54 = vadd.f32 %v2976_v28, %v2975_v52  ;;  %2753 = vperm.xlu1 %3977, %v2668_v12   ;;  %vm2005_vm6 = vcmp.eq.s32.totalorder %v7567_v42, 1  ;;  %v2038_v20 = vsel %vm2006_vm8, %v10907_v29, 0.0  ;;  %vm2633_vm7 = vcmp.eq.s32.totalorder %v7942_v50, 5  ;;  %10910 = vst [vmem:[#allocation9_spill] sm:$0xff] %v7945_v1  ;;  %v10911_v52 = vld [vmem:[#allocation110_spill] sm:$0xff]  ;;  %v10913_v28 = vld [vmem:[#allocation45_spill] sm:$0xff]  ;;  %v7962_v61 = vpop.permute.xlu0 %2308  ;;  %vm10917_vm8 = vmmov %vm10904_vm2 }
 0x2c7   :  { %v2090_v2 = vadd.f32 %v2089_v15, %v2088_v60  ;;  %v2037_v0 = vsel %vm2005_vm6, %v10908_v17, 0.0  ;;  %v2927_v42 = vsel %vm2634_vm3, %v10911_v52, 0.0  ;;  %v2665_v33 = vsel %vm2633_vm7, 1, %v10765_v32  ;;  %v4131_v50 = vld [vmem:[%s9282_s2 + $0xe0] sm:$0xff]  ;;  %10916 = vst [vmem:[#allocation169_spill] sm:$0xff] %v7962_v61  ;;  %v10919_v1 = vld [vmem:[#allocation130_spill] sm:$0xff]  ;;  %vm10922_vm2 = vmmov %vm10906_vm0 }
 0x2c8   :  { %v2091_v41 = vsel %vm10912_vm14, %v2037_v0, 0.0  ;;  %v2926_v60 = vsel %vm2633_vm7, %v10913_v28, 0.0  ;;  %vm2008_vm15 = vcmp.eq.s32.totalorder %v7549_v3, 1  ;;  %v2979_v15 = vadd.f32 %v2978_v5, %v2977_v54  ;;  %2744 = vperm.xlu0 %3976, %v2665_v33   ;;  %v10918_v5 = vld [vmem:[#allocation115_spill] sm:$0xff]  ;;  %vm10925_vm0 = vmmov %vm10917_vm8 }
 0x2c9   :  { %v2092_v12 = vadd.f32 %v2091_v41, %v2090_v2  ;;  %vm2638_vm1 = vcmp.eq.s32.totalorder %v4131_v50, 5  ;;  %v2093_v17 = vsel %vm10914_vm11, %v2038_v20, 0.0  ;;  %v2980_v29 = vsel %vm10915_vm12, %v2926_v60, 0.0  ;;  %v10920_v60 = vld [vmem:[#allocation133_spill] sm:$0xff]  ;;  %vm10926_vm6 = vmmov %vm10925_vm0 }
 0x2ca   :  { %v2670_v0 = vsel %vm2638_vm1, 1, %v10765_v32  ;;  %vm2007_vm3 = vcmp.eq.s32.totalorder %v7622_v22, 1  ;;  %v2982_v2 = vsel %vm10917_vm8, %v2927_v42, 0.0  ;;  %v2929_v54 = vsel %vm2636_vm13, %v10918_v5, 0.0  ;;  %v7975_v22 = vld [vmem:[%s9282_s2 + $0xc8] sm:$0xff]  ;;  %v7981_v42 = vld [vmem:[%s9282_s2 + $0xf0] sm:$0xff]  ;;  %vm10927_vm7 = vmmov %vm10922_vm2 }
 0x2cb   :  { %v2981_v41 = vadd.f32 %v2980_v29, %v2979_v15  ;;  %2759 = vperm.xlu1 %3977, %v2670_v0   ;;  %v2094_v33 = vadd.f32 %v2093_v17, %v2092_v12  ;;  %v2040_v20 = vsel %vm2008_vm15, %v10919_v1, 0.0  ;;  %v2039_v30 = vsel %vm2007_vm3, %v10920_v60, 0.0  ;;  %10921 = vst [vmem:[#allocation11_spill] sm:$0xff] %v7975_v22  ;;  %v10923_v17 = vld [vmem:[#allocation134_spill] sm:$0xff]  ;;  %v7987_v0 = vpop.permute.xlu1 %2323  ;;  %vm10933_vm11 = vmmov %vm10922_vm2 }
 0x2cc   :  { %vm2635_vm9 = vcmp.eq.s32.totalorder %v7975_v22, 5  ;;  %vm2640_vm13 = vcmp.eq.s32.totalorder %v7981_v42, 5  ;;  %v2095_v29 = vsel %vm10922_vm2, %v2039_v30, 0.0  ;;  %10924 = vst [vmem:[#allocation172_spill] sm:$0xff] %v7987_v0  ;;  %vm2010_vm10 = vcmp.eq.s32.totalorder %v7592_v14, 1  ;;  %vm10936_vm12 = vmmov %vm10925_vm0 }
 0x2cd   :  { %v2667_v3 = vsel %vm2635_vm9, 1, %v10765_v32  ;;  %v2928_v12 = vsel %vm2635_vm9, %v10923_v17, 0.0  ;;  %v2983_v15 = vadd.f32 %v2982_v2, %v2981_v41  ;;  %v2096_v60 = vadd.f32 %v2095_v29, %v2094_v33  ;;  %v10928_v2 = vld [vmem:[#allocation144_spill] sm:$0xff]  ;;  %v10929_v33 = vld [vmem:[#allocation57_spill] sm:$0xff]  ;;  %vm10938_vm8 = vmmov %vm10925_vm0 }
 0x2ce   :  { %v2984_v22 = vsel %vm10925_vm0, %v2928_v12, 0.0  ;;  %2750 = vperm.xlu0 %3976, %v2667_v3   ;;  %v2672_v1 = vsel %vm2640_vm13, 1, %v10765_v32  ;;  %v2986_v9 = vsel %vm10926_vm6, %v2929_v54, 0.0  ;;  %v2097_v30 = vsel %vm10927_vm7, %v2040_v20, 0.0  ;;  %v8003_v3 = vld [vmem:[%s9282_s2 + $0xd8] sm:$0xff]  ;;  %v8006_v54 = vpop.permute.xlu0 %2314  ;;  %v10932_v20 = vld [vmem:[#allocation146_spill] sm:$0xff]  ;;  %vm10939_vm9 = vmmov %vm10922_vm2 }
 0x2cf   :  { %v2985_v61 = vadd.f32 %v2984_v22, %v2983_v15  ;;  %2765 = vperm.xlu1 %3977, %v2672_v1   ;;  %vm2009_vm14 = vcmp.eq.s32.totalorder %v7659_v47, 1  ;;  %v2931_v41 = vsel %vm2638_vm1, %v10928_v2, 0.0  ;;  %v2098_v0 = vadd.f32 %v2097_v30, %v2096_v60  ;;  %10930 = vst [vmem:[#allocation13_spill] sm:$0xff] %v8003_v3  ;;  %10931 = vst [vmem:[#allocation177_spill] sm:$0xff] %v8006_v54  ;;  %v10934_v60 = vld [vmem:[#allocation127_spill] sm:$0xff] }
 0x2d0   :  { %v2041_v29 = vsel %vm2009_vm14, %v10929_v33, 0.0  ;;  %vm2637_vm15 = vcmp.eq.s32.totalorder %v8003_v3, 5  ;;  %v2042_v1 = vsel %vm2010_vm10, %v10932_v20, 0.0  ;;  %v2604_v12 = vrot.slane %v7814_v26, 4  ;;  %v8018_v3 = vld [vmem:[%s9282_s2] sm:$0xff]  ;;  %vm10944_vm14 = vmmov %vm10938_vm8 }
 0x2d1   :  { %v2099_v47 = vsel %vm10933_vm11, %v2041_v29, 0.0  ;;  %v2669_v50 = vsel %vm2637_vm15, 1, %v10765_v32  ;;  %v2930_v22 = vsel %vm2637_vm15, %v10934_v60, 0.0  ;;  %v2987_v30 = vadd.f32 %v2986_v9, %v2985_v61  ;;  %10935 = vst [vmem:[#allocation15_spill] sm:$0xff] %v8018_v3 }
 0x2d2   :  { %v2100_v15 = vadd.f32 %v2099_v47, %v2098_v0  ;;  %2756 = vperm.xlu0 %3976, %v2669_v50   ;;  %vm3004_vm1 = vcmp.eq.s32.totalorder %v8018_v3, 6  ;;  %v1424_v14 = vrot.slane %v7828_v4, 2  ;;  %v2988_v29 = vsel %vm10936_vm12, %v2930_v22, 0.0  ;;  %v8027_v0 = vpop.permute.xlu1 %2329  ;;  %v10940_v22 = vld [vmem:[#allocation56_spill] sm:$0xff]  ;;  %vm10962_vm12 = vmmov %vm10927_vm7  ;;  %v10968_v3 = vld [vmem:[#allocation143_spill] sm:$0xff] }
 0x2d3   :  { %v3036_v33 = vsel %vm3004_vm1, 1, %v10765_v32  ;;  %vm2011_vm3 = vcmp.eq.s32.totalorder %v7711_v6, 1  ;;  %10937 = vst [vmem:[#allocation65_spill] sm:$0xff] %v8027_v0  ;;  %v1816_v61 = vrot.slane %v7926_v57, 4  ;;  %v2990_v9 = vsel %vm10938_vm8, %v2931_v41, 0.0  ;;  %v10941_v0 = vld [vmem:[#allocation145_spill] sm:$0xff] }
 0x2d4   :  { %v2101_v47 = vsel %vm10939_vm9, %v2042_v1, 0.0  ;;  %v2989_v50 = vadd.f32 %v2988_v29, %v2987_v30  ;;  %3069 = vperm.xlu1 %3977, %v3036_v33   ;;  %vm2012_vm2 = vcmp.eq.s32.totalorder %v7637_v34, 1  ;;  %v2043_v54 = vsel %vm2011_vm3, %v10940_v22, 0.0  ;;  %v8042_v41 = vld [vmem:[%s9282_s2 + $0x10] sm:$0xff]  ;;  %v8045_v33 = vpop.permute.xlu0 %2320  ;;  %v10945_v30 = vld [vmem:[#allocation119_spill] sm:$0xff] }
 0x2d5   :  { %v2102_v20 = vadd.f32 %v2101_v47, %v2100_v15  ;;  %vm2639_vm10 = vcmp.eq.s32.totalorder %v4136_v36, 5  ;;  %10942 = vst [vmem:[#allocation149_spill] sm:$0xff] %v8042_v41  ;;  %vm3006_vm0 = vcmp.eq.s32.totalorder %v8042_v41, 6  ;;  %10943 = vst [vmem:[#allocation156_spill] sm:$0xff] %v8045_v33  ;;  %vm2376_vm6 = vcmp.eq.s32.totalorder %v7684_v24, 1 }
 0x2d6   :  { %v2671_v6 = vsel %vm2639_vm10, 1, %v10765_v32  ;;  %v2932_v51 = vsel %vm2639_vm10, %v10941_v0, 0.0  ;;  %v2991_v10 = vadd.f32 %v2990_v9, %v2989_v50  ;;  %v2103_v1 = vsel %vm10927_vm7, %v2043_v54, 0.0  ;;  %v10949_v54 = vld [vmem:[#allocation150_spill] sm:$0xff]  ;;  %v10950_v50 = vld [vmem:[#allocation151_spill] sm:$0xff] }
 0x2d7   :  { %v2992_v36 = vsel %vm10944_vm14, %v2932_v51, 0.0  ;;  %2762 = vperm.xlu0 %3976, %v2671_v6   ;;  %v3038_v15 = vsel %vm3006_vm0, 1, %v10765_v32  ;;  %vm10946_vm15 = vcmp.eq.s32.totalorder %v10945_v30, 3  ;;  %v8057_v9 = vadd.f32 %v1424_v14, %v7828_v4  ;;  %v8071_v30 = vpop.permute.xlu1 %2335  ;;  %v10952_v4 = vld [vmem:[#allocation147_spill] sm:$0xff]  ;;  %v10953_v14 = vld [vmem:[#allocation158_spill] sm:$0xff] }
 0x2d8   :  { %v2132_v29 = vsel %vm10946_vm15, %v10877_v44, 0.0  ;;  %v8060_v47 = vadd.f32 %v1816_v61, %v7926_v57  ;;  %v8062_v24 = vadd.f32 %v2992_v36, %v2991_v10  ;;  %3075 = vperm.xlu1 %3977, %v3038_v15   ;;  %v2933_v51 = vsel %vm2640_vm13, %v10949_v54, 0.0  ;;  %10951 = vst [vmem:[#allocation68_spill] sm:$0xff] %v8071_v30  ;;  %v10954_v36 = vld [vmem:[#allocation164_spill] sm:$0xff]  ;;  %vm10955_vm13 = vmmov %vm10938_vm8 }
 0x2d9   :  { %10947 = vst [vmem:[#allocation66_spill] sm:$0xff] %v8057_v9  ;;  %v2044_v6 = vsel %vm2012_vm2, %v10950_v50, 0.0  ;;  %vm2378_vm11 = vcmp.eq.s32.totalorder %v7733_v53, 1  ;;  %v3297_v57 = vsel %vm3004_vm1, %v10952_v4, 0.0  ;;  %v2408_v10 = vsel %vm2376_vm6, %v10953_v14, 0.0  ;;  %vm10959_vm1 = vmmov %vm10938_vm8  ;;  %v8093_v14 = vpop.permute.xlu0 %2326  ;;  %v10969_v9 = vld [vmem:[#allocation100_spill] sm:$0xff] }
 0x2da   :  { %10948 = vst [vmem:[#allocation157_spill] sm:$0xff] %v8060_v47  ;;  %v2104_v61 = vadd.f32 %v2103_v1, %v2102_v20  ;;  %v3299_v42 = vsel %vm3006_vm0, %v10954_v36, 0.0  ;;  %v8081_v15 = vsel %vm10955_vm13, %v2132_v29, 0.0  ;;  %v8085_v53 = vadd.f32 %v2604_v12, %v7814_v26  ;;  %v10960_v20 = vld [vmem:[#allocation166_spill] sm:$0xff]  ;;  %10961 = vst [vmem:[#allocation61_spill] sm:$0xff] %v8093_v14 }
 0x2db   :  { %10956 = vst [vmem:[#allocation67_spill] sm:$0xff] %v8081_v15  ;;  %v8090_v44 = vsel %vm10959_vm1, %v2933_v51, 0.0  ;;  %v2410_v1 = vsel %vm2378_vm11, %v10960_v20, 0.0  ;;  %v2105_v41 = vsel %vm10962_vm12, %v2044_v6, 0.0  ;;  %vm10963_vm3 = vmmov %vm10959_vm1  ;;  %v10966_v51 = vld [vmem:[#allocation97_spill] sm:$0xff]  ;;  %vm10970_vm10 = vcmp.eq.s32.totalorder %v10969_v9, 3  ;;  %v8128_v47 = vpop.permute.xlu1 %2341 }
 0x2dc   :  { %10958 = vst [vmem:[#allocation160_spill] sm:$0xff] %v8085_v53  ;;  %v8097_v29 = vsel %vm10963_vm3, %v3297_v57, 0.0  ;;  %vm10964_vm8 = vmmov %vm10927_vm7  ;;  %v8105_v12 = vadd.f32 %v2105_v41, %v2104_v61  ;;  %vm10967_vm2 = vcmp.eq.s32.totalorder %v10966_v51, 3  ;;  %v2116_v34 = vsel %vm10970_vm10, %v10968_v3, 0.0  ;;  %v10971_v6 = vld [vmem:[#allocation98_spill] sm:$0xff]  ;;  %v10976_v61 = vld [vmem:[#allocation99_spill] sm:$0xff] }
 0x2dd   :  { %v8100_v22 = vsel %vm10964_vm8, %v2408_v10, 0.0  ;;  %vm10965_vm9 = vmmov %vm10959_vm1  ;;  %v2115_v50 = vsel %vm10967_vm2, %v10952_v4, 0.0  ;;  %vm10972_vm0 = vcmp.eq.s32.totalorder %v10971_v6, 3  ;;  %vm10977_vm14 = vcmp.eq.s32.totalorder %v10976_v61, 3  ;;  %v10978_v53 = vld [vmem:[#allocation105_spill] sm:$0xff]  ;;  %10980 = vst [vmem:[#allocation60_spill] sm:$0xff] %v8128_v47 }
 0x2de   :  { %v8103_v26 = vsel %vm10965_vm9, %v3299_v42, 0.0  ;;  %v2117_v57 = vsel %vm10972_vm0, %v10954_v36, 0.0  ;;  %vm10973_vm6 = vmmov %vm10927_vm7  ;;  %v10974_v42 = vld [vmem:[#allocation103_spill] sm:$0xff]  ;;  %v2119_v51 = vsel %vm10977_vm14, %v10528_v25, 0.0  ;;  %vm10979_vm15 = vcmp.eq.s32.totalorder %v10978_v53, 3  ;;  %v10981_v6 = vld [vmem:[#allocation102_spill] sm:$0xff] }
 0x2df   :  { %v8117_v10 = vsel %vm10973_vm6, %v2410_v1, 0.0  ;;  %vm10975_vm7 = vcmp.eq.s32.totalorder %v10974_v42, 3  ;;  %v2120_v9 = vsel %vm10979_vm15, %v10531_v63, 0.0  ;;  %vm10982_vm11 = vcmp.eq.s32.totalorder %v10981_v6, 3  ;;  %v10983_v1 = vld [vmem:[#allocation109_spill] sm:$0xff]  ;;  %v10985_v42 = vld [vmem:[#allocation104_spill] sm:$0xff]  ;;  %vm10991_vm8 = vmmov %vm10965_vm9 }
 0x2e0   :  { %v2118_v41 = vsel %vm10975_vm7, %v10525_v46, 0.0  ;;  %v2121_v20 = vsel %vm10982_vm11, %v10534_v19, 0.0  ;;  %vm10984_vm13 = vcmp.eq.s32.totalorder %v10983_v1, 3  ;;  %vm10986_vm1 = vcmp.eq.s32.totalorder %v10985_v42, 3  ;;  %v10987_v61 = vld [vmem:[#allocation112_spill] sm:$0xff]  ;;  %vm10992_vm9 = vmmov %vm10991_vm8  ;;  %v10994_v1 = vld [vmem:[#allocation113_spill] sm:$0xff] }
 0x2e1   :  { %v2122_v36 = vsel %vm10984_vm13, %v10540_v39, 0.0  ;;  %v2123_v4 = vsel %vm10986_vm1, %v10670_v35, 0.0  ;;  %vm10988_vm12 = vcmp.eq.s32.totalorder %v10987_v61, 3  ;;  %v10989_v53 = vld [vmem:[#allocation108_spill] sm:$0xff]  ;;  %v2147_v14 = vsel %vm10991_vm8, %v2115_v50, 0.0  ;;  %vm10993_vm2 = vmmov %vm10991_vm8  ;;  %v10996_v42 = vld [vmem:[#allocation23_spill] sm:$0xff] }
 0x2e2   :  { %v2124_v30 = vsel %vm10988_vm12, %v10678_v18, 0.0  ;;  %vm10990_vm3 = vcmp.eq.s32.totalorder %v10989_v53, 3  ;;  %v2148_v6 = vsel %vm10992_vm9, %v2116_v34, 0.0  ;;  %v2150_v33 = vsel %vm10993_vm2, %v2117_v57, 0.0  ;;  %v10998_v61 = vld [vmem:[#allocation116_spill] sm:$0xff]  ;;  %v11001_v50 = vld [vmem:[#allocation26_spill] sm:$0xff]  ;;  %vm11019_vm9 = vmmov %vm10993_vm2 }
 0x2e3   :  { %v2125_v47 = vsel %vm10990_vm3, %v10681_v27, 0.0  ;;  %vm10995_vm10 = vcmp.eq.s32.totalorder %v10994_v1, 3  ;;  %vm10997_vm0 = vcmp.eq.s32.totalorder %v10996_v42, 3  ;;  %vm10999_vm6 = vcmp.eq.s32.totalorder %v10998_v61, 3  ;;  %v8157_v27 = vpop.permute.xlu0 %2332  ;;  %v11003_v57 = vld [vmem:[#allocation118_spill] sm:$0xff] }
 0x2e4   :  { %v2126_v39 = vsel %vm10995_vm10, %v10841_v58, 0.0  ;;  %v2127_v15 = vsel %vm10997_vm0, %v10687_v7, 0.0  ;;  %v2128_v18 = vsel %vm10999_vm6, %v10854_v49, 0.0  ;;  %v2149_v53 = vadd.f32 %v2148_v6, %v2147_v14  ;;  %11000 = vst [vmem:[#allocation17_spill] sm:$0xff] %v8157_v27  ;;  %v11005_v58 = vld [vmem:[#allocation33_spill] sm:$0xff]  ;;  %v11007_v7 = vld [vmem:[#allocation35_spill] sm:$0xff] }
 0x2e5   :  { %vm11002_vm7 = vcmp.eq.s32.totalorder %v11001_v50, 3  ;;  %vm11004_vm14 = vcmp.eq.s32.totalorder %v11003_v57, 3  ;;  %vm11006_vm15 = vcmp.eq.s32.totalorder %v11005_v58, 3  ;;  %vm11008_vm11 = vcmp.eq.s32.totalorder %v11007_v7, 3  ;;  %v11009_v14 = vld [vmem:[#allocation120_spill] sm:$0xff]  ;;  %v11011_v27 = vld [vmem:[#allocation37_spill] sm:$0xff] }
 0x2e6   :  { %v2129_v34 = vsel %vm11002_vm7, %v10848_v37, 0.0  ;;  %v2130_v1 = vsel %vm11004_vm14, %v10866_v16, 0.0  ;;  %v2131_v42 = vsel %vm11006_vm15, %v10861_v62, 0.0  ;;  %v2133_v61 = vsel %vm11008_vm11, %v10873_v23, 0.0  ;;  %v11013_v49 = vld [vmem:[#allocation121_spill] sm:$0xff]  ;;  %v11015_v58 = vld [vmem:[#allocation38_spill] sm:$0xff] }
 0x2e7   :  { %vm11010_vm13 = vcmp.eq.s32.totalorder %v11009_v14, 3  ;;  %vm11012_vm1 = vcmp.eq.s32.totalorder %v11011_v27, 3  ;;  %vm11014_vm12 = vcmp.eq.s32.totalorder %v11013_v49, 3  ;;  %v2151_v16 = vadd.f32 %v2150_v33, %v2149_v53  ;;  %v11017_v7 = vld [vmem:[#allocation122_spill] sm:$0xff]  ;;  %v11020_v49 = vld [vmem:[#allocation39_spill] sm:$0xff] }
 0x2e8   :  { %v2134_v6 = vsel %vm11010_vm13, %v10889_v13, 0.0  ;;  %v2135_v50 = vsel %vm11012_vm1, %v10884_v40, 0.0  ;;  %v8180_v57 = vsel %vm11014_vm12, %v10901_v55, 0.0  ;;  %vm11016_vm3 = vcmp.eq.s32.totalorder %v11015_v58, 3  ;;  %v8194_v40 = vpop.permute.xlu1 %2347  ;;  %v11022_v53 = vld [vmem:[#allocation123_spill] sm:$0xff]  ;;  %vm11036_vm1 = vmmov %vm10993_vm2 }
 0x2e9   :  { %v8185_v62 = vsel %vm11016_vm3, %v10896_v48, 0.0  ;;  %vm11018_vm8 = vcmp.eq.s32.totalorder %v11017_v7, 3  ;;  %v2152_v13 = vsel %vm11019_vm9, %v2118_v41, 0.0  ;;  %v2154_v27 = vsel %vm10993_vm2, %v2119_v51, 0.0  ;;  %v11024_v7 = vld [vmem:[#allocation40_spill] sm:$0xff]  ;;  %vm11037_vm12 = vmmov %vm11036_vm1 }
 0x2ea   :  { %v8190_v14 = vsel %vm11018_vm8, %v10913_v28, 0.0  ;;  %vm11021_vm10 = vcmp.eq.s32.totalorder %v11020_v49, 3  ;;  %vm11023_vm0 = vcmp.eq.s32.totalorder %v11022_v53, 3  ;;  %vm11025_vm6 = vcmp.eq.s32.totalorder %v11024_v7, 3  ;;  %v11026_v51 = vld [vmem:[#allocation124_spill] sm:$0xff]  ;;  %v11028_v49 = vld [vmem:[#allocation41_spill] sm:$0xff]  ;;  %vm11038_vm3 = vmmov %vm11036_vm1 }
 0x2eb   :  { %v8199_v33 = vsel %vm11021_vm10, %v10911_v52, 0.0  ;;  %v8204_v58 = vsel %vm11023_vm0, %v10923_v17, 0.0  ;;  %v8209_v28 = vsel %vm11025_vm6, %v10918_v5, 0.0  ;;  %v2153_v41 = vadd.f32 %v2152_v13, %v2151_v16  ;;  %v11030_v53 = vld [vmem:[#allocation125_spill] sm:$0xff]  ;;  %v11032_v7 = vld [vmem:[#allocation42_spill] sm:$0xff]  ;;  %vm11039_vm8 = vmmov %vm11036_vm1 }
 0x2ec   :  { %vm11027_vm7 = vcmp.eq.s32.totalorder %v11026_v51, 3  ;;  %vm11029_vm14 = vcmp.eq.s32.totalorder %v11028_v49, 3  ;;  %vm11031_vm15 = vcmp.eq.s32.totalorder %v11030_v53, 3  ;;  %vm11033_vm11 = vcmp.eq.s32.totalorder %v11032_v7, 3  ;;  %v11034_v16 = vld [vmem:[#allocation126_spill] sm:$0xff]  ;;  %vm11040_vm9 = vmmov %vm11036_vm1 }
 0x2ed   :  { %v8214_v55 = vsel %vm11027_vm7, %v10934_v60, 0.0  ;;  %v8219_v52 = vsel %vm11029_vm14, %v10928_v2, 0.0  ;;  %v8224_v17 = vsel %vm11031_vm15, %v10941_v0, 0.0  ;;  %v8229_v5 = vsel %vm11033_vm11, %v10949_v54, 0.0  ;;  %v8238_v60 = vpop.permute.xlu0 %2338  ;;  %vm11041_vm2 = vmmov %vm11036_vm1 }
 0x2ee   :  { %vm11035_vm13 = vcmp.eq.s32.totalorder %v11034_v16, 3  ;;  %v2155_v51 = vadd.f32 %v2154_v27, %v2153_v41  ;;  %v2156_v49 = vsel %vm11036_vm1, %v2120_v9, 0.0  ;;  %v2158_v2 = vsel %vm11037_vm12, %v2121_v20, 0.0  ;;  %vm11042_vm10 = vmmov %vm11036_vm1  ;;  %v11043_v9 = vld [vmem:[#allocation55_spill] sm:$0xff] }
 0x2ef   :  { %v8234_v13 = vsel %vm11035_vm13, %v10629_v59, 0.0  ;;  %v2160_v53 = vsel %vm11038_vm3, %v2122_v36, 0.0  ;;  %v2162_v0 = vsel %vm11039_vm8, %v2123_v4, 0.0  ;;  %v2164_v7 = vsel %vm11040_vm9, %v2124_v30, 0.0  ;;  %v8252_v36 = vpop.permute.xlu1 %2353  ;;  %vm11045_vm14 = vmmov %vm11036_vm1 }
 0x2f0   :  { %v2166_v54 = vsel %vm11041_vm2, %v2125_v47, 0.0  ;;  %v2157_v48 = vadd.f32 %v2156_v49, %v2155_v51  ;;  %v2168_v16 = vsel %vm11042_vm10, %v2126_v39, 0.0  ;;  %vm2013_vm0 = vcmp.eq.s32.totalorder %v7752_v38, 1  ;;  %vm11046_vm11 = vmmov %vm11036_vm1 }
 0x2f1   :  { %vm2641_vm6 = vcmp.eq.s32.totalorder %v7434_v31, 5  ;;  %v2045_v27 = vsel %vm2013_vm0, %v11043_v9, 0.0  ;;  %v2995_v4 = vadd.f32 %v8090_v44, %v8062_v24  ;;  %vm11044_vm7 = vcmask 261120   ;;  %vm11048_vm13 = vmmov %vm11036_vm1  ;;  %v8269_v49 = vpop.permute.xlu0 %2344 }
 0x2f2   :  { %v2673_v20 = vsel %vm2641_vm6, 1, %v10765_v32  ;;  %v2934_v41 = vsel %vm2641_vm6, %v10629_v59, 0.0  ;;  %v2159_v30 = vadd.f32 %v2158_v2, %v2157_v48  ;;  %v2107_v47 = vsel %vm11044_vm7, %v2045_v27, 0.0  ;;  %vm11049_vm3 = vmmov %vm11036_vm1 }
 0x2f3   :  { %v2996_v39 = vsel %vm11045_vm14, %v2934_v41, 0.0  ;;  %2768 = vperm.xlu0 %3976, %v2673_v20   ;;  %vm3008_vm15 = vcmp.eq.s32.totalorder %v7449_v21, 6  ;;  %v2170_v31 = vsel %vm11046_vm11, %v2127_v15, 0.0  ;;  %v2108_v38 = vadd.f32 %v2107_v47, %v8105_v12  ;;  %vm11050_vm8 = vmmov %vm11036_vm1  ;;  %v11051_v20 = vld [vmem:[#allocation159_spill] sm:$0xff]  ;;  %v8290_v47 = vpop.permute.xlu1 %2359 }
 0x2f4   :  { %v8259_v51 = vadd.f32 %v2996_v39, %v2995_v4  ;;  %v3040_v44 = vsel %vm3008_vm15, 1, %v10765_v32  ;;  %v2161_v24 = vadd.f32 %v2160_v53, %v2159_v30  ;;  %v2172_v48 = vsel %vm11048_vm13, %v2128_v18, 0.0  ;;  %vm11052_vm9 = vmmov %vm11036_vm1  ;;  %v11054_v4 = vld [vmem:[#allocation83_spill] sm:$0xff] }
 0x2f5   :  { %v8266_v2 = vsel %vm11036_vm1, %v2129_v34, 0.0  ;;  %3081 = vperm.xlu1 %3977, %v3040_v44   ;;  %vm2377_vm12 = vcmp.eq.s32.totalorder %v7791_v8, 1  ;;  %v8272_v15 = vsel %vm11049_vm3, %v2130_v1, 0.0  ;;  %v8275_v12 = vsel %vm11050_vm8, %v2131_v42, 0.0  ;;  %vm11053_vm2 = vmmov %vm11044_vm7 }
 0x2f6   :  { %11047 = vst [vmem:[#allocation129_spill] sm:$0xff] %v8259_v51  ;;  %v2109_v27 = vrot.slane %v2108_v38, 4  ;;  %v2409_v41 = vsel %vm2377_vm12, %v11051_v20, 0.0  ;;  %v2163_v53 = vadd.f32 %v2162_v0, %v2161_v24  ;;  %v8279_v18 = vsel %vm11052_vm9, %v2133_v61, 0.0  ;;  %vm11055_vm0 = vmmov %vm11036_vm1 }
 0x2f7   :  { %v2441_v34 = vsel %vm11053_vm2, %v2409_v41, 0.0  ;;  %vm3005_vm10 = vcmp.eq.s32.totalorder %v11054_v4, 6  ;;  %v8284_v8 = vsel %vm11055_vm0, %v2134_v6, 0.0  ;;  %vm11056_vm6 = vmmov %vm11055_vm0  ;;  %vm3010_vm7 = vcmp.eq.s32.totalorder %v7524_v45, 6  ;;  %v11062_v4 = vld [vmem:[#allocation161_spill] sm:$0xff] }
 0x2f8   :  { %v8287_v1 = vsel %vm11056_vm6, %v2135_v50, 0.0  ;;  %v2110_v30 = vadd.f32 %v2109_v27, %v2108_v38  ;;  %v3037_v42 = vsel %vm3005_vm10, 1, %v10765_v32  ;;  %v2165_v39 = vadd.f32 %v2164_v7, %v2163_v53  ;;  %vm11057_vm14 = vmmov %vm11055_vm0  ;;  %v8309_v27 = vpop.permute.xlu0 %2350 }
 0x2f9   :  { %v2442_v0 = vadd.f32 %v2441_v34, %v8100_v22  ;;  %v3298_v61 = vsel %vm3005_vm10, %v10968_v3, 0.0  ;;  %3072 = vperm.xlu0 %3976, %v3037_v42   ;;  %v8297_v6 = vsel %vm11057_vm14, %v8180_v57, 0.0  ;;  %vm11058_vm11 = vmmov %vm11055_vm0  ;;  %v3042_v38 = vsel %vm3010_vm7, 1, %v10765_v32 }
 0x2fa   :  { %v2111_v44 = vrot.slane %v2110_v30, 2  ;;  %v3330_v50 = vsel %vm11058_vm11, %v3298_v61, 0.0  ;;  %v2167_v24 = vadd.f32 %v2166_v54, %v2165_v39  ;;  %vm11059_vm13 = vmmov %vm11055_vm0  ;;  %vm2380_vm1 = vcmp.eq.s32.totalorder %v7772_v56, 1  ;;  %3087 = vperm.xlu1 %3977, %v3042_v38   ;;  %v8324_v39 = vpop.permute.xlu1 %2365 }
 0x2fb   :  { %v8305_v22 = vsel %vm11059_vm13, %v8185_v62, 0.0  ;;  %v3331_v7 = vadd.f32 %v3330_v50, %v8097_v29  ;;  %vm11060_vm12 = vmmov %vm11055_vm0  ;;  %vm3797_vm3 = vcmask 1042432   ;;  %v3301_v54 = vsel %vm3008_vm15, %v10528_v25, 0.0  ;;  %v11061_v29 = vld [vmem:[#allocation173_spill] sm:$0xff] }
 0x2fc   :  { %v8313_v57 = vsel %vm11060_vm12, %v8190_v14, 0.0  ;;  %v2112_v41 = vadd.f32 %v2111_v44, %v2110_v30  ;;  %v2169_v53 = vadd.f32 %v2168_v16, %v2167_v24  ;;  %v2444_v62 = vadd.f32 %v8117_v10, %v2442_v0  ;;  %v11063_v0 = vld [vmem:[#allocation91_spill] sm:$0xff]  ;;  %vm11064_vm10 = vmmov %vm11055_vm0  ;;  %v11065_v24 = vld [vmem:[#allocation86_spill] sm:$0xff] }
 0x2fd   :  { %vm2379_vm8 = vcmp.eq.s32.totalorder %v7832_v43, 1  ;;  %vm3007_vm9 = vcmp.eq.s32.totalorder %v7561_v11, 6  ;;  %v2412_v34 = vsel %vm2380_vm1, %v11061_v29, 0.0  ;;  %v3333_v10 = vadd.f32 %v8103_v26, %v3331_v7  ;;  %vm11068_vm14 = vmmov %vm11053_vm2 }
 0x2fe   :  { %v2113_v56 = vrot.slane %v2112_v41, 1  ;;  %v2411_v42 = vsel %vm2379_vm8, %v11062_v4, 0.0  ;;  %v3039_v14 = vsel %vm3007_vm9, 1, %v10765_v32  ;;  %v2171_v30 = vadd.f32 %v2170_v31, %v2169_v53  ;;  %v8333_v31 = vpop.permute.xlu0 %2356  ;;  %v11066_v53 = vld [vmem:[#allocation85_spill] sm:$0xff]  ;;  %v8352_v45 = vpop.permute.xlu1 %2371  ;;  %vm11076_vm8 = vmmov %vm11055_vm0 }
 0x2ff   :  { %v2445_v21 = vsel %vm11053_vm2, %v2411_v42, 0.0  ;;  %v3300_v16 = vsel %vm3007_vm9, %v10525_v46, 0.0  ;;  %3078 = vperm.xlu0 %3976, %v3039_v14   ;;  %vm2382_vm15 = vcmp.eq.s32.totalorder %v11063_v0, 1  ;;  %v3336_v50 = vsel %vm11055_vm0, %v3301_v54, 0.0  ;;  %v11069_v54 = vld [vmem:[#allocation180_spill] sm:$0xff]  ;;  %vm11077_vm9 = vmmov %vm11055_vm0 }
 0x300   :  { %v2114_v43 = vadd.f32 %v2113_v56, %v2112_v41  ;;  %v2446_v11 = vadd.f32 %v2445_v21, %v2444_v62  ;;  %v3334_v61 = vsel %vm11064_vm10, %v3300_v16, 0.0  ;;  %v2173_v44 = vadd.f32 %v2172_v48, %v2171_v30  ;;  %v11070_v56 = vld [vmem:[#allocation96_spill] sm:$0xff]  ;;  %v11071_v30 = vld [vmem:[#allocation62_spill] sm:$0xff]  ;;  %v11072_v21 = vld [vmem:[#allocation87_spill] sm:$0xff] }
 0x301   :  { %v3335_v38 = vadd.f32 %v3334_v61, %v3333_v10  ;;  %vm3012_vm6 = vcmp.eq.s32.totalorder %v11065_v24, 6  ;;  %v2447_v26 = vsel %vm11068_vm14, %v2412_v34, 0.0  ;;  %v3303_v7 = vsel %vm3010_vm7, %v10534_v19, 0.0  ;;  %v11073_v16 = vld [vmem:[#allocation88_spill] sm:$0xff]  ;;  %vm11075_vm7 = vmmov %vm11053_vm2 }
 0x302   :  { %v8337_v42 = vsel %vm3797_vm3, %v11066_v53, %v2114_v43  ;;  %v3044_v48 = vsel %vm3012_vm6, 1, %v10765_v32  ;;  %v2175_v41 = vadd.f32 %v8266_v2, %v2173_v44  ;;  %v2414_v62 = vsel %vm2382_vm15, %v11069_v54, 0.0  ;;  %v11074_v43 = vld [vmem:[#allocation176_spill] sm:$0xff]  ;;  %vm11084_vm14 = vmmov %vm11053_vm2 }
 0x303   :  { %11067 = vst [vmem:[#allocation19_spill] sm:$0xff] %v8337_v42  ;;  %3093 = vperm.xlu1 %3977, %v3044_v48   ;;  %vm2384_vm11 = vcmp.eq.s32.totalorder %v11070_v56, 1  ;;  %v2448_v14 = vadd.f32 %v2447_v26, %v2446_v11  ;;  %vm2381_vm13 = vcmp.eq.s32.totalorder %v11071_v30, 1  ;;  %vm3009_vm1 = vcmp.eq.s32.totalorder %v11072_v21, 6  ;;  %v11078_v30 = vld [vmem:[#allocation43_spill] sm:$0xff]  ;;  %v11105_v42 = vld [vmem:[#allocation185_spill] sm:$0xff] }
 0x304   :  { %v3337_v34 = vadd.f32 %v3336_v50, %v3335_v38  ;;  %vm3014_vm12 = vcmp.eq.s32.totalorder %v11073_v16, 6  ;;  %v2177_v10 = vadd.f32 %v8272_v15, %v2175_v41  ;;  %v2413_v0 = vsel %vm2381_vm13, %v11074_v43, 0.0  ;;  %v8368_v41 = vpop.permute.xlu0 %2362  ;;  %vm11087_vm13 = vmmov %vm11053_vm2 }
 0x305   :  { %v3041_v2 = vsel %vm3009_vm1, 1, %v10765_v32  ;;  %v3302_v61 = vsel %vm3009_vm1, %v10531_v63, 0.0  ;;  %v3305_v11 = vsel %vm3012_vm6, %v10670_v35, 0.0  ;;  %v2449_v44 = vsel %vm11075_vm7, %v2413_v0, 0.0  ;;  %v11079_v0 = vld [vmem:[#allocation7_spill] sm:$0xff]  ;;  %vm11088_vm1 = vmmov %vm11055_vm0 }
 0x306   :  { %v3338_v50 = vsel %vm11076_vm8, %v3302_v61, 0.0  ;;  %3084 = vperm.xlu0 %3976, %v3041_v2   ;;  %v3046_v38 = vsel %vm3014_vm12, 1, %v10765_v32  ;;  %v2179_v15 = vadd.f32 %v8275_v12, %v2177_v10  ;;  %v3340_v53 = vsel %vm11077_vm9, %v3303_v7, 0.0  ;;  %v11080_v2 = vld [vmem:[#allocation27_spill] sm:$0xff]  ;;  %v11083_v10 = vld [vmem:[#allocation64_spill] sm:$0xff] }
 0x307   :  { %v2450_v26 = vadd.f32 %v2449_v44, %v2448_v14  ;;  %v3339_v48 = vadd.f32 %v3338_v50, %v3337_v34  ;;  %3099 = vperm.xlu1 %3977, %v3046_v38   ;;  %v2451_v24 = vsel %vm11053_vm2, %v2414_v62, 0.0  ;;  %v2416_v21 = vsel %vm2384_vm11, %v11078_v30, 0.0  ;;  %v11081_v61 = vld [vmem:[#allocation67_spill] sm:$0xff]  ;;  %v11082_v14 = vld [vmem:[#allocation101_spill] sm:$0xff]  ;;  %v8383_v38 = vpop.permute.xlu1 %2675 }
 0x308   :  { %vm2383_vm15 = vcmp.eq.s32.totalorder %v11079_v0, 1  ;;  %vm3011_vm10 = vcmp.eq.s32.totalorder %v11080_v2, 6  ;;  %v2181_v51 = vadd.f32 %v11081_v61, %v2179_v15  ;;  %v3344_v12 = vsel %vm11055_vm0, %v3305_v11, 0.0  ;;  %v11085_v50 = vld [vmem:[#allocation179_spill] sm:$0xff]  ;;  %v11086_v15 = vld [vmem:[#allocation89_spill] sm:$0xff] }
 0x309   :  { %v2452_v7 = vadd.f32 %v2451_v24, %v2450_v26  ;;  %v2415_v34 = vsel %vm2383_vm15, %v11082_v14, 0.0  ;;  %vm2386_vm6 = vcmp.eq.s32.totalorder %v11083_v10, 1  ;;  %v3043_v62 = vsel %vm3011_vm10, 1, %v10765_v32  ;;  %v11089_v61 = vld [vmem:[#allocation169_spill] sm:$0xff]  ;;  %v11090_v14 = vld [vmem:[#allocation132_spill] sm:$0xff]  ;;  %v11095_v30 = vld [vmem:[#allocation183_spill] sm:$0xff] }
 0x30a   :  { %v2453_v44 = vsel %vm11084_vm14, %v2415_v34, 0.0  ;;  %v3304_v56 = vsel %vm3011_vm10, %v11085_v50, 0.0  ;;  %v2183_v0 = vadd.f32 %v8279_v18, %v2181_v51  ;;  %v3341_v59 = vadd.f32 %v3340_v53, %v3339_v48  ;;  %3090 = vperm.xlu0 %3976, %v3043_v62   ;;  %v11091_v18 = vld [vmem:[#allocation184_spill] sm:$0xff]  ;;  %v11093_v62 = vld [vmem:[#allocation46_spill] sm:$0xff]  ;;  %vm11098_vm10 = vmmov %vm11053_vm2 }
 0x30b   :  { %v2454_v2 = vadd.f32 %v2453_v44, %v2452_v7  ;;  %vm3016_vm11 = vcmp.eq.s32.totalorder %v11086_v15, 6  ;;  %v2455_v11 = vsel %vm11087_vm13, %v2416_v21, 0.0  ;;  %v3342_v26 = vsel %vm11088_vm1, %v3304_v56, 0.0  ;;  %v8400_v21 = vpop.permute.xlu0 %2368  ;;  %v11092_v7 = vld [vmem:[#allocation9_spill] sm:$0xff]  ;;  %vm11107_vm1 = vmmov %vm11055_vm0 }
 0x30c   :  { %v3048_v24 = vsel %vm3016_vm11, 1, %v10765_v32  ;;  %vm2385_vm7 = vcmp.eq.s32.totalorder %v11089_v61, 1  ;;  %v2185_v34 = vadd.f32 %v8284_v8, %v2183_v0  ;;  %v3307_v51 = vsel %vm3014_vm12, %v11090_v14, 0.0  ;;  %v11094_v61 = vld [vmem:[#allocation31_spill] sm:$0xff]  ;;  %vm11096_vm12 = vmmov %vm11055_vm0 }
 0x30d   :  { %v2418_v53 = vsel %vm2386_vm6, %v11091_v18, 0.0  ;;  %v3343_v48 = vadd.f32 %v3342_v26, %v3341_v59  ;;  %3105 = vperm.xlu1 %3977, %v3048_v24   ;;  %vm2388_vm8 = vcmp.eq.s32.totalorder %v11092_v7, 1  ;;  %v2456_v44 = vadd.f32 %v2455_v11, %v2454_v2  ;;  %v11097_v18 = vld [vmem:[#allocation25_spill] sm:$0xff]  ;;  %v8411_v2 = vpop.permute.xlu1 %2681 }
 0x30e   :  { %v2417_v56 = vsel %vm2385_vm7, %v11093_v62, 0.0  ;;  %vm3013_vm9 = vcmp.eq.s32.totalorder %v11094_v61, 6  ;;  %v2187_v8 = vadd.f32 %v8287_v1, %v2185_v34  ;;  %v3348_v59 = vsel %vm11096_vm12, %v3307_v51, 0.0  ;;  %v11104_v62 = vld [vmem:[#allocation44_spill] sm:$0xff] }
 0x30f   :  { %v2457_v16 = vsel %vm11053_vm2, %v2417_v56, 0.0  ;;  %v3045_v0 = vsel %vm3013_vm9, 1, %v10765_v32  ;;  %v3306_v10 = vsel %vm3013_vm9, %v11095_v30, 0.0  ;;  %v3345_v24 = vadd.f32 %v3344_v12, %v3343_v48  ;;  %v11099_v56 = vld [vmem:[#allocation51_spill] sm:$0xff]  ;;  %v11100_v12 = vld [vmem:[#allocation136_spill] sm:$0xff]  ;;  %vm11110_vm9 = vmmov %vm11055_vm0 }
 0x310   :  { %v2458_v26 = vadd.f32 %v2457_v16, %v2456_v44  ;;  %3096 = vperm.xlu0 %3976, %v3045_v0   ;;  %vm3018_vm15 = vcmp.eq.s32.totalorder %v11097_v18, 6  ;;  %v2189_v11 = vadd.f32 %v8297_v6, %v2187_v8  ;;  %v2459_v61 = vsel %vm11098_vm10, %v2418_v53, 0.0  ;;  %v11101_v53 = vld [vmem:[#allocation172_spill] sm:$0xff]  ;;  %v11102_v8 = vld [vmem:[#allocation177_spill] sm:$0xff] }
 0x311   :  { %v3346_v1 = vsel %vm11055_vm0, %v3306_v10, 0.0  ;;  %v3050_v34 = vsel %vm3018_vm15, 1, %v10765_v32  ;;  %v3309_v51 = vsel %vm3016_vm11, %v11099_v56, 0.0  ;;  %v2420_v48 = vsel %vm2388_vm8, %v11100_v12, 0.0  ;;  %v11103_v0 = vld [vmem:[#allocation29_spill] sm:$0xff]  ;;  %v8429_v10 = vpop.permute.xlu0 %2374  ;;  %vm11106_vm11 = vmmov %vm11053_vm2 }
 0x312   :  { %v3347_v44 = vadd.f32 %v3346_v1, %v3345_v24  ;;  %3111 = vperm.xlu1 %3977, %v3050_v34   ;;  %v2460_v16 = vadd.f32 %v2459_v61, %v2458_v26  ;;  %v2191_v6 = vadd.f32 %v8305_v22, %v2189_v11  ;;  %vm2390_vm6 = vcmp.eq.s32.totalorder %v11101_v53, 1  ;;  %v11108_v11 = vld [vmem:[#allocation32_spill] sm:$0xff]  ;;  %vm11109_vm8 = vmmov %vm11055_vm0  ;;  %v11118_v53 = vld [vmem:[#allocation90_spill] sm:$0xff] }
 0x313   :  { %vm2387_vm14 = vcmp.eq.s32.totalorder %v11102_v8, 1  ;;  %vm3015_vm13 = vcmp.eq.s32.totalorder %v11103_v0, 6  ;;  %vm3020_vm7 = vcmp.eq.s32.totalorder %v11108_v11, 6  ;;  %v2194_v61 = vsel %vm11109_vm8, %v8199_v33, 0.0  ;;  %v8443_v0 = vpop.permute.xlu1 %2687  ;;  %v11112_v33 = vld [vmem:[#allocation49_spill] sm:$0xff]  ;;  %vm11122_vm8 = vmmov %vm11107_vm1 }
 0x314   :  { %v2419_v15 = vsel %vm2387_vm14, %v11104_v62, 0.0  ;;  %v3047_v56 = vsel %vm3015_vm13, 1, %v10765_v32  ;;  %v3308_v7 = vsel %vm3015_vm13, %v11105_v42, 0.0  ;;  %v3349_v12 = vadd.f32 %v3348_v59, %v3347_v44  ;;  %v11111_v44 = vld [vmem:[#allocation156_spill] sm:$0xff]  ;;  %vm11116_vm14 = vmmov %vm11053_vm2 }
 0x315   :  { %v2193_v24 = vadd.f32 %v8313_v57, %v2191_v6  ;;  %v2461_v26 = vsel %vm11106_vm11, %v2419_v15, 0.0  ;;  %v3350_v22 = vsel %vm11107_vm1, %v3308_v7, 0.0  ;;  %3102 = vperm.xlu0 %3976, %v3047_v56   ;;  %v3052_v8 = vsel %vm3020_vm7, 1, %v10765_v32  ;;  %v11113_v6 = vld [vmem:[#allocation117_spill] sm:$0xff]  ;;  %v11114_v7 = vld [vmem:[#allocation30_spill] sm:$0xff]  ;;  %vm11120_vm13 = vmmov %vm11053_vm2 }
 0x316   :  { %v2462_v1 = vadd.f32 %v2461_v26, %v2460_v16  ;;  %v3351_v34 = vadd.f32 %v3350_v22, %v3349_v12  ;;  %v3352_v57 = vsel %vm11110_vm9, %v3309_v51, 0.0  ;;  %v2463_v59 = vsel %vm11053_vm2, %v2420_v48, 0.0  ;;  %3117 = vperm.xlu1 %3977, %v3052_v8   ;;  %v11115_v51 = vld [vmem:[#allocation65_spill] sm:$0xff]  ;;  %v8459_v22 = vpop.permute.xlu0 %2678  ;;  %vm11121_vm11 = vmmov %vm11107_vm1 }
 0x317   :  { %v3311_v56 = vsel %vm3018_vm15, %v10848_v37, 0.0  ;;  %vm2389_vm12 = vcmp.eq.s32.totalorder %v11111_v44, 1  ;;  %v2422_v12 = vsel %vm2390_vm6, %v11112_v33, 0.0  ;;  %vm3017_vm10 = vcmp.eq.s32.totalorder %v11114_v7, 6  ;;  %v11117_v44 = vld [vmem:[#allocation47_spill] sm:$0xff]  ;;  %vm11119_vm6 = vmmov %vm11107_vm1  ;;  %v8473_v7 = vpop.permute.xlu1 %2693 }
 0x318   :  { %v2464_v16 = vadd.f32 %v2463_v59, %v2462_v1  ;;  %v2421_v15 = vsel %vm2389_vm12, %v11113_v6, 0.0  ;;  %v2195_v26 = vadd.f32 %v2194_v61, %v2193_v24  ;;  %vm2392_vm0 = vcmp.eq.s32.totalorder %v11115_v51, 1  ;;  %vm11123_vm9 = vmmov %vm11107_vm1 }
 0x319   :  { %v2465_v48 = vsel %vm11116_vm14, %v2421_v15, 0.0  ;;  %v3049_v18 = vsel %vm3017_vm10, 1, %v10765_v32  ;;  %v3310_v62 = vsel %vm3017_vm10, %v11117_v44, 0.0  ;;  %v3353_v42 = vadd.f32 %v3352_v57, %v3351_v34  ;;  %vm11131_vm14 = vmmov %vm11120_vm13  ;;  %v11155_v44 = vld [vmem:[#allocation63_spill] sm:$0xff] }
 0x31a   :  { %v2466_v8 = vadd.f32 %v2465_v48, %v2464_v16  ;;  %3108 = vperm.xlu0 %3976, %v3049_v18   ;;  %vm3022_vm15 = vcmp.eq.s32.totalorder %v11118_v53, 6  ;;  %v2196_v1 = vsel %vm11119_vm6, %v8204_v58, 0.0  ;;  %v2467_v24 = vsel %vm11120_vm13, %v2422_v12, 0.0  ;;  %v11124_v12 = vld [vmem:[#allocation168_spill] sm:$0xff]  ;;  %v11125_v48 = vld [vmem:[#allocation61_spill] sm:$0xff] }
 0x31b   :  { %v3354_v61 = vsel %vm11121_vm11, %v3310_v62, 0.0  ;;  %v3054_v59 = vsel %vm3022_vm15, 1, %v10765_v32  ;;  %v2198_v16 = vsel %vm11107_vm1, %v8209_v28, 0.0  ;;  %v3356_v15 = vsel %vm11122_vm8, %v3311_v56, 0.0  ;;  %v11126_v18 = vld [vmem:[#allocation92_spill] sm:$0xff]  ;;  %v11127_v28 = vld [vmem:[#allocation141_spill] sm:$0xff] }
 0x31c   :  { %v3355_v34 = vadd.f32 %v3354_v61, %v3353_v42  ;;  %3123 = vperm.xlu1 %3977, %v3054_v59   ;;  %v2468_v57 = vadd.f32 %v2467_v24, %v2466_v8  ;;  %v2200_v58 = vsel %vm11123_vm9, %v8214_v55, 0.0  ;;  %v2424_v62 = vsel %vm2392_vm0, %v11124_v12, 0.0  ;;  %v11128_v56 = vld [vmem:[#allocation53_spill] sm:$0xff]  ;;  %v11129_v24 = vld [vmem:[#allocation163_spill] sm:$0xff]  ;;  %v11130_v55 = vld [vmem:[#allocation68_spill] sm:$0xff] }
 0x31d   :  { %vm2391_vm2 = vcmp.eq.s32.totalorder %v11125_v48, 1  ;;  %vm3019_vm12 = vcmp.eq.s32.totalorder %v11126_v18, 6  ;;  %v2197_v6 = vadd.f32 %v2196_v1, %v2195_v26  ;;  %v3313_v61 = vsel %vm3020_vm7, %v11129_v24, 0.0  ;;  %v8490_v48 = vpop.permute.xlu0 %2684  ;;  %vm11132_vm0 = vmmov %vm11107_vm1  ;;  %v11133_v1 = vld [vmem:[#allocation94_spill] sm:$0xff] }
 0x31e   :  { %v2423_v33 = vsel %vm2391_vm2, %v11127_v28, 0.0  ;;  %v3051_v42 = vsel %vm3019_vm12, 1, %v10765_v32  ;;  %v3312_v8 = vsel %vm3019_vm12, %v11128_v56, 0.0  ;;  %vm2394_vm10 = vcmp.eq.s32.totalorder %v11130_v55, 1  ;;  %v11134_v28 = vld [vmem:[#allocation17_spill] sm:$0xff]  ;;  %vm11135_vm11 = vmmov %vm11132_vm0  ;;  %v11146_v55 = vld [vmem:[#allocation95_spill] sm:$0xff] }
 0x31f   :  { %v2469_v51 = vsel %vm11131_vm14, %v2423_v33, 0.0  ;;  %v3357_v59 = vadd.f32 %v3356_v15, %v3355_v34  ;;  %3114 = vperm.xlu0 %3976, %v3051_v42   ;;  %v3358_v26 = vsel %vm11132_vm0, %v3312_v8, 0.0  ;;  %vm3024_vm6 = vcmp.eq.s32.totalorder %v11133_v1, 6  ;;  %vm11136_vm1 = vmmov %vm11131_vm14  ;;  %v11138_v42 = vld [vmem:[#allocation148_spill] sm:$0xff] }
 0x320   :  { %v2470_v18 = vadd.f32 %v2469_v51, %v2468_v57  ;;  %vm2393_vm13 = vcmp.eq.s32.totalorder %v11134_v28, 1  ;;  %v2202_v12 = vsel %vm11135_vm11, %v8219_v52, 0.0  ;;  %v2471_v11 = vsel %vm11136_vm1, %v2424_v62, 0.0  ;;  %vm11137_vm7 = vmmov %vm11132_vm0  ;;  %v8503_v51 = vpop.permute.xlu1 %2699  ;;  %v11139_v28 = vld [vmem:[#allocation175_spill] sm:$0xff] }
 0x321   :  { %v3359_v56 = vadd.f32 %v3358_v26, %v3357_v59  ;;  %v3056_v33 = vsel %vm3024_vm6, 1, %v10765_v32  ;;  %v2199_v15 = vadd.f32 %v2198_v16, %v2197_v6  ;;  %v3360_v34 = vsel %vm11137_vm7, %v3313_v61, 0.0  ;;  %vm11140_vm8 = vmmov %vm11136_vm1  ;;  %v11141_v26 = vld [vmem:[#allocation93_spill] sm:$0xff]  ;;  %v11142_v61 = vld [vmem:[#allocation138_spill] sm:$0xff] }
 0x322   :  { %3129 = vperm.xlu1 %3977, %v3056_v33   ;;  %v2472_v57 = vadd.f32 %v2471_v11, %v2470_v18  ;;  %v2425_v8 = vsel %vm2393_vm13, %v11138_v42, 0.0  ;;  %v3315_v52 = vsel %vm3022_vm15, %v10873_v23, 0.0  ;;  %v2426_v62 = vsel %vm2394_vm10, %v11139_v28, 0.0  ;;  %vm11143_vm2 = vmmov %vm11132_vm0  ;;  %v11144_v42 = vld [vmem:[#allocation60_spill] sm:$0xff]  ;;  %v8520_v28 = vpop.permute.xlu0 %2690 }
 0x323   :  { %v2473_v59 = vsel %vm11140_vm8, %v2425_v8, 0.0  ;;  %vm3021_vm9 = vcmp.eq.s32.totalorder %v11141_v26, 6  ;;  %v3361_v11 = vadd.f32 %v3360_v34, %v3359_v56  ;;  %v2204_v33 = vsel %vm11143_vm2, %v8224_v17, 0.0  ;;  %vm11145_vm15 = vmmov %vm11132_vm0 }
 0x324   :  { %v2474_v6 = vadd.f32 %v2473_v59, %v2472_v57  ;;  %v3053_v16 = vsel %vm3021_vm9, 1, %v10765_v32  ;;  %v3314_v18 = vsel %vm3021_vm9, %v11142_v61, 0.0  ;;  %vm2396_vm12 = vcmp.eq.s32.totalorder %v11144_v42, 1  ;;  %vm11147_vm14 = vmmov %vm11132_vm0  ;;  %v11150_v42 = vld [vmem:[#allocation178_spill] sm:$0xff] }
 0x325   :  { %v3362_v53 = vsel %vm11145_vm15, %v3314_v18, 0.0  ;;  %3120 = vperm.xlu0 %3976, %v3053_v16   ;;  %vm3026_vm10 = vcmp.eq.s32.totalorder %v11146_v55, 6  ;;  %v8524_v57 = vsel %vm11147_vm14, %v8229_v5, 0.0  ;;  %vm11148_vm0 = vmmov %vm11136_vm1  ;;  %v2201_v56 = vadd.f32 %v2200_v58, %v2199_v15  ;;  %v11151_v18 = vld [vmem:[#allocation182_spill] sm:$0xff]  ;;  %v11152_v5 = vld [vmem:[#allocation155_spill] sm:$0xff] }
 0x326   :  { %v2475_v8 = vsel %vm11148_vm0, %v2426_v62, 0.0  ;;  %v3363_v59 = vadd.f32 %v3362_v53, %v3361_v11  ;;  %v3058_v17 = vsel %vm3026_vm10, 1, %v10765_v32  ;;  %vm11149_vm13 = vmmov %vm11143_vm2  ;;  %v3317_v26 = vsel %vm3024_vm6, %v11150_v42, 0.0  ;;  %v8537_v11 = vpop.permute.xlu1 %2705  ;;  %v11153_v53 = vld [vmem:[#allocation171_spill] sm:$0xff] }
 0x327   :  { %v3364_v34 = vsel %vm11149_vm13, %v3315_v52, 0.0  ;;  %3135 = vperm.xlu1 %3977, %v3058_v17   ;;  %v2476_v16 = vadd.f32 %v2475_v8, %v2474_v6  ;;  %v2428_v61 = vsel %vm2396_vm12, %v11151_v18, 0.0  ;;  %vm2395_vm11 = vcmp.eq.s32.totalorder %v8238_v60, 1  ;;  %v11154_v15 = vld [vmem:[#allocation167_spill] sm:$0xff]  ;;  %vm11156_vm8 = vmmov %vm11148_vm0  ;;  %v11172_v18 = vld [vmem:[#allocation137_spill] sm:$0xff] }
 0x328   :  { %vm3023_vm1 = vcmp.eq.s32.totalorder %v11152_v5, 6  ;;  %v3365_v62 = vadd.f32 %v3364_v34, %v3363_v59  ;;  %v2427_v23 = vsel %vm2395_vm11, %v11153_v53, 0.0  ;;  %vm3028_vm7 = vcmp.eq.s32.totalorder %v11155_v44, 6  ;;  %vm11157_vm9 = vmmov %vm11143_vm2  ;;  %v8553_v5 = vpop.permute.xlu0 %2696 }
 0x329   :  { %v3055_v58 = vsel %vm3023_vm1, 1, %v10765_v32  ;;  %v3316_v52 = vsel %vm3023_vm1, %v11154_v15, 0.0  ;;  %vm2398_vm6 = vcmp.eq.s32.totalorder %v8194_v40, 1  ;;  %v2477_v1 = vsel %vm11156_vm8, %v2427_v23, 0.0  ;;  %vm11159_vm12 = vmmov %vm11143_vm2 }
 0x32a   :  { %v3366_v6 = vsel %vm11157_vm9, %v3316_v52, 0.0  ;;  %3126 = vperm.xlu0 %3976, %v3055_v58   ;;  %v3060_v60 = vsel %vm3028_vm7, 1, %v10765_v32  ;;  %v2203_v8 = vadd.f32 %v2202_v12, %v2201_v56  ;;  %v8551_v59 = vsel %vm11143_vm2, %v8234_v13, 0.0  ;;  %vm11160_vm15 = vmmov %vm11148_vm0  ;;  %v11161_v58 = vld [vmem:[#allocation6_spill] sm:$0xff]  ;;  %v11163_v56 = vld [vmem:[#allocation131_spill] sm:$0xff] }
 0x32b   :  { %11158 = vst [vmem:[#allocation135_spill] sm:$0xff] %v8551_v59  ;;  %v2478_v17 = vadd.f32 %v2477_v1, %v2476_v16  ;;  %v3367_v34 = vadd.f32 %v3366_v6, %v3365_v62  ;;  %3141 = vperm.xlu1 %3977, %v3060_v60   ;;  %v3368_v53 = vsel %vm11159_vm12, %v3317_v26, 0.0  ;;  %v2479_v23 = vsel %vm11160_vm15, %v2428_v61, 0.0  ;;  %v11162_v52 = vld [vmem:[#allocation106_spill] sm:$0xff]  ;;  %v11164_v62 = vld [vmem:[#allocation128_spill] sm:$0xff]  ;;  %vm11165_vm11 = vmmov %vm11156_vm8  ;;  %v8570_v60 = vpop.permute.xlu1 %2711 }
 0x32c   :  { %vm2397_vm14 = vcmp.eq.s32.totalorder %v8269_v49, 1  ;;  %vm3025_vm0 = vcmp.eq.s32.totalorder %v11161_v58, 6  ;;  %v3319_v12 = vsel %vm3026_vm10, %v11162_v52, 0.0  ;;  %v2430_v13 = vsel %vm2398_vm6, %v11163_v56, 0.0  ;;  %v11166_v49 = vld [vmem:[#allocation181_spill] sm:$0xff]  ;;  %v11167_v58 = vld [vmem:[#allocation110_spill] sm:$0xff]  ;;  %vm11169_vm1 = vmmov %vm11143_vm2 }
 0x32d   :  { %v2480_v16 = vadd.f32 %v2479_v23, %v2478_v17  ;;  %v2429_v1 = vsel %vm2397_vm14, %v11164_v62, 0.0  ;;  %vm2400_vm13 = vcmp.eq.s32.totalorder %v8252_v36, 1  ;;  %v3057_v61 = vsel %vm3025_vm0, 1, %v10765_v32  ;;  %v11168_v17 = vld [vmem:[#allocation5_spill] sm:$0xff]  ;;  %vm11170_vm8 = vmmov %vm11169_vm1 }
 0x32e   :  { %v2481_v26 = vsel %vm11165_vm11, %v2429_v1, 0.0  ;;  %v3318_v6 = vsel %vm3025_vm0, %v11166_v49, 0.0  ;;  %v3321_v55 = vsel %vm3028_vm7, %v11167_v58, 0.0  ;;  %v3369_v40 = vadd.f32 %v3368_v53, %v3367_v34  ;;  %3132 = vperm.xlu0 %3976, %v3057_v61   ;;  %vm11171_vm9 = vmmov %vm11165_vm11 }
 0x32f   :  { %v2482_v59 = vadd.f32 %v2481_v26, %v2480_v16  ;;  %vm3030_vm10 = vcmp.eq.s32.totalorder %v11168_v17, 6  ;;  %v8576_v23 = vadd.f32 %v2204_v33, %v2203_v8  ;;  %v3370_v62 = vsel %vm11169_vm1, %v3318_v6, 0.0  ;;  %v8588_v33 = vpop.permute.xlu0 %2702  ;;  %vm11173_vm7 = vmmov %vm11169_vm1  ;;  %v11174_v26 = vld [vmem:[#allocation48_spill] sm:$0xff]  ;;  %v11175_v6 = vld [vmem:[#allocation154_spill] sm:$0xff] }
 0x330   :  { %v3062_v1 = vsel %vm3030_vm10, 1, %v10765_v32  ;;  %vm2399_vm6 = vcmp.eq.s32.totalorder %v8309_v27, 1  ;;  %v3372_v56 = vsel %vm11170_vm8, %v3319_v12, 0.0  ;;  %v2483_v44 = vsel %vm11171_vm9, %v2430_v13, 0.0  ;;  %vm11176_vm15 = vmmov %vm11171_vm9  ;;  %v11177_v13 = vld [vmem:[#allocation45_spill] sm:$0xff] }
 0x331   :  { %v2432_v53 = vsel %vm2400_vm13, %v11172_v18, 0.0  ;;  %v3371_v34 = vadd.f32 %v3370_v62, %v3369_v40  ;;  %3147 = vperm.xlu1 %3977, %v3062_v1   ;;  %v3376_v8 = vsel %vm11173_vm7, %v3321_v55, 0.0  ;;  %v2484_v16 = vadd.f32 %v2483_v44, %v2482_v59  ;;  %vm11178_vm14 = vmmov %vm11171_vm9  ;;  %v11179_v18 = vld [vmem:[#allocation15_spill] sm:$0xff]  ;;  %v8599_v59 = vpop.permute.xlu1 %2717  ;;  %v11186_v17 = vld [vmem:[#allocation149_spill] sm:$0xff] }
 0x332   :  { %v2431_v61 = vsel %vm2399_vm6, %v11174_v26, 0.0  ;;  %vm3027_vm2 = vcmp.eq.s32.totalorder %v11175_v6, 6  ;;  %vm2402_vm12 = vcmp.eq.s32.totalorder %v8290_v47, 1  ;;  %v2487_v62 = vsel %vm11178_vm14, %v2432_v53, 0.0  ;;  %v11180_v55 = vld [vmem:[#allocation115_spill] sm:$0xff]  ;;  %vm11181_vm13 = vmmov %vm11169_vm1  ;;  %v11182_v6 = vld [vmem:[#allocation130_spill] sm:$0xff] }
 0x333   :  { %v2485_v27 = vsel %vm11176_vm15, %v2431_v61, 0.0  ;;  %v3059_v12 = vsel %vm3027_vm2, 1, %v10765_v32  ;;  %v3320_v36 = vsel %vm3027_vm2, %v11177_v13, 0.0  ;;  %v3373_v1 = vadd.f32 %v3372_v56, %v3371_v34  ;;  %vm11187_vm8 = vmmov %vm11171_vm9 }
 0x334   :  { %v2486_v40 = vadd.f32 %v2485_v27, %v2484_v16  ;;  %3138 = vperm.xlu0 %3976, %v3059_v12   ;;  %vm3398_vm0 = vcmp.eq.s32.totalorder %v11179_v18, 7  ;;  %v3323_v44 = vsel %vm3030_vm10, %v11180_v55, 0.0  ;;  %v3374_v47 = vsel %vm11181_vm13, %v3320_v36, 0.0  ;;  %v11183_v16 = vld [vmem:[#allocation147_spill] sm:$0xff]  ;;  %v11184_v18 = vld [vmem:[#allocation133_spill] sm:$0xff]  ;;  %v8613_v36 = vpop.permute.xlu0 %2708  ;;  %vm11189_vm9 = vmmov %vm11173_vm7 }
 0x335   :  { %v3430_v61 = vsel %vm3398_vm0, 1, %v10765_v32  ;;  %vm2401_vm11 = vcmp.eq.s32.totalorder %v8333_v31, 1  ;;  %v2434_v26 = vsel %vm2402_vm12, %v11182_v6, 0.0  ;;  %v3375_v53 = vadd.f32 %v3374_v47, %v3373_v1  ;;  %v11185_v12 = vld [vmem:[#allocation11_spill] sm:$0xff]  ;;  %v11188_v6 = vld [vmem:[#allocation134_spill] sm:$0xff]  ;;  %vm11190_vm2 = vmmov %vm11187_vm8 }
 0x336   :  { %v3691_v56 = vsel %vm3398_vm0, %v11183_v16, 0.0  ;;  %3463 = vperm.xlu1 %3977, %v3430_v61   ;;  %v2488_v34 = vadd.f32 %v2487_v62, %v2486_v40  ;;  %vm2404_vm1 = vcmp.eq.s32.totalorder %v8324_v39, 1  ;;  %v2433_v27 = vsel %vm2401_vm11, %v11184_v18, 0.0  ;;  %vm11192_vm15 = vmmov %vm11173_vm7 }
 0x337   :  { %vm3029_vm6 = vcmp.eq.s32.totalorder %v11185_v12, 6  ;;  %vm3400_vm10 = vcmp.eq.s32.totalorder %v11186_v17, 7  ;;  %v2489_v13 = vsel %vm11187_vm8, %v2433_v27, 0.0  ;;  %v3377_v47 = vadd.f32 %v3376_v8, %v3375_v53  ;;  %v11191_v12 = vld [vmem:[#allocation146_spill] sm:$0xff]  ;;  %vm11195_vm13 = vmmov %vm11190_vm2  ;;  %v4139_v17 = vld [vmem:[%s9282_s2 + $0x8] sm:$0xff] }
 0x338   :  { %v3061_v31 = vsel %vm3029_vm6, 1, %v10765_v32  ;;  %v3322_v1 = vsel %vm3029_vm6, %v11188_v6, 0.0  ;;  %v3380_v61 = vsel %vm11189_vm9, %v3323_v44, 0.0  ;;  %v2490_v62 = vadd.f32 %v2489_v13, %v2488_v34  ;;  %v8626_v6 = vpop.permute.xlu1 %2723  ;;  %v11193_v44 = vld [vmem:[#allocation57_spill] sm:$0xff]  ;;  %vm11197_vm11 = vmmov %vm11190_vm2 }
 0x339   :  { %v3378_v39 = vsel %vm11173_vm7, %v3322_v1, 0.0  ;;  %3144 = vperm.xlu0 %3976, %v3061_v31   ;;  %v3432_v40 = vsel %vm3400_vm10, 1, %v10765_v32  ;;  %v2491_v16 = vsel %vm11190_vm2, %v2434_v26, 0.0  ;;  %v2436_v18 = vsel %vm2404_vm1, %v11191_v12, 0.0  ;;  %v11194_v34 = vld [vmem:[#allocation13_spill] sm:$0xff]  ;;  %v11196_v1 = vld [vmem:[#allocation127_spill] sm:$0xff]  ;;  %vm11199_vm6 = vmmov %vm11173_vm7 }
 0x33a   :  { %v3379_v27 = vadd.f32 %v3378_v39, %v3377_v47  ;;  %3469 = vperm.xlu1 %3977, %v3432_v40   ;;  %vm2403_vm12 = vcmp.eq.s32.totalorder %v8368_v41, 1  ;;  %v3723_v8 = vsel %vm11192_vm15, %v3691_v56, 0.0  ;;  %v2492_v13 = vadd.f32 %v2491_v16, %v2490_v62  ;;  %v4138_v56 = vld [vmem:[%s9282_s2 + $0x20] sm:$0xff]  ;;  %v8639_v62 = vpop.permute.xlu0 %2714  ;;  %vm11203_vm15 = vmmov %vm11199_vm6 }
 0x33b   :  { %v2435_v53 = vsel %vm2403_vm12, %v11193_v44, 0.0  ;;  %vm3031_vm14 = vcmp.eq.s32.totalorder %v11194_v34, 6  ;;  %vm2406_vm0 = vcmp.eq.s32.totalorder %v8352_v45, 1  ;;  %v2495_v39 = vsel %vm11197_vm11, %v2436_v18, 0.0  ;;  %v11198_v16 = vld [vmem:[#allocation164_spill] sm:$0xff]  ;;  %v11200_v18 = vld [vmem:[#allocation151_spill] sm:$0xff]  ;;  %vm11202_vm12 = vmmov %vm11199_vm6 }
 0x33c   :  { %v2493_v31 = vsel %vm11195_vm13, %v2435_v53, 0.0  ;;  %v3063_v26 = vsel %vm3031_vm14, 1, %v10765_v32  ;;  %v3324_v47 = vsel %vm3031_vm14, %v11196_v1, 0.0  ;;  %v3381_v40 = vadd.f32 %v3380_v61, %v3379_v27  ;;  %vm11204_vm14 = vmmov %vm11190_vm2 }
 0x33d   :  { %v2494_v41 = vadd.f32 %v2493_v31, %v2492_v13  ;;  %3150 = vperm.xlu0 %3976, %v3063_v26   ;;  %vm3402_vm1 = vcmp.eq.s32.totalorder %v4138_v56, 7  ;;  %v3693_v45 = vsel %vm3400_vm10, %v11198_v16, 0.0  ;;  %v3382_v53 = vsel %vm11199_vm6, %v3324_v47, 0.0  ;;  %v11201_v26 = vld [vmem:[#allocation56_spill] sm:$0xff]  ;;  %v8659_v47 = vpop.permute.xlu1 %2729 }
 0x33e   :  { %v3434_v34 = vsel %vm3402_vm1, 1, %v10765_v32  ;;  %vm2405_vm8 = vcmp.eq.s32.totalorder %v8400_v21, 1  ;;  %v2438_v61 = vsel %vm2406_vm0, %v11200_v18, 0.0  ;;  %v8648_v27 = vadd.f32 %v3382_v53, %v3381_v40  ;;  %v4140_v21 = vld [vmem:[%s9282_s2 + $0x30] sm:$0xff]  ;;  %vm11205_vm0 = vmmov %vm11199_vm6  ;;  %v8677_v12 = vpop.permute.xlu0 %2720 }
 0x33f   :  { %v3695_v13 = vsel %vm3402_vm1, %v10528_v25, 0.0  ;;  %3475 = vperm.xlu1 %3977, %v3434_v34   ;;  %v2496_v31 = vadd.f32 %v2495_v39, %v2494_v41  ;;  %vm2770_vm9 = vcmp.eq.s32.totalorder %v8383_v38, 1  ;;  %v2437_v56 = vsel %vm2405_vm8, %v11201_v26, 0.0  ;;  %v11206_v18 = vld [vmem:[#allocation158_spill] sm:$0xff]  ;;  %vm11207_vm8 = vmmov %vm11190_vm2 }
 0x340   :  { %vm3399_vm10 = vcmp.eq.s32.totalorder %v4139_v17, 7  ;;  %vm3404_vm7 = vcmp.eq.s32.totalorder %v4140_v21, 7  ;;  %v2497_v25 = vsel %vm11190_vm2, %v2437_v56, 0.0  ;;  %v8668_v16 = vadd.f32 %v8524_v57, %v8576_v23 }
 0x341   :  { %v3431_v39 = vsel %vm3399_vm10, 1, %v10765_v32  ;;  %v3692_v41 = vsel %vm3399_vm10, %v10968_v3, 0.0  ;;  %v3436_v40 = vsel %vm3404_vm7, 1, %v10765_v32  ;;  %v3726_v53 = vsel %vm11202_vm12, %v3693_v45, 0.0  ;;  %vm11209_vm10 = vmmov %vm11205_vm0 }
 0x342   :  { %v2498_v34 = vadd.f32 %v2497_v25, %v2496_v31  ;;  %v3724_v17 = vsel %vm11203_vm15, %v3692_v41, 0.0  ;;  %3466 = vperm.xlu0 %3976, %v3431_v39   ;;  %v2499_v26 = vsel %vm11204_vm14, %v2438_v61, 0.0  ;;  %v3730_v56 = vsel %vm11205_vm0, %v3695_v13, 0.0  ;;  %v4141_v61 = vld [vmem:[%s9282_s2 + $0x18] sm:$0xff]  ;;  %v11211_v41 = vld [vmem:[#allocation166_spill] sm:$0xff]  ;;  %vm11212_vm14 = vmmov %vm11207_vm8 }
 0x343   :  { %v2802_v3 = vsel %vm2770_vm9, %v11206_v18, 0.0  ;;  %v3725_v44 = vadd.f32 %v3724_v17, %v3723_v8  ;;  %3481 = vperm.xlu1 %3977, %v3436_v40   ;;  %v3697_v57 = vsel %vm3404_vm7, %v10534_v19, 0.0  ;;  %vm2772_vm13 = vcmp.eq.s32.totalorder %v8411_v2, 1  ;;  %v4142_v8 = vld [vmem:[%s9282_s2 + $0x40] sm:$0xff]  ;;  %vm11208_vm9 = vmmov %vm11190_vm2 }
 0x344   :  { %v2500_v23 = vadd.f32 %v2499_v26, %v2498_v34  ;;  %vm2407_vm11 = vcmp.eq.s32.totalorder %v8429_v10, 1  ;;  %vm3401_vm1 = vcmp.eq.s32.totalorder %v4141_v61, 7  ;;  %vm3406_vm6 = vcmp.eq.s32.totalorder %v4142_v8, 7  ;;  %v8694_v26 = vpop.permute.xlu1 %2735  ;;  %vm11210_vm7 = vmmov %vm11205_vm0  ;;  %v4144_v8 = vld [vmem:[%s9282_s2 + $0x50] sm:$0xff] }
 0x345   :  { %v2439_v45 = vsel %vm2407_vm11, %v11043_v9, 0.0  ;;  %v3727_v38 = vadd.f32 %v3726_v53, %v3725_v44  ;;  %v3433_v13 = vsel %vm3401_vm1, 1, %v10765_v32  ;;  %v3694_v31 = vsel %vm3401_vm1, %v10525_v46, 0.0  ;;  %vm11213_vm11 = vmmov %vm11207_vm8 }
 0x346   :  { %v2501_v19 = vsel %vm11207_vm8, %v2439_v45, 0.0  ;;  %v3438_v10 = vsel %vm3406_vm6, 1, %v10765_v32  ;;  %v2834_v21 = vsel %vm11208_vm9, %v2802_v3, 0.0  ;;  %v3734_v25 = vsel %vm11209_vm10, %v3697_v57, 0.0  ;;  %3472 = vperm.xlu0 %3976, %v3433_v13   ;;  %v4143_v3 = vld [vmem:[%s9282_s2 + $0x28] sm:$0xff]  ;;  %v8709_v57 = vpop.permute.xlu0 %2726 }
 0x347   :  { %v2502_v44 = vadd.f32 %v2501_v19, %v2500_v23  ;;  %v3728_v39 = vsel %vm11210_vm7, %v3694_v31, 0.0  ;;  %3487 = vperm.xlu1 %3977, %v3438_v10   ;;  %v2804_v40 = vsel %vm2772_vm13, %v11211_v41, 0.0  ;;  %v3699_v46 = vsel %vm3406_vm6, %v10670_v35, 0.0  ;;  %vm11214_vm6 = vmmov %vm11205_vm0 }
 0x348   :  { %v3729_v53 = vadd.f32 %v3728_v39, %v3727_v38  ;;  %vm2771_vm2 = vcmp.eq.s32.totalorder %v8459_v22, 1  ;;  %vm2774_vm12 = vcmp.eq.s32.totalorder %v8443_v0, 1  ;;  %vm3403_vm15 = vcmp.eq.s32.totalorder %v4143_v3, 7  ;;  %vm11215_vm7 = vmmov %vm11213_vm11 }
 0x349   :  { %v2503_v34 = vrot.slane %v2502_v44, 4  ;;  %v2803_v17 = vsel %vm2771_vm2, %v11051_v20, 0.0  ;;  %v3435_v23 = vsel %vm3403_vm15, 1, %v10765_v32  ;;  %v3696_v35 = vsel %vm3403_vm15, %v10531_v63, 0.0  ;;  %v8721_v63 = vpop.permute.xlu1 %2741  ;;  %vm11216_vm2 = vmmov %vm11215_vm7 }
 0x34a   :  { %v2835_v2 = vsel %vm11212_vm14, %v2803_v17, 0.0  ;;  %v3731_v45 = vadd.f32 %v3730_v56, %v3729_v53  ;;  %v3732_v38 = vsel %vm11205_vm0, %v3696_v35, 0.0  ;;  %3478 = vperm.xlu0 %3976, %v3435_v23   ;;  %vm3408_vm13 = vcmp.eq.s32.totalorder %v4144_v8, 7  ;;  %v8735_v3 = vpop.permute.xlu0 %2732  ;;  %vm11217_vm15 = vmmov %vm11205_vm0 }
 0x34b   :  { %v2504_v22 = vadd.f32 %v2503_v34, %v2502_v44  ;;  %v2836_v61 = vadd.f32 %v2835_v2, %v2834_v21  ;;  %v2837_v19 = vsel %vm11213_vm11, %v2804_v40, 0.0  ;;  %vm3799_vm1 = vcmask 1043456   ;;  %v4145_v40 = vld [vmem:[%s9282_s2 + $0x38] sm:$0xff]  ;;  %vm11218_vm14 = vmmov %vm11205_vm0 }
 0x34c   :  { %v3738_v13 = vsel %vm11214_vm6, %v3699_v46, 0.0  ;;  %v3733_v31 = vadd.f32 %v3732_v38, %v3731_v45  ;;  %v3440_v10 = vsel %vm3408_vm13, 1, %v10765_v32  ;;  %v2806_v21 = vsel %vm2774_vm12, %v11061_v29, 0.0  ;;  %vm11219_vm11 = vmmov %vm11216_vm2 }
 0x34d   :  { %v2505_v56 = vrot.slane %v2504_v22, 2  ;;  %3493 = vperm.xlu1 %3977, %v3440_v10   ;;  %vm2776_vm8 = vcmp.eq.s32.totalorder %v8473_v7, 1  ;;  %v2838_v44 = vadd.f32 %v2837_v19, %v2836_v61  ;;  %v3701_v39 = vsel %vm3408_vm13, %v11090_v14, 0.0  ;;  %v4147_v61 = vld [vmem:[%s9282_s2 + $0x48] sm:$0xff]  ;;  %v8751_v38 = vpop.permute.xlu1 %2747 }
 0x34e   :  { %vm2773_vm9 = vcmp.eq.s32.totalorder %v8490_v48, 1  ;;  %vm3405_vm10 = vcmp.eq.s32.totalorder %v4145_v40, 7  ;;  %v3735_v53 = vadd.f32 %v3734_v25, %v3733_v31  ;;  %v2841_v7 = vsel %vm11215_vm7, %v2806_v21, 0.0  ;;  %v4146_v25 = vld [vmem:[%s9282_s2 + $0x60] sm:$0xff]  ;;  %v11221_v40 = vld [vmem:[#allocation51_spill] sm:$0xff] }
 0x34f   :  { %v2506_v46 = vadd.f32 %v2505_v56, %v2504_v22  ;;  %v2805_v34 = vsel %vm2773_vm9, %v11062_v4, 0.0  ;;  %v3437_v0 = vsel %vm3405_vm10, 1, %v10765_v32  ;;  %v3698_v17 = vsel %vm3405_vm10, %v11085_v50, 0.0  ;;  %vm11224_vm10 = vmmov %vm11218_vm14 }
 0x350   :  { %v2808_v14 = vsel %vm2776_vm8, %v11069_v54, 0.0  ;;  %v2839_v48 = vsel %vm11216_vm2, %v2805_v34, 0.0  ;;  %3484 = vperm.xlu0 %3976, %v3437_v0   ;;  %vm3410_vm12 = vcmp.eq.s32.totalorder %v4146_v25, 7  ;;  %v3736_v35 = vsel %vm11217_vm15, %v3698_v17, 0.0  ;;  %vm11222_vm8 = vmmov %vm11216_vm2  ;;  %v8768_v34 = vpop.permute.xlu0 %2738  ;;  %v11223_v0 = vld [vmem:[#allocation43_spill] sm:$0xff] }
 0x351   :  { %v2507_v2 = vrot.slane %v2506_v46, 1  ;;  %v2840_v23 = vadd.f32 %v2839_v48, %v2838_v44  ;;  %v3442_v50 = vsel %vm3410_vm12, 1, %v10765_v32  ;;  %v3742_v45 = vsel %vm11218_vm14, %v3701_v39, 0.0  ;;  %v11220_v44 = vld [vmem:[#allocation19_spill] sm:$0xff]  ;;  %vm11226_vm15 = vmmov %vm11224_vm10 }
 0x352   :  { %v3737_v22 = vadd.f32 %v3736_v35, %v3735_v53  ;;  %3499 = vperm.xlu1 %3977, %v3442_v50   ;;  %vm2775_vm0 = vcmp.eq.s32.totalorder %v8520_v28, 1  ;;  %vm3407_vm13 = vcmp.eq.s32.totalorder %v4147_v61, 7  ;;  %v2845_v19 = vsel %vm11219_vm11, %v2808_v14, 0.0  ;;  %v4149_v25 = vld [vmem:[%s9282_s2 + $0x58] sm:$0xff]  ;;  %vm11227_vm14 = vmmov %vm11222_vm8 }
 0x353   :  { %v2508_v8 = vadd.f32 %v2507_v2, %v2506_v46  ;;  %vm2778_vm6 = vcmp.eq.s32.totalorder %v8503_v51, 1  ;;  %v2842_v31 = vadd.f32 %v2841_v7, %v2840_v23  ;;  %v2807_v10 = vsel %vm2775_vm0, %v11074_v43, 0.0  ;;  %v4148_v51 = vld [vmem:[%s9282_s2 + $0x70] sm:$0xff]  ;;  %v11225_v23 = vld [vmem:[#allocation101_spill] sm:$0xff]  ;;  %vm11229_vm0 = vmmov %vm11222_vm8 }
 0x354   :  { %v3439_v56 = vsel %vm3407_vm13, 1, %v10765_v32  ;;  %v3700_v21 = vsel %vm3407_vm13, %v11095_v30, 0.0  ;;  %v3739_v28 = vadd.f32 %v3738_v13, %v3737_v22  ;;  %v3703_v53 = vsel %vm3410_vm12, %v11221_v40, 0.0  ;;  %v8781_v22 = vpop.permute.xlu1 %2753  ;;  %vm11230_vm13 = vmmov %vm11224_vm10 }
 0x355   :  { %v8760_v39 = vsel %vm3799_vm1, %v11220_v44, %v2508_v8  ;;  %v2843_v46 = vsel %vm11222_vm8, %v2807_v10, 0.0  ;;  %3490 = vperm.xlu0 %3976, %v3439_v56   ;;  %vm3412_vm9 = vcmp.eq.s32.totalorder %v4148_v51, 7  ;;  %v2810_v30 = vsel %vm2778_vm6, %v11223_v0, 0.0  ;;  %v11228_v8 = vld [vmem:[#allocation185_spill] sm:$0xff]  ;;  %vm11231_vm6 = vmmov %vm11224_vm10  ;;  %v11232_v44 = vld [vmem:[#allocation184_spill] sm:$0xff] }
 0x356   :  { %v2844_v13 = vadd.f32 %v2843_v46, %v2842_v31  ;;  %v3740_v17 = vsel %vm11224_vm10, %v3700_v21, 0.0  ;;  %v3444_v7 = vsel %vm3412_vm9, 1, %v10765_v32  ;;  %v3705_v48 = vsel %vm3412_vm9, %v10848_v37, 0.0  ;;  %v8796_v46 = vpop.permute.xlu0 %2744 }
 0x357   :  { %v3741_v14 = vadd.f32 %v3740_v17, %v3739_v28  ;;  %3505 = vperm.xlu1 %3977, %v3444_v7   ;;  %vm2777_vm7 = vcmp.eq.s32.totalorder %v8553_v5, 1  ;;  %vm3409_vm2 = vcmp.eq.s32.totalorder %v4149_v25, 7  ;;  %vm2780_vm12 = vcmp.eq.s32.totalorder %v8537_v11, 1  ;;  %v4151_v11 = vld [vmem:[%s9282_s2 + $0x68] sm:$0xff] }
 0x358   :  { %v2846_v2 = vadd.f32 %v2845_v19, %v2844_v13  ;;  %v2809_v35 = vsel %vm2777_vm7, %v11225_v23, 0.0  ;;  %v3441_v50 = vsel %vm3409_vm2, 1, %v10765_v32  ;;  %v3746_v61 = vsel %vm11226_vm15, %v3703_v53, 0.0  ;;  %v4150_v19 = vld [vmem:[%s9282_s2 + $0x80] sm:$0xff]  ;;  %v11233_v13 = vld [vmem:[#allocation46_spill] sm:$0xff]  ;;  %vm11238_vm15 = vmmov %vm11231_vm6 }
 0x359   :  { %v2847_v37 = vsel %vm11227_vm14, %v2809_v35, 0.0  ;;  %v3702_v5 = vsel %vm3409_vm2, %v11228_v8, 0.0  ;;  %v3743_v31 = vadd.f32 %v3742_v45, %v3741_v14  ;;  %3496 = vperm.xlu0 %3976, %v3441_v50   ;;  %v2849_v10 = vsel %vm11229_vm0, %v2810_v30, 0.0  ;;  %v4152_v14 = vld [vmem:[%s9282_s2 + $0x90] sm:$0xff]  ;;  %vm11234_vm2 = vmmov %vm11229_vm0  ;;  %v11237_v50 = vld [vmem:[#allocation136_spill] sm:$0xff] }
 0x35a   :  { %v2848_v56 = vadd.f32 %v2847_v37, %v2846_v2  ;;  %v3744_v21 = vsel %vm11230_vm13, %v3702_v5, 0.0  ;;  %vm3414_vm11 = vcmp.eq.s32.totalorder %v4150_v19, 7  ;;  %v3750_v28 = vsel %vm11231_vm6, %v3705_v48, 0.0  ;;  %v11235_v48 = vld [vmem:[#allocation47_spill] sm:$0xff]  ;;  %v8812_v2 = vpop.permute.xlu1 %2759  ;;  %vm11239_vm14 = vmmov %vm11231_vm6  ;;  %v11241_v19 = vld [vmem:[#allocation44_spill] sm:$0xff] }
 0x35b   :  { %v2812_v40 = vsel %vm2780_vm12, %v11232_v44, 0.0  ;;  %v3745_v53 = vadd.f32 %v3744_v21, %v3743_v31  ;;  %v3446_v45 = vsel %vm3414_vm11, 1, %v10765_v32  ;;  %v3707_v51 = vsel %vm3414_vm11, %v11129_v24, 0.0  ;;  %vm11236_vm12 = vmmov %vm11229_vm0 }
 0x35c   :  { %3511 = vperm.xlu1 %3977, %v3446_v45   ;;  %vm2782_vm8 = vcmp.eq.s32.totalorder %v8570_v60, 1  ;;  %v2850_v30 = vadd.f32 %v2849_v10, %v2848_v56  ;;  %vm2779_vm9 = vcmp.eq.s32.totalorder %v8588_v33, 1  ;;  %vm3411_vm10 = vcmp.eq.s32.totalorder %v4151_v11, 7  ;;  %v11240_v10 = vld [vmem:[#allocation170_spill] sm:$0xff]  ;;  %v8825_v45 = vpop.permute.xlu0 %2750  ;;  %vm11242_vm6 = vmmov %vm11234_vm2 }
 0x35d   :  { %v2811_v17 = vsel %vm2779_vm9, %v11233_v13, 0.0  ;;  %v3747_v7 = vadd.f32 %v3746_v61, %v3745_v53  ;;  %vm3416_vm7 = vcmp.eq.s32.totalorder %v4152_v14, 7  ;;  %v3443_v60 = vsel %vm3411_vm10, 1, %v10765_v32  ;;  %vm11245_vm9 = vmmov %vm11239_vm14 }
 0x35e   :  { %v2851_v24 = vsel %vm11234_vm2, %v2811_v17, 0.0  ;;  %v3704_v25 = vsel %vm3411_vm10, %v11235_v48, 0.0  ;;  %v3448_v33 = vsel %vm3416_vm7, 1, %v10765_v32  ;;  %v2853_v35 = vsel %vm11236_vm12, %v2812_v40, 0.0  ;;  %3502 = vperm.xlu0 %3976, %v3443_v60   ;;  %v4153_v40 = vld [vmem:[%s9282_s2 + $0x78] sm:$0xff]  ;;  %v11243_v17 = vld [vmem:[#allocation53_spill] sm:$0xff] }
 0x35f   :  { %v2814_v37 = vsel %vm2782_vm8, %v11237_v50, 0.0  ;;  %v2852_v61 = vadd.f32 %v2851_v24, %v2850_v30  ;;  %v3748_v8 = vsel %vm11238_vm15, %v3704_v25, 0.0  ;;  %v3754_v5 = vsel %vm11239_vm14, %v3707_v51, 0.0  ;;  %vm11244_vm8 = vmmov %vm11234_vm2  ;;  %v4154_v60 = vld [vmem:[%s9282_s2 + $0xa0] sm:$0xff]  ;;  %v11247_v25 = vld [vmem:[#allocation49_spill] sm:$0xff] }
 0x360   :  { %v3749_v31 = vadd.f32 %v3748_v8, %v3747_v7  ;;  %v3709_v56 = vsel %vm3416_vm7, %v11240_v10, 0.0  ;;  %3517 = vperm.xlu1 %3977, %v3448_v33   ;;  %vm2781_vm0 = vcmp.eq.s32.totalorder %v8613_v36, 1  ;;  %vm2784_vm13 = vcmp.eq.s32.totalorder %v8599_v59, 1  ;;  %vm11246_vm7 = vmmov %vm11245_vm9  ;;  %v4155_v59 = vld [vmem:[%s9282_s2 + $0x88] sm:$0xff] }
 0x361   :  { %v2854_v21 = vadd.f32 %v2853_v35, %v2852_v61  ;;  %v2813_v53 = vsel %vm2781_vm0, %v11241_v19, 0.0  ;;  %vm3413_vm11 = vcmp.eq.s32.totalorder %v4153_v40, 7  ;;  %v2857_v36 = vsel %vm11244_vm8, %v2814_v37, 0.0  ;;  %v8840_v61 = vpop.permute.xlu1 %2765  ;;  %vm11249_vm0 = vmmov %vm11242_vm6 }
 0x362   :  { %v2855_v51 = vsel %vm11242_vm6, %v2813_v53, 0.0  ;;  %v3445_v30 = vsel %vm3413_vm11, 1, %v10765_v32  ;;  %v3706_v11 = vsel %vm3413_vm11, %v11243_v17, 0.0  ;;  %v3751_v7 = vadd.f32 %v3750_v28, %v3749_v31  ;;  %v11248_v31 = vld [vmem:[#allocation117_spill] sm:$0xff]  ;;  %v11250_v53 = vld [vmem:[#allocation138_spill] sm:$0xff]  ;;  %v11252_v17 = vld [vmem:[#allocation168_spill] sm:$0xff] }
 0x363   :  { %v2856_v14 = vadd.f32 %v2855_v51, %v2854_v21  ;;  %v3752_v24 = vsel %vm11245_vm9, %v3706_v11, 0.0  ;;  %3508 = vperm.xlu0 %3976, %v3445_v30   ;;  %vm3418_vm10 = vcmp.eq.s32.totalorder %v4154_v60, 7  ;;  %v3758_v48 = vsel %vm11246_vm7, %v3709_v56, 0.0  ;;  %v4156_v21 = vld [vmem:[%s9282_s2 + $0xb0] sm:$0xff]  ;;  %v8856_v51 = vpop.permute.xlu0 %2756  ;;  %vm11253_vm11 = vmmov %vm11246_vm7 }
 0x364   :  { %v2816_v33 = vsel %vm2784_vm13, %v11247_v25, 0.0  ;;  %v3753_v35 = vadd.f32 %v3752_v24, %v3751_v7  ;;  %v3450_v28 = vsel %vm3418_vm10, 1, %v10765_v32  ;;  %v3711_v37 = vsel %vm3418_vm10, %v11150_v42, 0.0  ;;  %vm11251_vm13 = vmmov %vm11249_vm0 }
 0x365   :  { %3523 = vperm.xlu1 %3977, %v3450_v28   ;;  %vm2786_vm2 = vcmp.eq.s32.totalorder %v8626_v6, 1  ;;  %v2858_v8 = vadd.f32 %v2857_v36, %v2856_v14  ;;  %vm2783_vm12 = vcmp.eq.s32.totalorder %v8639_v62, 1  ;;  %vm3415_vm15 = vcmp.eq.s32.totalorder %v4155_v59, 7  ;;  %vm11254_vm6 = vmmov %vm11246_vm7 }
 0x366   :  { %v2815_v10 = vsel %vm2783_vm12, %v11248_v31, 0.0  ;;  %v3755_v56 = vadd.f32 %v3754_v5, %v3753_v35  ;;  %vm3420_vm14 = vcmp.eq.s32.totalorder %v4156_v21, 7  ;;  %v3447_v6 = vsel %vm3415_vm15, 1, %v10765_v32  ;;  %v11255_v35 = vld [vmem:[#allocation141_spill] sm:$0xff]  ;;  %vm11256_vm7 = vmmov %vm11249_vm0 }
 0x367   :  { %v2859_v42 = vsel %vm11249_vm0, %v2815_v10, 0.0  ;;  %v3708_v40 = vsel %vm3415_vm15, %v11250_v53, 0.0  ;;  %v3452_v62 = vsel %vm3420_vm14, 1, %v10765_v32  ;;  %v2861_v30 = vsel %vm11251_vm13, %v2816_v33, 0.0  ;;  %3514 = vperm.xlu0 %3976, %v3447_v6   ;;  %v4157_v33 = vld [vmem:[%s9282_s2 + $0x98] sm:$0xff]  ;;  %vm11258_vm12 = vmmov %vm11254_vm6 }
 0x368   :  { %v2818_v11 = vsel %vm2786_vm2, %v11252_v17, 0.0  ;;  %v2860_v5 = vadd.f32 %v2859_v42, %v2858_v8  ;;  %v3756_v7 = vsel %vm11253_vm11, %v3708_v40, 0.0  ;;  %v3762_v36 = vsel %vm11254_vm6, %v3711_v37, 0.0  ;;  %v8869_v8 = vpop.permute.xlu1 %3069  ;;  %vm11257_vm2 = vmmov %vm11249_vm0  ;;  %v4158_v42 = vld [vmem:[%s9282_s2 + $0xc0] sm:$0xff]  ;;  %v11260_v53 = vld [vmem:[#allocation175_spill] sm:$0xff] }
 0x369   :  { %v3757_v14 = vadd.f32 %v3756_v7, %v3755_v56  ;;  %v3713_v24 = vsel %vm3420_vm14, %v11162_v52, 0.0  ;;  %3529 = vperm.xlu1 %3977, %v3452_v62   ;;  %vm2785_vm8 = vcmp.eq.s32.totalorder %v8677_v12, 1  ;;  %vm2788_vm9 = vcmp.eq.s32.totalorder %v8659_v47, 1  ;;  %vm11259_vm14 = vmmov %vm11254_vm6  ;;  %v4159_v47 = vld [vmem:[%s9282_s2 + $0xa8] sm:$0xff] }
 0x36a   :  { %v2862_v60 = vadd.f32 %v2861_v30, %v2860_v5  ;;  %v2817_v28 = vsel %vm2785_vm8, %v11255_v35, 0.0  ;;  %vm3417_vm10 = vcmp.eq.s32.totalorder %v4157_v33, 7  ;;  %v2865_v12 = vsel %vm11257_vm2, %v2818_v11, 0.0  ;;  %v11261_v5 = vld [vmem:[#allocation148_spill] sm:$0xff]  ;;  %vm11262_vm8 = vmmov %vm11257_vm2 }
 0x36b   :  { %v2863_v37 = vsel %vm11256_vm7, %v2817_v28, 0.0  ;;  %v3449_v10 = vsel %vm3417_vm10, 1, %v10765_v32  ;;  %v3710_v52 = vsel %vm3417_vm10, %v11154_v15, 0.0  ;;  %v3759_v59 = vadd.f32 %v3758_v48, %v3757_v14  ;;  %v8884_v48 = vpop.permute.xlu0 %2762  ;;  %vm11265_vm10 = vmmov %vm11258_vm12 }
 0x36c   :  { %v2864_v56 = vadd.f32 %v2863_v37, %v2862_v60  ;;  %v3760_v21 = vsel %vm11258_vm12, %v3710_v52, 0.0  ;;  %3520 = vperm.xlu0 %3976, %v3449_v10   ;;  %vm3422_vm15 = vcmp.eq.s32.totalorder %v4158_v42, 7  ;;  %v3766_v6 = vsel %vm11259_vm14, %v3713_v24, 0.0  ;;  %v4160_v24 = vld [vmem:[%s9282_s2 + $0xd0] sm:$0xff]  ;;  %v8900_v28 = vpop.permute.xlu1 %3075  ;;  %vm11266_vm7 = vmmov %vm11265_vm10 }
 0x36d   :  { %v2820_v40 = vsel %vm2788_vm9, %v11260_v53, 0.0  ;;  %v3761_v62 = vadd.f32 %v3760_v21, %v3759_v59  ;;  %v3454_v15 = vsel %vm3422_vm15, 1, %v10765_v32  ;;  %v3715_v30 = vsel %vm3422_vm15, %v11167_v58, 0.0  ;;  %vm11263_vm9 = vmmov %vm11257_vm2  ;;  %v11264_v37 = vld [vmem:[#allocation182_spill] sm:$0xff]  ;;  %v11267_v21 = vld [vmem:[#allocation171_spill] sm:$0xff] }
 0x36e   :  { %3535 = vperm.xlu1 %3977, %v3454_v15   ;;  %vm2790_vm0 = vcmp.eq.s32.totalorder %v8694_v26, 1  ;;  %v2866_v11 = vadd.f32 %v2865_v12, %v2864_v56  ;;  %vm2787_vm13 = vcmp.eq.s32.totalorder %v8709_v57, 1  ;;  %vm3419_vm11 = vcmp.eq.s32.totalorder %v4159_v47, 7  ;;  %vm11268_vm14 = vmmov %vm11262_vm8 }
 0x36f   :  { %v2819_v7 = vsel %vm2787_vm13, %v11261_v5, 0.0  ;;  %v3763_v14 = vadd.f32 %v3762_v36, %v3761_v62  ;;  %vm3424_vm6 = vcmp.eq.s32.totalorder %v4160_v24, 7  ;;  %v3451_v26 = vsel %vm3419_vm11, 1, %v10765_v32  ;;  %vm11271_vm13 = vmmov %vm11266_vm7  ;;  %v8923_v24 = vld [vmem:[%s9282_s2 + $0xe0] sm:$0xff] }
 0x370   :  { %v2867_v58 = vsel %vm11262_vm8, %v2819_v7, 0.0  ;;  %v3712_v60 = vsel %vm3419_vm11, %v11166_v49, 0.0  ;;  %v3456_v57 = vsel %vm3424_vm6, 1, %v10765_v32  ;;  %v2869_v33 = vsel %vm11263_vm9, %v2820_v40, 0.0  ;;  %3526 = vperm.xlu0 %3976, %v3451_v26   ;;  %v4161_v40 = vld [vmem:[%s9282_s2 + $0xb8] sm:$0xff] }
 0x371   :  { %v2822_v10 = vsel %vm2790_vm0, %v11264_v37, 0.0  ;;  %v2868_v36 = vadd.f32 %v2867_v58, %v2866_v11  ;;  %v3764_v52 = vsel %vm11265_vm10, %v3712_v60, 0.0  ;;  %v3770_v59 = vsel %vm11266_vm7, %v3715_v30, 0.0  ;;  %vm11270_vm0 = vmmov %vm11262_vm8 }
 0x372   :  { %v3765_v12 = vadd.f32 %v3764_v52, %v3763_v14  ;;  %v3717_v56 = vsel %vm3424_vm6, %v11180_v55, 0.0  ;;  %3541 = vperm.xlu1 %3977, %v3456_v57   ;;  %vm2789_vm2 = vcmp.eq.s32.totalorder %v8735_v3, 1  ;;  %vm2792_vm12 = vcmp.eq.s32.totalorder %v8721_v63, 1  ;;  %v8913_v62 = vpop.permute.xlu0 %2768  ;;  %v11269_v55 = vld [vmem:[#allocation45_spill] sm:$0xff]  ;;  %vm11272_vm6 = vmmov %vm11266_vm7  ;;  %v11273_v57 = vld [vmem:[#allocation144_spill] sm:$0xff] }
 0x373   :  { %v2870_v49 = vadd.f32 %v2869_v33, %v2868_v36  ;;  %v2821_v42 = vsel %vm2789_vm2, %v11267_v21, 0.0  ;;  %vm3421_vm15 = vcmp.eq.s32.totalorder %v4161_v40, 7  ;;  %v2873_v3 = vsel %vm11270_vm0, %v2822_v10, 0.0  ;;  %v11274_v10 = vld [vmem:[#allocation131_spill] sm:$0xff]  ;;  %vm11275_vm10 = vmmov %vm11272_vm6 }
 0x374   :  { %v2871_v15 = vsel %vm11268_vm14, %v2821_v42, 0.0  ;;  %v3453_v30 = vsel %vm3421_vm15, 1, %v10765_v32  ;;  %v3714_v11 = vsel %vm3421_vm15, %v11269_v55, 0.0  ;;  %v3767_v7 = vadd.f32 %v3766_v6, %v3765_v12  ;;  %v8929_v33 = vpop.permute.xlu1 %3081  ;;  %v4163_v42 = vld [vmem:[%s9282_s2 + $0xc8] sm:$0xff]  ;;  %vm11277_vm2 = vmmov %vm11270_vm0 }
 0x375   :  { %v2872_v47 = vadd.f32 %v2871_v15, %v2870_v49  ;;  %v3768_v14 = vsel %vm11271_vm13, %v3714_v11, 0.0  ;;  %3532 = vperm.xlu0 %3976, %v3453_v30   ;;  %vm3032_vm11 = vcmp.eq.s32.totalorder %v8923_v24, 6  ;;  %v3774_v58 = vsel %vm11272_vm6, %v3717_v56, 0.0  ;;  %v11276_v56 = vld [vmem:[#allocation128_spill] sm:$0xff]  ;;  %v11278_v30 = vld [vmem:[#allocation134_spill] sm:$0xff]  ;;  %vm11279_vm15 = vmmov %vm11272_vm6 }
 0x376   :  { %v3769_v26 = vadd.f32 %v3768_v14, %v3767_v7  ;;  %v3064_v60 = vsel %vm3032_vm11, 1, %v10765_v32  ;;  %v3325_v6 = vsel %vm3032_vm11, %v11273_v57, 0.0  ;;  %v2824_v36 = vsel %vm2792_vm12, %v11274_v10, 0.0  ;;  %vm11281_vm14 = vmmov %vm11270_vm0 }
 0x377   :  { %3153 = vperm.xlu1 %3977, %v3064_v60   ;;  %vm2794_vm8 = vcmp.eq.s32.totalorder %v8751_v38, 1  ;;  %v2874_v52 = vadd.f32 %v2873_v3, %v2872_v47  ;;  %vm2791_vm9 = vcmp.eq.s32.totalorder %v8768_v34, 1  ;;  %v3384_v12 = vsel %vm11275_vm10, %v3325_v6, 0.0  ;;  %v8947_v34 = vld [vmem:[%s9282_s2 + $0xe8] sm:$0xff]  ;;  %vm11283_vm13 = vmmov %vm11272_vm6 }
 0x378   :  { %v2823_v49 = vsel %vm2791_vm9, %v11276_v56, 0.0  ;;  %vm3423_vm7 = vcmp.eq.s32.totalorder %v4163_v42, 7  ;;  %v3771_v40 = vadd.f32 %v3770_v59, %v3769_v26  ;;  %vm3033_vm12 = vcmp.eq.s32.totalorder %v8947_v34, 6  ;;  %v8950_v11 = vpop.permute.xlu0 %3072  ;;  %v11280_v47 = vld [vmem:[#allocation145_spill] sm:$0xff]  ;;  %vm11285_vm6 = vmmov %vm11277_vm2 }
 0x379   :  { %v2875_v15 = vsel %vm11277_vm2, %v2823_v49, 0.0  ;;  %v3455_v63 = vsel %vm3423_vm7, 1, %v10765_v32  ;;  %v3716_v55 = vsel %vm3423_vm7, %v11278_v30, 0.0  ;;  %v3065_v59 = vsel %vm3033_vm12, 1, %v10765_v32  ;;  %v11282_v49 = vld [vmem:[#allocation137_spill] sm:$0xff]  ;;  %vm11287_vm10 = vmmov %vm11277_vm2 }
 0x37a   :  { %v2876_v7 = vadd.f32 %v2875_v15, %v2874_v52  ;;  %v3772_v3 = vsel %vm11279_vm15, %v3716_v55, 0.0  ;;  %3538 = vperm.xlu0 %3976, %v3455_v63   ;;  %v3326_v14 = vsel %vm3033_vm12, %v11280_v47, 0.0  ;;  %v2877_v26 = vsel %vm11281_vm14, %v2824_v36, 0.0  ;;  %v11284_v63 = vld [vmem:[#allocation48_spill] sm:$0xff]  ;;  %v8963_v55 = vpop.permute.xlu1 %3087  ;;  %vm11289_vm7 = vmmov %vm11283_vm13 }
 0x37b   :  { %v3385_v60 = vadd.f32 %v3384_v12, %v8648_v27  ;;  %v3773_v6 = vadd.f32 %v3772_v3, %v3771_v40  ;;  %3156 = vperm.xlu1 %3977, %v3065_v59   ;;  %vm2793_vm0 = vcmp.eq.s32.totalorder %v8796_v46, 1  ;;  %v2826_v42 = vsel %vm2794_vm8, %v11282_v49, 0.0  ;;  %v4165_v27 = vld [vmem:[%s9282_s2 + $0xd8] sm:$0xff] }
 0x37c   :  { %v3386_v52 = vsel %vm11283_vm13, %v3326_v14, 0.0  ;;  %v2878_v15 = vadd.f32 %v2877_v26, %v2876_v7  ;;  %v2825_v30 = vsel %vm2793_vm0, %v11284_v63, 0.0  ;;  %vm2796_vm11 = vcmp.eq.s32.totalorder %v8781_v22, 1  ;;  %v8975_v7 = vld [vmem:[%s9282_s2 + $0xf0] sm:$0xff]  ;;  %v11286_v3 = vld [vmem:[#allocation135_spill] sm:$0xff]  ;;  %vm11292_vm0 = vmmov %vm11285_vm6 }
 0x37d   :  { %v2879_v36 = vsel %vm11285_vm6, %v2825_v30, 0.0  ;;  %vm3425_vm9 = vcmp.eq.s32.totalorder %v4165_v27, 7  ;;  %v3775_v46 = vadd.f32 %v3774_v58, %v3773_v6  ;;  %vm3034_vm8 = vcmp.eq.s32.totalorder %v8975_v7, 6  ;;  %vm11293_vm13 = vmmov %vm11289_vm7 }
 0x37e   :  { %v2880_v12 = vadd.f32 %v2879_v36, %v2878_v15  ;;  %v3457_v38 = vsel %vm3425_vm9, 1, %v10765_v32  ;;  %v3718_v40 = vsel %vm3425_vm9, %v11196_v1, 0.0  ;;  %v2209_v59 = vadd.f32 %v11286_v3, %v8668_v16  ;;  %v8982_v6 = vpop.permute.xlu0 %3078  ;;  %v11288_v15 = vld [vmem:[#allocation130_spill] sm:$0xff]  ;;  %v11291_v16 = vld [vmem:[#allocation133_spill] sm:$0xff]  ;;  %vm11296_vm6 = vmmov %vm11289_vm7 }
 0x37f   :  { %v2881_v14 = vsel %vm11287_vm10, %v2826_v42, 0.0  ;;  %v3387_v26 = vadd.f32 %v3386_v52, %v3385_v60  ;;  %3544 = vperm.xlu0 %3976, %v3457_v38   ;;  %v3066_v58 = vsel %vm3034_vm8, 1, %v10765_v32  ;;  %v2828_v1 = vsel %vm2796_vm11, %v11288_v15, 0.0  ;;  %v11290_v36 = vld [vmem:[#allocation150_spill] sm:$0xff]  ;;  %v4167_v52 = vld [vmem:[%s9282_s2 + $0xf8] sm:$0xff]  ;;  %vm11294_vm11 = vmmov %vm11292_vm0 }
 0x380   :  { %v3776_v30 = vsel %vm11289_vm7, %v3718_v40, 0.0  ;;  %3159 = vperm.xlu1 %3977, %v3066_v58   ;;  %v3327_v27 = vsel %vm3034_vm8, %v11290_v36, 0.0  ;;  %v2882_v49 = vadd.f32 %v2881_v14, %v2880_v12  ;;  %vm2798_vm2 = vcmp.eq.s32.totalorder %v8812_v2, 1  ;;  %v11295_v40 = vld [vmem:[#allocation146_spill] sm:$0xff]  ;;  %vm11299_vm7 = vmmov %vm11292_vm0 }
 0x381   :  { %v3777_v63 = vadd.f32 %v3776_v30, %v3775_v46  ;;  %vm2795_vm12 = vcmp.eq.s32.totalorder %v8825_v45, 1  ;;  %vm3426_vm15 = vcmp.eq.s32.totalorder %v8923_v24, 7  ;;  %vm3035_vm14 = vcmp.eq.s32.totalorder %v4167_v52, 6  ;;  %v11297_v30 = vld [vmem:[#allocation54_spill] sm:$0xff] }
 0x382   :  { %v2827_v60 = vsel %vm2795_vm12, %v11291_v16, 0.0  ;;  %v3458_v42 = vsel %vm3426_vm15, 1, %v10765_v32  ;;  %v3719_v22 = vsel %vm3426_vm15, %v11273_v57, 0.0  ;;  %v8998_v38 = vpop.permute.xlu1 %3093  ;;  %v2885_v46 = vsel %vm11292_vm0, %v2828_v1, 0.0  ;;  %vm11301_vm12 = vmmov %vm11296_vm6  ;;  %v11305_v16 = vld [vmem:[#allocation157_spill] sm:$0xff] }
 0x383   :  { %v3388_v2 = vsel %vm11293_vm13, %v3327_v27, 0.0  ;;  %v2883_v45 = vsel %vm11294_vm11, %v2827_v60, 0.0  ;;  %3547 = vperm.xlu0 %3976, %v3458_v42   ;;  %v3067_v24 = vsel %vm3035_vm14, 1, %v10765_v32  ;;  %v2830_v3 = vsel %vm2798_vm2, %v11295_v40, 0.0  ;;  %v11298_v60 = vld [vmem:[#allocation57_spill] sm:$0xff]  ;;  %vm11300_vm2 = vmmov %vm11292_vm0  ;;  %v11304_v40 = vld [vmem:[#allocation56_spill] sm:$0xff] }
 0x384   :  { %v3389_v12 = vadd.f32 %v3388_v2, %v3387_v26  ;;  %v2884_v57 = vadd.f32 %v2883_v45, %v2882_v49  ;;  %v3778_v14 = vsel %vm11296_vm6, %v3719_v22, 0.0  ;;  %3162 = vperm.xlu1 %3977, %v3067_v24   ;;  %v3328_v15 = vsel %vm3035_vm14, %v11297_v30, 0.0  ;;  %vm11302_vm15 = vmmov %vm11296_vm6  ;;  %v11303_v24 = vld [vmem:[#allocation151_spill] sm:$0xff] }
 0x385   :  { %v3779_v58 = vadd.f32 %v3778_v14, %v3777_v63  ;;  %vm2797_vm9 = vcmp.eq.s32.totalorder %v8856_v51, 1  ;;  %vm3427_vm8 = vcmp.eq.s32.totalorder %v8947_v34, 7  ;;  %v9009_v1 = vpop.permute.xlu0 %3084  ;;  %vm2800_vm10 = vcmp.eq.s32.totalorder %v8840_v61, 1  ;;  %vm11308_vm11 = vmmov %vm11292_vm0 }
 0x386   :  { %v2886_v27 = vadd.f32 %v2885_v46, %v2884_v57  ;;  %v2829_v26 = vsel %vm2797_vm9, %v11298_v60, 0.0  ;;  %v3459_v42 = vsel %vm3427_vm8, 1, %v10765_v32  ;;  %v9014_v49 = vpop.permute.xlu1 %3099  ;;  %v2210_v22 = vrot.slane %v2209_v59, 4 }
 0x387   :  { %v2889_v63 = vsel %vm11299_vm7, %v2830_v3, 0.0  ;;  %v2887_v2 = vsel %vm11300_vm2, %v2829_v26, 0.0  ;;  %v3720_v51 = vsel %vm3427_vm8, %v11280_v47, 0.0  ;;  %3550 = vperm.xlu0 %3976, %v3459_v42   ;;  %v3390_v34 = vsel %vm11301_vm12, %v3328_v15, 0.0  ;;  %v11307_v42 = vld [vmem:[#allocation129_spill] sm:$0xff]  ;;  %vm11310_vm2 = vmmov %vm11296_vm6 }
 0x388   :  { %v2888_v45 = vadd.f32 %v2887_v2, %v2886_v27  ;;  %v3780_v61 = vsel %vm11302_vm15, %v3720_v51, 0.0  ;;  %vm2799_vm14 = vcmp.eq.s32.totalorder %v8884_v48, 1  ;;  %v3391_v46 = vadd.f32 %v3390_v34, %v3389_v12 }
 0x389   :  { %v2832_v57 = vsel %vm2800_vm10, %v11303_v24, 0.0  ;;  %v3781_v14 = vadd.f32 %v3780_v61, %v3779_v58  ;;  %v2831_v60 = vsel %vm2799_vm14, %v11304_v40, 0.0  ;;  %v11306_v3 = vrot.slane %v11305_v16, 2  ;;  %v9029_v15 = vpop.permute.xlu0 %3090  ;;  %vm11309_vm10 = vmmov %vm11292_vm0 }
 0x38a   :  { %v2890_v10 = vadd.f32 %v2889_v63, %v2888_v45  ;;  %v2891_v47 = vsel %vm11292_vm0, %v2831_v60, 0.0  ;;  %vm3428_vm13 = vcmp.eq.s32.totalorder %v8975_v7, 7  ;;  %v2211_v27 = vadd.f32 %v2210_v22, %v2209_v59  ;;  %vm11316_vm14 = vmmov %vm11292_vm0 }
 0x38b   :  { %v1819_v26 = vadd.f32 %v11306_v3, %v11305_v16  ;;  %v2998_v48 = vrot.slane %v11307_v42, 4  ;;  %v3460_v12 = vsel %vm3428_vm13, 1, %v10765_v32  ;;  %v3721_v58 = vsel %vm3428_vm13, %v11290_v36, 0.0 }
 0x38c   :  { %v2893_v2 = vsel %vm11308_vm11, %v2832_v57, 0.0  ;;  %v2892_v51 = vadd.f32 %v2891_v47, %v2890_v10  ;;  %v3782_v34 = vsel %vm11296_vm6, %v3721_v58, 0.0  ;;  %3553 = vperm.xlu0 %3976, %v3460_v12   ;;  %vm2801_vm9 = vcmp.eq.s32.totalorder %v8913_v62, 1  ;;  %v9037_v16 = vpop.permute.xlu1 %3105  ;;  %v11311_v57 = vld [vmem:[#allocation160_spill] sm:$0xff]  ;;  %v11312_v12 = vld [vmem:[#allocation82_spill] sm:$0xff]  ;;  %vm11317_vm11 = vmmov %vm11292_vm0 }
 0x38d   :  { %v3392_v7 = vrot.slane %v3391_v46, 4  ;;  %v3783_v60 = vadd.f32 %v3782_v34, %v3781_v14  ;;  %v2833_v59 = vsel %vm2801_vm9, %v11043_v9, 0.0  ;;  %vm3429_vm8 = vcmp.eq.s32.totalorder %v4167_v52, 7 }
 0x38e   :  { %v2894_v22 = vadd.f32 %v2893_v2, %v2892_v51  ;;  %v2895_v63 = vsel %vm11309_vm10, %v2833_v59, 0.0  ;;  %v3461_v36 = vsel %vm3429_vm8, 1, %v10765_v32  ;;  %v3722_v45 = vsel %vm3429_vm8, %v11297_v30, 0.0  ;;  %vm11321_vm8 = vmmov %vm11310_vm2 }
 0x38f   :  { %v2212_v10 = vrot.slane %v2211_v27, 2  ;;  %vm3164_vm7 = vcmp.eq.s32.totalorder %v8869_v8, 1  ;;  %v3784_v61 = vsel %vm11310_vm2, %v3722_v45, 0.0  ;;  %vm3165_vm12 = vcmp.eq.s32.totalorder %v8950_v11, 1  ;;  %v9046_v62 = vpop.permute.xlu0 %3096  ;;  %v11314_v45 = vld [vmem:[#allocation66_spill] sm:$0xff]  ;;  %vm11322_vm2 = vmmov %vm11292_vm0 }
 0x390   :  { %v2606_v14 = vrot.slane %v11311_v57, 2  ;;  %v2896_v3 = vadd.f32 %v2895_v63, %v2894_v22  ;;  %v3785_v52 = vadd.f32 %v3784_v61, %v3783_v60  ;;  %3556 = vperm.xlu0 %3976, %v3461_v36   ;;  %v3197_v47 = vsel %vm3165_vm12, %v11051_v20, 0.0 }
 0x391   :  { %v11313_v32 = vrot.slane %v11312_v12, 1  ;;  %v1820_v58 = vrot.slane %v1819_v26, 1  ;;  %v2999_v8 = vadd.f32 %v2998_v48, %v11307_v42  ;;  %v9054_v2 = vpop.permute.xlu1 %3111  ;;  %v3393_v51 = vadd.f32 %v3392_v7, %v3391_v46 }
 0x392   :  { %v3196_v11 = vsel %vm3164_vm7, %v11206_v18, 0.0  ;;  %v2897_v34 = vrot.slane %v2896_v3, 4  ;;  %v3786_v59 = vrot.slane %v3785_v52, 4  ;;  %v11315_v60 = vrot.slane %v11314_v45, 1 }
 0x393   :  { %v1033_v30 = vadd.f32 %v11313_v32, %v11312_v12  ;;  %v2213_v63 = vadd.f32 %v2212_v10, %v2211_v27  ;;  %vm3166_vm15 = vcmp.eq.s32.totalorder %v8900_v28, 1  ;;  %v3229_v36 = vsel %vm11316_vm14, %v3197_v47, 0.0  ;;  %vm11323_vm14 = vmmov %vm11292_vm0 }
 0x394   :  { %v1427_v22 = vadd.f32 %v11315_v60, %v11314_v45  ;;  %v2607_v61 = vadd.f32 %v2606_v14, %v11311_v57  ;;  %v2898_v12 = vadd.f32 %v2897_v34, %v2896_v3  ;;  %v3787_v42 = vadd.f32 %v3786_v59, %v3785_v52  ;;  %v9063_v48 = vpop.permute.xlu0 %3102 }
 0x395   :  { %v1821_v46 = vadd.f32 %v1820_v58, %v1819_v26  ;;  %v3000_v7 = vrot.slane %v2999_v8, 2  ;;  %v3228_v32 = vsel %vm11292_vm0, %v3196_v11, 0.0  ;;  %vm3167_vm13 = vcmp.eq.s32.totalorder %v8982_v6, 1  ;;  %v9068_v28 = vpop.permute.xlu1 %3117 }
 0x396   :  { %v3394_v9 = vrot.slane %v3393_v51, 2  ;;  %v3198_v45 = vsel %vm3166_vm15, %v11211_v41, 0.0  ;;  %v2899_v27 = vrot.slane %v2898_v12, 2  ;;  %v3230_v10 = vadd.f32 %v3229_v36, %v3228_v32 }
 0x397   :  { %v3810_v47 = vsel %vm3793_vm4, %v1033_v30, %v1427_v22  ;;  %v2214_v57 = vrot.slane %v2213_v63, 1  ;;  %v3788_v3 = vrot.slane %v3787_v42, 2  ;;  %v3199_v52 = vsel %vm3167_vm13, %v11062_v4, 0.0  ;;  %vm11318_vm4 = vmmov %vm11292_vm0 }
 0x398   :  { %v2900_v14 = vadd.f32 %v2899_v27, %v2898_v12  ;;  %v2608_v26 = vrot.slane %v2607_v61, 1  ;;  %v3001_v58 = vadd.f32 %v3000_v7, %v2999_v8  ;;  %v3231_v11 = vsel %vm11317_vm11, %v3198_v45, 0.0  ;;  %vm11324_vm13 = vmmov %vm11322_vm2 }
 0x399   :  { %v9073_v34 = vpop.permute.xlu0 %3108  ;;  %v3811_v6 = vsel %vm3795_vm5, %v3810_v47, %v1821_v46  ;;  %v3395_v59 = vadd.f32 %v3394_v9, %v3393_v51  ;;  %v3232_v36 = vadd.f32 %v3231_v11, %v3230_v10  ;;  %v2215_v32 = vadd.f32 %v2214_v57, %v2213_v63  ;;  %vm11319_vm5 = vmmov %vm11292_vm0 }
 0x39a   :  { %v2901_v60 = vrot.slane %v2900_v14, 1  ;;  %vm3168_vm6 = vcmp.eq.s32.totalorder %v8929_v33, 1  ;;  %v3233_v30 = vsel %vm11318_vm4, %v3199_v52, 0.0  ;;  %v3789_v12 = vadd.f32 %v3788_v3, %v3787_v42  ;;  %vm11325_vm11 = vmmov %vm11321_vm8 }
 0x39b   :  { %v9078_v22 = vpop.permute.xlu1 %3123  ;;  %v2609_v27 = vadd.f32 %v2608_v26, %v2607_v61  ;;  %v3812_v8 = vsel %vm3797_vm3, %v3811_v6, %v2215_v32  ;;  %v3002_v7 = vrot.slane %v3001_v58, 1  ;;  %vm3169_vm9 = vcmp.eq.s32.totalorder %v9009_v1, 1  ;;  %vm11320_vm3 = vmmov %vm11292_vm0 }
 0x39c   :  { %v3396_v45 = vrot.slane %v3395_v59, 1  ;;  %v2902_v24 = vadd.f32 %v2901_v60, %v2900_v14  ;;  %v3200_v9 = vsel %vm3168_vm6, %v11061_v29, 0.0  ;;  %v3234_v51 = vadd.f32 %v3233_v30, %v3232_v36  ;;  %vm11326_vm4 = vmmov %vm11322_vm2 }
 0x39d   :  { %v3813_v33 = vsel %vm3799_vm1, %v3812_v8, %v2609_v27  ;;  %v3790_v63 = vrot.slane %v3789_v12, 1  ;;  %v3201_v10 = vsel %vm3169_vm9, %v11074_v43, 0.0  ;;  %v3003_v47 = vadd.f32 %v3002_v7, %v3001_v58 }
 0x39e   :  { %v9083_v46 = vpop.permute.xlu0 %3114  ;;  %v3235_v61 = vsel %vm11319_vm5, %v3200_v9, 0.0  ;;  %v4193_v57 = vmov 0.0   ;;  %vm3801_vm10 = vcmask 1044480   ;;  %vm3803_vm7 = vcmask 1045504   ;;  %vm11327_vm5 = vmmov %vm11322_vm2 }
 0x39f   :  { %22 = vst.msk [vmem:[#allocation2] sm:$0xff] %vm11320_vm3, %v4193_v57  ;;  %v3397_v1 = vadd.f32 %v3396_v45, %v3395_v59  ;;  %v3236_v14 = vadd.f32 %v3235_v61, %v3234_v51  ;;  %v9096_v3 = vsel %vm3801_vm10, %v8760_v39, %v2902_v24  ;;  %vm3170_vm1 = vcmp.eq.s32.totalorder %v8963_v55, 1 }
 0x3a0   :  { %24 = vst.msk [vmem:[%s9284_s4] sm:$0xff] %vm11321_vm8, %v4193_v57  ;;  %v3237_v52 = vsel %vm11322_vm2, %v3201_v10, 0.0  ;;  %vm3805_vm12 = vcmask 1046528   ;;  %v3814_v26 = vsel %vm3801_vm10, %v3813_v33, %v3003_v47  ;;  %v3791_v58 = vadd.f32 %v3790_v63, %v3789_v12  ;;  %vm11328_vm8 = vmmov %vm11322_vm2 }
 0x3a1   :  { %v9088_v42 = vpop.permute.xlu1 %3129  ;;  %v3815_v6 = vsel %vm3803_vm7, %v3814_v26, %v3397_v1  ;;  %vm3171_vm15 = vcmp.eq.s32.totalorder %v9029_v15, 1  ;;  %v3202_v60 = vsel %vm3170_vm1, %v11069_v54, 0.0  ;;  %v3238_v59 = vadd.f32 %v3237_v52, %v3236_v14  ;;  %vm11329_vm1 = vmmov %vm11322_vm2 }
 0x3a2   :  { %v3816_v39 = vsel %vm3805_vm12, %v3815_v6, %v3791_v58  ;;  %v3203_v55 = vsel %vm3171_vm15, %v11225_v23, 0.0  ;;  %v3239_v32 = vsel %vm11323_vm14, %v3202_v60, 0.0  ;;  %vm3172_vm0 = vcmp.eq.s32.totalorder %v8998_v38, 1 }
 0x3a3   :  { %v3240_v27 = vadd.f32 %v3239_v32, %v3238_v59  ;;  %v3241_v8 = vsel %vm11324_vm13, %v3203_v55, 0.0  ;;  %vm3173_vm6 = vcmp.eq.s32.totalorder %v9046_v62, 1  ;;  %v3204_v7 = vsel %vm3172_vm0, %v11223_v0, 0.0  ;;  %vm11330_vm0 = vmmov %vm11329_vm1 }
 0x3a4   :  { %v9100_v11 = vpop.permute.xlu0 %3120  ;;  %v3205_v51 = vsel %vm3173_vm6, %v11233_v13, 0.0  ;;  %v3243_v38 = vsel %vm11326_vm4, %v3204_v7, 0.0  ;;  %vm3174_vm9 = vcmp.eq.s32.totalorder %v9014_v49, 1  ;;  %vm3175_vm3 = vcmp.eq.s32.totalorder %v9063_v48, 1  ;;  %vm11331_vm6 = vmmov %vm11330_vm0 }
 0x3a5   :  { %v3242_v45 = vadd.f32 %v3241_v8, %v3240_v27  ;;  %v3245_v10 = vsel %vm11327_vm5, %v3205_v51, 0.0  ;;  %v3206_v61 = vsel %vm3174_vm9, %v11232_v44, 0.0  ;;  %v3207_v1 = vsel %vm3175_vm3, %v11241_v19, 0.0  ;;  %vm11332_vm4 = vmmov %vm11330_vm0 }
 0x3a6   :  { %v9105_v36 = vpop.permute.xlu1 %3135  ;;  %v3247_v52 = vsel %vm11328_vm8, %v3206_v61, 0.0  ;;  %vm3176_vm10 = vcmp.eq.s32.totalorder %v9037_v16, 1  ;;  %v3249_v49 = vsel %vm11329_vm1, %v3207_v1, 0.0  ;;  %vm3177_vm2 = vcmp.eq.s32.totalorder %v9073_v34, 1  ;;  %vm11333_vm9 = vmmov %vm11330_vm0 }
 0x3a7   :  { %v3809_v24 = vld [vmem:[%s9284_s4] sm:$0xff]  ;;  %v3244_v63 = vadd.f32 %v3243_v38, %v3242_v45  ;;  %v3208_v48 = vsel %vm3176_vm10, %v11237_v50, 0.0  ;;  %vm3179_vm5 = vcmp.eq.s32.totalorder %v9083_v46, 1  ;;  %vm11334_vm8 = vmmov %vm11330_vm0 }
 0x3a8   :  { %v3817_v12 = vadd.f32 %v3816_v39, %v3809_v24  ;;  %v3209_v39 = vsel %vm3177_vm2, %v11248_v31, 0.0  ;;  %v3251_v55 = vsel %vm11330_vm0, %v3208_v48, 0.0  ;;  %vm11335_vm1 = vmmov %vm11330_vm0 }
 0x3a9   :  { %v9113_v30 = vpop.permute.xlu0 %3126  ;;  %v3246_v57 = vadd.f32 %v3245_v10, %v3244_v63  ;;  %v3253_v34 = vsel %vm11331_vm6, %v3209_v39, 0.0  ;;  %vm3181_vm6 = vcmp.eq.s32.totalorder %v9100_v11, 1 }
 0x3aa   :  { %v9115_v15 = vpop.permute.xlu1 %3141  ;;  %3818 = vst.msk [vmem:[%s9284_s4] sm:$0xff] %vm11325_vm11, %v3817_v12  ;;  %vm3178_vm11 = vcmp.eq.s32.totalorder %v9054_v2, 1  ;;  %s4194_s4 = smov [#allocation2]  }
 0x3ab   :  { %v3248_v58 = vadd.f32 %v3247_v52, %v3246_v57  ;;  %v3210_v51 = vsel %vm3178_vm11, %v11247_v25, 0.0  ;;  %s3825_s25 = sshll.u32 %s4194_s4, 4  ;;  %s3826_s25 = int_to_ptr.vmem [resolvable:$true] %s3825_s25 }
 0x3ac   :  { %v3255_v57 = vsel %vm11335_vm1, %v3210_v51, 0.0  ;;  %vm3182_vm1 = vcmp.eq.s32.totalorder %v9078_v22, 1  ;;  %s4168_s26 = scalar_lea.vmem %s3826_s25, 128  ;;  %p4173_p1 = scmp.lt.s32.totalorder %s3826_s25, %s3826_s25 }
 0x3ad   :  { %v9125_v9 = vpop.permute.xlu0 %3132  ;;  %v3250_v60 = vadd.f32 %v3249_v49, %v3248_v58  ;;  %p4169_p0 = scmp.ne.s32.totalorder %s3826_s25, %s4168_s26  ;;  %p4174_p2 = scmp.lt.s32.totalorder %s4168_s26, %s4168_s26 }
 0x3af   :  { %v3252_v16 = vadd.f32 %v3251_v55, %v3250_v60  ;;  %p4175_p3 = por %p4174_p2, %p4173_p1 }
 0x3b0   :  { %v9128_v33 = vpop.permute.xlu1 %3147 }
 0x3b1   :  { %v3254_v38 = vadd.f32 %v3253_v34, %v3252_v16  ;;  %v3213_v16 = vsel %vm3181_vm6, %v11261_v5, 0.0  ;;  %p4176_p4 = pnand %p4175_p3, %p4169_p0 }
 0x3b3   :  { %v9133_v47 = vpop.permute.xlu0 %3138  ;;  %v3256_v1 = vadd.f32 %v3255_v57, %v3254_v38 }
 0x3b5   :  { %v3464_v62 = vpop.permute.xlu1 %3463 }
 0x3b6   :  { %vm3558_vm15 = vcmp.eq.s32.totalorder %v3464_v62, 1 }
 0x3b7   :  { %v3590_v24 = vsel %vm3558_vm15, %v11206_v18, 0.0  ;;  %vm11336_vm15 = vmmov %vm11330_vm0 }
 0x3b8   :  { %v9138_v14 = vpop.permute.xlu0 %3144  ;;  %v3622_v7 = vsel %vm11332_vm4, %v3590_v24, 0.0  ;;  %vm11338_vm4 = vmmov %vm11330_vm0 }
 0x3b9   :  { %v3470_v26 = vpop.permute.xlu1 %3469 }
 0x3ba   :  { %vm3560_vm14 = vcmp.eq.s32.totalorder %v3470_v26, 1 }
 0x3bb   :  { %v3592_v27 = vsel %vm3560_vm14, %v11211_v41, 0.0  ;;  %v3211_v41 = vsel %vm3179_vm5, %v11255_v35, 0.0  ;;  %vm3180_vm14 = vcmp.eq.s32.totalorder %v9068_v28, 1  ;;  %vm11339_vm5 = vmmov %vm11330_vm0 }
 0x3bc   :  { %v9143_v6 = vpop.permute.xlu0 %3150  ;;  %v3625_v63 = vsel %vm11334_vm8, %v3592_v27, 0.0  ;;  %v3257_v58 = vsel %vm11330_vm0, %v3211_v41, 0.0  ;;  %v3212_v39 = vsel %vm3180_vm14, %v11252_v17, 0.0  ;;  %vm11340_vm8 = vmmov %vm11330_vm0 }
 0x3bd   :  { %v3258_v55 = vadd.f32 %v3257_v58, %v3256_v1  ;;  %vm11343_vm14 = vmmov %vm11330_vm0 }
 0x3be   :  { %v3476_v59 = vpop.permute.xlu1 %3475 }
 0x3bf   :  { %vm3562_vm3 = vcmp.eq.s32.totalorder %v3476_v59, 1 }
 0x3c1   :  { %v3467_v32 = vpop.permute.xlu0 %3466 }
 0x3c2   :  { %vm3559_vm13 = vcmp.eq.s32.totalorder %v3467_v32, 1  ;;  %v3482_v12 = vpop.permute.xlu1 %3481 }
 0x3c3   :  { %v3591_v8 = vsel %vm3559_vm13, %v11051_v20, 0.0  ;;  %v3594_v20 = vsel %vm3562_vm3, %v11061_v29, 0.0  ;;  %vm3564_vm2 = vcmp.eq.s32.totalorder %v3482_v12, 1  ;;  %vm11337_vm13 = vmmov %vm11330_vm0 }
 0x3c4   :  { %v3623_v45 = vsel %vm11333_vm9, %v3591_v8, 0.0  ;;  %v3629_v49 = vsel %vm11337_vm13, %v3594_v20, 0.0  ;;  %v3596_v48 = vsel %vm3564_vm2, %v11069_v54, 0.0  ;;  %v3259_v54 = vsel %vm11340_vm8, %v3212_v39, 0.0  ;;  %vm11342_vm2 = vmmov %vm11330_vm0 }
 0x3c5   :  { %v3624_v18 = vadd.f32 %v3623_v45, %v3622_v7  ;;  %v3473_v2 = vpop.permute.xlu0 %3472  ;;  %v3633_v24 = vsel %vm11339_vm5, %v3596_v48, 0.0  ;;  %v3260_v27 = vadd.f32 %v3259_v54, %v3258_v55  ;;  %v3261_v7 = vsel %vm11342_vm2, %v3213_v16, 0.0  ;;  %vm11344_vm6 = vmmov %vm11342_vm2 }
 0x3c6   :  { %v3488_v10 = vpop.permute.xlu1 %3487  ;;  %vm3561_vm10 = vcmp.eq.s32.totalorder %v3473_v2, 1  ;;  %vm11347_vm8 = vmmov %vm11342_vm2 }
 0x3c7   :  { %v3626_v62 = vadd.f32 %v3625_v63, %v3624_v18  ;;  %v3593_v61 = vsel %vm3561_vm10, %v11062_v4, 0.0  ;;  %vm3566_vm9 = vcmp.eq.s32.totalorder %v3488_v10, 1  ;;  %vm11341_vm10 = vmmov %vm11330_vm0  ;;  %vm3183_vm0 = vcmp.eq.s32.totalorder %v9113_v30, 1 }
 0x3c8   :  { %v3627_v46 = vsel %vm11336_vm15, %v3593_v61, 0.0 }
 0x3c9   :  { %v3628_v52 = vadd.f32 %v3627_v46, %v3626_v62  ;;  %v3479_v26 = vpop.permute.xlu0 %3478  ;;  %v3215_v62 = vsel %vm3183_vm0, %v11267_v21, 0.0  ;;  %vm11349_vm0 = vmmov %vm11342_vm2 }
 0x3ca   :  { %vm3563_vm11 = vcmp.eq.s32.totalorder %v3479_v26, 1 }
 0x3cb   :  { %v3630_v29 = vadd.f32 %v3629_v49, %v3628_v52  ;;  %v3595_v4 = vsel %vm3563_vm11, %v11074_v43, 0.0  ;;  %v3598_v43 = vsel %vm3566_vm9, %v11223_v0, 0.0  ;;  %v3214_v0 = vsel %vm3182_vm1, %v11260_v53, 0.0  ;;  %vm11346_vm9 = vmmov %vm11342_vm2 }
 0x3cc   :  { %v3494_v60 = vpop.permute.xlu1 %3493  ;;  %v3631_v59 = vsel %vm11338_vm4, %v3595_v4, 0.0  ;;  %v3637_v18 = vsel %vm11343_vm14, %v3598_v43, 0.0  ;;  %vm11345_vm4 = vmmov %vm11342_vm2  ;;  %vm3185_vm1 = vcmp.eq.s32.totalorder %v9125_v9, 1 }
 0x3cd   :  { %v3632_v28 = vadd.f32 %v3631_v59, %v3630_v29  ;;  %vm3568_vm15 = vcmp.eq.s32.totalorder %v3494_v60, 1  ;;  %v3263_v61 = vsel %vm11345_vm4, %v3214_v0, 0.0  ;;  %vm11351_vm4 = vmmov %vm11349_vm0 }
 0x3ce   :  { %v3600_v63 = vsel %vm3568_vm15, %v11232_v44, 0.0 }
 0x3cf   :  { %v3485_v32 = vpop.permute.xlu0 %3484  ;;  %v3634_v12 = vadd.f32 %v3633_v24, %v3632_v28  ;;  %v3641_v30 = vsel %vm11346_vm9, %v3600_v63, 0.0  ;;  %vm11352_vm9 = vmmov %vm11349_vm0 }
 0x3d0   :  { %vm3565_vm3 = vcmp.eq.s32.totalorder %v3485_v32, 1 }
 0x3d1   :  { %v3597_v11 = vsel %vm3565_vm3, %v11225_v23, 0.0  ;;  %v3500_v34 = vpop.permute.xlu1 %3499  ;;  %v3262_v23 = vadd.f32 %v3261_v7, %v3260_v27  ;;  %vm3184_vm3 = vcmp.eq.s32.totalorder %v9088_v42, 1  ;;  %v3217_v42 = vsel %vm3185_vm1, %v11276_v56, 0.0  ;;  %vm11355_vm1 = vmmov %vm11349_vm0 }
 0x3d2   :  { %v3635_v8 = vsel %vm11341_vm10, %v3597_v11, 0.0  ;;  %vm3570_vm11 = vcmp.eq.s32.totalorder %v3500_v34, 1  ;;  %vm11348_vm10 = vmmov %vm11342_vm2  ;;  %v3216_v48 = vsel %vm3184_vm3, %v11264_v37, 0.0  ;;  %v3269_v32 = vsel %vm11351_vm4, %v3217_v42, 0.0  ;;  %v11354_v11 = vld [vmem:[#allocation131_spill] sm:$0xff] }
 0x3d3   :  { %v3636_v45 = vadd.f32 %v3635_v8, %v3634_v12  ;;  %v3264_v57 = vadd.f32 %v3263_v61, %v3262_v23  ;;  %v3602_v46 = vsel %vm3570_vm11, %v11237_v50, 0.0  ;;  %v3267_v39 = vsel %vm11349_vm0, %v3216_v48, 0.0  ;;  %vm11350_vm11 = vmmov %vm11349_vm0 }
 0x3d4   :  { %v3491_v51 = vpop.permute.xlu0 %3490  ;;  %v3645_v49 = vsel %vm11342_vm2, %v3602_v46, 0.0  ;;  %vm3187_vm3 = vcmp.eq.s32.totalorder %v9133_v47, 1  ;;  %v11362_v46 = vld [vmem:[#allocation133_spill] sm:$0xff] }
 0x3d5   :  { %v3638_v38 = vadd.f32 %v3637_v18, %v3636_v45  ;;  %vm3567_vm13 = vcmp.eq.s32.totalorder %v3491_v51, 1  ;;  %v11356_v45 = vld [vmem:[#allocation48_spill] sm:$0xff] }
 0x3d6   :  { %v3599_v2 = vsel %vm3567_vm13, %v11233_v13, 0.0  ;;  %v3506_v10 = vpop.permute.xlu1 %3505  ;;  %v3265_v13 = vsel %vm11347_vm8, %v3215_v62, 0.0  ;;  %vm11353_vm8 = vmmov %vm11349_vm0  ;;  %v3219_v18 = vsel %vm3187_vm3, %v11356_v45, 0.0 }
 0x3d7   :  { %v3639_v22 = vsel %vm11344_vm6, %v3599_v2, 0.0  ;;  %vm3572_vm15 = vcmp.eq.s32.totalorder %v3506_v10, 1  ;;  %v3266_v29 = vadd.f32 %v3265_v13, %v3264_v57  ;;  %vm3186_vm6 = vcmp.eq.s32.totalorder %v9105_v36, 1  ;;  %vm11363_vm3 = vmmov %vm11349_vm0 }
 0x3d8   :  { %v3640_v41 = vadd.f32 %v3639_v22, %v3638_v38  ;;  %v3497_v20 = vpop.permute.xlu0 %3496  ;;  %v3604_v60 = vsel %vm3572_vm15, %v11247_v25, 0.0  ;;  %v3218_v34 = vsel %vm3186_vm6, %v11354_v11, 0.0  ;;  %vm11357_vm15 = vmmov %vm11349_vm0 }
 0x3d9   :  { %vm3569_vm5 = vcmp.eq.s32.totalorder %v3497_v20, 1  ;;  %v3268_v55 = vadd.f32 %v3267_v39, %v3266_v29  ;;  %v3649_v16 = vsel %vm11352_vm9, %v3604_v60, 0.0  ;;  %vm11359_vm6 = vmmov %vm11349_vm0  ;;  %vm3189_vm9 = vcmp.eq.s32.totalorder %v9138_v14, 1  ;;  %v11360_v20 = vld [vmem:[#allocation137_spill] sm:$0xff] }
 0x3da   :  { %v3642_v1 = vadd.f32 %v3641_v30, %v3640_v41  ;;  %v3601_v44 = vsel %vm3569_vm5, %v11241_v19, 0.0 }
 0x3db   :  { %v3643_v52 = vsel %vm11348_vm10, %v3601_v44, 0.0  ;;  %v3512_v26 = vpop.permute.xlu1 %3511  ;;  %v3270_v27 = vadd.f32 %v3269_v32, %v3268_v55  ;;  %v11371_v55 = vld [vmem:[#allocation57_spill] sm:$0xff] }
 0x3dc   :  { %v3644_v58 = vadd.f32 %v3643_v52, %v3642_v1  ;;  %vm3574_vm13 = vcmp.eq.s32.totalorder %v3512_v26, 1  ;;  %v3221_v1 = vsel %vm3189_vm9, %v11362_v46, 0.0 }
 0x3dd   :  { %v3503_v4 = vpop.permute.xlu0 %3502  ;;  %v3606_v12 = vsel %vm3574_vm13, %v11252_v17, 0.0  ;;  %vm3188_vm13 = vcmp.eq.s32.totalorder %v9115_v15, 1 }
 0x3de   :  { %v3646_v50 = vadd.f32 %v3645_v49, %v3644_v58  ;;  %vm3571_vm14 = vcmp.eq.s32.totalorder %v3503_v4, 1  ;;  %v3653_v8 = vsel %vm11355_vm1, %v3606_v12, 0.0  ;;  %v3220_v61 = vsel %vm3188_vm13, %v11360_v20, 0.0  ;;  %v11367_v4 = vld [vmem:[#allocation130_spill] sm:$0xff] }
 0x3df   :  { %v3518_v19 = vpop.permute.xlu1 %3517  ;;  %v3603_v59 = vsel %vm3571_vm14, %v11248_v31, 0.0  ;;  %vm3191_vm13 = vcmp.eq.s32.totalorder %v9143_v6, 1 }
 0x3e0   :  { %v3647_v9 = vsel %vm11350_vm11, %v3603_v59, 0.0  ;;  %vm3576_vm10 = vcmp.eq.s32.totalorder %v3518_v19, 1  ;;  %vm11358_vm11 = vmmov %vm11349_vm0 }
 0x3e1   :  { %v3648_v28 = vadd.f32 %v3647_v9, %v3646_v50  ;;  %v3608_v38 = vsel %vm3576_vm10, %v11260_v53, 0.0  ;;  %v3273_v63 = vsel %vm11358_vm11, %v3219_v18, 0.0  ;;  %vm11364_vm10 = vmmov %vm11349_vm0 }
 0x3e2   :  { %v3509_v24 = vpop.permute.xlu0 %3508  ;;  %v3657_v22 = vsel %vm11359_vm6, %v3608_v38, 0.0  ;;  %v3275_v14 = vsel %vm11364_vm10, %v3220_v61, 0.0  ;;  %vm11368_vm11 = vmmov %vm11363_vm3 }
 0x3e3   :  { %vm3573_vm5 = vcmp.eq.s32.totalorder %v3509_v24, 1  ;;  %v3650_v25 = vadd.f32 %v3649_v16, %v3648_v28  ;;  %v3223_v28 = vsel %vm3191_vm13, %v11371_v55, 0.0 }
 0x3e4   :  { %v3605_v31 = vsel %vm3573_vm5, %v11255_v35, 0.0  ;;  %v3524_v54 = vpop.permute.xlu1 %3523  ;;  %v3271_v35 = vsel %vm11357_vm15, %v3218_v34, 0.0  ;;  %vm11361_vm5 = vmmov %vm11349_vm0 }
 0x3e5   :  { %v3651_v43 = vsel %vm11353_vm8, %v3605_v31, 0.0  ;;  %v3272_v0 = vadd.f32 %v3271_v35, %v3270_v27  ;;  %vm3578_vm14 = vcmp.eq.s32.totalorder %v3524_v54, 1  ;;  %vm11365_vm15 = vmmov %vm11349_vm0  ;;  %v11378_v35 = vld [vmem:[#allocation151_spill] sm:$0xff] }
 0x3e6   :  { %v3652_v36 = vadd.f32 %v3651_v43, %v3650_v25  ;;  %v3515_v7 = vpop.permute.xlu0 %3514  ;;  %v3610_v62 = vsel %vm3578_vm14, %v11264_v37, 0.0  ;;  %v3277_v58 = vsel %vm11365_vm15, %v3221_v1, 0.0  ;;  %vm11366_vm14 = vmmov %vm11349_vm0  ;;  %v11372_v25 = vld [vmem:[#allocation146_spill] sm:$0xff] }
 0x3e7   :  { %vm3575_vm2 = vcmp.eq.s32.totalorder %v3515_v7, 1  ;;  %v3274_v30 = vadd.f32 %v3273_v63, %v3272_v0  ;;  %v3661_v44 = vsel %vm11363_vm3, %v3610_v62, 0.0 }
 0x3e8   :  { %v3654_v51 = vadd.f32 %v3653_v8, %v3652_v36  ;;  %v3530_v17 = vpop.permute.xlu1 %3529  ;;  %v3607_v47 = vsel %vm3575_vm2, %v11261_v5, 0.0  ;;  %vm3190_vm2 = vcmp.eq.s32.totalorder %v9128_v33, 1 }
 0x3e9   :  { %v3655_v23 = vsel %vm11349_vm0, %v3607_v47, 0.0  ;;  %vm3580_vm8 = vcmp.eq.s32.totalorder %v3530_v17, 1  ;;  %v3222_v19 = vsel %vm3190_vm2, %v11367_v4, 0.0 }
 0x3ea   :  { %v3656_v2 = vadd.f32 %v3655_v23, %v3654_v51  ;;  %v3612_v49 = vsel %vm3580_vm8, %v11354_v11, 0.0 }
 0x3eb   :  { %v3521_v10 = vpop.permute.xlu0 %3520  ;;  %v3665_v60 = vsel %vm11368_vm11, %v3612_v49, 0.0 }
 0x3ec   :  { %vm3577_vm4 = vcmp.eq.s32.totalorder %v3521_v10, 1  ;;  %v3658_v53 = vadd.f32 %v3657_v22, %v3656_v2 }
 0x3ed   :  { %v3609_v5 = vsel %vm3577_vm4, %v11267_v21, 0.0  ;;  %v3536_v41 = vpop.permute.xlu1 %3535  ;;  %v3276_v21 = vadd.f32 %v3275_v14, %v3274_v30  ;;  %vm11369_vm4 = vmmov %vm11363_vm3 }
 0x3ee   :  { %v3659_v15 = vsel %vm11361_vm5, %v3609_v5, 0.0  ;;  %vm3582_vm6 = vcmp.eq.s32.totalorder %v3536_v41, 1  ;;  %vm11370_vm5 = vmmov %vm11363_vm3 }
 0x3ef   :  { %v3660_v57 = vadd.f32 %v3659_v15, %v3658_v53  ;;  %v3527_v13 = vpop.permute.xlu0 %3526  ;;  %v3278_v42 = vadd.f32 %v3277_v58, %v3276_v21  ;;  %v3279_v9 = vsel %vm11370_vm5, %v3222_v19, 0.0  ;;  %v3614_v6 = vsel %vm3582_vm6, %v11360_v20, 0.0  ;;  %vm11373_vm10 = vmmov %vm11369_vm4  ;;  %v11380_v53 = vld [vmem:[#allocation55_spill] sm:$0xff] }
 0x3f0   :  { %vm3579_vm1 = vcmp.eq.s32.totalorder %v3527_v13, 1  ;;  %v3281_v54 = vsel %vm11373_vm10, %v3223_v28, 0.0 }
 0x3f1   :  { %v3662_v52 = vadd.f32 %v3661_v44, %v3660_v57  ;;  %v3542_v37 = vpop.permute.xlu1 %3541  ;;  %v3611_v26 = vsel %vm3579_vm1, %v11276_v56, 0.0  ;;  %v3280_v32 = vadd.f32 %v3279_v9, %v3278_v42  ;;  %vm11374_vm1 = vmmov %vm11369_vm4 }
 0x3f2   :  { %v3663_v48 = vsel %vm11366_vm14, %v3611_v26, 0.0  ;;  %v3669_v34 = vsel %vm11374_vm1, %v3614_v6, 0.0  ;;  %vm11375_vm2 = vmmov %vm11374_vm1  ;;  %vm3584_vm15 = vcmp.eq.s32.totalorder %v3542_v37, 1 }
 0x3f3   :  { %v3664_v29 = vadd.f32 %v3663_v48, %v3662_v52  ;;  %v3282_v8 = vadd.f32 %v3281_v54, %v3280_v32  ;;  %vm11376_vm14 = vmmov %vm11374_vm1  ;;  %v3616_v23 = vsel %vm3584_vm15, %v11367_v4, 0.0 }
 0x3f4   :  { %v3533_v50 = vpop.permute.xlu0 %3532 }
 0x3f5   :  { %vm3581_vm0 = vcmp.eq.s32.totalorder %v3533_v50, 1  ;;  %v3666_v56 = vadd.f32 %v3665_v60, %v3664_v29 }
 0x3f6   :  { %v3613_v33 = vsel %vm3581_vm0, %v11356_v45, 0.0  ;;  %v3154_v59 = vpop.permute.xlu1 %3153  ;;  %vm11377_vm0 = vmmov %vm11374_vm1 }
 0x3f7   :  { %v3667_v39 = vsel %vm11369_vm4, %v3613_v33, 0.0  ;;  %vm3192_vm9 = vcmp.eq.s32.totalorder %v3154_v59, 1  ;;  %vm11379_vm6 = vmmov %vm11377_vm0 }
 0x3f8   :  { %v3668_v12 = vadd.f32 %v3667_v39, %v3666_v56  ;;  %v3224_v31 = vsel %vm3192_vm9, %v11372_v25, 0.0  ;;  %vm11381_vm5 = vmmov %vm11377_vm0 }
 0x3f9   :  { %v3539_v24 = vpop.permute.xlu0 %3538  ;;  %v3283_v27 = vsel %vm11375_vm2, %v3224_v31, 0.0  ;;  %v3673_v41 = vsel %vm11381_vm5, %v3616_v23, 0.0  ;;  %vm11383_vm10 = vmmov %vm11377_vm0 }
 0x3fa   :  { %vm3583_vm3 = vcmp.eq.s32.totalorder %v3539_v24, 1  ;;  %v3157_v16 = vpop.permute.xlu1 %3156  ;;  %v3670_v7 = vadd.f32 %v3669_v34, %v3668_v12  ;;  %v3284_v17 = vadd.f32 %v3283_v27, %v3282_v8  ;;  %vm11384_vm1 = vmmov %vm11377_vm0 }
 0x3fb   :  { %vm3193_vm8 = vcmp.eq.s32.totalorder %v3157_v16, 1  ;;  %v3615_v43 = vsel %vm3583_vm3, %v11362_v46, 0.0  ;;  %vm11382_vm3 = vmmov %vm11377_vm0  ;;  %v3792_v16 = vld [vmem:[#allocation2] sm:$0xff] }
 0x3fc   :  { %v3225_v11 = vsel %vm3193_vm8, %v11304_v40, 0.0  ;;  %v3671_v18 = vsel %vm11376_vm14, %v3615_v43, 0.0  ;;  %vm11385_vm2 = vmmov %vm11377_vm0 }
 0x3fd   :  { %v3285_v51 = vsel %vm11377_vm0, %v3225_v11, 0.0  ;;  %v3672_v63 = vadd.f32 %v3671_v18, %v3670_v7  ;;  %vm11386_vm14 = vmmov %vm11377_vm0 }
 0x3fe   :  { %v3545_v36 = vpop.permute.xlu0 %3544  ;;  %v3286_v2 = vadd.f32 %v3285_v51, %v3284_v17 }
 0x3ff   :  { %v3160_v45 = vpop.permute.xlu1 %3159  ;;  %vm3585_vm11 = vcmp.eq.s32.totalorder %v3545_v36, 1  ;;  %v3674_v30 = vadd.f32 %v3673_v41, %v3672_v63 }
 0x400   :  { %vm3194_vm13 = vcmp.eq.s32.totalorder %v3160_v45, 1  ;;  %v3617_v22 = vsel %vm3585_vm11, %v11371_v55, 0.0  ;;  %vm11388_vm11 = vmmov %vm11384_vm1 }
 0x401   :  { %v3226_v38 = vsel %vm3194_vm13, %v11378_v35, 0.0  ;;  %v3675_v46 = vsel %vm11383_vm10, %v3617_v22, 0.0  ;;  %vm11387_vm13 = vmmov %vm11384_vm1 }
 0x402   :  { %v3287_v47 = vsel %vm11379_vm6, %v3226_v38, 0.0  ;;  %v3548_v0 = vpop.permute.xlu0 %3547  ;;  %v3676_v14 = vadd.f32 %v3675_v46, %v3674_v30 }
 0x403   :  { %v3163_v10 = vpop.permute.xlu1 %3162  ;;  %vm3586_vm4 = vcmp.eq.s32.totalorder %v3548_v0, 1  ;;  %v3288_v62 = vadd.f32 %v3287_v47, %v3286_v2 }
 0x404   :  { %vm3195_vm9 = vcmp.eq.s32.totalorder %v3163_v10, 1  ;;  %v3618_v15 = vsel %vm3586_vm4, %v11372_v25, 0.0 }
 0x405   :  { %v3227_v5 = vsel %vm3195_vm9, %v11380_v53, 0.0  ;;  %v3677_v13 = vsel %vm11384_vm1, %v3618_v15, 0.0 }
 0x406   :  { %v3289_v20 = vsel %vm11382_vm3, %v3227_v5, 0.0  ;;  %v3551_v61 = vpop.permute.xlu0 %3550  ;;  %v3678_v26 = vadd.f32 %v3677_v13, %v3676_v14 }
 0x407   :  { %v3290_v57 = vadd.f32 %v3289_v20, %v3288_v62  ;;  %vm3587_vm8 = vcmp.eq.s32.totalorder %v3551_v61, 1 }
 0x408   :  { %v3619_v44 = vsel %vm3587_vm8, %v11304_v40, 0.0 }
 0x409   :  { %v3291_v1 = vrot.slane %v3290_v57, 4  ;;  %v3679_v21 = vsel %vm11385_vm2, %v3619_v44, 0.0 }
 0x40a   :  { %v3680_v50 = vadd.f32 %v3679_v21, %v3678_v26 }
 0x40b   :  { %v3292_v52 = vadd.f32 %v3291_v1, %v3290_v57  ;;  %v3554_v37 = vpop.permute.xlu0 %3553 }
 0x40c   :  { %vm3588_vm15 = vcmp.eq.s32.totalorder %v3554_v37, 1 }
 0x40d   :  { %v3293_v58 = vrot.slane %v3292_v52, 2  ;;  %v3620_v49 = vsel %vm3588_vm15, %v11378_v35, 0.0 }
 0x40e   :  { %v3681_v48 = vsel %vm11386_vm14, %v3620_v49, 0.0 }
 0x40f   :  { %v3294_v29 = vadd.f32 %v3293_v58, %v3292_v52  ;;  %v3557_v4 = vpop.permute.xlu0 %3556  ;;  %v3682_v40 = vadd.f32 %v3681_v48, %v3680_v50 }
 0x410   :  { %vm3589_vm0 = vcmp.eq.s32.totalorder %v3557_v4, 1 }
 0x411   :  { %v3295_v19 = vrot.slane %v3294_v29, 1  ;;  %v3621_v42 = vsel %vm3589_vm0, %v11380_v53, 0.0 }
 0x412   :  { %v3683_v60 = vsel %vm11387_vm13, %v3621_v42, 0.0 }
 0x413   :  { %v3296_v33 = vadd.f32 %v3295_v19, %v3294_v29  ;;  %v3684_v59 = vadd.f32 %v3683_v60, %v3682_v40 }
 0x415   :  { %v3685_v56 = vrot.slane %v3684_v59, 4  ;;  %v3804_v39 = vsel %vm3803_vm7, %v9096_v3, %v3296_v33 }
 0x417   :  { %v3686_v9 = vadd.f32 %v3685_v56, %v3684_v59 }
 0x419   :  { %v3687_v55 = vrot.slane %v3686_v9, 2 }
 0x41b   :  { %v3688_v28 = vadd.f32 %v3687_v55, %v3686_v9 }
 0x41d   :  { %v3689_v24 = vrot.slane %v3688_v28, 1 }
 0x41f   :  { %v3690_v32 = vadd.f32 %v3689_v24, %v3688_v28 }
 0x421   :  { %v3806_v6 = vsel %vm3805_vm12, %v3804_v39, %v3690_v32 }
 0x422   :  { %v3807_v12 = vadd.f32 %v3806_v6, %v3792_v16 }
 0x424   :  { %3808 = vst.msk [vmem:[#allocation2] sm:$0xff] %vm11388_vm11, %v3807_v12 }
 0x425   :  { %4179 = shalt.err (!%p4176_p4)
}
 0x426   :  { %s4180_s29 = scalar_lea.hbm %s9283_s3, 128 }
 0x427   :  { %p4181_p5 = scmp.ne.s32.totalorder %s9283_s3, %s4180_s29  ;;  %p4184_p6 = scmp.lt.u32.totalorder %s4180_s29, %s9283_s3 }
 0x429   :  { %p4186_p7 = pnand %p4184_p6, %p4181_p5 }
 0x42b   :  { %4189 = shalt.err (!%p4186_p7)
}
 0x42c   :  { %3828 = dma.vmem_to_hbm [thread:$0]  %s3826_s25, 128, %s9283_s3, [#allocation3]  }
 0x42d   :  { %4190 = dma.done.wait [#allocation3], 128  }
 0x42e   :  { %4191 = vsyncadd [#allocation3], 4294967168 }
 0x42f   :  { %3836 = vsyncpa [#allocation3], 1 }

</bundles_post_ra>
